<compile_context>
chip_gen: v7x
topology: tpu7x:2x2x1
jax: 0.10.0
libtpu: 0.0.40
codegen_flags: <defaults>
</compile_context>

<pallas_src>
import functools
import math

import jax
import jax.numpy as jnp
from jax.experimental import pallas as pl
from jax.experimental.pallas import tpu as pltpu


# ----------------------------------------------------------------------------
# Helpers
# ----------------------------------------------------------------------------

def _round_up(x, m):
    return ((x + m - 1) // m) * m


@functools.lru_cache(maxsize=None)
def _vmem_limit_bytes():
    # Per-generation scoped-VMEM budget (v7x has 64 MiB/TC, v5e/v6e 128 MiB).
    try:
        cap = int(pltpu.get_tpu_info().vmem_capacity_bytes)
    except Exception:
        cap = 64 * 1024 * 1024
    return max(32 * 1024 * 1024, min(int(cap * 0.7), 100 * 1024 * 1024))


@functools.lru_cache(maxsize=None)
def _plan_m(M):
    """Row tile for the fused matmul: avoid padding when possible and keep
    >=2 row tiles so both TensorCores get work on multi-core parts."""
    if M < 16:
        return 8, 16
    cap = min(512, (M // 2) - (M // 2) % 8)
    for t in range(cap, 7, -8):
        if M % t == 0:
            return t, M
    gm = max(2, -(-M // 512))
    tm = _round_up(-(-M // gm), 8)
    return tm, tm * gm


# ----------------------------------------------------------------------------
# Fused multi-input matmul (+bias +activation +residual) kernel  (1x1 convs,
# fused concats, detect head).  Weights are VMEM-resident; K is not tiled.
# ----------------------------------------------------------------------------

_MODES = {"plain": (0, 1), "res": (1, 1), "base_res": (1, 2),
          "res2": (2, 2), "detect": (0, 2)}


@functools.lru_cache(maxsize=None)
def _mm_call(Mp, tm, Ks, N, act, mode, out_dtype_name, vmem_limit):
    out_dtype = jnp.dtype(out_dtype_name)
    n_extra, n_out = _MODES[mode]
    nx = len(Ks)
    Ktot = sum(Ks)
    gm = Mp // tm

    def kernel(*refs):
        xs = refs[:nx]
        w_ref = refs[nx]
        b_ref = refs[nx + 1]
        extras = refs[nx + 2:nx + 2 + n_extra]
        outs = refs[nx + 2 + n_extra:]
        y = None
        off = 0
        for i, ki in enumerate(Ks):
            d = jnp.dot(xs[i][...], w_ref[off:off + ki, :],
                        preferred_element_type=jnp.float32)
            y = d if y is None else y + d
            off += ki
        y = y + b_ref[...]
        if act == "silu":
            y = y * jax.nn.sigmoid(y)
        elif act == "sigmoid":
            y = jax.nn.sigmoid(y)
        if mode == "plain":
            outs[0][...] = y.astype(outs[0].dtype)
        elif mode == "res":
            outs[0][...] = (y + extras[0][...].astype(jnp.float32)
                            ).astype(outs[0].dtype)
        elif mode == "base_res":
            outs[0][...] = y.astype(outs[0].dtype)
            outs[1][...] = (y + extras[0][...].astype(jnp.float32)
                            ).astype(outs[1].dtype)
        elif mode == "res2":
            outs[0][...] = (y + extras[0][...].astype(jnp.float32)
                            ).astype(outs[0].dtype)
            outs[1][...] = (y + extras[1][...].astype(jnp.float32)
                            ).astype(outs[1].dtype)
        else:  # "detect": raw + sigmoid in a single HBM pass
            outs[0][...] = y.astype(outs[0].dtype)
            outs[1][...] = jax.nn.sigmoid(y).astype(outs[1].dtype)

    in_specs = [pl.BlockSpec((tm, ki), lambda i: (i, 0)) for ki in Ks]
    # resident weights: constant index_map -> DMA'd once for the whole grid
    in_specs.append(pl.BlockSpec((Ktot, N), lambda i: (0, 0)))
    in_specs.append(pl.BlockSpec((1, N), lambda i: (0, 0)))
    in_specs += [pl.BlockSpec((tm, N), lambda i: (i, 0)) for _ in range(n_extra)]
    o_spec = pl.BlockSpec((tm, N), lambda i: (i, 0))
    if n_out == 1:
        out_shape = jax.ShapeDtypeStruct((Mp, N), out_dtype)
        out_specs = o_spec
    else:
        out_shape = tuple(jax.ShapeDtypeStruct((Mp, N), out_dtype)
                          for _ in range(n_out))
        out_specs = tuple(o_spec for _ in range(n_out))

    cost = pl.CostEstimate(
        flops=2 * Mp * Ktot * N,
        transcendentals=Mp * N if (act != "none" or mode == "detect") else 0,
        bytes_accessed=2 * (Mp * Ktot + Ktot * N + (n_extra + n_out) * Mp * N)
                       + 4 * N)

    return pl.pallas_call(
        kernel,
        out_shape=out_shape,
        grid=(gm,),
        in_specs=in_specs,
        out_specs=out_specs,
        compiler_params=pltpu.CompilerParams(
            dimension_semantics=("parallel",),
            vmem_limit_bytes=vmem_limit),
        cost_estimate=cost,
    )


def matmul_fused(xs, w, b, *, act="none", mode="plain", extras=(),
                 out_dtype=jnp.bfloat16):
    """sum_i(x_i @ w_rows_i) + b with bf16 operands, f32 accumulation and a
    fused epilogue.

    modes: plain -> act(y) ; res -> act(y)+r1 ; base_res -> (act(y), act(y)+r1)
           res2 -> (act(y)+r1, act(y)+r2) ; detect -> (y, sigmoid(y))
    """
    if not isinstance(xs, (list, tuple)):
        xs = [xs]
    M = xs[0].shape[0]
    Ks = tuple(int(x.shape[1]) for x in xs)
    Ktot, N = w.shape
    assert sum(Ks) == Ktot
    tm, Mp = _plan_m(M)

    def prep(t):
        t = t.astype(jnp.bfloat16)
        if Mp != M:
            t = jnp.pad(t, ((0, Mp - M), (0, 0)))
        return t

    xs_p = [prep(x) for x in xs]
    ext_p = [prep(r) for r in extras]
    wb = w.astype(jnp.bfloat16)
    bb = b.astype(jnp.float32).reshape(1, N)

    call = _mm_call(Mp, tm, Ks, N, act, mode, jnp.dtype(out_dtype).name,
                    _vmem_limit_bytes())
    outs = call(*xs_p, wb, bb, *ext_p)

    if _MODES[mode][1] == 1:
        return outs[:M] if Mp != M else outs
    if Mp != M:
        return tuple(o[:M] for o in outs)
    return tuple(outs)


# ----------------------------------------------------------------------------
# Direct (tap-accumulating) conv kernel for k>1 convs — no im2col in HBM.
# The padded input is row-flattened so every tap is a shifted 2-D slab; the
# k-1 overhang columns per row are garbage and get cropped by the caller.
# ----------------------------------------------------------------------------

@functools.lru_cache(maxsize=None)
def _dconv_call(NB, L, Cin, k, Wi, tHo, Cout, tn, act, vmem_limit):
    gn = Cout // tn
    M2 = tHo * Wi

    def kernel(x_ref, w_ref, b_ref, o_ref):
        y = None
        for dy in range(k):
            for dx in range(k):
                off = dy * Wi + dx
                slab = x_ref[off:off + M2, :]
                wt = w_ref[(dy * k + dx) * Cin:(dy * k + dx + 1) * Cin, :]
                d = jnp.dot(slab, wt, preferred_element_type=jnp.float32)
                y = d if y is None else y + d
        y = y + b_ref[...]
        if act == "silu":
            y = y * jax.nn.sigmoid(y)
        elif act == "sigmoid":
            y = jax.nn.sigmoid(y)
        o_ref[...] = y.astype(o_ref.dtype)

    return pl.pallas_call(
        kernel,
        out_shape=jax.ShapeDtypeStruct((NB, M2, Cout), jnp.bfloat16),
        grid=(gn, NB),
        in_specs=[
            pl.BlockSpec((None, L, Cin), lambda j, nb: (nb, 0, 0)),
            pl.BlockSpec((k * k * Cin, tn), lambda j, nb: (0, j)),
            pl.BlockSpec((1, tn), lambda j, nb: (0, j)),
        ],
        out_specs=pl.BlockSpec((None, M2, tn), lambda j, nb: (nb, 0, j)),
        compiler_params=pltpu.CompilerParams(
            dimension_semantics=("parallel", "parallel"),
            vmem_limit_bytes=vmem_limit),
        cost_estimate=pl.CostEstimate(
            flops=2 * NB * M2 * k * k * Cin * Cout,
            transcendentals=NB * M2 * Cout if act != "none" else 0,
            bytes_accessed=2 * (NB * L * Cin + k * k * Cin * Cout
                                + NB * M2 * Cout)),
    )


def _pick_tn(Cin, k, Cout, budget=4 * 1024 * 1024):
    if Cout % 128 != 0:
        return Cout
    tn = Cout
    while tn > 128 and k * k * Cin * tn * 2 > budget:
        if tn % 2 or (tn // 2) % 128:
            break
        tn //= 2
    return tn


def conv_k_direct(x, w4, b, *, k, s, p, act):
    """k>1 Conv(+BN+act).  Stride>1 is folded to a stride-1 conv over a
    space-to-depth phase stack; the conv runs as a tap-accumulating Pallas
    kernel on row-flattened slabs (no im2col patch tensor in HBM).
    Returns None if the feature map would not fit VMEM (caller falls back)."""
    N, H, W, C = x.shape
    c_out = w4.shape[-1]
    Ho = (H + 2 * p - k) // s + 1
    Wo = (W + 2 * p - k) // s + 1
    xp = jnp.pad(x, ((0, 0), (p, p), (p, p), (0, 0)))

    if s > 1:
        A = -(-k // s)
        phases = []
        for bph in range(s):
            for dph in range(s):
                ph = xp[:, bph::s, dph::s, :]
                ph = ph[:, :Ho + A - 1, :Wo + A - 1, :]
                ph = jnp.pad(ph, ((0, 0),
                                  (0, Ho + A - 1 - ph.shape[1]),
                                  (0, Wo + A - 1 - ph.shape[2]),
                                  (0, 0)))
                phases.append(ph)
        xp = jnp.concatenate(phases, axis=-1)            # (N,Ho+A-1,Wo+A-1,s*s*C)
        kpad = A * s
        wp = jnp.pad(w4, ((0, kpad - k), (0, kpad - k), (0, 0), (0, 0)))
        w4 = wp.reshape(A, s, A, s, C, c_out).transpose(0, 2, 1, 3, 4, 5)
        w4 = w4.reshape(A, A, s * s * C, c_out)
        k_eff, C_eff = A, s * s * C
    else:
        k_eff, C_eff = k, C

    if C_eff % 8 != 0:  # keep the reduction dim sublane-aligned (6x6 stem -> 12ch)
        cp = _round_up(C_eff, 8)
        xp = jnp.pad(xp, ((0, 0), (0, 0), (0, 0), (0, cp - C_eff)))
        w4 = jnp.pad(w4, ((0, 0), (0, 0), (0, cp - C_eff), (0, 0)))
        C_eff = cp

    Hi, Wi = xp.shape[1], xp.shape[2]                    # Hi = Ho+k_eff-1
    vmem = _vmem_limit_bytes()
    tn = _pick_tn(C_eff, k_eff, c_out)

    def est(tho):
        l = (tho + k_eff) * Wi
        m2 = tho * Wi
        return (2 * l * C_eff * 2 + 2 * k_eff * k_eff * C_eff * tn * 2
                + 2 * m2 * c_out * 2 + m2 * tn * 4 + m2 * C_eff * 2)

    tHo, G = Ho, 1
    if est(Ho) > vmem // 2:
        G = None
        for g in range(2, Ho + 1):
            if Ho % g == 0 and est(Ho // g) <= vmem // 2:
                G, tHo = g, Ho // g
                break
        if G is None:
            return None  # caller uses the im2col fallback

    w2 = w4.reshape(k_eff * k_eff * C_eff, c_out).astype(jnp.bfloat16)
    bb = b.astype(jnp.float32).reshape(1, c_out)
    xq = jnp.pad(xp, ((0, 0), (0, 1), (0, 0), (0, 0))).astype(jnp.bfloat16)
    x2 = xq.reshape(N, (Hi + 1) * Wi, C_eff)

    rows = tHo * Wi
    bandL = (tHo + k_eff) * Wi
    if G == 1:
        xb = x2
    else:
        xb = jnp.stack([x2[:, g * rows:g * rows + bandL, :] for g in range(G)],
                       axis=1).reshape(N * G, bandL, C_eff)

    out2 = _dconv_call(N * G, bandL, C_eff, k_eff, Wi, tHo, c_out, tn, act,
                       vmem)(xb, w2, bb)
    out = out2.reshape(N, G * tHo, Wi, c_out)[:, :Ho, :Wo, :]
    return out


def _conv_im2col(x, w4, b, *, k, s, p, act):
    # TODO(synk): only used when a feature map is too large for the direct
    # conv's VMEM budget; a halo'd row-band variant would remove it entirely.
    N, H, W, C = x.shape
    c_out = w4.shape[-1]
    xp = jnp.pad(x, ((0, 0), (p, p), (p, p), (0, 0)))
    Ho = (H + 2 * p - k) // s + 1
    Wo = (W + 2 * p - k) // s + 1
    cols = []
    for dy in range(k):
        for dx in range(k):
            cols.append(xp[:, dy:dy + s * Ho:s, dx:dx + s * Wo:s, :])
    cols = jnp.concatenate(cols, axis=-1).reshape(N * Ho * Wo, k * k * C)
    out = matmul_fused(cols, w4.reshape(k * k * C, c_out), b, act=act,
                       mode="plain")
    return out.reshape(N, Ho, Wo, c_out)


# ----------------------------------------------------------------------------
# Fused SPPF triple 5x5 max-pool kernel (separable, intermediates in VMEM)
# ----------------------------------------------------------------------------

@functools.lru_cache(maxsize=None)
def _sppf_pool_call(Nb, H, W, C, k, dtype_name, vmem_limit):
    dtype = jnp.dtype(dtype_name)
    p = k // 2
    Hp, Wp = H + 6 * p, W + 6 * p

    def kernel(x_ref, o1_ref, o2_ref, o3_ref, s1_ref, s2_ref):
        # x_ref: (H+6p, W+6p, C) padded with -inf
        def pool(src, Hs, Ws):
            r = src[:, 0:Ws, :]
            for dx in range(1, k):
                r = jnp.maximum(r, src[:, dx:dx + Ws, :])
            o = r[0:Hs, :, :]
            for dy in range(1, k):
                o = jnp.maximum(o, r[dy:dy + Hs, :, :])
            return o

        s1_ref[...] = pool(x_ref, H + 4 * p, W + 4 * p)
        s2_ref[...] = pool(s1_ref, H + 2 * p, W + 2 * p)
        o3_ref[...] = pool(s2_ref, H, W)
        o1_ref[...] = s1_ref[2 * p:2 * p + H, 2 * p:2 * p + W, :]
        o2_ref[...] = s2_ref[p:p + H, p:p + W, :]

    return pl.pallas_call(
        kernel,
        out_shape=tuple(jax.ShapeDtypeStruct((Nb, H, W, C), dtype)
                        for _ in range(3)),
        grid=(Nb,),
        in_specs=[pl.BlockSpec((None, Hp, Wp, C), lambda nb: (nb, 0, 0, 0))],
        out_specs=tuple(pl.BlockSpec((None, H, W, C), lambda nb: (nb, 0, 0, 0))
                        for _ in range(3)),
        scratch_shapes=[pltpu.VMEM((H + 4 * p, W + 4 * p, C), dtype),
                        pltpu.VMEM((H + 2 * p, W + 2 * p, C), dtype)],
        compiler_params=pltpu.CompilerParams(
            dimension_semantics=("parallel",),
            vmem_limit_bytes=vmem_limit),
    )


def pallas_sppf_pool(x, k=5):
    """Returns (mp5(y), mp5^2(y), mp5^3(y)) computed in one VMEM-resident pass."""
    Nb, H, W, C = x.shape
    p = k // 2
    xp = jnp.pad(x, ((0, 0), (3 * p, 3 * p), (3 * p, 3 * p), (0, 0)),
                 constant_values=-jnp.inf)
    return _sppf_pool_call(Nb, H, W, C, k, x.dtype.name, _vmem_limit_bytes())(xp)


# ----------------------------------------------------------------------------
# Deterministic synthetic parameters (Conv+BN folded into one weight/bias)
# ----------------------------------------------------------------------------

class ParamStore:
    def __init__(self, seed=0):
        self._key = jax.random.PRNGKey(seed)
        self._count = 0
        self._cache = {}

    def get(self, name, shape, scale=0.05):
        if name not in self._cache:
            k = jax.random.fold_in(self._key, self._count)
            self._count += 1
            self._cache[name] = (scale * jax.random.normal(k, shape)
                                 ).astype(jnp.float32)
        return self._cache[name]


def gw_div(x, gw, divisor=8):
    return int(math.ceil(x * gw / divisor) * divisor)


# ----------------------------------------------------------------------------
# YOLOv5 building blocks (NHWC, bf16)
# ----------------------------------------------------------------------------

def conv(ps, name, x, c_out, k=1, s=1, p=None, act="silu",
         residual=None, residual2=None, also_plus=None):
    """YOLOv5 Conv = Conv2d(bias=False)+BN+SiLU (BN folded).  `x` may be a list
    of NHWC tensors whose channel-concat feeds this (1x1) conv — the concat is
    fused into the matmul.  Residual adds of the surrounding graph are fused
    into the epilogue."""
    xs = x if isinstance(x, (list, tuple)) else [x]
    c_in = sum(int(t.shape[-1]) for t in xs)
    if p is None:
        p = k // 2
    w4 = ps.get(name + "/w", (k, k, c_in, c_out))
    b = ps.get(name + "/b", (c_out,))
    N, H, W = xs[0].shape[0], xs[0].shape[1], xs[0].shape[2]

    if k == 1 and s == 1 and p == 0:
        w2 = w4.reshape(c_in, c_out)
        flat = [t.reshape(N * H * W, t.shape[-1]) for t in xs]

        def rs(t):
            return t.reshape(N, H, W, c_out)

        if residual is not None and residual2 is not None:
            o1, o2 = matmul_fused(flat, w2, b, act=act, mode="res2",
                                  extras=(residual.reshape(-1, c_out),
                                          residual2.reshape(-1, c_out)))
            return rs(o1), rs(o2)
        if residual is not None:
            return rs(matmul_fused(flat, w2, b, act=act, mode="res",
                                   extras=(residual.reshape(-1, c_out),)))
        if also_plus is not None:
            o1, o2 = matmul_fused(flat, w2, b, act=act, mode="base_res",
                                  extras=(also_plus.reshape(-1, c_out),))
            return rs(o1), rs(o2)
        return rs(matmul_fused(flat, w2, b, act=act, mode="plain"))

    # k > 1 path (single input): direct tap-accumulating conv; the residual
    # add is folded into the W-overhang crop pass in JAX.
    assert len(xs) == 1 and residual2 is None and also_plus is None
    out = conv_k_direct(xs[0], w4, b, k=k, s=s, p=p, act=act)
    if out is None:
        out = _conv_im2col(xs[0], w4, b, k=k, s=s, p=p, act=act)
    if residual is not None:
        out = out + residual
    return out


def bottleneck(ps, name, x, c_out, shortcut=True, e=0.5):
    c_in = x.shape[-1]
    c_ = int(c_out * e)
    y = conv(ps, name + "/cv1", x, c_, 1, 1)
    if shortcut and c_in == c_out:
        return conv(ps, name + "/cv2", y, c_out, 3, 1, residual=x)
    return conv(ps, name + "/cv2", y, c_out, 3, 1)


def c3(ps, name, x, c_out, n=1, shortcut=True, e=0.5, also_plus=None):
    c_ = int(c_out * e)
    y1 = conv(ps, name + "/cv1", x, c_, 1, 1)
    for i in range(n):
        y1 = bottleneck(ps, f"{name}/m{i}", y1, c_, shortcut=shortcut, e=1.0)
    y2 = conv(ps, name + "/cv2", x, c_, 1, 1)
    # cv3 consumes concat([y1, y2]) as a fused 2-input matmul
    return conv(ps, name + "/cv3", [y1, y2], c_out, 1, 1, also_plus=also_plus)


def backbone_block(ps, name, x, c2_raw, n_raw, gd, gw, also_plus=None):
    c2 = gw_div(c2_raw, gw)
    n = max(round(n_raw * gd), 1)
    y = conv(ps, name + "/down", x, c2, 3, 2)
    return c3(ps, name + "/c3", y, c2, n=n, shortcut=True, also_plus=also_plus)


def sppf(ps, name, x, c_out, k=5, residual=None):
    c_in = x.shape[-1]
    c_ = c_in // 2
    y = conv(ps, name + "/cv1", x, c_, 1, 1)
    p1, p2, p3 = pallas_sppf_pool(y, k)
    # concat([y, p1, p2, p3]) -> cv2 is a fused 4-input matmul (no HBM concat)
    return conv(ps, name + "/cv2", [y, p1, p2, p3], c_out, 1, 1,
                residual=residual)


def fuse_block_conv1x1(ps, name, rgb, t):
    # TODO(synk): exact fuse_block_conv1x1 source not provided; modeled as
    # Conv(2c -> c, 1x1)+BN+SiLU over the channel concat as the name implies.
    # The rgb+fuse / t+fuse adds of forward() are fused into the epilogue.
    c = rgb.shape[-1]
    return conv(ps, name + "/cv", [rgb, t], c, 1, 1, residual=rgb, residual2=t)


def upsample2x(x):
    # single broadcast+reshape pass (no double jnp.repeat round trips)
    # TODO(synk): could be folded into the consumer conv's x index_map entirely.
    N, H, W, C = x.shape
    return jnp.broadcast_to(x[:, :, None, :, None, :],
                            (N, H, 2, W, 2, C)).reshape(N, 2 * H, 2 * W, C)


def neck(ps, name, p3, p4, p5, gd, gw, last_ch):
    n = max(round(3 * gd), 1)
    c256 = gw_div(last_ch // 4, gw)
    c512 = gw_div(last_ch // 2, gw)
    c1024 = gw_div(last_ch, gw)
    x10 = conv(ps, name + "/cv1", p5, c512, 1, 1)
    x13 = c3(ps, name + "/c3_1", [upsample2x(x10), p4], c512, n=n, shortcut=False)
    x14 = conv(ps, name + "/cv2", x13, c256, 1, 1)
    out1 = c3(ps, name + "/c3_2", [upsample2x(x14), p3], c256, n=n, shortcut=False)
    d1 = conv(ps, name + "/cv3", out1, c256, 3, 2)
    out2 = c3(ps, name + "/c3_3", [d1, x14], c512, n=n, shortcut=False)
    d2 = conv(ps, name + "/cv4", out2, c512, 3, 2)
    out3 = c3(ps, name + "/c3_4", [d2, x10], c1024, n=n, shortcut=False)
    return out1, out2, out3


def detect_head(ps, name, feats, nc, anchors, strides):
    na = len(anchors[0]) // 2
    no = nc + 5
    z, raw = [], []
    for i, x in enumerate(feats):
        N, H, W, C = x.shape
        w = ps.get(f"{name}/m{i}/w", (C, na * no))
        b = ps.get(f"{name}/m{i}/b", (na * no,))
        # un-padded (M, 21) outputs: raw + sigmoid from one HBM pass
        y_raw, y_sig = matmul_fused(x.reshape(N * H * W, C), w, b,
                                    act="none", mode="detect",
                                    out_dtype=jnp.float32)
        y_raw = y_raw.reshape(N, H, W, na, no)
        ys = y_sig.reshape(N, H, W, na, no)
        raw.append(jnp.transpose(y_raw, (0, 3, 1, 2, 4)))  # (bs,na,ny,nx,no)
        gy, gx = jnp.meshgrid(jnp.arange(H, dtype=jnp.float32),
                              jnp.arange(W, dtype=jnp.float32), indexing="ij")
        grid = jnp.stack([gx, gy], axis=-1)                 # (H,W,2) xy order
        anc = jnp.asarray(anchors[i], jnp.float32).reshape(na, 2)
        xy = (ys[..., 0:2] * 2.0 - 0.5 + grid[None, :, :, None, :]) * strides[i]
        wh = (ys[..., 2:4] * 2.0) ** 2 * anc[None, None, None, :, :]
        out = jnp.concatenate([xy, wh, ys[..., 4:]], axis=-1)
        z.append(out.reshape(N, -1, no))
    return jnp.concatenate(z, axis=1), raw


# ----------------------------------------------------------------------------
# Full forward (mirrors rgbt_yolov5.forward)
# ----------------------------------------------------------------------------

def rgbt_yolov5_forward(ps, rgb, t, *, gd, gw, last_ch, nc):
    # torch-style NCHW f32 -> NHWC bf16 exactly once at entry
    rgb = jnp.transpose(rgb, (0, 2, 3, 1)).astype(jnp.bfloat16)
    t = jnp.transpose(t, (0, 2, 3, 1)).astype(jnp.bfloat16)
    c16 = gw_div(last_ch // 16, gw)
    c1024 = gw_div(last_ch, gw)

    r0 = conv(ps, "rgb_conv1", rgb, c16, 6, 2, p=2)
    t0 = conv(ps, "t_conv1", t, c16, 6, 2, p=2)

    rgb_f1 = backbone_block(ps, "rgb_block1", r0, last_ch // 8, 3, gd, gw)
    t_f1 = backbone_block(ps, "t_block1", t0, last_ch // 8, 3, gd, gw)
    # fuse_block1 epilogue directly emits (rgb_f1+fuse_f1, t_f1+fuse_f1)
    rgb_in2, t_in2 = fuse_block_conv1x1(ps, "fuse1", rgb_f1, t_f1)

    rgb_f2 = backbone_block(ps, "rgb_block2", rgb_in2, last_ch // 4, 6, gd, gw)
    t_f2, fuse1 = backbone_block(ps, "t_block2", t_in2, last_ch // 4, 6, gd, gw,
                                 also_plus=rgb_f2)           # fuse1 = rgb_f2+t_f2
    rgb_in3, t_in3 = fuse_block_conv1x1(ps, "fuse2", rgb_f2, t_f2)

    rgb_f3 = backbone_block(ps, "rgb_block3", rgb_in3, last_ch // 2, 9, gd, gw)
    t_f3, fuse2 = backbone_block(ps, "t_block3", t_in3, last_ch // 2, 9, gd, gw,
                                 also_plus=rgb_f3)           # fuse2 = rgb_f3+t_f3
    rgb_in4, t_in4 = fuse_block_conv1x1(ps, "fuse3", rgb_f3, t_f3)

    rgb_f4 = backbone_block(ps, "rgb_block4", rgb_in4, last_ch, 3, gd, gw)
    t_f4 = backbone_block(ps, "t_block4", t_in4, last_ch, 3, gd, gw)
    rgb_f4 = sppf(ps, "rgb_sppf", rgb_f4, c1024, 5)
    # fuse3 = rgb_sppf(rgb_f4) + t_sppf(t_f4), fused into t_sppf's cv2 epilogue
    fuse3 = sppf(ps, "t_sppf", t_f4, c1024, 5, residual=rgb_f4)
    # NOTE: fuse_block4 exists in __init__ of the reference module but forward()
    # never calls it, so it is intentionally omitted here as well.

    n1, n2, n3 = neck(ps, "neck", fuse1, fuse2, fuse3, gd, gw, last_ch)
    anchors = [[10, 13, 16, 30, 33, 23],
               [30, 61, 62, 45, 59, 119],
               [116, 90, 156, 198, 373, 326]]
    strides = (8.0, 16.0, 32.0)
    return detect_head(ps, "detect", [n1, n2, n3], nc, anchors, strides)


# ----------------------------------------------------------------------------

if __name__ == "__main__":
    key = jax.random.PRNGKey(0)
    k1, k2 = jax.random.split(key)
    # small, self-consistent config: input 64x64 (original uses 640x640),
    # gw=0.125 / gd=0.1 width/depth multipliers; detect levels at 8x8/4x4/2x2.
    B, CH, H, W = 2, 3, 64, 64
    rgb = jax.random.normal(k1, (B, CH, H, W), jnp.float32)   # NCHW like torch
    t = jax.random.normal(k2, (B, CH, H, W), jnp.float32)

    ps = ParamStore(seed=0)
    pred, raw = rgbt_yolov5_forward(ps, rgb, t, gd=0.1, gw=0.125,
                                    last_ch=1024, nc=2)

    jax.block_until_ready(pred)
    for r in raw:
        jax.block_until_ready(r)
    assert pred.shape == (B, 3 * (8 * 8 + 4 * 4 + 2 * 2), 2 + 5)
    assert bool(jnp.all(jnp.isfinite(pred)))
    print("KERNEL_OK")
</pallas_src>

<mosaic_0001>
module attributes {stable_mosaic.version = 11 : i64} {
  func.func @kernel(%arg0: i32, %arg1: i32, %arg2: memref<1x1190x16xbf16, #tpu.memory_space<vmem>>, %arg3: memref<144x8xbf16, #tpu.memory_space<vmem>>, %arg4: memref<1x8xf32, #tpu.memory_space<vmem>>, %arg5: memref<1x1088x8xbf16, #tpu.memory_space<vmem>>) attributes {dimension_semantics = [#tpu.dimension_semantics<parallel>, #tpu.dimension_semantics<parallel>], iteration_bounds = array<i64: 1, 2>, scalar_prefetch = 0 : i64, scratch_operands = 0 : i64, tpu.core_type = #tpu.core_type<tc>, window_params = [{transform_indices = @transform_0, window_bounds = array<i64: 1, 1190, 16>}, {transform_indices = @transform_1, window_bounds = array<i64: 144, 8>}, {transform_indices = @transform_2, window_bounds = array<i64: 1, 8>}, {transform_indices = @transform_3, window_bounds = array<i64: 1, 1088, 8>}]} {
    %c0 = arith.constant 0 : index
    %c0_0 = arith.constant 0 : index
    %c0_1 = arith.constant 0 : index
    %0 = vector.load %arg2[%c0, %c0_0, %c0_1] : memref<1x1190x16xbf16, #tpu.memory_space<vmem>>, vector<1x1088x16xbf16>
    %1 = vector.shape_cast %0 : vector<1x1088x16xbf16> to vector<1088x16xbf16>
    %c0_2 = arith.constant 0 : index
    %c0_3 = arith.constant 0 : index
    %2 = vector.load %arg3[%c0_2, %c0_3] : memref<144x8xbf16, #tpu.memory_space<vmem>>, vector<16x8xbf16>
    %cst = arith.constant dense<0.000000e+00> : vector<1088x8xf32>
    %3 = tpu.matmul %1, %2, %cst {dimension_numbers = #tpu.dot_dimension_numbers<[1], [0], [0], [1], [0, 0, 1, 1], [], []>} : vector<1088x16xbf16>, vector<16x8xbf16>, vector<1088x8xf32> -> vector<1088x8xf32>
    %c0_4 = arith.constant 0 : index
    %c1 = arith.constant 1 : index
    %c0_5 = arith.constant 0 : index
    %4 = vector.load %arg2[%c0_4, %c1, %c0_5] : memref<1x1190x16xbf16, #tpu.memory_space<vmem>>, vector<1x1088x16xbf16>
    %5 = vector.shape_cast %4 : vector<1x1088x16xbf16> to vector<1088x16xbf16>
    %c16 = arith.constant 16 : index
    %c0_6 = arith.constant 0 : index
    %6 = vector.load %arg3[%c16, %c0_6] : memref<144x8xbf16, #tpu.memory_space<vmem>>, vector<16x8xbf16>
    %cst_7 = arith.constant dense<0.000000e+00> : vector<1088x8xf32>
    %7 = tpu.matmul %5, %6, %cst_7 {dimension_numbers = #tpu.dot_dimension_numbers<[1], [0], [0], [1], [0, 0, 1, 1], [], []>} : vector<1088x16xbf16>, vector<16x8xbf16>, vector<1088x8xf32> -> vector<1088x8xf32>
    %8 = arith.addf %3, %7 : vector<1088x8xf32>
    %c0_8 = arith.constant 0 : index
    %c2 = arith.constant 2 : index
    %c0_9 = arith.constant 0 : index
    %9 = vector.load %arg2[%c0_8, %c2, %c0_9] : memref<1x1190x16xbf16, #tpu.memory_space<vmem>>, vector<1x1088x16xbf16>
    %10 = vector.shape_cast %9 : vector<1x1088x16xbf16> to vector<1088x16xbf16>
    %c32 = arith.constant 32 : index
    %c0_10 = arith.constant 0 : index
    %11 = vector.load %arg3[%c32, %c0_10] : memref<144x8xbf16, #tpu.memory_space<vmem>>, vector<16x8xbf16>
    %cst_11 = arith.constant dense<0.000000e+00> : vector<1088x8xf32>
    %12 = tpu.matmul %10, %11, %cst_11 {dimension_numbers = #tpu.dot_dimension_numbers<[1], [0], [0], [1], [0, 0, 1, 1], [], []>} : vector<1088x16xbf16>, vector<16x8xbf16>, vector<1088x8xf32> -> vector<1088x8xf32>
    %13 = arith.addf %8, %12 : vector<1088x8xf32>
    %c0_12 = arith.constant 0 : index
    %c34 = arith.constant 34 : index
    %c0_13 = arith.constant 0 : index
    %14 = vector.load %arg2[%c0_12, %c34, %c0_13] : memref<1x1190x16xbf16, #tpu.memory_space<vmem>>, vector<1x1088x16xbf16>
    %15 = vector.shape_cast %14 : vector<1x1088x16xbf16> to vector<1088x16xbf16>
    %c48 = arith.constant 48 : index
    %c0_14 = arith.constant 0 : index
    %16 = vector.load %arg3[%c48, %c0_14] : memref<144x8xbf16, #tpu.memory_space<vmem>>, vector<16x8xbf16>
    %cst_15 = arith.constant dense<0.000000e+00> : vector<1088x8xf32>
    %17 = tpu.matmul %15, %16, %cst_15 {dimension_numbers = #tpu.dot_dimension_numbers<[1], [0], [0], [1], [0, 0, 1, 1], [], []>} : vector<1088x16xbf16>, vector<16x8xbf16>, vector<1088x8xf32> -> vector<1088x8xf32>
    %18 = arith.addf %13, %17 : vector<1088x8xf32>
    %c0_16 = arith.constant 0 : index
    %c35 = arith.constant 35 : index
    %c0_17 = arith.constant 0 : index
    %19 = vector.load %arg2[%c0_16, %c35, %c0_17] : memref<1x1190x16xbf16, #tpu.memory_space<vmem>>, vector<1x1088x16xbf16>
    %20 = vector.shape_cast %19 : vector<1x1088x16xbf16> to vector<1088x16xbf16>
    %c64 = arith.constant 64 : index
    %c0_18 = arith.constant 0 : index
    %21 = vector.load %arg3[%c64, %c0_18] : memref<144x8xbf16, #tpu.memory_space<vmem>>, vector<16x8xbf16>
    %cst_19 = arith.constant dense<0.000000e+00> : vector<1088x8xf32>
    %22 = tpu.matmul %20, %21, %cst_19 {dimension_numbers = #tpu.dot_dimension_numbers<[1], [0], [0], [1], [0, 0, 1, 1], [], []>} : vector<1088x16xbf16>, vector<16x8xbf16>, vector<1088x8xf32> -> vector<1088x8xf32>
    %23 = arith.addf %18, %22 : vector<1088x8xf32>
    %c0_20 = arith.constant 0 : index
    %c36 = arith.constant 36 : index
    %c0_21 = arith.constant 0 : index
    %24 = vector.load %arg2[%c0_20, %c36, %c0_21] : memref<1x1190x16xbf16, #tpu.memory_space<vmem>>, vector<1x1088x16xbf16>
    %25 = vector.shape_cast %24 : vector<1x1088x16xbf16> to vector<1088x16xbf16>
    %c80 = arith.constant 80 : index
    %c0_22 = arith.constant 0 : index
    %26 = vector.load %arg3[%c80, %c0_22] : memref<144x8xbf16, #tpu.memory_space<vmem>>, vector<16x8xbf16>
    %cst_23 = arith.constant dense<0.000000e+00> : vector<1088x8xf32>
    %27 = tpu.matmul %25, %26, %cst_23 {dimension_numbers = #tpu.dot_dimension_numbers<[1], [0], [0], [1], [0, 0, 1, 1], [], []>} : vector<1088x16xbf16>, vector<16x8xbf16>, vector<1088x8xf32> -> vector<1088x8xf32>
    %28 = arith.addf %23, %27 : vector<1088x8xf32>
    %c0_24 = arith.constant 0 : index
    %c68 = arith.constant 68 : index
    %c0_25 = arith.constant 0 : index
    %29 = vector.load %arg2[%c0_24, %c68, %c0_25] : memref<1x1190x16xbf16, #tpu.memory_space<vmem>>, vector<1x1088x16xbf16>
    %30 = vector.shape_cast %29 : vector<1x1088x16xbf16> to vector<1088x16xbf16>
    %c96 = arith.constant 96 : index
    %c0_26 = arith.constant 0 : index
    %31 = vector.load %arg3[%c96, %c0_26] : memref<144x8xbf16, #tpu.memory_space<vmem>>, vector<16x8xbf16>
    %cst_27 = arith.constant dense<0.000000e+00> : vector<1088x8xf32>
    %32 = tpu.matmul %30, %31, %cst_27 {dimension_numbers = #tpu.dot_dimension_numbers<[1], [0], [0], [1], [0, 0, 1, 1], [], []>} : vector<1088x16xbf16>, vector<16x8xbf16>, vector<1088x8xf32> -> vector<1088x8xf32>
    %33 = arith.addf %28, %32 : vector<1088x8xf32>
    %c0_28 = arith.constant 0 : index
    %c69 = arith.constant 69 : index
    %c0_29 = arith.constant 0 : index
    %34 = vector.load %arg2[%c0_28, %c69, %c0_29] : memref<1x1190x16xbf16, #tpu.memory_space<vmem>>, vector<1x1088x16xbf16>
    %35 = vector.shape_cast %34 : vector<1x1088x16xbf16> to vector<1088x16xbf16>
    %c112 = arith.constant 112 : index
    %c0_30 = arith.constant 0 : index
    %36 = vector.load %arg3[%c112, %c0_30] : memref<144x8xbf16, #tpu.memory_space<vmem>>, vector<16x8xbf16>
    %cst_31 = arith.constant dense<0.000000e+00> : vector<1088x8xf32>
    %37 = tpu.matmul %35, %36, %cst_31 {dimension_numbers = #tpu.dot_dimension_numbers<[1], [0], [0], [1], [0, 0, 1, 1], [], []>} : vector<1088x16xbf16>, vector<16x8xbf16>, vector<1088x8xf32> -> vector<1088x8xf32>
    %38 = arith.addf %33, %37 : vector<1088x8xf32>
    %c0_32 = arith.constant 0 : index
    %c70 = arith.constant 70 : index
    %c0_33 = arith.constant 0 : index
    %39 = vector.load %arg2[%c0_32, %c70, %c0_33] : memref<1x1190x16xbf16, #tpu.memory_space<vmem>>, vector<1x1088x16xbf16>
    %40 = vector.shape_cast %39 : vector<1x1088x16xbf16> to vector<1088x16xbf16>
    %c128 = arith.constant 128 : index
    %c0_34 = arith.constant 0 : index
    %41 = vector.load %arg3[%c128, %c0_34] : memref<144x8xbf16, #tpu.memory_space<vmem>>, vector<16x8xbf16>
    %cst_35 = arith.constant dense<0.000000e+00> : vector<1088x8xf32>
    %42 = tpu.matmul %40, %41, %cst_35 {dimension_numbers = #tpu.dot_dimension_numbers<[1], [0], [0], [1], [0, 0, 1, 1], [], []>} : vector<1088x16xbf16>, vector<16x8xbf16>, vector<1088x8xf32> -> vector<1088x8xf32>
    %43 = arith.addf %38, %42 : vector<1088x8xf32>
    %c0_36 = arith.constant 0 : index
    %c0_37 = arith.constant 0 : index
    %44 = vector.load %arg4[%c0_36, %c0_37] : memref<1x8xf32, #tpu.memory_space<vmem>>, vector<1x8xf32>
    %45 = vector.broadcast %44 : vector<1x8xf32> to vector<1088x8xf32>
    %46 = arith.addf %43, %45 : vector<1088x8xf32>
    %47 = arith.negf %46 : vector<1088x8xf32>
    %48 = math.exp %47 : vector<1088x8xf32>
    %cst_38 = arith.constant 1.000000e+00 : f32
    %49 = vector.broadcast %cst_38 : f32 to vector<1088x8xf32>
    %50 = arith.addf %49, %48 : vector<1088x8xf32>
    %51 = arith.divf %49, %50 : vector<1088x8xf32>
    %52 = arith.mulf %46, %51 : vector<1088x8xf32>
    %53 = arith.truncf %52 : vector<1088x8xf32> to vector<1088x8xbf16>
    %c0_39 = arith.constant 0 : index
    %c0_40 = arith.constant 0 : index
    %c0_41 = arith.constant 0 : index
    %54 = vector.load %arg5[%c0_39, %c0_40, %c0_41] : memref<1x1088x8xbf16, #tpu.memory_space<vmem>>, vector<1x1088x8xbf16>
    %55 = vector.shape_cast %54 : vector<1x1088x8xbf16> to vector<1088x8xbf16>
    %56 = vector.shape_cast %53 : vector<1088x8xbf16> to vector<1x1088x8xbf16>
    tpu.vector_store %arg5[%c0_39, %c0_40, %c0_41], %56 {strides = array<i32>} : memref<1x1088x8xbf16, #tpu.memory_space<vmem>>, vector<1x1088x8xbf16>,
    return
  }
  func.func @transform_0(%arg0: i32, %arg1: i32) -> (i32, i32, i32) {
    %c0_i32 = arith.constant 0 : i32
    %c0_i32_0 = arith.constant 0 : i32
    %c0_i32_1 = arith.constant 0 : i32
    return %arg1, %c0_i32, %c0_i32_0 : i32, i32, i32
  }
  func.func @transform_1(%arg0: i32, %arg1: i32) -> (i32, i32) {
    %c0_i32 = arith.constant 0 : i32
    %c0_i32_0 = arith.constant 0 : i32
    return %c0_i32, %arg0 : i32, i32
  }
  func.func @transform_2(%arg0: i32, %arg1: i32) -> (i32, i32) {
    %c0_i32 = arith.constant 0 : i32
    %c0_i32_0 = arith.constant 0 : i32
    return %c0_i32, %arg0 : i32, i32
  }
  func.func @transform_3(%arg0: i32, %arg1: i32) -> (i32, i32, i32) {
    %c0_i32 = arith.constant 0 : i32
    %c0_i32_0 = arith.constant 0 : i32
    return %arg1, %c0_i32, %arg0 : i32, i32, i32
  }
}

</mosaic_0001>

<bundles_post_ra>
// kernel: tpu_custom_call.1
= control target key start
LH: loop header
LB: loop body
LE: loop exit
PB: predicated region body
PF: predicated region fallthrough
CT: control target
= control target key end

     0   :  { %s19367_s12 = smov 0   ;;  %s19369_s13 = smov 0   ;;  %s22983_s0 = inlined_call_operand.vmem [shape: bf16[2,1190,16], index: 0, kind: input, shape index: {}]   ;;  %s22984_s1 = inlined_call_operand.vmem [shape: bf16[144,8], index: 1, kind: input, shape index: {}]   ;;  %s22985_s2 = inlined_call_operand.vmem [shape: f32[1,8], index: 2, kind: input, shape index: {}]   ;;  %s22986_s3 = inlined_call_operand.vmem [shape: bf16[2,1088,8], index: 3, kind: output, shape index: {}]  }
   0x1   :  { %s19371_s14 = smov 0  }
   0x2 LB: > { %s22_s15 = sadd.s32 1, %s19341_s13  ;;  %p14035_p0 = scmp.ge.s32.totalorder %s19345_s14, 1  ;;  %s19345_s14 = sphi %s19371_s14, %s13_s14   ;;  %s19341_s13 = sphi %s19369_s13, %s23195_s13   ;;  %s19337_s12 = sphi %s19367_s12, %s23194_s12  }
   0x3   : > { %p23_p1 = scmp.ge.s32.totalorder %s22_s15, 2  ;;  %p168_p2 = scmp.lt.s32.totalorder %s19345_s14, 3 }
   0x5   : > { %s23197_s15 = smov (%p23_p1, %s22_s15), 0  ;;  %p169_p3 = pnand %p14035_p0, %p168_p2 }
   0x7   : > { %172 = sbr.rel (%p169_p3) target bundleno = 1509 (0x5e5), region = 32 }
   0xe   : > { %v18261_v0 = vld [vmem:[%s22984_s1 + $0x8] sm:$0xff]   ;;  %p202_p4 = scmp.lt.s32.totalorder %s19337_s12, 1  ;;  %v18262_v1 = vld [vmem:[%s22984_s1 + $0x20] sm:$0xff]   ;;  %vm707_vm0 = vsmask.f32 7424  ;;  %vm1262_vm1 = vcmask 130048  }
   0xf   : > { %15903 = vmatprep.subr.bf16.mxu1 %v18261_v0  ;;  %v18265_v2 = vld [vmem:[%s22984_s1] sm:$0xff]   ;;  %16455 = vmatprep.subr.bf16.mxu0 %v18262_v1  ;;  %v19400_v3 = vld [vmem:[%s22984_s1 + $0x28] sm:$0xff]   ;;  %vm5378_vm2 = vsmask.f32 6400  ;;  %vm6928_vm3 = vcmask 1045504   ;;  %vm2769_vm4 = vcmask 1046528  }
  0x10   : > { %s23199_s12 = smov (!%p202_p4, %s19337_s12), 1  ;;  %15904 = vmatpush3.bf16.msra.mxu1 %v18261_v0  ;;  %16456 = vmatpush3.bf16.msra.mxu0 %v18262_v1  ;;  %vm9537_vm5 = vsmask.f32 5376  ;;  %vm11087_vm6 = vcmask 1044480   ;;  %vm13787_vm7 = vcmask 60416  }
  0x11   : > { %s18235_s22 = smul.u32 596, %s23199_s12  ;;  %16041 = vmatprep.subr.bf16.mxu1 %v18265_v2  ;;  %16593 = vmatprep.subr.bf16.mxu0 %v19400_v3 }
  0x12   : > { %s18236_s21 = smul.u32 544, %s23199_s12 }
  0x13   : > { %s19405_s27 = scalar_lea.vmem %s22983_s0, %s18235_s22 }
  0x14   : > { %v223_v4 = vld [vmem:[%s19405_s27] sm:$0xf]  ;;  %v224_v5 = vld [vmem:[%s19405_s27 + $0x4] sm:$0xf]  ;;  %v18264_v7 = vld [vmem:[%s19405_s27 + $0x8] sm:$0xff]   ;;  %s21944_s23 = scalar_lea.vmem %s22986_s3, %s18236_s21 }
  0x15   : > { %v19410_v6 = vcombine.low %v223_v4, %v224_v5  ;;  %v3830_v8 = vld [vmem:[%s19405_s27 + $0x10] sm:$0xe]  ;;  %v3831_v9 = vld [vmem:[%s19405_s27 + $0x14] sm:$0xf]  ;;  %v716_v12 = vshll.u32 %v18264_v7, 16  ;;  %v720_v13 = vshrl.u32 %v18264_v7, 16 }
  0x16   : > { %v18267_v14 = vld [vmem:[%s19405_s27 + $0x18] sm:$0xff]   ;;  %v18269_v15 = vld [vmem:[%s19405_s27 + $0x10] sm:$0xff]   ;;  %v19419_v16 = vcombine.low %v3830_v8, %v3831_v9  ;;  %v18270_v24 = vld [vmem:[%s19405_s27 + $0x20] sm:$0xff]  }
  0x17   : > { %v709_v10 = vshrl.u32 %v19410_v6, 16  ;;  %v711_v11 = vshll.u32 %v19410_v6, 16  ;;  %v718_v18 = vrot.slane %v716_v12, 1  ;;  %v5388_v19 = vshrl.u32 %v18267_v14, 16  ;;  %v18271_v29 = vld [vmem:[%s19405_s27 + $0x18] sm:$0xff]   ;;  %v18272_v30 = vld [vmem:[%s19405_s27 + $0x28] sm:$0xff]  }
  0x18   : > { %23038 = vst [vmem:[#allocation2_spill] sm:$0xff] %v19419_v16  ;;  %v5391_v20 = vshll.u32 %v18267_v14, 16  ;;  %v5380_v21 = vshrl.u32 %v19419_v16, 16  ;;  %v5383_v22 = vshll.u32 %v19419_v16, 16  ;;  %v724_v23 = vshll.u32 %v18269_v15, 16  ;;  %v18273_v43 = vld [vmem:[%s19405_s27 + $0x20] sm:$0xff]  }
  0x19   : > { %v713_v17 = vrot.slane %v711_v11, 1  ;;  %v722_v26 = vor.u32 %v720_v13, %v718_v18  ;;  %v5390_v27 = vrot.slane %v5388_v19, 1  ;;  %v5397_v34 = vshrl.u32 %v18270_v24, 16  ;;  %v18274_v44 = vld [vmem:[%s19405_s27 + $0x30] sm:$0xff]   ;;  %v18275_v49 = vld [vmem:[%s19405_s27 + $0x28] sm:$0xff]   ;;  %v18276_v54 = vld [vmem:[%s19405_s27 + $0x38] sm:$0xff]  }
  0x1a   : > { %v5393_v28 = vrot.slane %v5391_v20, 2  ;;  %v5382_v31 = vrot.slane %v5380_v21, 1  ;;  %v5385_v32 = vrot.slane %v5383_v22, 2  ;;  %v726_v33 = vrot.slane %v724_v23, 1  ;;  %v18277_v59 = vld [vmem:[%s19405_s27 + $0x30] sm:$0xff]   ;;  %v18279_v20 = vld [vmem:[%s19405_s27 + $0x38] sm:$0xff]  }
  0x1b   : > { %v714_v25 = vor.u32 %v713_v17, %v709_v10  ;;  %v5400_v37 = vshll.u32 %v18270_v24, 16  ;;  %v728_v38 = vshrl.u32 %v18269_v15, 16  ;;  %v5399_v41 = vrot.slane %v5397_v34, 1  ;;  %v18278_v10 = vld [vmem:[%s19405_s27 + $0x40] sm:$0xff]  }
  0x1c   : > { %v5394_v36 = vor.u32 %v5393_v28, %v5390_v27  ;;  %v5386_v39 = vor.u32 %v5385_v32, %v5382_v31  ;;  %v727_v40 = vsel %vm707_vm0, %v722_v26, %v726_v33  ;;  %v732_v42 = vshll.u32 %v18271_v29, 16  ;;  %v18280_v28 = vld [vmem:[%s19405_s27 + $0x48] sm:$0xff]  }
  0x1d   : > { %v719_v35 = vsel %vm707_vm0, %v714_v25, %v718_v18  ;;  %v5402_v45 = vrot.slane %v5400_v37, 2  ;;  %v730_v46 = vor.u32 %v728_v38, %v726_v33  ;;  %v5406_v47 = vshrl.u32 %v18272_v30, 16  ;;  %v18281_v33 = vld [vmem:[%s19405_s27 + $0x40] sm:$0xff]  }
  0x1e   : > { %15905 = vmatprep.mubr.msk.bf16.mxu1 %vm1262_vm1, %v719_v35  ;;  %v5409_v48 = vshll.u32 %v18272_v30, 16  ;;  %v5395_v50 = vsel %vm5378_vm2, %v5386_v39, %v5394_v36  ;;  %v734_v51 = vrot.slane %v732_v42, 1  ;;  %v736_v52 = vshrl.u32 %v18271_v29, 16  ;;  %v18283_v42 = vld [vmem:[%s19405_s27 + $0x48] sm:$0xff]  }
  0x1f   : > { %15906 = vmatmul.mubr.msk.bf16.vlgmr.msra.gmra.mrb[0].mxu1 %vm1262_vm1, %v727_v40  ;;  %v740_v53 = vshll.u32 %v18273_v43, 16  ;;  %16457 = vmatprep.mubr.msk.bf16.mxu0 %vm1262_vm1, %v5395_v50  ;;  %v5403_v55 = vor.u32 %v5402_v45, %v5399_v41  ;;  %v5408_v56 = vrot.slane %v5406_v47, 1  ;;  %v5415_v58 = vshrl.u32 %v18274_v44, 16  ;;  %v18282_v41 = vld [vmem:[%s19405_s27 + $0x50] sm:$0xff]   ;;  %v18284_v50 = vld [vmem:[%s19405_s27 + $0x58] sm:$0xff]  }
  0x20   : > { %16042 = vmatpush3.bf16.msra.mxu1 %v18265_v2  ;;  %v5411_v57 = vrot.slane %v5409_v48, 2  ;;  %v735_v60 = vsel %vm707_vm0, %v730_v46, %v734_v51  ;;  %v738_v61 = vor.u32 %v736_v52, %v734_v51  ;;  %v5418_v63 = vshll.u32 %v18274_v44, 16 }
  0x21   : > { %v742_v62 = vrot.slane %v740_v53, 1  ;;  %v5404_v0 = vsel %vm5378_vm2, %v5394_v36, %v5403_v55  ;;  %15909 = vmatprep.mubr.msk.bf16.mxu1 %vm1262_vm1, %v735_v60  ;;  %v5417_v2 = vrot.slane %v5415_v58, 1  ;;  %v744_v4 = vshrl.u32 %v18273_v43, 16  ;;  %v18285_v58 = vld [vmem:[%s19405_s27 + $0x50] sm:$0xff]  }
  0x22   : > { %v5412_v1 = vor.u32 %v5411_v57, %v5408_v56  ;;  %16458 = vmatmul.mubr.msk.bf16.vlgmr.msra.gmra.mrb[0].mxu0 %vm1262_vm1, %v5404_v0  ;;  %v5420_v7 = vrot.slane %v5418_v63, 2  ;;  %v748_v8 = vshll.u32 %v18275_v49, 16  ;;  %v5424_v9 = vshrl.u32 %v18276_v54, 16 }
  0x23   : > { %v743_v5 = vsel %vm707_vm0, %v738_v61, %v742_v62  ;;  %16594 = vmatpush3.bf16.msra.mxu0 %v19400_v3  ;;  %v746_v12 = vor.u32 %v744_v4, %v742_v62  ;;  %v5427_v13 = vshll.u32 %v18276_v54, 16  ;;  %v752_v14 = vshrl.u32 %v18275_v49, 16  ;;  %v18286_v61 = vld [vmem:[%s19405_s27 + $0x60] sm:$0xff]  }
  0x24   : > { %v5413_v11 = vsel %vm5378_vm2, %v5403_v55, %v5412_v1  ;;  %v5421_v15 = vor.u32 %v5420_v7, %v5417_v2  ;;  %v750_v17 = vrot.slane %v748_v8, 1  ;;  %v5426_v18 = vrot.slane %v5424_v9, 1  ;;  %v18287_v7 = vld [vmem:[%s19405_s27 + $0x58] sm:$0xff]  }
  0x25   : > { %16461 = vmatprep.mubr.msk.bf16.mxu0 %vm1262_vm1, %v5413_v11  ;;  %v756_v19 = vshll.u32 %v18277_v59, 16  ;;  %v5429_v21 = vrot.slane %v5427_v13, 2  ;;  %v5433_v22 = vshrl.u32 %v18278_v10, 16  ;;  %v5436_v23 = vshll.u32 %v18278_v10, 16 }
  0x26   : > { %v760_v3 = vshrl.u32 %v18277_v59, 16  ;;  %v5422_v24 = vsel %vm5378_vm2, %v5412_v1, %v5421_v15  ;;  %v751_v25 = vsel %vm707_vm0, %v746_v12, %v750_v17  ;;  %v754_v26 = vor.u32 %v752_v14, %v750_v17  ;;  %v18288_v12 = vld [vmem:[%s19405_s27 + $0x68] sm:$0xff]  }
  0x27   : > { %15910 = vmatmul.mubr.msk.bf16.gmra.mrb[4].mxu1 %vm1262_vm1, %v743_v5  ;;  %v758_v27 = vrot.slane %v756_v19, 1  ;;  %v5430_v29 = vor.u32 %v5429_v21, %v5426_v18  ;;  %v5435_v30 = vrot.slane %v5433_v22, 1  ;;  %v5438_v31 = vrot.slane %v5436_v23, 2  ;;  %v18289_v22 = vld [vmem:[%s19405_s27 + $0x60] sm:$0xff]   ;;  %v18290_v23 = vld [vmem:[%s19405_s27 + $0x70] sm:$0xff]  }
  0x28   : > { %15913 = vmatprep.mubr.msk.bf16.mxu1 %vm1262_vm1, %v751_v25  ;;  %v764_v32 = vshll.u32 %v18279_v20, 16  ;;  %v5442_v35 = vshrl.u32 %v18280_v28, 16  ;;  %v5445_v36 = vshll.u32 %v18280_v28, 16  ;;  %v768_v40 = vshrl.u32 %v18279_v20, 16  ;;  %v18291_v25 = vld [vmem:[%s19405_s27 + $0x68] sm:$0xff]  }
  0x29   : > { %v762_v34 = vor.u32 %v760_v3, %v758_v27  ;;  %v5431_v37 = vsel %vm5378_vm2, %v5421_v15, %v5430_v29  ;;  %v759_v38 = vsel %vm707_vm0, %v754_v26, %v758_v27  ;;  %v772_v45 = vshll.u32 %v18281_v33, 16 }
  0x2a   : > { %v766_v39 = vrot.slane %v764_v32, 1  ;;  %16462 = vmatmul.mubr.msk.bf16.gmra.mrb[4].mxu0 %vm1262_vm1, %v5422_v24  ;;  %v5444_v43 = vrot.slane %v5442_v35, 1  ;;  %v5447_v44 = vrot.slane %v5445_v36, 2  ;;  %v776_v46 = vshrl.u32 %v18281_v33, 16 }
  0x2b   : > { %16465 = vmatprep.mubr.msk.bf16.mxu0 %vm1262_vm1, %v5431_v37  ;;  %v5439_v47 = vor.u32 %v5438_v31, %v5435_v30  ;;  %v5451_v49 = vshrl.u32 %v18282_v41, 16  ;;  %v774_v52 = vrot.slane %v772_v45, 1  ;;  %v5454_v53 = vshll.u32 %v18282_v41, 16 }
  0x2c   : > { %v767_v48 = vsel %vm707_vm0, %v762_v34, %v766_v39  ;;  %v5448_v51 = vor.u32 %v5447_v44, %v5444_v43  ;;  %v780_v54 = vshll.u32 %v18283_v42, 16  ;;  %v5460_v56 = vshrl.u32 %v18284_v50, 16  ;;  %v18292_v34 = vld [vmem:[%s19405_s27 + $0x78] sm:$0xff]   ;;  %v18293_v43 = vld [vmem:[%s19405_s27 + $0x70] sm:$0xff]   ;;  %v18294_v44 = vld [vmem:[%s19405_s27 + $0x80] sm:$0xff]  }
  0x2d   : > { %v5453_v55 = vrot.slane %v5451_v49, 1  ;;  %v5463_v57 = vshll.u32 %v18284_v50, 16  ;;  %v770_v59 = vor.u32 %v768_v40, %v766_v39  ;;  %v5456_v60 = vrot.slane %v5454_v53, 2 }
  0x2e   : > { %v5440_v62 = vsel %vm5378_vm2, %v5430_v29, %v5439_v47  ;;  %v778_v63 = vor.u32 %v776_v46, %v774_v52  ;;  %v782_v0 = vrot.slane %v780_v54, 1  ;;  %v5449_v1 = vsel %vm5378_vm2, %v5439_v47, %v5448_v51 }
  0x2f   : > { %15914 = vmatmul.mubr.msk.bf16.gmra.mrb[8].mxu1 %vm1262_vm1, %v759_v38  ;;  %v5462_v2 = vrot.slane %v5460_v56, 1  ;;  %v5465_v4 = vrot.slane %v5463_v57, 2  ;;  %v788_v5 = vshll.u32 %v18285_v58, 16  ;;  %v775_v8 = vsel %vm707_vm0, %v770_v59, %v774_v52  ;;  %v18295_v56 = vld [vmem:[%s19405_s27 + $0x78] sm:$0xff]  }
  0x30   : > { %15917 = vmatprep.mubr.msk.bf16.mxu1 %vm1262_vm1, %v767_v48  ;;  %v5457_v9 = vor.u32 %v5456_v60, %v5453_v55  ;;  %v784_v10 = vshrl.u32 %v18283_v42, 16  ;;  %v5469_v11 = vshrl.u32 %v18286_v61, 16  ;;  %v783_v13 = vsel %vm707_vm0, %v778_v63, %v782_v0 }
  0x31   : > { %v5472_v14 = vshll.u32 %v18286_v61, 16  ;;  %v792_v15 = vshrl.u32 %v18285_v58, 16  ;;  %v796_v17 = vshll.u32 %v18287_v7, 16  ;;  %v5466_v18 = vor.u32 %v5465_v4, %v5462_v2  ;;  %v18296_v61 = vld [vmem:[%s19405_s27 + $0x88] sm:$0xff]  }
  0x32   : > { %16466 = vmatmul.mubr.msk.bf16.gmra.mrb[8].mxu0 %vm1262_vm1, %v5440_v62  ;;  %v5478_v19 = vshrl.u32 %v18288_v12, 16  ;;  %v5481_v20 = vshll.u32 %v18288_v12, 16  ;;  %v790_v21 = vrot.slane %v788_v5, 1  ;;  %v786_v3 = vor.u32 %v784_v10, %v782_v0 }
  0x33   : > { %16469 = vmatprep.mubr.msk.bf16.mxu0 %vm1262_vm1, %v5449_v1  ;;  %v5471_v24 = vrot.slane %v5469_v11, 1  ;;  %v5458_v26 = vsel %vm5378_vm2, %v5448_v51, %v5457_v9  ;;  %v5474_v27 = vrot.slane %v5472_v14, 2  ;;  %v798_v29 = vrot.slane %v796_v17, 1  ;;  %v18297_v14 = vld [vmem:[%s19405_s27 + $0x80] sm:$0xff]   ;;  %v18299_v17 = vld [vmem:[%s19405_s27 + $0x88] sm:$0xff]  }
  0x34   : > { %v794_v28 = vor.u32 %v792_v15, %v790_v21  ;;  %v5467_v30 = vsel %vm5378_vm2, %v5457_v9, %v5466_v18  ;;  %v5480_v31 = vrot.slane %v5478_v19, 1  ;;  %v5483_v32 = vrot.slane %v5481_v20, 2  ;;  %v18298_v15 = vld [vmem:[%s19405_s27 + $0x90] sm:$0xff]  }
  0x35   : > { %v800_v33 = vshrl.u32 %v18287_v7, 16  ;;  %v804_v35 = vshll.u32 %v18289_v22, 16  ;;  %v5487_v36 = vshrl.u32 %v18290_v23, 16  ;;  %v791_v37 = vsel %vm707_vm0, %v786_v3, %v790_v21  ;;  %v18300_v21 = vld [vmem:[%s19405_s27 + $0x98] sm:$0xff]  }
  0x36   : > { %v5490_v38 = vshll.u32 %v18290_v23, 16  ;;  %v812_v39 = vshll.u32 %v18291_v25, 16  ;;  %v5475_v40 = vor.u32 %v5474_v27, %v5471_v24  ;;  %v799_v41 = vsel %vm707_vm0, %v794_v28, %v798_v29 }
  0x37   : > { %15918 = vmatmul.mubr.msk.bf16.gmra.mrb[12].mxu1 %vm1262_vm1, %v775_v8  ;;  %v808_v42 = vshrl.u32 %v18289_v22, 16  ;;  %v5484_v45 = vor.u32 %v5483_v32, %v5480_v31  ;;  %v5496_v46 = vshrl.u32 %v18292_v34, 16  ;;  %v5499_v47 = vshll.u32 %v18292_v34, 16 }
  0x38   : > { %15921 = vmatprep.mubr.msk.bf16.mxu1 %vm1262_vm1, %v783_v13  ;;  %v806_v48 = vrot.slane %v804_v35, 1  ;;  %v5489_v49 = vrot.slane %v5487_v36, 1  ;;  %v802_v50 = vor.u32 %v800_v33, %v798_v29  ;;  %v5492_v51 = vrot.slane %v5490_v38, 2  ;;  %v18301_v36 = vld [vmem:[%s19405_s27 + $0x90] sm:$0xff]   ;;  %v18302_v38 = vld [vmem:[%s19405_s27 + $0xa0] sm:$0xff]  }
  0x39   : > { %v814_v52 = vrot.slane %v812_v39, 1  ;;  %v5476_v53 = vsel %vm5378_vm2, %v5466_v18, %v5475_v40  ;;  %v820_v55 = vshll.u32 %v18293_v43, 16  ;;  %v5485_v57 = vsel %vm5378_vm2, %v5475_v40, %v5484_v45 }
  0x3a   : > { %16470 = vmatmul.mubr.msk.bf16.gmra.mrb[12].mxu0 %vm1262_vm1, %v5458_v26  ;;  %v810_v54 = vor.u32 %v808_v42, %v806_v48  ;;  %v5498_v58 = vrot.slane %v5496_v46, 1  ;;  %v5501_v59 = vrot.slane %v5499_v47, 2  ;;  %v5505_v60 = vshrl.u32 %v18294_v44, 16  ;;  %v18303_v46 = vld [vmem:[%s19405_s27 + $0x98] sm:$0xff]  }
  0x3b   : > { %16473 = vmatprep.mubr.msk.bf16.mxu0 %vm1262_vm1, %v5467_v30  ;;  %v816_v62 = vshrl.u32 %v18291_v25, 16  ;;  %v5508_v63 = vshll.u32 %v18294_v44, 16  ;;  %v807_v0 = vsel %vm707_vm0, %v802_v50, %v806_v48  ;;  %v5493_v1 = vor.u32 %v5492_v51, %v5489_v49  ;;  %v18304_v49 = vld [vmem:[%s19405_s27 + $0xa8] sm:$0xff]  }
  0x3c   : > { %v815_v2 = vsel %vm707_vm0, %v810_v54, %v814_v52  ;;  %v822_v4 = vrot.slane %v820_v55, 1  ;;  %v824_v5 = vshrl.u32 %v18293_v43, 16  ;;  %v828_v7 = vshll.u32 %v18295_v56, 16 }
  0x3d   : > { %v5502_v8 = vor.u32 %v5501_v59, %v5498_v58  ;;  %v5507_v9 = vrot.slane %v5505_v60, 1  ;;  %v5514_v10 = vshrl.u32 %v18296_v61, 16  ;;  %v5517_v11 = vshll.u32 %v18296_v61, 16 }
  0x3e   : > { %v818_v12 = vor.u32 %v816_v62, %v814_v52  ;;  %v5510_v13 = vrot.slane %v5508_v63, 2  ;;  %v5494_v18 = vsel %vm5378_vm2, %v5484_v45, %v5493_v1  ;;  %v826_v19 = vor.u32 %v824_v5, %v822_v4 }
  0x3f   : > { %15922 = vmatmul.mubr.msk.bf16.gmra.mrb[16].mxu1 %vm1262_vm1, %v791_v37  ;;  %v830_v20 = vrot.slane %v828_v7, 1  ;;  %v5503_v22 = vsel %vm5378_vm2, %v5493_v1, %v5502_v8  ;;  %v5516_v23 = vrot.slane %v5514_v10, 1  ;;  %v5519_v3 = vrot.slane %v5517_v11, 2  ;;  %v18305_v1 = vld [vmem:[%s19405_s27 + $0xa0] sm:$0xff]  }
  0x40   : > { %15925 = vmatprep.mubr.msk.bf16.mxu1 %vm1262_vm1, %v799_v41  ;;  %v823_v24 = vsel %vm707_vm0, %v818_v12, %v822_v4  ;;  %v5511_v25 = vor.u32 %v5510_v13, %v5507_v9  ;;  %v836_v26 = vshll.u32 %v18297_v14, 16  ;;  %v832_v27 = vshrl.u32 %v18295_v56, 16  ;;  %v18306_v4 = vld [vmem:[%s19405_s27 + $0xb0] sm:$0xff]   ;;  %v18307_v9 = vld [vmem:[%s19405_s27 + $0xa8] sm:$0xff]   ;;  %v18308_v13 = vld [vmem:[%s19405_s27 + $0xb8] sm:$0xff]  }
  0x41   : > { %v5523_v28 = vshrl.u32 %v18298_v15, 16  ;;  %v5526_v29 = vshll.u32 %v18298_v15, 16  ;;  %v840_v30 = vshrl.u32 %v18297_v14, 16  ;;  %v831_v31 = vsel %vm707_vm0, %v826_v19, %v830_v20 }
  0x42   : > { %16474 = vmatmul.mubr.msk.bf16.gmra.mrb[16].mxu0 %vm1262_vm1, %v5476_v53  ;;  %v844_v32 = vshll.u32 %v18299_v17, 16  ;;  %v5532_v33 = vshrl.u32 %v18300_v21, 16  ;;  %v5520_v34 = vor.u32 %v5519_v3, %v5516_v23  ;;  %v5535_v35 = vshll.u32 %v18300_v21, 16 }
  0x43   : > { %16477 = vmatprep.mubr.msk.bf16.mxu0 %vm1262_vm1, %v5485_v57  ;;  %v838_v37 = vrot.slane %v836_v26, 1  ;;  %v5512_v39 = vsel %vm5378_vm2, %v5502_v8, %v5511_v25  ;;  %v834_v40 = vor.u32 %v832_v27, %v830_v20  ;;  %v5525_v41 = vrot.slane %v5523_v28, 1  ;;  %v18309_v27 = vld [vmem:[%s19405_s27 + $0xb0] sm:$0xff]  }
  0x44   : > { %v5528_v42 = vrot.slane %v5526_v29, 2  ;;  %v846_v44 = vrot.slane %v844_v32, 1  ;;  %v5534_v45 = vrot.slane %v5532_v33, 1  ;;  %v5521_v47 = vsel %vm5378_vm2, %v5511_v25, %v5520_v34 }
  0x45   : > { %v842_v43 = vor.u32 %v840_v30, %v838_v37  ;;  %v5537_v48 = vrot.slane %v5535_v35, 2  ;;  %v848_v50 = vshrl.u32 %v18299_v17, 16  ;;  %v852_v51 = vshll.u32 %v18301_v36, 16  ;;  %v18310_v30 = vld [vmem:[%s19405_s27 + $0xc0] sm:$0xff]   ;;  %v18311_v35 = vld [vmem:[%s19405_s27 + $0xb8] sm:$0xff]  }
  0x46   : > { %v5541_v52 = vshrl.u32 %v18302_v38, 16  ;;  %v839_v53 = vsel %vm707_vm0, %v834_v40, %v838_v37  ;;  %v5544_v54 = vshll.u32 %v18302_v38, 16  ;;  %v5529_v55 = vor.u32 %v5528_v42, %v5525_v41 }
  0x47   : > { %15926 = vmatmul.mubr.msk.bf16.gmra.mrb[20].mxu1 %vm1262_vm1, %v807_v0  ;;  %v847_v56 = vsel %vm707_vm0, %v842_v43, %v846_v44  ;;  %v856_v57 = vshrl.u32 %v18301_v36, 16  ;;  %v860_v58 = vshll.u32 %v18303_v46, 16  ;;  %v5538_v59 = vor.u32 %v5537_v48, %v5534_v45 }
  0x48   : > { %15929 = vmatprep.mubr.msk.bf16.mxu1 %vm1262_vm1, %v815_v2  ;;  %v5550_v60 = vshrl.u32 %v18304_v49, 16  ;;  %v5553_v61 = vshll.u32 %v18304_v49, 16  ;;  %v850_v62 = vor.u32 %v848_v50, %v846_v44  ;;  %v854_v63 = vrot.slane %v852_v51, 1 }
  0x49   : > { %v5543_v0 = vrot.slane %v5541_v52, 1  ;;  %v5546_v2 = vrot.slane %v5544_v54, 2  ;;  %v5530_v5 = vsel %vm5378_vm2, %v5520_v34, %v5529_v55  ;;  %v862_v8 = vrot.slane %v860_v58, 1  ;;  %v18314_v54 = vld [vmem:[%s19405_s27 + $0xd0] sm:$0xff]  }
  0x4a   : > { %16478 = vmatmul.mubr.msk.bf16.gmra.mrb[20].mxu0 %vm1262_vm1, %v5494_v18  ;;  %v858_v7 = vor.u32 %v856_v57, %v854_v63  ;;  %v5539_v10 = vsel %vm5378_vm2, %v5529_v55, %v5538_v59  ;;  %v5552_v11 = vrot.slane %v5550_v60, 1  ;;  %v5555_v12 = vrot.slane %v5553_v61, 2  ;;  %v18315_v61 = vld [vmem:[%s19405_s27 + $0xc8] sm:$0xff]  }
  0x4b   : > { %16481 = vmatprep.mubr.msk.bf16.mxu0 %vm1262_vm1, %v5503_v22  ;;  %v855_v14 = vsel %vm707_vm0, %v850_v62, %v854_v63  ;;  %v868_v15 = vshll.u32 %v18305_v1, 16  ;;  %v5547_v17 = vor.u32 %v5546_v2, %v5543_v0  ;;  %v864_v18 = vshrl.u32 %v18303_v46, 16 }
  0x4c   : > { %v5559_v19 = vshrl.u32 %v18306_v4, 16  ;;  %v5562_v20 = vshll.u32 %v18306_v4, 16  ;;  %v863_v21 = vsel %vm707_vm0, %v858_v7, %v862_v8  ;;  %v872_v22 = vshrl.u32 %v18305_v1, 16  ;;  %v18316_v1 = vld [vmem:[%s19405_s27 + $0xd8] sm:$0xff]  }
  0x4d   : > { %v876_v23 = vshll.u32 %v18307_v9, 16  ;;  %v5556_v3 = vor.u32 %v5555_v12, %v5552_v11  ;;  %v5571_v25 = vshll.u32 %v18308_v13, 16  ;;  %v870_v26 = vrot.slane %v868_v15, 1 }
  0x4e   : > { %v5548_v28 = vsel %vm5378_vm2, %v5538_v59, %v5547_v17  ;;  %v866_v29 = vor.u32 %v864_v18, %v862_v8  ;;  %v5564_v32 = vrot.slane %v5562_v20, 2  ;;  %v884_v40 = vshll.u32 %v18309_v27, 16  ;;  %v18318_v20 = vld [vmem:[%s19405_s27 + $0xe0] sm:$0xff]  }
  0x4f   : > { %15930 = vmatmul.mubr.msk.bf16.gmra.mrb[24].mxu1 %vm1262_vm1, %v823_v24  ;;  %v5568_v24 = vshrl.u32 %v18308_v13, 16  ;;  %v874_v33 = vor.u32 %v872_v22, %v870_v26  ;;  %v878_v34 = vrot.slane %v876_v23, 1  ;;  %v5557_v36 = vsel %vm5378_vm2, %v5547_v17, %v5556_v3  ;;  %v18319_v23 = vld [vmem:[%s19405_s27 + $0xd8] sm:$0xff]  }
  0x50   : > { %15933 = vmatprep.mubr.msk.bf16.mxu1 %vm1262_vm1, %v831_v31  ;;  %v5561_v31 = vrot.slane %v5559_v19, 1  ;;  %v5573_v38 = vrot.slane %v5571_v25, 2  ;;  %v871_v41 = vsel %vm707_vm0, %v866_v29, %v870_v26  ;;  %v880_v42 = vshrl.u32 %v18307_v9, 16  ;;  %v18317_v19 = vld [vmem:[%s19405_s27 + $0xd0] sm:$0xff]   ;;  %v18320_v26 = vld [vmem:[%s19405_s27 + $0xe8] sm:$0xff]  }
  0x51   : > { %v5570_v37 = vrot.slane %v5568_v24, 1  ;;  %v5577_v43 = vshrl.u32 %v18310_v30, 16  ;;  %v5580_v44 = vshll.u32 %v18310_v30, 16  ;;  %v879_v46 = vsel %vm707_vm0, %v874_v33, %v878_v34 }
  0x52   : > { %16482 = vmatmul.mubr.msk.bf16.gmra.mrb[24].mxu0 %vm1262_vm1, %v5512_v39  ;;  %v18312_v39 = vld [vmem:[%s19405_s27 + $0xc8] sm:$0xff]   ;;  %v5565_v45 = vor.u32 %v5564_v32, %v5561_v31  ;;  %v892_v48 = vshll.u32 %v18311_v35, 16  ;;  %v886_v52 = vrot.slane %v884_v40, 1  ;;  %v882_v55 = vor.u32 %v880_v42, %v878_v34 }
  0x53   : > { %16485 = vmatprep.mubr.msk.bf16.mxu0 %vm1262_vm1, %v5521_v47  ;;  %v888_v47 = vshrl.u32 %v18309_v27, 16  ;;  %v5574_v49 = vor.u32 %v5573_v38, %v5570_v37  ;;  %v5586_v50 = vshrl.u32 %v18312_v39, 16  ;;  %v5589_v51 = vshll.u32 %v18312_v39, 16 }
  0x54   : > { %v5582_v57 = vrot.slane %v5580_v44, 2  ;;  %v5566_v58 = vsel %vm5378_vm2, %v5556_v3, %v5565_v45  ;;  %v894_v60 = vrot.slane %v892_v48, 1  ;;  %v5595_v4 = vshrl.u32 %v18314_v54, 16  ;;  %v18322_v44 = vld [vmem:[%s19405_s27 + $0xf0] sm:$0xff]  }
  0x55   : > { %v890_v59 = vor.u32 %v888_v47, %v886_v52  ;;  %v5575_v62 = vsel %vm5378_vm2, %v5565_v45, %v5574_v49  ;;  %v5588_v63 = vrot.slane %v5586_v50, 1  ;;  %v5591_v0 = vrot.slane %v5589_v51, 2  ;;  %v19575_v45 = vld [vmem:[%s22984_s1 + $0x30] sm:$0xff]  }
  0x56   : > { %v896_v7 = vshrl.u32 %v18311_v35, 16  ;;  %v5598_v8 = vshll.u32 %v18314_v54, 16  ;;  %v908_v12 = vshll.u32 %v18315_v61, 16  ;;  %v5607_v15 = vshll.u32 %v18316_v1, 16  ;;  %16731 = vmatprep.subr.bf16.mxu0 %v19575_v45 }
  0x57   : > { %15934 = vmatmul.mubr.msk.bf16.gmra.mrb[28].mxu1 %vm1262_vm1, %v839_v53  ;;  %v18313_v53 = vld [vmem:[%s19405_s27 + $0xc0] sm:$0xff]   ;;  %v5592_v13 = vor.u32 %v5591_v0, %v5588_v63  ;;  %v5597_v18 = vrot.slane %v5595_v4, 1  ;;  %v912_v30 = vshrl.u32 %v18315_v61, 16  ;;  %v916_v31 = vshll.u32 %v18317_v19, 16 }
  0x58   : > { %15937 = vmatprep.mubr.msk.bf16.mxu1 %vm1262_vm1, %v847_v56  ;;  %v5579_v56 = vrot.slane %v5577_v43, 1  ;;  %v900_v2 = vshll.u32 %v18313_v53, 16  ;;  %v904_v11 = vshrl.u32 %v18313_v53, 16  ;;  %v5600_v22 = vrot.slane %v5598_v8, 2  ;;  %v18321_v43 = vld [vmem:[%s19405_s27 + $0xe0] sm:$0xff]   ;;  %v18323_v53 = vld [vmem:[%s19405_s27 + $0xe8] sm:$0xff]  }
  0x59   : > { %v910_v25 = vrot.slane %v908_v12, 1  ;;  %v5609_v29 = vrot.slane %v5607_v15, 2  ;;  %v5613_v32 = vshrl.u32 %v18318_v20, 16  ;;  %v5616_v34 = vshll.u32 %v18318_v20, 16  ;;  %v18326_v12 = vld [vmem:[%s19405_s27 + $0x100] sm:$0xff]  }
  0x5a   : > { %16486 = vmatmul.mubr.msk.bf16.gmra.mrb[28].mxu0 %vm1262_vm1, %v5530_v5  ;;  %v887_v5 = vsel %vm707_vm0, %v882_v55, %v886_v52  ;;  %v5583_v9 = vor.u32 %v5582_v57, %v5579_v56  ;;  %v902_v17 = vrot.slane %v900_v2, 1  ;;  %v924_v35 = vshll.u32 %v18319_v23, 16  ;;  %v18324_v56 = vld [vmem:[%s19405_s27 + $0xf8] sm:$0xff]  }
  0x5b   : > { %16489 = vmatprep.mubr.msk.bf16.mxu0 %vm1262_vm1, %v5539_v10  ;;  %v895_v10 = vsel %vm707_vm0, %v890_v59, %v894_v60  ;;  %v920_v38 = vshrl.u32 %v18317_v19, 16  ;;  %v5622_v39 = vshrl.u32 %v18320_v26, 16  ;;  %v918_v42 = vrot.slane %v916_v31, 1 }
  0x5c   : > { %v5584_v3 = vsel %vm5378_vm2, %v5574_v49, %v5583_v9  ;;  %v906_v24 = vor.u32 %v904_v11, %v902_v17  ;;  %v5593_v27 = vsel %vm5378_vm2, %v5583_v9, %v5592_v13  ;;  %v5615_v47 = vrot.slane %v5613_v32, 1 }
  0x5d   : > { %v5618_v48 = vrot.slane %v5616_v34, 2  ;;  %v926_v49 = vrot.slane %v924_v35, 1  ;;  %v922_v51 = vor.u32 %v920_v38, %v918_v42  ;;  %v5624_v52 = vrot.slane %v5622_v39, 1  ;;  %v18329_v34 = vld [vmem:[%s19405_s27 + $0x100] sm:$0xff]   ;;  %v18330_v38 = vld [vmem:[%s19405_s27 + $0x110] sm:$0xff]  }
  0x5e   : > { %v911_v37 = vsel %vm707_vm0, %v906_v24, %v910_v25  ;;  %v928_v57 = vshrl.u32 %v18319_v23, 16  ;;  %v5631_v59 = vshrl.u32 %v18322_v44, 16  ;;  %v936_v0 = vshrl.u32 %v18321_v43, 16 }
  0x5f   : > { %15938 = vmatmul.mubr.msk.bf16.gmra.mrb[32].mxu1 %vm1262_vm1, %v855_v14  ;;  %v5604_v14 = vshrl.u32 %v18316_v1, 16  ;;  %v927_v63 = vsel %vm707_vm0, %v922_v51, %v926_v49  ;;  %v940_v1 = vshll.u32 %v18323_v53, 16  ;;  %v5640_v4 = vshrl.u32 %v18324_v56, 16 }
  0x60   : > { %15941 = vmatprep.mubr.msk.bf16.mxu1 %vm1262_vm1, %v863_v21  ;;  %v898_v21 = vor.u32 %v896_v7, %v894_v60  ;;  %v5634_v60 = vshll.u32 %v18322_v44, 16  ;;  %v18325_v7 = vld [vmem:[%s19405_s27 + $0xf0] sm:$0xff]   ;;  %v930_v8 = vor.u32 %v928_v57, %v926_v49  ;;  %v944_v24 = vshrl.u32 %v18323_v53, 16 }
  0x61   : > { %v5642_v20 = vrot.slane %v5640_v4, 1  ;;  %v964_v49 = vshll.u32 %v18329_v34, 16  ;;  %v5667_v51 = vshrl.u32 %v18330_v38, 16 }
  0x62   : > { %16490 = vmatmul.mubr.msk.bf16.gmra.mrb[32].mxu0 %vm1262_vm1, %v5548_v28  ;;  %v5606_v28 = vrot.slane %v5604_v14, 1  ;;  %v903_v33 = vsel %vm707_vm0, %v898_v21, %v902_v17  ;;  %v5636_v11 = vrot.slane %v5634_v60, 2  ;;  %v942_v17 = vrot.slane %v940_v1, 1  ;;  %v18334_v1 = vld [vmem:[%s19405_s27 + $0x120] sm:$0xff]  }
  0x63   : > { %16493 = vmatprep.mubr.msk.bf16.mxu0 %vm1262_vm1, %v5557_v36  ;;  %v5601_v36 = vor.u32 %v5600_v22, %v5597_v18  ;;  %v18328_v18 = vld [vmem:[%s19405_s27 + $0x108] sm:$0xff]   ;;  %v966_v60 = vrot.slane %v964_v49, 1 }
  0x64   : > { %v5610_v40 = vor.u32 %v5609_v29, %v5606_v28  ;;  %v5661_v32 = vshll.u32 %v18328_v18, 16 }
  0x65   : > { %v5602_v50 = vsel %vm5378_vm2, %v5592_v13, %v5601_v36  ;;  %v18327_v13 = vld [vmem:[%s19405_s27 + $0xf8] sm:$0xff]  }
  0x66   : > { %v5611_v54 = vsel %vm5378_vm2, %v5601_v36, %v5610_v40  ;;  %v956_v29 = vshll.u32 %v18327_v13, 16  ;;  %v946_v36 = vor.u32 %v944_v24, %v942_v17 }
  0x67   : > { %15942 = vmatmul.mubr.msk.bf16.gmra.mrb[36].mxu1 %vm1262_vm1, %v871_v41  ;;  %v5625_v41 = vshll.u32 %v18320_v26, 16  ;;  %v5652_v26 = vshll.u32 %v18326_v12, 16 }
  0x68   : > { %15945 = vmatprep.mubr.msk.bf16.mxu1 %vm1262_vm1, %v879_v46  ;;  %v914_v46 = vor.u32 %v912_v30, %v910_v25  ;;  %v5649_v25 = vshrl.u32 %v18326_v12, 16  ;;  %v5658_v30 = vshrl.u32 %v18328_v18, 16  ;;  %v5688_v18 = vshll.u32 %v18334_v1, 16 }
  0x69   : > { %v5627_v55 = vrot.slane %v5625_v41, 2  ;;  %v5654_v39 = vrot.slane %v5652_v26, 2  ;;  %v958_v41 = vrot.slane %v956_v29, 1 }
  0x6a   : > { %16494 = vmatmul.mubr.msk.bf16.gmra.mrb[36].mxu0 %vm1262_vm1, %v5566_v58  ;;  %v932_v58 = vshll.u32 %v18321_v43, 16  ;;  %v919_v61 = vsel %vm707_vm0, %v914_v46, %v918_v42  ;;  %v5660_v42 = vrot.slane %v5658_v30, 1  ;;  %v18331_v43 = vld [vmem:[%s19405_s27 + $0x108] sm:$0xff]   ;;  %v5663_v46 = vrot.slane %v5661_v32, 2  ;;  %v19026_v32 = vld [vmem:[%s19405_s27 + $0x14] sm:$0xf] }
  0x6b   : > { %16497 = vmatprep.mubr.msk.bf16.mxu0 %vm1262_vm1, %v5575_v62  ;;  %v5619_v62 = vor.u32 %v5618_v48, %v5615_v47  ;;  %v5628_v2 = vor.u32 %v5627_v55, %v5624_v52  ;;  %v18332_v47 = vld [vmem:[%s19405_s27 + $0x118] sm:$0xff]   ;;  %v960_v48 = vshrl.u32 %v18327_v13, 16  ;;  %v5670_v52 = vshll.u32 %v18330_v38, 16  ;;  %v18339_v30 = vld [vmem:[%s19405_s27 + $0x128] sm:$0xff]  }
  0x6c   : > { %v934_v9 = vrot.slane %v932_v58, 1  ;;  %v968_v55 = vshrl.u32 %v18329_v34, 16  ;;  %v5664_v57 = vor.u32 %v5663_v46, %v5660_v42  ;;  %v5676_v58 = vshrl.u32 %v18332_v47, 16  ;;  %v19027_v42 = vld [vmem:[%s19405_s27 + $0x18] sm:$0xff]   ;;  %v18340_v46 = vld [vmem:[%s19405_s27 + $0x130] sm:$0xff]  }
  0x6d   : > { %v5620_v14 = vsel %vm5378_vm2, %v5610_v40, %v5619_v62  ;;  %v5629_v19 = vsel %vm5378_vm2, %v5619_v62, %v5628_v2  ;;  %v962_v62 = vor.u32 %v960_v48, %v958_v41 }
  0x6e   : > { %v938_v15 = vor.u32 %v936_v0, %v934_v9  ;;  %v935_v22 = vsel %vm707_vm0, %v930_v8, %v934_v9  ;;  %v5672_v0 = vrot.slane %v5670_v52, 2  ;;  %v970_v4 = vor.u32 %v968_v55, %v966_v60 }
  0x6f   : > { %15946 = vmatmul.mubr.msk.bf16.gmra.mrb[40].mxu1 %vm1262_vm1, %v887_v5  ;;  %v5643_v5 = vshll.u32 %v18324_v56, 16  ;;  %v972_v56 = vshll.u32 %v18331_v43, 16  ;;  %v5678_v9 = vrot.slane %v5676_v58, 1  ;;  %v967_v12 = vsel %vm707_vm0, %v962_v62, %v966_v60 }
  0x70   : > { %15949 = vmatprep.mubr.msk.bf16.mxu1 %vm1262_vm1, %v895_v10  ;;  %v5633_v10 = vrot.slane %v5631_v59, 1  ;;  %v943_v28 = vsel %vm707_vm0, %v938_v15, %v942_v17  ;;  %v5679_v59 = vshll.u32 %v18332_v47, 16  ;;  %v5685_v15 = vshrl.u32 %v18334_v1, 16 }
  0x71   : > { %v5645_v21 = vrot.slane %v5643_v5, 2  ;;  %v974_v5 = vrot.slane %v972_v56, 1  ;;  %v1008_v55 = vshrl.u32 %v18339_v30, 16  ;;  %v19028_v56 = vld [vmem:[%s19405_s27 + $0x20] sm:$0xff]  }
  0x72   : > { %16498 = vmatmul.mubr.msk.bf16.gmra.mrb[40].mxu0 %vm1262_vm1, %v5584_v3  ;;  %v5637_v23 = vor.u32 %v5636_v11, %v5633_v10  ;;  %v948_v3 = vshll.u32 %v18325_v7, 16  ;;  %v5681_v10 = vrot.slane %v5679_v59, 2  ;;  %v5687_v26 = vrot.slane %v5685_v15, 1 }
  0x73   : > { %16501 = vmatprep.mubr.msk.bf16.mxu0 %vm1262_vm1, %v5593_v27  ;;  %v952_v27 = vshrl.u32 %v18325_v7, 16  ;;  %v5646_v31 = vor.u32 %v5645_v21, %v5642_v20  ;;  %v18335_v7 = vld [vmem:[%s19405_s27 + $0x118] sm:$0xff]   ;;  %v975_v17 = vsel %vm707_vm0, %v970_v4, %v974_v5  ;;  %v1016_v59 = vshrl.u32 %v18340_v46, 16 }
  0x74   : > { %v5638_v35 = vsel %vm5378_vm2, %v5628_v2, %v5637_v23  ;;  %v988_v20 = vshll.u32 %v18335_v7, 16  ;;  %v5682_v21 = vor.u32 %v5681_v10, %v5678_v9 }
  0x75   : > { %v5647_v44 = vsel %vm5378_vm2, %v5637_v23, %v5646_v31  ;;  %v6922_v23 = vld [vmem:[%s19405_s27 + $0x10] sm:$0xc] }
  0x76   : > { %v990_v29 = vrot.slane %v988_v20, 1 }
  0x77   : > { %15950 = vmatmul.mubr.msk.bf16.gmra.mrb[44].mxu1 %vm1262_vm1, %v903_v33  ;;  %v950_v33 = vrot.slane %v948_v3, 1  ;;  %v18338_v3 = vld [vmem:[%s19405_s27 + $0x120] sm:$0xff]  }
  0x78   : > { %15953 = vmatprep.mubr.msk.bf16.mxu1 %vm1262_vm1, %v911_v37  ;;  %v5651_v37 = vrot.slane %v5649_v25, 1  ;;  %v996_v34 = vshll.u32 %v18338_v3, 16 }
  0x79   : > { %v954_v40 = vor.u32 %v952_v27, %v950_v33  ;;  %v5690_v27 = vrot.slane %v5688_v18, 2 }
  0x7a   : > { %16502 = vmatmul.mubr.msk.bf16.gmra.mrb[44].mxu0 %vm1262_vm1, %v5602_v50  ;;  %v951_v50 = vsel %vm707_vm0, %v946_v36, %v950_v33  ;;  %v5655_v53 = vor.u32 %v5654_v39, %v5651_v37  ;;  %v14523_v33 = vcombine.low %v6922_v23, %v19026_v32  ;;  %v992_v36 = vshrl.u32 %v18335_v7, 16  ;;  %v18343_v7 = vld [vmem:[%s19405_s27 + $0x148] sm:$0xff]   ;;  %v18345_v23 = vld [vmem:[%s19405_s27 + $0x158] sm:$0xff]  }
  0x7b   : > { %16505 = vmatprep.mubr.msk.bf16.mxu0 %vm1262_vm1, %v5611_v54  ;;  %v959_v54 = vsel %vm707_vm0, %v954_v40, %v958_v41  ;;  %v19633_v37 = vor.u32 %v5690_v27, %v5687_v26  ;;  %v1000_v39 = vshrl.u32 %v18338_v3, 16  ;;  %v1004_v40 = vshll.u32 %v18339_v30, 16 }
  0x7c   : > { %v5656_v2 = vsel %vm5378_vm2, %v5646_v31, %v5655_v53  ;;  %v5665_v8 = vsel %vm5378_vm2, %v5655_v53, %v5664_v57  ;;  %v6929_v41 = vrot.slane %v14523_v33, 2  ;;  %v994_v47 = vor.u32 %v992_v36, %v990_v29  ;;  %v18347_v36 = vld [vmem:[%s19405_s27 + $0x168] sm:$0xff]  }
  0x7d   : > { %23039 = vst [vmem:[#allocation3_spill] sm:$0xff] %v19633_v37  ;;  %v5692_v48 = vsel %vm5378_vm2, %v5682_v21, %v19633_v37  ;;  %v1012_v53 = vshll.u32 %v18340_v46, 16  ;;  %v1036_v18 = vshll.u32 %v18343_v7, 16  ;;  %v1040_v30 = vshrl.u32 %v18343_v7, 16  ;;  %v18350_v7 = vld [vmem:[%s19405_s27 + $0x180] sm:$0xff]  }
  0x7f   : > { %15954 = vmatmul.mubr.msk.bf16.gmra.mrb[48].mxu1 %vm1262_vm1, %v919_v61  ;;  %v18333_v61 = vld [vmem:[%s19405_s27 + $0x110] sm:$0xff]  }
  0x80   : > { %15957 = vmatprep.mubr.msk.bf16.mxu1 %vm1262_vm1, %v927_v63  ;;  %v5669_v63 = vrot.slane %v5667_v51, 1  ;;  %v980_v11 = vshll.u32 %v18333_v61, 16  ;;  %v18341_v51 = vld [vmem:[%s19405_s27 + $0x138] sm:$0xff]  }
  0x81   : > { %v1020_v60 = vshll.u32 %v18341_v51, 16 }
  0x82   : > { %16506 = vmatmul.mubr.msk.bf16.gmra.mrb[48].mxu0 %vm1262_vm1, %v5620_v14  ;;  %v5673_v13 = vor.u32 %v5672_v0, %v5669_v63  ;;  %v976_v14 = vshrl.u32 %v18331_v43, 16  ;;  %v6930_v43 = vrot.slane %v19027_v42, 2  ;;  %v1014_v63 = vrot.slane %v1012_v53, 1  ;;  %v18342_v0 = vld [vmem:[%s19405_s27 + $0x140] sm:$0xff]  }
  0x83   : > { %16509 = vmatprep.mubr.msk.bf16.mxu0 %vm1262_vm1, %v5629_v19  ;;  %v984_v19 = vshrl.u32 %v18333_v61, 16  ;;  %v19029_v61 = vld [vmem:[%s19405_s27 + $0x28] sm:$0xff]   ;;  %v1028_v9 = vshll.u32 %v18342_v0, 16 }
  0x84   : > { %v5674_v24 = vsel %vm5378_vm2, %v5664_v57, %v5673_v13  ;;  %v978_v25 = vor.u32 %v976_v14, %v974_v5  ;;  %v5683_v31 = vsel %vm5378_vm2, %v5673_v13, %v5682_v21  ;;  %v6931_v52 = vsel %vm6928_vm3, %v6929_v41, %v6930_v43  ;;  %v19662_v14 = vld [vmem:[%s22984_s1 + $0x10] sm:$0xff]  }
  0x85   : > { %v6932_v57 = vrot.slane %v19028_v56, 2  ;;  %v6934_v62 = vrot.slane %v19029_v61, 2  ;;  %v1018_v4 = vor.u32 %v1016_v59, %v1014_v63  ;;  %v1022_v5 = vrot.slane %v1020_v60, 1  ;;  %16179 = vmatprep.subr.bf16.mxu1 %v19662_v14  ;;  %v19036_v59 = vld [vmem:[%s19405_s27 + $0x60] sm:$0xff]  }
  0x86   : > { %v1024_v13 = vshrl.u32 %v18341_v51, 16  ;;  %v1030_v21 = vrot.slane %v1028_v9, 1  ;;  %v18348_v51 = vld [vmem:[%s19405_s27 + $0x170] sm:$0xff]   ;;  %v6948_v60 = vrot.slane %v19036_v59, 2 }
  0x87   : > { %15958 = vmatmul.mubr.msk.bf16.gmra.mrb[52].mxu1 %vm1262_vm1, %v935_v22  ;;  %v982_v22 = vrot.slane %v980_v11, 1  ;;  %v19030_v11 = vld [vmem:[%s19405_s27 + $0x30] sm:$0xff]   ;;  %v1023_v15 = vsel %vm707_vm0, %v1018_v4, %v1022_v5 }
  0x88   : > { %15961 = vmatprep.mubr.msk.bf16.mxu1 %vm1262_vm1, %v943_v28 }
  0x89   : > { %v986_v28 = vor.u32 %v984_v19, %v982_v22  ;;  %v19031_v19 = vld [vmem:[%s19405_s27 + $0x38] sm:$0xff]  }
  0x8a   : > { %16510 = vmatmul.mubr.msk.bf16.gmra.mrb[52].mxu0 %vm1262_vm1, %v5638_v35  ;;  %v983_v35 = vsel %vm707_vm0, %v978_v25, %v982_v22  ;;  %v6938_v20 = vrot.slane %v19031_v19, 2  ;;  %v18344_v22 = vld [vmem:[%s19405_s27 + $0x150] sm:$0xff]   ;;  %v1038_v25 = vrot.slane %v1036_v18, 1 }
  0x8b   : > { %16513 = vmatprep.mubr.msk.bf16.mxu0 %vm1262_vm1, %v5647_v44  ;;  %v991_v38 = vsel %vm707_vm0, %v986_v28, %v990_v29  ;;  %v998_v44 = vrot.slane %v996_v34, 1  ;;  %v1044_v27 = vshll.u32 %v18344_v22, 16  ;;  %v1052_v28 = vshll.u32 %v18345_v23, 16 }
  0x8c   : > { %v1048_v34 = vshrl.u32 %v18344_v22, 16 }
  0x8d   : > { %v1002_v49 = vor.u32 %v1000_v39, %v998_v44  ;;  %v1046_v42 = vrot.slane %v1044_v27, 1 }
  0x8f   : > { %15962 = vmatmul.mubr.msk.bf16.gmra.mrb[56].mxu1 %vm1262_vm1, %v951_v50  ;;  %v1006_v50 = vrot.slane %v1004_v40, 1  ;;  %v19034_v40 = vld [vmem:[%s19405_s27 + $0x50] sm:$0xff]  }
  0x90   : > { %15965 = vmatprep.mubr.msk.bf16.mxu1 %vm1262_vm1, %v959_v54  ;;  %v999_v54 = vsel %vm707_vm0, %v994_v47, %v998_v44  ;;  %v6944_v41 = vrot.slane %v19034_v40, 2  ;;  %v1042_v44 = vor.u32 %v1040_v30, %v1038_v25  ;;  %v1050_v47 = vor.u32 %v1048_v34, %v1046_v42 }
  0x91   : > { %v1007_v58 = vsel %vm707_vm0, %v1002_v49, %v1006_v50  ;;  %v1010_v1 = vor.u32 %v1008_v55, %v1006_v50  ;;  %v1068_v49 = vshll.u32 %v18347_v36, 16 }
  0x92   : > { %16514 = vmatmul.mubr.msk.bf16.gmra.mrb[56].mxu0 %vm1262_vm1, %v5656_v2  ;;  %v6933_v2 = vsel %vm6928_vm3, %v6930_v43, %v6932_v57  ;;  %v1054_v43 = vrot.slane %v1052_v28, 1  ;;  %v1047_v53 = vsel %vm707_vm0, %v1042_v44, %v1046_v42  ;;  %v18354_v44 = vld [vmem:[%s19405_s27 + $0x1a0] sm:$0xff]  }
  0x93   : > { %16517 = vmatprep.mubr.msk.bf16.mxu0 %vm1262_vm1, %v5665_v8  ;;  %v6935_v8 = vsel %vm6928_vm3, %v6932_v57, %v6934_v62  ;;  %v1015_v10 = vsel %vm707_vm0, %v1010_v1, %v1014_v63  ;;  %v19035_v57 = vld [vmem:[%s19405_s27 + $0x58] sm:$0xff]  }
  0x94   : > { %v1055_v56 = vsel %vm707_vm0, %v1050_v47, %v1054_v43 }
  0x97   : > { %15966 = vmatmul.mubr.msk.bf16.gmra.mrb[60].mxu1 %vm1262_vm1, %v967_v12  ;;  %v6936_v12 = vrot.slane %v19030_v11, 2  ;;  %v1080_v11 = vshrl.u32 %v18348_v51, 16 }
  0x98   : > { %15969 = vmatprep.mubr.msk.bf16.mxu1 %vm1262_vm1, %v975_v17  ;;  %v1032_v17 = vshrl.u32 %v18342_v0, 16 }
  0x99   : > { %v6937_v3 = vsel %vm6928_vm3, %v6934_v62, %v6936_v12  ;;  %v6939_v26 = vsel %vm6928_vm3, %v6936_v12, %v6938_v20  ;;  %v1070_v62 = vrot.slane %v1068_v49, 1 }
  0x9a   : > { %16518 = vmatmul.mubr.msk.bf16.gmra.mrb[60].mxu0 %vm1262_vm1, %v5674_v24  ;;  %v1034_v24 = vor.u32 %v1032_v17, %v1030_v21  ;;  %v19038_v17 = vld [vmem:[%s19405_s27 + $0x70] sm:$0xff]  }
  0x9b   : > { %16521 = vmatprep.mubr.msk.bf16.mxu0 %vm1262_vm1, %v5683_v31  ;;  %v19032_v31 = vld [vmem:[%s19405_s27 + $0x40] sm:$0xff]   ;;  %v6952_v18 = vrot.slane %v19038_v17, 2 }
  0x9c   : > { %v6940_v32 = vrot.slane %v19032_v31, 2  ;;  %v1039_v33 = vsel %vm707_vm0, %v1034_v24, %v1038_v25  ;;  %v18352_v25 = vld [vmem:[%s19405_s27 + $0x190] sm:$0xff]   ;;  %v19039_v31 = vld [vmem:[%s19405_s27 + $0x78] sm:$0xff]  }
  0x9d   : > { %v1112_v49 = vshrl.u32 %v18352_v25, 16 }
  0x9e   : > { %v6941_v46 = vsel %vm6928_vm3, %v6938_v20, %v6940_v32 }
  0x9f   : > { %15970 = vmatmul.mubr.msk.bf16.gmra.mrb[64].mxu1 %vm1262_vm1, %v983_v35  ;;  %v18346_v35 = vld [vmem:[%s19405_s27 + $0x160] sm:$0xff]  }
  0xa0   : > { %15973 = vmatprep.mubr.msk.bf16.mxu1 %vm1262_vm1, %v991_v38  ;;  %v19033_v38 = vld [vmem:[%s19405_s27 + $0x48] sm:$0xff]   ;;  %v1064_v55 = vshrl.u32 %v18346_v35, 16 }
  0xa1   : > { %v6942_v39 = vrot.slane %v19033_v38, 2 }
  0xa2   : > { %16522 = vmatmul.mubr.msk.bf16.gmra.mrb[64].mxu0 %vm1262_vm1, %v5692_v48  ;;  %v1060_v48 = vshll.u32 %v18346_v35, 16 }
  0xa3   : > { %16595 = vmatprep.mubr.msk.bf16.mxu0 %vm1262_vm1, %v6931_v52  ;;  %v6943_v50 = vsel %vm6928_vm3, %v6940_v32, %v6942_v39  ;;  %v18349_v52 = vld [vmem:[%s19405_s27 + $0x178] sm:$0xff]   ;;  %v6945_v0 = vsel %vm6928_vm3, %v6942_v39, %v6944_v41  ;;  %v6954_v32 = vrot.slane %v19039_v31, 2 }
  0xa4   : > { %v1062_v61 = vrot.slane %v1060_v48, 1  ;;  %v1084_v4 = vshll.u32 %v18349_v52, 16  ;;  %v1088_v28 = vshrl.u32 %v18349_v52, 16 }
  0xa6   : > { %v1066_v1 = vor.u32 %v1064_v55, %v1062_v61  ;;  %v1086_v20 = vrot.slane %v1084_v4, 1  ;;  %v1128_v4 = vshrl.u32 %v18354_v44, 16 }
  0xa7   : > { %15974 = vmatmul.mubr.msk.bf16.gmra.mrb[68].mxu1 %vm1262_vm1, %v999_v54  ;;  %v1056_v54 = vshrl.u32 %v18345_v23, 16 }
  0xa8   : > { %15977 = vmatprep.mubr.msk.bf16.mxu1 %vm1262_vm1, %v1007_v58  ;;  %v6946_v58 = vrot.slane %v19035_v57, 2  ;;  %v1071_v12 = vsel %vm707_vm0, %v1066_v1, %v1070_v62  ;;  %v1090_v38 = vor.u32 %v1088_v28, %v1086_v20 }
  0xa9   : > { %v1058_v63 = vor.u32 %v1056_v54, %v1054_v43  ;;  %v6955_v43 = vsel %vm6928_vm3, %v6952_v18, %v6954_v32 }
  0xaa   : > { %16596 = vmatmul.mubr.msk.bf16.vlgmr.msra.gmra.mrb[0].mxu0 %vm1262_vm1, %v6933_v2  ;;  %v1076_v2 = vshll.u32 %v18348_v51, 16  ;;  %v6949_v22 = vsel %vm6928_vm3, %v6946_v58, %v6948_v60  ;;  %v19041_v51 = vld [vmem:[%s19405_s27 + $0x88] sm:$0xff]  }
  0xab   : > { %16732 = vmatpush3.bf16.msra.mxu0 %v19575_v45  ;;  %16599 = vmatprep.mubr.msk.bf16.mxu0 %vm1262_vm1, %v6935_v8  ;;  %v1026_v45 = vor.u32 %v1024_v13, %v1022_v5  ;;  %v6947_v5 = vsel %vm6928_vm3, %v6944_v41, %v6946_v58  ;;  %v18351_v8 = vld [vmem:[%s19405_s27 + $0x188] sm:$0xff]   ;;  %v1063_v9 = vsel %vm707_vm0, %v1058_v63, %v1062_v61  ;;  %v1108_v41 = vshll.u32 %v18352_v25, 16  ;;  %v18356_v63 = vld [vmem:[%s19405_s27 + $0x1b0] sm:$0xff]  }
  0xac   : > { %v19037_v13 = vld [vmem:[%s19405_s27 + $0x68] sm:$0xff]   ;;  %v1078_v19 = vrot.slane %v1076_v2, 1  ;;  %v1104_v48 = vshrl.u32 %v18351_v8, 16  ;;  %v6958_v52 = vrot.slane %v19041_v51, 2 }
  0xad   : > { %v1031_v29 = vsel %vm707_vm0, %v1026_v45, %v1030_v21  ;;  %v1092_v45 = vshll.u32 %v18350_v7, 16  ;;  %v1110_v55 = vrot.slane %v1108_v41, 1  ;;  %v19045_v25 = vld [vmem:[%s19405_s27 + $0xa8] sm:$0xff]  }
  0xae   : > { %v1082_v23 = vor.u32 %v1080_v11, %v1078_v19 }
  0xaf   : > { %15978 = vmatmul.mubr.msk.bf16.gmra.mrb[72].mxu1 %vm1262_vm1, %v1015_v10  ;;  %v1072_v10 = vshrl.u32 %v18347_v36, 16  ;;  %v1094_v35 = vrot.slane %v1092_v45, 1  ;;  %v1114_v59 = vor.u32 %v1112_v49, %v1110_v55 }
  0xb0   : > { %15981 = vmatprep.mubr.msk.bf16.mxu1 %vm1262_vm1, %v1023_v15  ;;  %v6950_v15 = vrot.slane %v19037_v13, 2  ;;  %v1087_v30 = vsel %vm707_vm0, %v1082_v23, %v1086_v20 }
  0xb1   : > { %v1074_v21 = vor.u32 %v1072_v10, %v1070_v62  ;;  %v1095_v47 = vsel %vm707_vm0, %v1090_v38, %v1094_v35  ;;  %v19761_v38 = vld [vmem:[%s19405_s27 + $0x1d0] sm:$0xff]  }
  0xb2   : > { %16600 = vmatmul.mubr.msk.bf16.gmra.mrb[4].mxu0 %vm1262_vm1, %v6937_v3  ;;  %v1100_v3 = vshll.u32 %v18351_v8, 16  ;;  %v6951_v24 = vsel %vm6928_vm3, %v6948_v60, %v6950_v15  ;;  %v6953_v39 = vsel %vm6928_vm3, %v6950_v15, %v6952_v18  ;;  %v1124_v60 = vshll.u32 %v18354_v44, 16  ;;  %v19047_v44 = vld [vmem:[%s19405_s27 + $0xb8] sm:$0xff]  }
  0xb3   : > { %16603 = vmatprep.mubr.msk.bf16.mxu0 %vm1262_vm1, %v6939_v26  ;;  %v18353_v26 = vld [vmem:[%s19405_s27 + $0x198] sm:$0xff]   ;;  %v1079_v27 = vsel %vm707_vm0, %v1074_v21, %v1078_v19  ;;  %v1140_v18 = vshll.u32 %v18356_v63, 16  ;;  %v18358_v21 = vld [vmem:[%s19405_s27 + $0x1c0] sm:$0xff]  }
  0xb4   : > { %v1102_v36 = vrot.slane %v1100_v3, 1  ;;  %v1116_v42 = vshll.u32 %v18353_v26, 16  ;;  %v1120_v2 = vshrl.u32 %v18353_v26, 16  ;;  %v1126_v11 = vrot.slane %v1124_v60, 1 }
  0xb5   : > { %v1144_v3 = vshrl.u32 %v18356_v63, 16  ;;  %v6966_v26 = vrot.slane %v19045_v25, 2  ;;  %v1176_v60 = vshrl.u32 %v19761_v38, 16  ;;  %v19811_v25 = vld [vmem:[%s19405_s27 + $0x1f8] sm:$0xff]  }
  0xb6   : > { %v1106_v57 = vor.u32 %v1104_v48, %v1102_v36  ;;  %v1130_v17 = vor.u32 %v1128_v4, %v1126_v11 }
  0xb7   : > { %15982 = vmatmul.mubr.msk.bf16.gmra.mrb[76].mxu1 %vm1262_vm1, %v1031_v29  ;;  %v1096_v29 = vshrl.u32 %v18350_v7, 16  ;;  %v19043_v7 = vld [vmem:[%s19405_s27 + $0x98] sm:$0xff]  }
  0xb8   : > { %15985 = vmatprep.mubr.msk.bf16.mxu1 %vm1262_vm1, %v1039_v33  ;;  %v19040_v33 = vld [vmem:[%s19405_s27 + $0x80] sm:$0xff]   ;;  %v1111_v1 = vsel %vm707_vm0, %v1106_v57, %v1110_v55  ;;  %v6962_v8 = vrot.slane %v19043_v7, 2 }
  0xb9   : > { %v6956_v34 = vrot.slane %v19040_v33, 2  ;;  %v1098_v40 = vor.u32 %v1096_v29, %v1094_v35  ;;  %v1142_v29 = vrot.slane %v1140_v18, 1  ;;  %v19779_v57 = vld [vmem:[%s19405_s27 + $0x1e0] sm:$0xff]  }
  0xba   : > { %16604 = vmatmul.mubr.msk.bf16.gmra.mrb[8].mxu0 %vm1262_vm1, %v6941_v46  ;;  %v18355_v46 = vld [vmem:[%s19405_s27 + $0x1a8] sm:$0xff]  }
  0xbb   : > { %16607 = vmatprep.mubr.msk.bf16.mxu0 %vm1262_vm1, %v6943_v50  ;;  %v1103_v50 = vsel %vm707_vm0, %v1098_v40, %v1102_v36  ;;  %v6957_v58 = vsel %vm6928_vm3, %v6954_v32, %v6956_v34  ;;  %v1132_v61 = vshll.u32 %v18355_v46, 16  ;;  %v6959_v62 = vsel %vm6928_vm3, %v6956_v34, %v6958_v52 }
  0xbc   : > { %v1136_v45 = vshrl.u32 %v18355_v46, 16  ;;  %v1146_v33 = vor.u32 %v1144_v3, %v1142_v29  ;;  %v1156_v34 = vshll.u32 %v18358_v21, 16  ;;  %v6970_v46 = vrot.slane %v19047_v44, 2 }
  0xbe   : > { %v1158_v49 = vrot.slane %v1156_v34, 1  ;;  %v1212_v34 = vshll.u32 %v19811_v25, 16 }
  0xbf   : > { %15986 = vmatmul.mubr.msk.bf16.gmra.mrb[80].mxu1 %vm1262_vm1, %v1047_v53  ;;  %v19042_v53 = vld [vmem:[%s19405_s27 + $0x90] sm:$0xff]  }
  0xc0   : > { %15989 = vmatprep.mubr.msk.bf16.mxu1 %vm1262_vm1, %v1055_v56  ;;  %v6960_v54 = vrot.slane %v19042_v53, 2  ;;  %v1118_v56 = vrot.slane %v1116_v42, 1  ;;  %v1160_v42 = vshrl.u32 %v18358_v21, 16 }
  0xc2   : > { %16608 = vmatmul.mubr.msk.bf16.gmra.mrb[12].mxu0 %vm1262_vm1, %v6945_v0  ;;  %v18357_v0 = vld [vmem:[%s19405_s27 + $0x1b8] sm:$0xff]   ;;  %v1122_v13 = vor.u32 %v1120_v2, %v1118_v56  ;;  %v6961_v15 = vsel %vm6928_vm3, %v6958_v52, %v6960_v54  ;;  %v6963_v20 = vsel %vm6928_vm3, %v6960_v54, %v6962_v8  ;;  %v1162_v53 = vor.u32 %v1160_v42, %v1158_v49  ;;  %v19789_v2 = vld [vmem:[%s19405_s27 + $0x1e8] sm:$0xff]  }
  0xc3   : > { %16611 = vmatprep.mubr.msk.bf16.mxu0 %vm1262_vm1, %v6947_v5  ;;  %v1119_v5 = vsel %vm707_vm0, %v1114_v59, %v1118_v56  ;;  %v1148_v19 = vshll.u32 %v18357_v0, 16  ;;  %v1152_v41 = vshrl.u32 %v18357_v0, 16  ;;  %v1172_v54 = vshll.u32 %v19761_v38, 16  ;;  %v19050_v0 = vld [vmem:[%s19405_s27 + $0xd0] sm:$0xff]  }
  0xc4   : > { %v1127_v23 = vsel %vm707_vm0, %v1122_v13, %v1126_v11  ;;  %v1188_v11 = vshll.u32 %v19779_v57, 16 }
  0xc5   : > { %v1174_v4 = vrot.slane %v1172_v54, 1 }
  0xc6   : > { %v1190_v21 = vrot.slane %v1188_v11, 1 }
  0xc7   : > { %15990 = vmatmul.mubr.msk.bf16.gmra.mrb[84].mxu1 %vm1262_vm1, %v1063_v9  ;;  %v19044_v9 = vld [vmem:[%s19405_s27 + $0xa0] sm:$0xff]  }
  0xc8   : > { %15993 = vmatprep.mubr.msk.bf16.mxu1 %vm1262_vm1, %v1071_v12  ;;  %v6964_v10 = vrot.slane %v19044_v9, 2  ;;  %v1134_v12 = vrot.slane %v1132_v61, 1  ;;  %v1178_v9 = vor.u32 %v1176_v60, %v1174_v4 }
  0xca   : > { %16612 = vmatmul.mubr.msk.bf16.gmra.mrb[16].mxu0 %vm1262_vm1, %v6949_v22  ;;  %v18359_v22 = vld [vmem:[%s19405_s27 + $0x1c8] sm:$0xff]   ;;  %v1138_v31 = vor.u32 %v1136_v45, %v1134_v12  ;;  %v6965_v32 = vsel %vm6928_vm3, %v6962_v8, %v6964_v10  ;;  %v6967_v36 = vsel %vm6928_vm3, %v6964_v10, %v6966_v26 }
  0xcb   : > { %16615 = vmatprep.mubr.msk.bf16.mxu0 %vm1262_vm1, %v6951_v24  ;;  %v1135_v24 = vsel %vm707_vm0, %v1130_v17, %v1134_v12  ;;  %v1164_v35 = vshll.u32 %v18359_v22, 16  ;;  %v1168_v59 = vshrl.u32 %v18359_v22, 16  ;;  %v1196_v17 = vshll.u32 %v19789_v2, 16  ;;  %v19806_v22 = vld [vmem:[%s19405_s27 + $0x1f0] sm:$0xff]  }
  0xcc   : > { %v1143_v40 = vsel %vm707_vm0, %v1138_v31, %v1142_v29  ;;  %v1200_v29 = vshrl.u32 %v19789_v2, 16 }
  0xcf   : > { %15994 = vmatmul.mubr.msk.bf16.gmra.mrb[88].mxu1 %vm1262_vm1, %v1079_v27  ;;  %v19046_v27 = vld [vmem:[%s19405_s27 + $0xb0] sm:$0xff]  }
  0xd0   : > { %15997 = vmatprep.mubr.msk.bf16.mxu1 %vm1262_vm1, %v1087_v30  ;;  %v6968_v28 = vrot.slane %v19046_v27, 2  ;;  %v1150_v30 = vrot.slane %v1148_v19, 1  ;;  %v19051_v19 = vld [vmem:[%s19405_s27 + $0xd8] sm:$0xff]   ;;  %v1204_v27 = vshll.u32 %v19806_v22, 16 }
  0xd2   : > { %16616 = vmatmul.mubr.msk.bf16.gmra.mrb[20].mxu0 %vm1262_vm1, %v6953_v39  ;;  %v19764_v39 = vld [vmem:[%s19405_s27 + $0x1d8] sm:$0xff]   ;;  %v1154_v51 = vor.u32 %v1152_v41, %v1150_v30  ;;  %v6969_v52 = vsel %vm6928_vm3, %v6966_v26, %v6968_v28  ;;  %v6971_v56 = vsel %vm6928_vm3, %v6968_v28, %v6970_v46  ;;  %v19826_v41 = vld [vmem:[%s19405_s27 + $0x200] sm:$0xff]  }
  0xd3   : > { %16619 = vmatprep.mubr.msk.bf16.mxu0 %vm1262_vm1, %v6955_v43  ;;  %v1151_v43 = vsel %vm707_vm0, %v1146_v33, %v1150_v30  ;;  %v1180_v55 = vshll.u32 %v19764_v39, 16  ;;  %v1184_v10 = vshrl.u32 %v19764_v39, 16  ;;  %v19052_v30 = vld [vmem:[%s19405_s27 + $0xe0] sm:$0xff]   ;;  %v1208_v33 = vshrl.u32 %v19806_v22, 16 }
  0xd4   : > { %v6980_v31 = vrot.slane %v19052_v30, 2 }
  0xd7   : > { %15998 = vmatmul.mubr.msk.bf16.gmra.mrb[92].mxu1 %vm1262_vm1, %v1095_v47  ;;  %v19048_v47 = vld [vmem:[%s19405_s27 + $0xc0] sm:$0xff]  }
  0xd8   : > { %16001 = vmatprep.mubr.msk.bf16.mxu1 %vm1262_vm1, %v1103_v50  ;;  %v6972_v48 = vrot.slane %v19048_v47, 2  ;;  %v1166_v50 = vrot.slane %v1164_v35, 1  ;;  %v19053_v35 = vld [vmem:[%s19405_s27 + $0xe8] sm:$0xff]  }
  0xd9   : > { %v19831_v47 = vld [vmem:[%s19405_s27 + $0x208] sm:$0xff]  }
  0xda   : > { %16620 = vmatmul.mubr.msk.bf16.gmra.mrb[24].mxu0 %vm1262_vm1, %v6957_v58  ;;  %v1159_v58 = vsel %vm707_vm0, %v1154_v51, %v1158_v49  ;;  %v1167_v61 = vsel %vm707_vm0, %v1162_v53, %v1166_v50  ;;  %v1170_v7 = vor.u32 %v1168_v59, %v1166_v50  ;;  %v6973_v8 = vsel %vm6928_vm3, %v6970_v46, %v6972_v48 }
  0xdb   : > { %16623 = vmatprep.mubr.msk.bf16.mxu0 %vm1262_vm1, %v6959_v62  ;;  %v19049_v62 = vld [vmem:[%s19405_s27 + $0xc8] sm:$0xff]   ;;  %v1214_v46 = vrot.slane %v1212_v34, 1  ;;  %v1220_v49 = vshll.u32 %v19826_v41, 16  ;;  %v1216_v51 = vshrl.u32 %v19811_v25, 16 }
  0xdc   : > { %v6974_v63 = vrot.slane %v19049_v62, 2  ;;  %v1175_v13 = vsel %vm707_vm0, %v1170_v7, %v1174_v4  ;;  %v19851_v4 = vld [vmem:[%s19405_s27 + $0x218] sm:$0xff]  }
  0xdd   : > { %v1222_v60 = vrot.slane %v1220_v49, 1  ;;  %v1218_v62 = vor.u32 %v1216_v51, %v1214_v46 }
  0xde   : > { %v6975_v12 = vsel %vm6928_vm3, %v6972_v48, %v6974_v63 }
  0xdf   : > { %16002 = vmatmul.mubr.msk.bf16.gmra.mrb[96].mxu1 %vm1262_vm1, %v1111_v1  ;;  %v6976_v1 = vrot.slane %v19050_v0, 2 }
  0xe0   : > { %16005 = vmatprep.mubr.msk.bf16.mxu1 %vm1262_vm1, %v1119_v5  ;;  %v1182_v5 = vrot.slane %v1180_v55, 1  ;;  %v1224_v55 = vshrl.u32 %v19826_v41, 16 }
  0xe1   : > { %v6977_v45 = vsel %vm6928_vm3, %v6974_v63, %v6976_v1 }
  0xe2   : > { %16624 = vmatmul.mubr.msk.bf16.gmra.mrb[28].mxu0 %vm1262_vm1, %v6961_v15  ;;  %v1192_v15 = vshrl.u32 %v19779_v57, 16  ;;  %v1183_v18 = vsel %vm707_vm0, %v1178_v9, %v1182_v5  ;;  %v1226_v0 = vor.u32 %v1224_v55, %v1222_v60  ;;  %v1232_v9 = vshrl.u32 %v19831_v47, 16  ;;  %v19895_v55 = vld [vmem:[%s19405_s27 + $0x8] sm:$0xff]  }
  0xe3   : > { %16627 = vmatprep.mubr.msk.bf16.mxu0 %vm1262_vm1, %v6963_v20  ;;  %v6978_v20 = vrot.slane %v19051_v19, 2 }
  0xe4   : > { %v1194_v3 = vor.u32 %v1192_v15, %v1190_v21  ;;  %v1244_v15 = vshll.u32 %v19851_v4, 16 }
  0xe5   : > { %v6979_v26 = vsel %vm6928_vm3, %v6976_v1, %v6978_v20 }
  0xe7   : > { %16006 = vmatmul.mubr.msk.bf16.gmra.mrb[100].mxu1 %vm1262_vm1, %v1127_v23  ;;  %v1186_v23 = vor.u32 %v1184_v10, %v1182_v5  ;;  %v19056_v10 = vld [vmem:[%s19405_s27 + $0x100] sm:$0xff]  }
  0xe8   : > { %16009 = vmatprep.mubr.msk.bf16.mxu1 %vm1262_vm1, %v1135_v24  ;;  %v1198_v24 = vrot.slane %v1196_v17, 1  ;;  %v6988_v11 = vrot.slane %v19056_v10, 2  ;;  %v19057_v17 = vld [vmem:[%s19405_s27 + $0x108] sm:$0xff]  }
  0xe9   : > { %v1191_v28 = vsel %vm707_vm0, %v1186_v23, %v1190_v21  ;;  %v18370_v21 = vld [vmem:[%s19405_s27 + $0x220] ss:$0 sps:$4 sm:$0x11]  }
  0xea   : > { %16628 = vmatmul.mubr.msk.bf16.gmra.mrb[32].mxu0 %vm1262_vm1, %v6965_v32  ;;  %v1199_v32 = vsel %vm707_vm0, %v1194_v3, %v1198_v24  ;;  %v1202_v42 = vor.u32 %v1200_v29, %v1198_v24  ;;  %v1246_v3 = vrot.slane %v1244_v15, 1  ;;  %v19058_v29 = vld [vmem:[%s19405_s27 + $0x110] sm:$0xff]  }
  0xeb   : > { %16631 = vmatprep.mubr.msk.bf16.mxu0 %vm1262_vm1, %v6967_v36  ;;  %v6982_v36 = vrot.slane %v19053_v35, 2  ;;  %v6992_v30 = vrot.slane %v19058_v29, 2 }
  0xed   : > { %v6983_v48 = vsel %vm6928_vm3, %v6980_v31, %v6982_v36 }
  0xef   : > { %16010 = vmatmul.mubr.msk.bf16.gmra.mrb[104].mxu1 %vm1262_vm1, %v1143_v40  ;;  %v1206_v40 = vrot.slane %v1204_v27, 1  ;;  %v1248_v27 = vshrl.u32 %v19851_v4, 16 }
  0xf0   : > { %16013 = vmatprep.mubr.msk.bf16.mxu1 %vm1262_vm1, %v1151_v43  ;;  %v6981_v43 = vsel %vm6928_vm3, %v6978_v20, %v6980_v31 }
  0xf1   : > { %v1210_v44 = vor.u32 %v1208_v33, %v1206_v40  ;;  %v1207_v50 = vsel %vm707_vm0, %v1202_v42, %v1206_v40  ;;  %v1250_v34 = vor.u32 %v1248_v27, %v1246_v3  ;;  %v18372_v42 = vld [vmem:[%s19405_s27 + $0x128] sm:$0xff]   ;;  %v18382_v27 = vld [vmem:[%s19405_s27 + $0x178] sm:$0xff]  }
  0xf2   : > { %16632 = vmatmul.mubr.msk.bf16.gmra.mrb[36].mxu0 %vm1262_vm1, %v6969_v52  ;;  %v19054_v52 = vld [vmem:[%s19405_s27 + $0xf0] sm:$0xff]   ;;  %v7018_v29 = vrot.slane %v18382_v27, 2  ;;  %v20046_v27 = vld [vmem:[%s19405_s27 + $0x98] sm:$0xff]  }
  0xf3   : > { %16635 = vmatprep.mubr.msk.bf16.mxu0 %vm1262_vm1, %v6971_v56  ;;  %v6984_v53 = vrot.slane %v19054_v52, 2  ;;  %v1215_v54 = vsel %vm707_vm0, %v1210_v44, %v1214_v46  ;;  %v1228_v56 = vshll.u32 %v19831_v47, 16  ;;  %v19060_v44 = vld [vmem:[%s19405_s27 + $0x120] sm:$0xff]   ;;  %v18374_v52 = vld [vmem:[%s19405_s27 + $0x138] sm:$0xff]  }
  0xf4   : > { %v6996_v46 = vrot.slane %v19060_v44, 2 }
  0xf5   : > { %v6985_v63 = vsel %vm6928_vm3, %v6982_v36, %v6984_v53  ;;  %v1230_v1 = vrot.slane %v1228_v56, 1 }
  0xf7   : > { %16014 = vmatmul.mubr.msk.bf16.gmra.mrb[108].mxu1 %vm1262_vm1, %v1159_v58  ;;  %v19055_v58 = vld [vmem:[%s19405_s27 + $0xf8] sm:$0xff]   ;;  %v1234_v20 = vor.u32 %v1232_v9, %v1230_v1 }
  0xf8   : > { %16017 = vmatprep.mubr.msk.bf16.mxu1 %vm1262_vm1, %v1167_v61  ;;  %v6986_v59 = vrot.slane %v19055_v58, 2  ;;  %v19846_v61 = vld [vmem:[%s19405_s27 + $0x210] sm:$0xff]   ;;  %v18375_v58 = vld [vmem:[%s19405_s27 + $0x140] sm:$0xff]   ;;  %v18378_v9 = vld [vmem:[%s19405_s27 + $0x158] sm:$0xff]  }
  0xf9   : > { %v1236_v7 = vshll.u32 %v19846_v61, 16 }
  0xfa   : > { %16636 = vmatmul.mubr.msk.bf16.gmra.mrb[40].mxu0 %vm1262_vm1, %v6973_v8  ;;  %v6987_v5 = vsel %vm6928_vm3, %v6984_v53, %v6986_v59  ;;  %v1223_v8 = vsel %vm707_vm0, %v1218_v62, %v1222_v60  ;;  %v6989_v23 = vsel %vm6928_vm3, %v6986_v59, %v6988_v11  ;;  %v18376_v60 = vld [vmem:[%s19405_s27 + $0x148] sm:$0xff]   ;;  %v7004_v62 = vrot.slane %v18375_v58, 2 }
  0xfb   : > { %16639 = vmatprep.mubr.msk.bf16.mxu0 %vm1262_vm1, %v6975_v12  ;;  %v1231_v12 = vsel %vm707_vm0, %v1226_v0, %v1230_v1  ;;  %v1238_v19 = vrot.slane %v1236_v7, 1  ;;  %v19917_v0 = vld [vmem:[%s19405_s27 + $0x18] sm:$0xff]   ;;  %v19923_v1 = vld [vmem:[%s19405_s27 + $0x20] sm:$0xff]   ;;  %v18377_v7 = vld [vmem:[%s19405_s27 + $0x150] sm:$0xff]  }
  0xfc   : > { %v7008_v10 = vrot.slane %v18377_v7, 2 }
  0xff   : > { %16018 = vmatmul.mubr.msk.bf16.gmra.mrb[112].mxu1 %vm1262_vm1, %v1175_v13  ;;  %v1240_v13 = vshrl.u32 %v19846_v61, 16 }
 0x100   : > { %16021 = vmatprep.mubr.msk.bf16.mxu1 %vm1262_vm1, %v1183_v18  ;;  %v6990_v18 = vrot.slane %v19057_v17, 2  ;;  %v18379_v17 = vld [vmem:[%s19405_s27 + $0x160] sm:$0xff]  }
 0x102   : > { %16640 = vmatmul.mubr.msk.bf16.gmra.mrb[44].mxu0 %vm1262_vm1, %v6977_v45  ;;  %v1242_v45 = vor.u32 %v1240_v13, %v1238_v19  ;;  %v6991_v24 = vsel %vm6928_vm3, %v6988_v11, %v6990_v18  ;;  %v6993_v36 = vsel %vm6928_vm3, %v6990_v18, %v6992_v30  ;;  %v7010_v11 = vrot.slane %v18378_v9, 2  ;;  %v19939_v13 = vld [vmem:[%s19405_s27 + $0x30] sm:$0xff]  }
 0x103   : > { %16643 = vmatprep.mubr.msk.bf16.mxu0 %vm1262_vm1, %v6979_v26  ;;  %v1239_v26 = vsel %vm707_vm0, %v1234_v20, %v1238_v19  ;;  %v18380_v19 = vld [vmem:[%s19405_s27 + $0x168] sm:$0xff]   ;;  %v7012_v20 = vrot.slane %v18379_v17, 2 }
 0x104   : > { %v1247_v31 = vsel %vm707_vm0, %v1242_v45, %v1246_v3  ;;  %v7011_v18 = vsel %vm6928_vm3, %v7008_v10, %v7010_v11  ;;  %v19955_v45 = vld [vmem:[%s19405_s27 + $0x40] sm:$0xff]   ;;  %v20030_v17 = vld [vmem:[%s19405_s27 + $0x88] sm:$0xff]  }
 0x105   : > { %v7013_v3 = vsel %vm6928_vm3, %v7010_v11, %v7012_v20 }
 0x107   : > { %16022 = vmatmul.mubr.msk.bf16.gmra.mrb[116].mxu1 %vm1262_vm1, %v1191_v28  ;;  %v1252_v28 = vshll.u32 %v18370_v21, 16  ;;  %v7014_v21 = vrot.slane %v18380_v19, 2 }
 0x108   : > { %16025 = vmatprep.mubr.msk.bf16.mxu1 %vm1262_vm1, %v1199_v32  ;;  %v19059_v32 = vld [vmem:[%s19405_s27 + $0x118] sm:$0xff]  }
 0x109   : > { %v6994_v33 = vrot.slane %v19059_v32, 2  ;;  %v1254_v35 = vrot.slane %v1252_v28, 1 }
 0x10a   : > { %16644 = vmatmul.mubr.msk.bf16.gmra.mrb[48].mxu0 %vm1262_vm1, %v6981_v43 }
 0x10b   : > { %16647 = vmatprep.mubr.msk.bf16.mxu0 %vm1262_vm1, %v6983_v48  ;;  %v6995_v40 = vsel %vm6928_vm3, %v6992_v30, %v6994_v33  ;;  %v1255_v43 = vsel %vm707_vm0, %v1250_v34, %v1254_v35  ;;  %v6998_v48 = vrot.slane %v18372_v42, 2  ;;  %v6997_v49 = vsel %vm6928_vm3, %v6994_v33, %v6996_v46  ;;  %v19966_v30 = vld [vmem:[%s19405_s27 + $0x48] sm:$0xff]   ;;  %v18383_v33 = vld [vmem:[%s19405_s27 + $0x180] sm:$0xff]   ;;  %v19982_v42 = vld [vmem:[%s19405_s27 + $0x58] sm:$0xff]  }
 0x10c   : > { %v18384_v35 = vld [vmem:[%s19405_s27 + $0x188] sm:$0xff]  }
 0x10d   : > { %v6999_v51 = vsel %vm6928_vm3, %v6996_v46, %v6998_v48  ;;  %v18385_v46 = vld [vmem:[%s19405_s27 + $0x190] sm:$0xff]  }
 0x10f   : > { %16026 = vmatmul.mubr.msk.bf16.gmra.mrb[120].mxu1 %vm1262_vm1, %v1207_v50  ;;  %v18373_v50 = vld [vmem:[%s19405_s27 + $0x130] sm:$0xff]  }
 0x110   : > { %16029 = vmatprep.mubr.msk.bf16.mxu1 %vm1262_vm1, %v1215_v54  ;;  %v7000_v53 = vrot.slane %v18373_v50, 2  ;;  %v7002_v54 = vrot.slane %v18374_v52, 2  ;;  %v7024_v50 = vrot.slane %v18385_v46, 2  ;;  %v19998_v52 = vld [vmem:[%s19405_s27 + $0x68] sm:$0xff]  }
 0x112   : > { %16648 = vmatmul.mubr.msk.bf16.gmra.mrb[52].mxu0 %vm1262_vm1, %v6985_v63  ;;  %v7001_v56 = vsel %vm6928_vm3, %v6998_v48, %v7000_v53  ;;  %v7003_v59 = vsel %vm6928_vm3, %v7000_v53, %v7002_v54  ;;  %v7006_v63 = vrot.slane %v18376_v60, 2  ;;  %v20003_v53 = vld [vmem:[%s19405_s27 + $0x70] sm:$0xff]  }
 0x113   : > { %16651 = vmatprep.mubr.msk.bf16.mxu0 %vm1262_vm1, %v6987_v5  ;;  %v7005_v5 = vsel %vm6928_vm3, %v7002_v54, %v7004_v62 }
 0x114   : > { %v7009_v15 = vsel %vm6928_vm3, %v7006_v63, %v7008_v10  ;;  %v18390_v10 = vld [vmem:[%s19405_s27 + $0x1b8] sm:$0xff]  }
 0x117   : > { %16030 = vmatmul.mubr.msk.bf16.gmra.mrb[124].mxu1 %vm1262_vm1, %v1223_v8  ;;  %v7007_v8 = vsel %vm6928_vm3, %v7004_v62, %v7006_v63  ;;  %v20014_v63 = vld [vmem:[%s19405_s27 + $0x78] sm:$0xff]  }
 0x118   : > { %16033 = vmatprep.mubr.msk.bf16.mxu1 %vm1262_vm1, %v1231_v12  ;;  %v19934_v12 = vld [vmem:[%s19405_s27 + $0x28] sm:$0xff]  }
 0x11a   : > { %16652 = vmatmul.mubr.msk.bf16.gmra.mrb[56].mxu0 %vm1262_vm1, %v6989_v23  ;;  %v19950_v23 = vld [vmem:[%s19405_s27 + $0x38] sm:$0xff]  }
 0x11b   : > { %16655 = vmatprep.mubr.msk.bf16.mxu0 %vm1262_vm1, %v6991_v24  ;;  %v18381_v24 = vld [vmem:[%s19405_s27 + $0x170] sm:$0xff]  }
 0x11c   : > { %v7016_v28 = vrot.slane %v18381_v24, 2 }
 0x11e   : > { %v7017_v32 = vsel %vm6928_vm3, %v7014_v21, %v7016_v28  ;;  %v7019_v34 = vsel %vm6928_vm3, %v7016_v28, %v7018_v29  ;;  %v20051_v28 = vld [vmem:[%s19405_s27 + $0xa0] sm:$0xff]  }
 0x11f   : > { %16034 = vmatmul.mubr.msk.bf16.gmra.mrb[128].mxu1 %vm1262_vm1, %v1239_v26  ;;  %v7015_v26 = vsel %vm6928_vm3, %v7012_v20, %v7014_v21  ;;  %v18391_v20 = vld [vmem:[%s19405_s27 + $0x1c0] sm:$0xff]  }
 0x120   : > { %16037 = vmatprep.mubr.msk.bf16.mxu1 %vm1262_vm1, %v1247_v31  ;;  %v19971_v31 = vld [vmem:[%s19405_s27 + $0x50] sm:$0xff]   ;;  %v7036_v24 = vrot.slane %v18391_v20, 2 }
 0x122   : > { %16656 = vmatmul.mubr.msk.bf16.gmra.mrb[60].mxu0 %vm1262_vm1, %v6993_v36  ;;  %v7020_v36 = vrot.slane %v18383_v33, 2 }
 0x123   : > { %16659 = vmatprep.mubr.msk.bf16.mxu0 %vm1262_vm1, %v6995_v40  ;;  %v7022_v40 = vrot.slane %v18384_v35, 2 }
 0x124   : > { %v7021_v44 = vsel %vm6928_vm3, %v7018_v29, %v7020_v36 }
 0x125   : > { %v7023_v48 = vsel %vm6928_vm3, %v7020_v36, %v7022_v40  ;;  %v7025_v54 = vsel %vm6928_vm3, %v7022_v40, %v7024_v50  ;;  %v20062_v40 = vld [vmem:[%s19405_s27 + $0xa8] sm:$0xff]  }
 0x127   : > { %16038 = vmatmul.mubr.msk.bf16.gmra.mrb[132].mxu1 %vm1262_vm1, %v1255_v43  ;;  %v19987_v43 = vld [vmem:[%s19405_s27 + $0x60] sm:$0xff]  }
 0x128   : > { %16043 = vmatprep.mubr.msk.bf16.mxu1 %vm1262_vm1, %v19410_v6  ;;  %v19901_v6 = vld [vmem:[%s19405_s27 + $0x10] sm:$0xff]  }
 0x12a   : > { %16660 = vmatmul.mubr.msk.bf16.gmra.mrb[64].mxu0 %vm1262_vm1, %v6997_v49  ;;  %v18386_v49 = vld [vmem:[%s19405_s27 + $0x198] sm:$0xff]  }
 0x12b   : > { %16663 = vmatprep.mubr.msk.bf16.mxu0 %vm1262_vm1, %v6999_v51  ;;  %v7026_v51 = vrot.slane %v18386_v49, 2 }
 0x12d   : > { %v7027_v58 = vsel %vm6928_vm3, %v7024_v50, %v7026_v51  ;;  %v18396_v50 = vld [vmem:[%s19405_s27 + $0x1e8] sm:$0xff]  }
 0x12f   : > { %16044 = vmatmul.mubr.msk.bf16.vlgmr.msra.gmra.mrb[0].mxu1 %vm1262_vm1, %v19895_v55 }
 0x130   : > { %16180 = vmatpush3.bf16.msra.mxu1 %v19662_v14  ;;  %16047 = vmatprep.mubr.msk.bf16.mxu1 %vm1262_vm1, %v19901_v6  ;;  %v19914_v14 = vld [vmem:[%s22984_s1 + $0x38] sm:$0xff]  }
 0x131   : > { %16869 = vmatprep.subr.bf16.mxu0 %v19914_v14 }
 0x132   : > { %16664 = vmatmul.mubr.msk.bf16.gmra.mrb[68].mxu0 %vm1262_vm1, %v7001_v56  ;;  %v18387_v56 = vld [vmem:[%s19405_s27 + $0x1a0] sm:$0xff]  }
 0x133   : > { %16667 = vmatprep.mubr.msk.bf16.mxu0 %vm1262_vm1, %v7003_v59  ;;  %v18388_v59 = vld [vmem:[%s19405_s27 + $0x1a8] sm:$0xff]   ;;  %v7028_v60 = vrot.slane %v18387_v56, 2  ;;  %v20078_v56 = vld [vmem:[%s19405_s27 + $0xb8] sm:$0xff]  }
 0x134   : > { %v7030_v62 = vrot.slane %v18388_v59, 2 }
 0x135   : > { %v7029_v7 = vsel %vm6928_vm3, %v7026_v51, %v7028_v60 }
 0x136   : > { %v7031_v9 = vsel %vm6928_vm3, %v7028_v60, %v7030_v62  ;;  %v18397_v60 = vld [vmem:[%s19405_s27 + $0x1f0] sm:$0xff]  }
 0x137   : > { %16048 = vmatmul.mubr.msk.bf16.gmra.mrb[4].mxu1 %vm1262_vm1, %v19917_v0 }
 0x138   : > { %16051 = vmatprep.mubr.msk.bf16.mxu1 %vm1262_vm1, %v19923_v1 }
 0x13a   : > { %16668 = vmatmul.mubr.msk.bf16.gmra.mrb[72].mxu0 %vm1262_vm1, %v7005_v5  ;;  %v20019_v5 = vld [vmem:[%s19405_s27 + $0x80] sm:$0xff]  }
 0x13b   : > { %16671 = vmatprep.mubr.msk.bf16.mxu0 %vm1262_vm1, %v7007_v8  ;;  %v18389_v8 = vld [vmem:[%s19405_s27 + $0x1b0] sm:$0xff]  }
 0x13c   : > { %v7032_v11 = vrot.slane %v18389_v8, 2  ;;  %v7048_v8 = vrot.slane %v18397_v60, 2 }
 0x13e   : > { %v7033_v19 = vsel %vm6928_vm3, %v7030_v62, %v7032_v11 }
 0x13f   : > { %16052 = vmatmul.mubr.msk.bf16.gmra.mrb[8].mxu1 %vm1262_vm1, %v19934_v12 }
 0x140   : > { %16055 = vmatprep.mubr.msk.bf16.mxu1 %vm1262_vm1, %v19939_v13 }
 0x142   : > { %16672 = vmatmul.mubr.msk.bf16.gmra.mrb[76].mxu0 %vm1262_vm1, %v7009_v15  ;;  %v7034_v15 = vrot.slane %v18390_v10, 2  ;;  %v20094_v10 = vld [vmem:[%s19405_s27 + $0xc8] sm:$0xff]  }
 0x143   : > { %16675 = vmatprep.mubr.msk.bf16.mxu0 %vm1262_vm1, %v7011_v18  ;;  %v20035_v18 = vld [vmem:[%s19405_s27 + $0x90] sm:$0xff]  }
 0x144   : > { %v7035_v21 = vsel %vm6928_vm3, %v7032_v11, %v7034_v15  ;;  %v7037_v29 = vsel %vm6928_vm3, %v7034_v15, %v7036_v24  ;;  %v20099_v11 = vld [vmem:[%s19405_s27 + $0xd0] sm:$0xff]  }
 0x147   : > { %16056 = vmatmul.mubr.msk.bf16.gmra.mrb[12].mxu1 %vm1262_vm1, %v19950_v23 }
 0x148   : > { %16059 = vmatprep.mubr.msk.bf16.mxu1 %vm1262_vm1, %v19955_v45 }
 0x14a   : > { %16676 = vmatmul.mubr.msk.bf16.gmra.mrb[80].mxu0 %vm1262_vm1, %v7013_v3  ;;  %v18392_v3 = vld [vmem:[%s19405_s27 + $0x1c8] sm:$0xff]  }
 0x14b   : > { %16679 = vmatprep.mubr.msk.bf16.mxu0 %vm1262_vm1, %v7015_v26  ;;  %v7038_v26 = vrot.slane %v18392_v3, 2 }
 0x14d   : > { %v7039_v33 = vsel %vm6928_vm3, %v7036_v24, %v7038_v26 }
 0x14f   : > { %16060 = vmatmul.mubr.msk.bf16.gmra.mrb[16].mxu1 %vm1262_vm1, %v19966_v30 }
 0x150   : > { %16063 = vmatprep.mubr.msk.bf16.mxu1 %vm1262_vm1, %v19971_v31 }
 0x152   : > { %16680 = vmatmul.mubr.msk.bf16.gmra.mrb[84].mxu0 %vm1262_vm1, %v7017_v32  ;;  %v18393_v32 = vld [vmem:[%s19405_s27 + $0x1d0] sm:$0xff]  }
 0x153   : > { %16683 = vmatprep.mubr.msk.bf16.mxu0 %vm1262_vm1, %v7019_v34  ;;  %v18394_v34 = vld [vmem:[%s19405_s27 + $0x1d8] sm:$0xff]   ;;  %v7040_v35 = vrot.slane %v18393_v32, 2 }
 0x154   : > { %v7042_v36 = vrot.slane %v18394_v34, 2 }
 0x155   : > { %v7041_v46 = vsel %vm6928_vm3, %v7038_v26, %v7040_v35  ;;  %v20110_v26 = vld [vmem:[%s19405_s27 + $0xd8] sm:$0xff]  }
 0x156   : > { %v7043_v49 = vsel %vm6928_vm3, %v7040_v35, %v7042_v36  ;;  %v18402_v35 = vld [vmem:[%s19405_s27 + $0x218] sm:$0xff]  }
 0x157   : > { %16064 = vmatmul.mubr.msk.bf16.gmra.mrb[20].mxu1 %vm1262_vm1, %v19982_v42 }
 0x158   : > { %16067 = vmatprep.mubr.msk.bf16.mxu1 %vm1262_vm1, %v19987_v43 }
 0x15a   : > { %16684 = vmatmul.mubr.msk.bf16.gmra.mrb[88].mxu0 %vm1262_vm1, %v7021_v44  ;;  %v20067_v44 = vld [vmem:[%s19405_s27 + $0xb0] sm:$0xff]  }
 0x15b   : > { %16687 = vmatprep.mubr.msk.bf16.mxu0 %vm1262_vm1, %v7023_v48  ;;  %v18395_v48 = vld [vmem:[%s19405_s27 + $0x1e0] sm:$0xff]  }
 0x15c   : > { %v7044_v51 = vrot.slane %v18395_v48, 2  ;;  %v20126_v48 = vld [vmem:[%s19405_s27 + $0xe8] sm:$0xff]  }
 0x15e   : > { %v7045_v59 = vsel %vm6928_vm3, %v7042_v36, %v7044_v51 }
 0x15f   : > { %16068 = vmatmul.mubr.msk.bf16.gmra.mrb[24].mxu1 %vm1262_vm1, %v19998_v52 }
 0x160   : > { %16071 = vmatprep.mubr.msk.bf16.mxu1 %vm1262_vm1, %v20003_v53 }
 0x162   : > { %16688 = vmatmul.mubr.msk.bf16.gmra.mrb[92].mxu0 %vm1262_vm1, %v7025_v54  ;;  %v7046_v54 = vrot.slane %v18396_v50, 2 }
 0x163   : > { %16691 = vmatprep.mubr.msk.bf16.mxu0 %vm1262_vm1, %v7027_v58  ;;  %v20083_v58 = vld [vmem:[%s19405_s27 + $0xc0] sm:$0xff]  }
 0x164   : > { %v7047_v62 = vsel %vm6928_vm3, %v7044_v51, %v7046_v54  ;;  %v7049_v15 = vsel %vm6928_vm3, %v7046_v54, %v7048_v8  ;;  %v18403_v51 = vld [vmem:[%s19405_s27 + $0x220] sm:$0xff]  }
 0x165   : > { %v7060_v60 = vrot.slane %v18403_v51, 2 }
 0x167   : > { %16072 = vmatmul.mubr.msk.bf16.gmra.mrb[28].mxu1 %vm1262_vm1, %v20014_v63 }
 0x168   : > { %16075 = vmatprep.mubr.msk.bf16.mxu1 %vm1262_vm1, %v20019_v5 }
 0x16a   : > { %16692 = vmatmul.mubr.msk.bf16.gmra.mrb[96].mxu0 %vm1262_vm1, %v7029_v7  ;;  %v18398_v7 = vld [vmem:[%s19405_s27 + $0x1f8] sm:$0xff]  }
 0x16b   : > { %16695 = vmatprep.mubr.msk.bf16.mxu0 %vm1262_vm1, %v7031_v9  ;;  %v7050_v9 = vrot.slane %v18398_v7, 2  ;;  %v20142_v7 = vld [vmem:[%s19405_s27 + $0xf8] sm:$0xff]  }
 0x16d   : > { %v7051_v20 = vsel %vm6928_vm3, %v7048_v8, %v7050_v9  ;;  %v7989_v8 = vld [vmem:[%s19405_s27 + $0x20] sm:$0xc] }
 0x16f   : > { %16076 = vmatmul.mubr.msk.bf16.gmra.mrb[32].mxu1 %vm1262_vm1, %v20030_v17 }
 0x170   : > { %16079 = vmatprep.mubr.msk.bf16.mxu1 %vm1262_vm1, %v20035_v18 }
 0x172   : > { %16696 = vmatmul.mubr.msk.bf16.gmra.mrb[100].mxu0 %vm1262_vm1, %v7033_v19  ;;  %v18399_v19 = vld [vmem:[%s19405_s27 + $0x200] sm:$0xff]  }
 0x173   : > { %16699 = vmatprep.mubr.msk.bf16.mxu0 %vm1262_vm1, %v7035_v21  ;;  %v18400_v21 = vld [vmem:[%s19405_s27 + $0x208] sm:$0xff]   ;;  %v7052_v3 = vrot.slane %v18399_v19, 2 }
 0x174   : > { %v7054_v24 = vrot.slane %v18400_v21, 2 }
 0x175   : > { %v7053_v32 = vsel %vm6928_vm3, %v7050_v9, %v7052_v3  ;;  %v7990_v9 = vld [vmem:[%s19405_s27 + $0x24] sm:$0xf] }
 0x176   : > { %v7055_v34 = vsel %vm6928_vm3, %v7052_v3, %v7054_v24  ;;  %v20156_v3 = vcombine.low %v7989_v8, %v7990_v9  ;;  %v20188_v8 = vld [vmem:[%s19405_s27 + $0x118] sm:$0xff]  }
 0x177   : > { %16080 = vmatmul.mubr.msk.bf16.gmra.mrb[36].mxu1 %vm1262_vm1, %v20046_v27 }
 0x178   : > { %16083 = vmatprep.mubr.msk.bf16.mxu1 %vm1262_vm1, %v20051_v28 }
 0x17a   : > { %16700 = vmatmul.mubr.msk.bf16.gmra.mrb[104].mxu0 %vm1262_vm1, %v7037_v29  ;;  %v20115_v29 = vld [vmem:[%s19405_s27 + $0xe0] sm:$0xff]  }
 0x17b   : > { %16703 = vmatprep.mubr.msk.bf16.mxu0 %vm1262_vm1, %v7039_v33  ;;  %v18401_v33 = vld [vmem:[%s19405_s27 + $0x210] sm:$0xff]  }
 0x17c   : > { %v7056_v36 = vrot.slane %v18401_v33, 2  ;;  %v8471_v33 = vrot.slane %v20156_v3, 2 }
 0x17e   : > { %v7057_v50 = vsel %vm6928_vm3, %v7054_v24, %v7056_v36  ;;  %v20159_v24 = vld [vmem:[%s19405_s27 + $0x28] sm:$0xff]  }
 0x17f   : > { %16084 = vmatmul.mubr.msk.bf16.gmra.mrb[40].mxu1 %vm1262_vm1, %v20062_v40 }
 0x180   : > { %16087 = vmatprep.mubr.msk.bf16.mxu1 %vm1262_vm1, %v20067_v44 }
 0x182   : > { %16704 = vmatmul.mubr.msk.bf16.gmra.mrb[108].mxu0 %vm1262_vm1, %v7041_v46  ;;  %v7058_v46 = vrot.slane %v18402_v35, 2  ;;  %v20166_v35 = vld [vmem:[%s19405_s27 + $0x108] sm:$0xff]  }
 0x183   : > { %16707 = vmatprep.mubr.msk.bf16.mxu0 %vm1262_vm1, %v7043_v49  ;;  %v20131_v49 = vld [vmem:[%s19405_s27 + $0xf0] sm:$0xff]  }
 0x184   : > { %v7059_v54 = vsel %vm6928_vm3, %v7056_v36, %v7058_v46  ;;  %v7061_v19 = vsel %vm6928_vm3, %v7058_v46, %v7060_v60  ;;  %v20171_v36 = vld [vmem:[%s19405_s27 + $0x110] sm:$0xff]  }
 0x187   : > { %16088 = vmatmul.mubr.msk.bf16.gmra.mrb[44].mxu1 %vm1262_vm1, %v20078_v56 }
 0x188   : > { %16091 = vmatprep.mubr.msk.bf16.mxu1 %vm1262_vm1, %v20083_v58 }
 0x18a   : > { %16708 = vmatmul.mubr.msk.bf16.gmra.mrb[112].mxu0 %vm1262_vm1, %v7045_v59  ;;  %v18404_v59 = vld [vmem:[%s19405_s27 + $0x228] sm:$0xff]  }
 0x18b   : > { %16711 = vmatprep.mubr.msk.bf16.mxu0 %vm1262_vm1, %v7047_v62  ;;  %v7062_v62 = vrot.slane %v18404_v59, 2 }
 0x18d   : > { %v7063_v21 = vsel %vm6928_vm3, %v7060_v60, %v7062_v62 }
 0x18f   : > { %16092 = vmatmul.mubr.msk.bf16.gmra.mrb[48].mxu1 %vm1262_vm1, %v20094_v10 }
 0x190   : > { %16095 = vmatprep.mubr.msk.bf16.mxu1 %vm1262_vm1, %v20099_v11 }
 0x192   : > { %16712 = vmatmul.mubr.msk.bf16.gmra.mrb[116].mxu0 %vm1262_vm1, %v7049_v15  ;;  %v20149_v15 = vld [vmem:[%s19405_s27 + $0x100] sm:$0xff]  }
 0x193   : > { %16715 = vmatprep.mubr.msk.bf16.mxu0 %vm1262_vm1, %v7051_v20  ;;  %v18405_v20 = vld [vmem:[%s19405_s27 + $0x230] ss:$0 sps:$4 sm:$0x33]  }
 0x197   : > { %16096 = vmatmul.mubr.msk.bf16.gmra.mrb[52].mxu1 %vm1262_vm1, %v20110_v26 }
 0x198   : > { %16099 = vmatprep.mubr.msk.bf16.mxu1 %vm1262_vm1, %v20115_v29 }
 0x19a   : > { %16716 = vmatmul.mubr.msk.bf16.gmra.mrb[120].mxu0 %vm1262_vm1, %v7053_v32  ;;  %v7064_v32 = vrot.slane %v18405_v20, 2 }
 0x19b   : > { %16719 = vmatprep.mubr.msk.bf16.mxu0 %vm1262_vm1, %v7055_v34  ;;  %v8472_v34 = vrot.slane %v20159_v24, 2 }
 0x19c   : > { %v7065_v46 = vsel %vm6928_vm3, %v7062_v62, %v7064_v32  ;;  %v20193_v62 = vld [vmem:[%s19405_s27 + $0x120] sm:$0xff]   ;;  %v20209_v32 = vld [vmem:[%s22984_s1 + $0x18] sm:$0xff]  }
 0x19d   : > { %v8473_v51 = vsel %vm6928_vm3, %v8471_v33, %v8472_v34  ;;  %16317 = vmatprep.subr.bf16.mxu1 %v20209_v32 }
 0x19f   : > { %16100 = vmatmul.mubr.msk.bf16.gmra.mrb[56].mxu1 %vm1262_vm1, %v20126_v48 }
 0x1a0   : > { %16103 = vmatprep.mubr.msk.bf16.mxu1 %vm1262_vm1, %v20131_v49 }
 0x1a2   : > { %16720 = vmatmul.mubr.msk.bf16.gmra.mrb[124].mxu0 %vm1262_vm1, %v7057_v50  ;;  %v20177_v50 = vld [vmem:[%s19405_s27 + $0x30] sm:$0xff]  }
 0x1a3   : > { %16723 = vmatprep.mubr.msk.bf16.mxu0 %vm1262_vm1, %v7059_v54  ;;  %v20181_v54 = vld [vmem:[%s19405_s27 + $0x38] sm:$0xff]   ;;  %v8474_v59 = vrot.slane %v20177_v50, 2 }
 0x1a4   : > { %v8476_v60 = vrot.slane %v20181_v54, 2 }
 0x1a5   : > { %v8475_v9 = vsel %vm6928_vm3, %v8472_v34, %v8474_v59 }
 0x1a6   : > { %v8477_v20 = vsel %vm6928_vm3, %v8474_v59, %v8476_v60  ;;  %v20228_v59 = vld [vmem:[%s19405_s27 + $0x50] sm:$0xff]  }
 0x1a7   : > { %16104 = vmatmul.mubr.msk.bf16.gmra.mrb[60].mxu1 %vm1262_vm1, %v20142_v7  ;;  %23043 = vst [vmem:[#allocation7_spill] sm:$0xff] %v20228_v59  ;;  %v8482_v37 = vrot.slane %v20228_v59, 2  ;;  %v20254_v59 = vld [vmem:[%s19405_s27 + $0x68] sm:$0xff]  }
 0x1a8   : > { %16107 = vmatprep.mubr.msk.bf16.mxu1 %vm1262_vm1, %v20149_v15  ;;  %23048 = vst [vmem:[#allocation12_spill] sm:$0xff] %v20254_v59 }
 0x1aa   : > { %16724 = vmatmul.mubr.msk.bf16.gmra.mrb[128].mxu0 %vm1262_vm1, %v7061_v19  ;;  %v20199_v19 = vld [vmem:[%s19405_s27 + $0x40] sm:$0xff]  }
 0x1ab   : > { %16727 = vmatprep.mubr.msk.bf16.mxu0 %vm1262_vm1, %v7063_v21  ;;  %23040 = vst [vmem:[#allocation4_spill] sm:$0xff] %v20199_v19  ;;  %v20203_v21 = vld [vmem:[%s19405_s27 + $0x48] sm:$0xff]   ;;  %v8478_v33 = vrot.slane %v20199_v19, 2  ;;  %v18430_v19 = vld [vmem:[%s19405_s27 + $0xd8] sm:$0xff]  }
 0x1ac   : > { %23041 = vst [vmem:[#allocation5_spill] sm:$0xff] %v20203_v21  ;;  %v8480_v34 = vrot.slane %v20203_v21, 2  ;;  %v20387_v21 = vld [vmem:[%s19405_s27 + $0x1a8] sm:$0xff]  }
 0x1ad   : > { %23071 = vst [vmem:[#allocation35_spill] sm:$0xff] %v20387_v21 }
 0x1af   : > { %16108 = vmatmul.mubr.msk.bf16.gmra.mrb[64].mxu1 %vm1262_vm1, %v20166_v35 }
 0x1b0   : > { %16111 = vmatprep.mubr.msk.bf16.mxu1 %vm1262_vm1, %v20171_v36 }
 0x1b2   : > { %16728 = vmatmul.mubr.msk.bf16.gmra.mrb[132].mxu0 %vm1262_vm1, %v7065_v46  ;;  %v20217_v46 = vld [vmem:[%s19405_s27 + $0x128] sm:$0xff]  }
 0x1b3   : > { %16733 = vmatprep.mubr.msk.bf16.mxu0 %vm1262_vm1, %v8473_v51  ;;  %v20222_v51 = vld [vmem:[%s19405_s27 + $0x130] sm:$0xff]  }
 0x1b4   : > { %23042 = vst [vmem:[#allocation6_spill] sm:$0xff] %v20222_v51 }
 0x1b7   : > { %16112 = vmatmul.mubr.msk.bf16.gmra.mrb[68].mxu1 %vm1262_vm1, %v20188_v8 }
 0x1b8   : > { %16115 = vmatprep.mubr.msk.bf16.mxu1 %vm1262_vm1, %v20193_v62 }
 0x1ba   : > { %16734 = vmatmul.mubr.msk.bf16.vlgmr.msra.gmra.mrb[0].mxu0 %vm1262_vm1, %v8475_v9  ;;  %v8481_v9 = vsel %vm6928_vm3, %v8478_v33, %v8480_v34 }
 0x1bb   : > { %16870 = vmatpush3.bf16.msra.mxu0 %v19914_v14  ;;  %16737 = vmatprep.mubr.msk.bf16.mxu0 %vm1262_vm1, %v8477_v20  ;;  %v8479_v14 = vsel %vm6928_vm3, %v8476_v60, %v8478_v33  ;;  %v20232_v20 = vld [vmem:[%s19405_s27 + $0x58] sm:$0xff]   ;;  %v20244_v60 = vld [vmem:[%s19405_s27 + $0x140] sm:$0xff]   ;;  %v8483_v33 = vsel %vm6928_vm3, %v8480_v34, %v8482_v37  ;;  %v20266_v34 = vld [vmem:[%s19405_s27 + $0x150] sm:$0xff]  }
 0x1bc   : > { %23044 = vst [vmem:[#allocation8_spill] sm:$0xff] %v20232_v20  ;;  %v8484_v16 = vrot.slane %v20232_v20, 2  ;;  %23046 = vst [vmem:[#allocation10_spill] sm:$0xff] %v20244_v60 }
 0x1bd   : > { %23050 = vst [vmem:[#allocation14_spill] sm:$0xff] %v20266_v34 }
 0x1bf   : > { %16116 = vmatmul.mubr.msk.bf16.gmra.mrb[72].mxu1 %vm1262_vm1, %v20217_v46 }
 0x1c0   : > { %16119 = vmatprep.mubr.msk.bf16.mxu1 %vm1262_vm1, %v20222_v51  ;;  %v20239_v51 = vld [vmem:[%s19405_s27 + $0x138] sm:$0xff]  }
 0x1c1   : > { %23045 = vst [vmem:[#allocation9_spill] sm:$0xff] %v20239_v51 }
 0x1c2   : > { %16738 = vmatmul.mubr.msk.bf16.gmra.mrb[4].mxu0 %vm1262_vm1, %v8479_v14  ;;  %v20250_v14 = vld [vmem:[%s19405_s27 + $0x60] sm:$0xff]  }
 0x1c3   : > { %16741 = vmatprep.mubr.msk.bf16.mxu0 %vm1262_vm1, %v8481_v9  ;;  %23047 = vst [vmem:[#allocation11_spill] sm:$0xff] %v20250_v14  ;;  %v8485_v9 = vsel %vm6928_vm3, %v8482_v37, %v8484_v16  ;;  %v8486_v20 = vrot.slane %v20250_v14, 2  ;;  %v20276_v14 = vld [vmem:[%s19405_s27 + $0x78] sm:$0xff]  }
 0x1c4   : > { %23052 = vst [vmem:[#allocation16_spill] sm:$0xff] %v20276_v14 }
 0x1c5   : > { %v8487_v37 = vsel %vm6928_vm3, %v8484_v16, %v8486_v20  ;;  %v20288_v16 = vld [vmem:[%s19405_s27 + $0x160] sm:$0xff]  }
 0x1c6   : > { %23054 = vst [vmem:[#allocation18_spill] sm:$0xff] %v20288_v16 }
 0x1c7   : > { %16120 = vmatmul.mubr.msk.bf16.gmra.mrb[76].mxu1 %vm1262_vm1, %v20239_v51  ;;  %v8488_v51 = vrot.slane %v20254_v59, 2 }
 0x1c8   : > { %16123 = vmatprep.mubr.msk.bf16.mxu1 %vm1262_vm1, %v20244_v60  ;;  %v20261_v60 = vld [vmem:[%s19405_s27 + $0x148] sm:$0xff]  }
 0x1c9   : > { %23049 = vst [vmem:[#allocation13_spill] sm:$0xff] %v20261_v60 }
 0x1ca   : > { %16742 = vmatmul.mubr.msk.bf16.gmra.mrb[8].mxu0 %vm1262_vm1, %v8483_v33  ;;  %v20272_v33 = vld [vmem:[%s19405_s27 + $0x70] sm:$0xff]  }
 0x1cb   : > { %16745 = vmatprep.mubr.msk.bf16.mxu0 %vm1262_vm1, %v8485_v9  ;;  %23051 = vst [vmem:[#allocation15_spill] sm:$0xff] %v20272_v33  ;;  %v8489_v9 = vsel %vm6928_vm3, %v8486_v20, %v8488_v51  ;;  %v8490_v59 = vrot.slane %v20272_v33, 2  ;;  %v20298_v33 = vld [vmem:[%s19405_s27 + $0x88] sm:$0xff]  }
 0x1cc   : > { %23056 = vst [vmem:[#allocation20_spill] sm:$0xff] %v20298_v33 }
 0x1cd   : > { %v8491_v20 = vsel %vm6928_vm3, %v8488_v51, %v8490_v59  ;;  %v20310_v51 = vld [vmem:[%s19405_s27 + $0x170] sm:$0xff]  }
 0x1ce   : > { %23058 = vst [vmem:[#allocation22_spill] sm:$0xff] %v20310_v51 }
 0x1cf   : > { %16124 = vmatmul.mubr.msk.bf16.gmra.mrb[80].mxu1 %vm1262_vm1, %v20261_v60  ;;  %v8492_v60 = vrot.slane %v20276_v14, 2 }
 0x1d0   : > { %16127 = vmatprep.mubr.msk.bf16.mxu1 %vm1262_vm1, %v20266_v34  ;;  %v20283_v34 = vld [vmem:[%s19405_s27 + $0x158] sm:$0xff]  }
 0x1d1   : > { %23053 = vst [vmem:[#allocation17_spill] sm:$0xff] %v20283_v34 }
 0x1d2   : > { %16746 = vmatmul.mubr.msk.bf16.gmra.mrb[12].mxu0 %vm1262_vm1, %v8487_v37  ;;  %v20294_v37 = vld [vmem:[%s19405_s27 + $0x80] sm:$0xff]  }
 0x1d3   : > { %16749 = vmatprep.mubr.msk.bf16.mxu0 %vm1262_vm1, %v8489_v9  ;;  %23055 = vst [vmem:[#allocation19_spill] sm:$0xff] %v20294_v37  ;;  %v8493_v9 = vsel %vm6928_vm3, %v8490_v59, %v8492_v60  ;;  %v8494_v14 = vrot.slane %v20294_v37, 2  ;;  %v20320_v37 = vld [vmem:[%s19405_s27 + $0x98] sm:$0xff]  }
 0x1d4   : > { %23060 = vst [vmem:[#allocation24_spill] sm:$0xff] %v20320_v37 }
 0x1d5   : > { %v8495_v59 = vsel %vm6928_vm3, %v8492_v60, %v8494_v14  ;;  %v20332_v60 = vld [vmem:[%s19405_s27 + $0x180] sm:$0xff]  }
 0x1d6   : > { %23062 = vst [vmem:[#allocation26_spill] sm:$0xff] %v20332_v60 }
 0x1d7   : > { %16128 = vmatmul.mubr.msk.bf16.gmra.mrb[84].mxu1 %vm1262_vm1, %v20283_v34  ;;  %v8496_v34 = vrot.slane %v20298_v33, 2 }
 0x1d8   : > { %16131 = vmatprep.mubr.msk.bf16.mxu1 %vm1262_vm1, %v20288_v16  ;;  %v20305_v16 = vld [vmem:[%s19405_s27 + $0x168] sm:$0xff]  }
 0x1d9   : > { %23057 = vst [vmem:[#allocation21_spill] sm:$0xff] %v20305_v16 }
 0x1da   : > { %16750 = vmatmul.mubr.msk.bf16.gmra.mrb[16].mxu0 %vm1262_vm1, %v8491_v20  ;;  %v20316_v20 = vld [vmem:[%s19405_s27 + $0x90] sm:$0xff]  }
 0x1db   : > { %16753 = vmatprep.mubr.msk.bf16.mxu0 %vm1262_vm1, %v8493_v9  ;;  %23059 = vst [vmem:[#allocation23_spill] sm:$0xff] %v20316_v20  ;;  %v8497_v9 = vsel %vm6928_vm3, %v8494_v14, %v8496_v34  ;;  %v8498_v33 = vrot.slane %v20316_v20, 2  ;;  %v20342_v20 = vld [vmem:[%s19405_s27 + $0xa8] sm:$0xff]  }
 0x1dc   : > { %23064 = vst [vmem:[#allocation28_spill] sm:$0xff] %v20342_v20 }
 0x1dd   : > { %v8499_v14 = vsel %vm6928_vm3, %v8496_v34, %v8498_v33  ;;  %v20354_v34 = vld [vmem:[%s19405_s27 + $0x190] sm:$0xff]  }
 0x1de   : > { %23066 = vst [vmem:[#allocation30_spill] sm:$0xff] %v20354_v34 }
 0x1df   : > { %16132 = vmatmul.mubr.msk.bf16.gmra.mrb[88].mxu1 %vm1262_vm1, %v20305_v16  ;;  %v8500_v16 = vrot.slane %v20320_v37, 2 }
 0x1e0   : > { %16135 = vmatprep.mubr.msk.bf16.mxu1 %vm1262_vm1, %v20310_v51  ;;  %v20327_v51 = vld [vmem:[%s19405_s27 + $0x178] sm:$0xff]  }
 0x1e1   : > { %23061 = vst [vmem:[#allocation25_spill] sm:$0xff] %v20327_v51 }
 0x1e2   : > { %16754 = vmatmul.mubr.msk.bf16.gmra.mrb[20].mxu0 %vm1262_vm1, %v8495_v59  ;;  %v20338_v59 = vld [vmem:[%s19405_s27 + $0xa0] sm:$0xff]  }
 0x1e3   : > { %16757 = vmatprep.mubr.msk.bf16.mxu0 %vm1262_vm1, %v8497_v9  ;;  %23063 = vst [vmem:[#allocation27_spill] sm:$0xff] %v20338_v59  ;;  %v8501_v9 = vsel %vm6928_vm3, %v8498_v33, %v8500_v16  ;;  %v8502_v37 = vrot.slane %v20338_v59, 2  ;;  %v20364_v59 = vld [vmem:[%s19405_s27 + $0xb8] sm:$0xff]  }
 0x1e4   : > { %23068 = vst [vmem:[#allocation32_spill] sm:$0xff] %v20364_v59 }
 0x1e5   : > { %v8503_v33 = vsel %vm6928_vm3, %v8500_v16, %v8502_v37  ;;  %v20376_v16 = vld [vmem:[%s19405_s27 + $0x1a0] sm:$0xff]  }
 0x1e6   : > { %23070 = vst [vmem:[#allocation34_spill] sm:$0xff] %v20376_v16 }
 0x1e7   : > { %16136 = vmatmul.mubr.msk.bf16.gmra.mrb[92].mxu1 %vm1262_vm1, %v20327_v51  ;;  %v8504_v51 = vrot.slane %v20342_v20, 2 }
 0x1e8   : > { %16139 = vmatprep.mubr.msk.bf16.mxu1 %vm1262_vm1, %v20332_v60  ;;  %v20349_v60 = vld [vmem:[%s19405_s27 + $0x188] sm:$0xff]  }
 0x1e9   : > { %23065 = vst [vmem:[#allocation29_spill] sm:$0xff] %v20349_v60 }
 0x1ea   : > { %16758 = vmatmul.mubr.msk.bf16.gmra.mrb[24].mxu0 %vm1262_vm1, %v8499_v14  ;;  %v20360_v14 = vld [vmem:[%s19405_s27 + $0xb0] sm:$0xff]  }
 0x1eb   : > { %16761 = vmatprep.mubr.msk.bf16.mxu0 %vm1262_vm1, %v8501_v9  ;;  %23067 = vst [vmem:[#allocation31_spill] sm:$0xff] %v20360_v14  ;;  %v8505_v9 = vsel %vm6928_vm3, %v8502_v37, %v8504_v51  ;;  %v8506_v20 = vrot.slane %v20360_v14, 2  ;;  %v18428_v14 = vld [vmem:[%s19405_s27 + $0xc8] sm:$0xff]  }
 0x1ed   : > { %v8507_v37 = vsel %vm6928_vm3, %v8504_v51, %v8506_v20 }
 0x1ef   : > { %16140 = vmatmul.mubr.msk.bf16.gmra.mrb[96].mxu1 %vm1262_vm1, %v20349_v60  ;;  %v8508_v60 = vrot.slane %v20364_v59, 2 }
 0x1f0   : > { %16143 = vmatprep.mubr.msk.bf16.mxu1 %vm1262_vm1, %v20354_v34  ;;  %v20371_v34 = vld [vmem:[%s19405_s27 + $0x198] sm:$0xff]  }
 0x1f1   : > { %23069 = vst [vmem:[#allocation33_spill] sm:$0xff] %v20371_v34 }
 0x1f2   : > { %16762 = vmatmul.mubr.msk.bf16.gmra.mrb[28].mxu0 %vm1262_vm1, %v8503_v33  ;;  %v18427_v33 = vld [vmem:[%s19405_s27 + $0xc0] sm:$0xff]  }
 0x1f3   : > { %16765 = vmatprep.mubr.msk.bf16.mxu0 %vm1262_vm1, %v8505_v9  ;;  %v8509_v9 = vsel %vm6928_vm3, %v8506_v20, %v8508_v60  ;;  %v8510_v59 = vrot.slane %v18427_v33, 2  ;;  %v18429_v20 = vld [vmem:[%s19405_s27 + $0xd0] sm:$0xff]   ;;  %v8516_v33 = vrot.slane %v18430_v19, 2 }
 0x1f5   : > { %v8511_v51 = vsel %vm6928_vm3, %v8508_v60, %v8510_v59 }
 0x1f7   : > { %16144 = vmatmul.mubr.msk.bf16.gmra.mrb[100].mxu1 %vm1262_vm1, %v20371_v34  ;;  %v8512_v34 = vrot.slane %v18428_v14, 2  ;;  %v8514_v14 = vrot.slane %v18429_v20, 2 }
 0x1f8   : > { %16147 = vmatprep.mubr.msk.bf16.mxu1 %vm1262_vm1, %v20376_v16  ;;  %v19114_v16 = vld [vmem:[%s19405_s27 + $0x1b0] sm:$0xff]  }
 0x1f9   : > { %v8515_v60 = vsel %vm6928_vm3, %v8512_v34, %v8514_v14 }
 0x1fa   : > { %16766 = vmatmul.mubr.msk.bf16.gmra.mrb[32].mxu0 %vm1262_vm1, %v8507_v37  ;;  %v8513_v37 = vsel %vm6928_vm3, %v8510_v59, %v8512_v34  ;;  %v18431_v59 = vld [vmem:[%s19405_s27 + $0xe0] sm:$0xff]  }
 0x1fb   : > { %16769 = vmatprep.mubr.msk.bf16.mxu0 %vm1262_vm1, %v8509_v9  ;;  %v20400_v9 = vld [vmem:[%s19405_s27 + $0x1b8] sm:$0xff]   ;;  %v8518_v19 = vrot.slane %v18431_v59, 2 }
 0x1fc   : > { %23072 = vst [vmem:[#allocation36_spill] sm:$0xff] %v20400_v9 }
 0x1fd   : > { %v8519_v34 = vsel %vm6928_vm3, %v8516_v33, %v8518_v19 }
 0x1ff   : > { %16148 = vmatmul.mubr.msk.bf16.gmra.mrb[104].mxu1 %vm1262_vm1, %v20387_v21  ;;  %v18432_v21 = vld [vmem:[%s19405_s27 + $0xe8] sm:$0xff]  }
 0x200   : > { %16151 = vmatprep.mubr.msk.bf16.mxu1 %vm1262_vm1, %v19114_v16  ;;  %v19116_v16 = vld [vmem:[%s19405_s27 + $0x1c0] sm:$0xff]   ;;  %v8520_v20 = vrot.slane %v18432_v21, 2 }
 0x202   : > { %16770 = vmatmul.mubr.msk.bf16.gmra.mrb[36].mxu0 %vm1262_vm1, %v8511_v51  ;;  %v8517_v51 = vsel %vm6928_vm3, %v8514_v14, %v8516_v33  ;;  %v8521_v14 = vsel %vm6928_vm3, %v8518_v19, %v8520_v20  ;;  %v18435_v33 = vld [vmem:[%s19405_s27 + $0x100] sm:$0xff]  }
 0x203   : > { %16773 = vmatprep.mubr.msk.bf16.mxu0 %vm1262_vm1, %v8513_v37  ;;  %v19117_v37 = vld [vmem:[%s19405_s27 + $0x1c8] sm:$0xff]   ;;  %v8526_v19 = vrot.slane %v18435_v33, 2  ;;  %v19118_v33 = vld [vmem:[%s19405_s27 + $0x4] sm:$0xf] }
 0x207   : > { %16152 = vmatmul.mubr.msk.bf16.gmra.mrb[108].mxu1 %vm1262_vm1, %v20400_v9  ;;  %v18434_v9 = vld [vmem:[%s19405_s27 + $0xf8] sm:$0xff]  }
 0x208   : > { %16155 = vmatprep.mubr.msk.bf16.mxu1 %vm1262_vm1, %v19116_v16  ;;  %v18433_v16 = vld [vmem:[%s19405_s27 + $0xf0] sm:$0xff]   ;;  %v8524_v21 = vrot.slane %v18434_v9, 2 }
 0x20a   : > { %16774 = vmatmul.mubr.msk.bf16.gmra.mrb[40].mxu0 %vm1262_vm1, %v8515_v60  ;;  %v8522_v60 = vrot.slane %v18433_v16, 2 }
 0x20b   : > { %16777 = vmatprep.mubr.msk.bf16.mxu0 %vm1262_vm1, %v8517_v51  ;;  %v18436_v51 = vld [vmem:[%s19405_s27 + $0x108] sm:$0xff]  }
 0x20c   : > { %v8525_v59 = vsel %vm6928_vm3, %v8522_v60, %v8524_v21  ;;  %v8528_v9 = vrot.slane %v18436_v51, 2  ;;  %v18441_v51 = vld [vmem:[%s19405_s27 + $0x130] sm:$0xff]  }
 0x20f   : > { %16156 = vmatmul.mubr.msk.bf16.gmra.mrb[112].mxu1 %vm1262_vm1, %v19117_v37  ;;  %v18438_v37 = vld [vmem:[%s19405_s27 + $0x118] sm:$0xff]  }
 0x210   : > { %16159 = vmatprep.mubr.msk.bf16.mxu1 %vm1262_vm1, %v19761_v38  ;;  %v8523_v38 = vsel %vm6928_vm3, %v8520_v20, %v8522_v60  ;;  %v8529_v20 = vsel %vm6928_vm3, %v8526_v19, %v8528_v9  ;;  %v8532_v16 = vrot.slane %v18438_v37, 2  ;;  %v18440_v60 = vld [vmem:[%s19405_s27 + $0x128] sm:$0xff]  }
 0x212   : > { %16778 = vmatmul.mubr.msk.bf16.gmra.mrb[44].mxu0 %vm1262_vm1, %v8519_v34 }
 0x213   : > { %16781 = vmatprep.mubr.msk.bf16.mxu0 %vm1262_vm1, %v8521_v14 }
 0x217   : > { %16160 = vmatmul.mubr.msk.bf16.gmra.mrb[116].mxu1 %vm1262_vm1, %v19764_v39  ;;  %v8527_v39 = vsel %vm6928_vm3, %v8524_v21, %v8526_v19  ;;  %v2763_v21 = vld [vmem:[%s19405_s27] sm:$0xe] }
 0x218   : > { %16163 = vmatprep.mubr.msk.bf16.mxu1 %vm1262_vm1, %v19779_v57  ;;  %v18437_v57 = vld [vmem:[%s19405_s27 + $0x110] sm:$0xff]  }
 0x219   : > { %v8530_v34 = vrot.slane %v18437_v57, 2  ;;  %v18444_v57 = vld [vmem:[%s19405_s27 + $0x138] sm:$0xff]  }
 0x21a   : > { %16782 = vmatmul.mubr.msk.bf16.gmra.mrb[48].mxu0 %vm1262_vm1, %v8523_v38 }
 0x21b   : > { %16785 = vmatprep.mubr.msk.bf16.mxu0 %vm1262_vm1, %v8525_v59  ;;  %v8533_v14 = vsel %vm6928_vm3, %v8530_v34, %v8532_v16  ;;  %v14245_v59 = vcombine.low %v2763_v21, %v19118_v33  ;;  %v2779_v33 = vrot.slane %v19934_v12, 1  ;;  %v20498_v12 = vld [vmem:[%s22984_s1 + $0x40] sm:$0xff]  }
 0x21c   : > { %17007 = vmatprep.subr.bf16.mxu0 %v20498_v12 }
 0x21d   : > { %v2770_v19 = vrot.slane %v14245_v59, 1  ;;  %v19119_v59 = vld [vmem:[%s22984_s1 + $0x20] sm:$0xff]  }
 0x21f   : > { %16164 = vmatmul.mubr.msk.bf16.gmra.mrb[120].mxu1 %vm1262_vm1, %v19789_v2  ;;  %v8531_v2 = vsel %vm6928_vm3, %v8528_v9, %v8530_v34  ;;  %v2771_v9 = vrot.slane %v19895_v55, 1  ;;  %v2773_v55 = vrot.slane %v19901_v6, 1  ;;  %v18445_v34 = vld [vmem:[%s19405_s27 + $0x140] sm:$0xff]  }
 0x220   : > { %16167 = vmatprep.mubr.msk.bf16.mxu1 %vm1262_vm1, %v19806_v22  ;;  %v18439_v22 = vld [vmem:[%s19405_s27 + $0x120] sm:$0xff]  }
 0x221   : > { %v8534_v38 = vrot.slane %v18439_v22, 2  ;;  %v18446_v22 = vld [vmem:[%s19405_s27 + $0x148] sm:$0xff]  }
 0x222   : > { %16786 = vmatmul.mubr.msk.bf16.gmra.mrb[52].mxu0 %vm1262_vm1, %v8527_v39  ;;  %v8544_v6 = vrot.slane %v18446_v22, 2  ;;  %v2787_v22 = vrot.slane %v19966_v30, 1  ;;  %v2789_v30 = vrot.slane %v19971_v31, 1 }
 0x223   : > { %16789 = vmatprep.mubr.msk.bf16.mxu0 %vm1262_vm1, %v8529_v20  ;;  %v2772_v20 = vsel %vm2769_vm4, %v2770_v19, %v2771_v9 }
 0x227   : > { %16168 = vmatmul.mubr.msk.bf16.gmra.mrb[124].mxu1 %vm1262_vm1, %v19811_v25  ;;  %v8536_v25 = vrot.slane %v18440_v60, 2 }
 0x228   : > { %16171 = vmatprep.mubr.msk.bf16.mxu1 %vm1262_vm1, %v19826_v41  ;;  %v8535_v41 = vsel %vm6928_vm3, %v8532_v16, %v8534_v38  ;;  %v2775_v16 = vrot.slane %v19917_v0, 1  ;;  %v2777_v0 = vrot.slane %v19923_v1, 1 }
 0x229   : > { %v8537_v39 = vsel %vm6928_vm3, %v8534_v38, %v8536_v25  ;;  %v18447_v38 = vld [vmem:[%s19405_s27 + $0x150] sm:$0xff]  }
 0x22a   : > { %16790 = vmatmul.mubr.msk.bf16.gmra.mrb[56].mxu0 %vm1262_vm1, %v8531_v2  ;;  %v2776_v60 = vsel %vm2769_vm4, %v2773_v55, %v2775_v16  ;;  %v8546_v1 = vrot.slane %v18447_v38, 2  ;;  %v18453_v38 = vld [vmem:[%s19405_s27 + $0x180] sm:$0xff]  }
 0x22b   : > { %16793 = vmatprep.mubr.msk.bf16.mxu0 %vm1262_vm1, %v8533_v14  ;;  %v2774_v14 = vsel %vm2769_vm4, %v2771_v9, %v2773_v55  ;;  %v2781_v9 = vrot.slane %v19939_v13, 1 }
 0x22d   : > { %v2782_v55 = vsel %vm2769_vm4, %v2779_v33, %v2781_v9 }
 0x22f   : > { %16172 = vmatmul.mubr.msk.bf16.gmra.mrb[128].mxu1 %vm1262_vm1, %v19831_v47  ;;  %v8538_v47 = vrot.slane %v18441_v51, 2  ;;  %v2780_v51 = vsel %vm2769_vm4, %v2777_v0, %v2779_v33  ;;  %v2791_v33 = vrot.slane %v19982_v42, 1  ;;  %v2793_v42 = vrot.slane %v19987_v43, 1 }
 0x230   : > { %16175 = vmatprep.mubr.msk.bf16.mxu1 %vm1262_vm1, %v19846_v61  ;;  %v8540_v61 = vrot.slane %v18444_v57, 2  ;;  %v18449_v57 = vld [vmem:[%s19405_s27 + $0x160] sm:$0xff]  }
 0x231   : > { %v8539_v37 = vsel %vm6928_vm3, %v8536_v25, %v8538_v47 }
 0x232   : > { %16794 = vmatmul.mubr.msk.bf16.gmra.mrb[60].mxu0 %vm1262_vm1, %v8535_v41  ;;  %v8541_v2 = vsel %vm6928_vm3, %v8538_v47, %v8540_v61  ;;  %v18448_v41 = vld [vmem:[%s19405_s27 + $0x158] sm:$0xff]   ;;  %v2783_v47 = vrot.slane %v19950_v23, 1  ;;  %v2785_v23 = vrot.slane %v19955_v45, 1 }
 0x233   : > { %16797 = vmatprep.mubr.msk.bf16.mxu0 %vm1262_vm1, %v8537_v39  ;;  %v8548_v19 = vrot.slane %v18448_v41, 2  ;;  %v8547_v39 = vsel %vm6928_vm3, %v8544_v6, %v8546_v1  ;;  %v2790_v41 = vsel %vm2769_vm4, %v2787_v22, %v2789_v30 }
 0x237   : > { %16176 = vmatmul.mubr.msk.bf16.gmra.mrb[132].mxu1 %vm1262_vm1, %v19851_v4  ;;  %v8542_v4 = vrot.slane %v18445_v34, 2  ;;  %v2784_v34 = vsel %vm2769_vm4, %v2781_v9, %v2783_v47  ;;  %v2795_v9 = vrot.slane %v19998_v52, 1  ;;  %v2797_v52 = vrot.slane %v20003_v53, 1 }
 0x238   : > { %16181 = vmatprep.mubr.msk.bf16.mxu1 %vm1262_vm1, %v2772_v20  ;;  %v8549_v20 = vsel %vm6928_vm3, %v8546_v1, %v8548_v19  ;;  %v2792_v1 = vsel %vm2769_vm4, %v2789_v30, %v2791_v33 }
 0x239   : > { %v8543_v21 = vsel %vm6928_vm3, %v8540_v61, %v8542_v4  ;;  %v8545_v25 = vsel %vm6928_vm3, %v8542_v4, %v8544_v6  ;;  %v18450_v61 = vld [vmem:[%s19405_s27 + $0x168] sm:$0xff]   ;;  %v18452_v4 = vld [vmem:[%s19405_s27 + $0x178] sm:$0xff]  }
 0x23a   : > { %16798 = vmatmul.mubr.msk.bf16.gmra.mrb[64].mxu0 %vm1262_vm1, %v8539_v37  ;;  %v8550_v37 = vrot.slane %v18449_v57, 2  ;;  %v8552_v13 = vrot.slane %v18450_v61, 2  ;;  %v8556_v45 = vrot.slane %v18452_v4, 2  ;;  %v18456_v57 = vld [vmem:[%s19405_s27 + $0x198] sm:$0xff]   ;;  %v2796_v61 = vsel %vm2769_vm4, %v2793_v42, %v2795_v9  ;;  %v18459_v4 = vld [vmem:[%s19405_s27 + $0x1b0] sm:$0xff]  }
 0x23b   : > { %16801 = vmatprep.mubr.msk.bf16.mxu0 %vm1262_vm1, %v8541_v2  ;;  %v18451_v2 = vld [vmem:[%s19405_s27 + $0x170] sm:$0xff]   ;;  %v8564_v43 = vrot.slane %v18456_v57, 2  ;;  %v8570_v30 = vrot.slane %v18459_v4, 2 }
 0x23c   : > { %v8554_v6 = vrot.slane %v18451_v2, 2 }
 0x23f   : > { %16182 = vmatmul.mubr.msk.bf16.vlgmr.msra.gmra.mrb[0].mxu1 %vm1262_vm1, %v2774_v14  ;;  %v8553_v14 = vsel %vm6928_vm3, %v8550_v37, %v8552_v13 }
 0x240   : > { %16318 = vmatpush3.bf16.msra.mxu1 %v20209_v32  ;;  %16185 = vmatprep.mubr.msk.bf16.mxu1 %vm1262_vm1, %v2776_v60  ;;  %v2778_v32 = vsel %vm2769_vm4, %v2775_v16, %v2777_v0  ;;  %v8551_v16 = vsel %vm6928_vm3, %v8548_v19, %v8550_v37  ;;  %v2786_v60 = vsel %vm2769_vm4, %v2783_v47, %v2785_v23  ;;  %v18455_v19 = vld [vmem:[%s19405_s27 + $0x190] sm:$0xff]   ;;  %v18457_v37 = vld [vmem:[%s19405_s27 + $0x1a0] sm:$0xff]  }
 0x241   : > { %17145 = vmatprep.subr.bf16.mxu1 %v19119_v59  ;;  %v2788_v0 = vsel %vm2769_vm4, %v2785_v23, %v2787_v22  ;;  %v8557_v59 = vsel %vm6928_vm3, %v8554_v6, %v8556_v45  ;;  %v2794_v47 = vsel %vm2769_vm4, %v2791_v33, %v2793_v42  ;;  %v18458_v23 = vld [vmem:[%s19405_s27 + $0x1a8] sm:$0xff]   ;;  %v8566_v2 = vrot.slane %v18457_v37, 2  ;;  %v18461_v33 = vld [vmem:[%s19405_s27 + $0x1c0] sm:$0xff]  }
 0x242   : > { %16802 = vmatmul.mubr.msk.bf16.gmra.mrb[68].mxu0 %vm1262_vm1, %v8543_v21  ;;  %v8555_v21 = vsel %vm6928_vm3, %v8552_v13, %v8554_v6  ;;  %v8568_v53 = vrot.slane %v18458_v23, 2  ;;  %v18466_v37 = vld [vmem:[%s19405_s27 + $0x1e8] sm:$0xff]  }
 0x243   : > { %16805 = vmatprep.mubr.msk.bf16.mxu0 %vm1262_vm1, %v8545_v25  ;;  %v18454_v25 = vld [vmem:[%s19405_s27 + $0x188] sm:$0xff]  }
 0x244   : > { %v8560_v31 = vrot.slane %v18454_v25, 2  ;;  %v8569_v6 = vsel %vm6928_vm3, %v8566_v2, %v8568_v53 }
 0x247   : > { %16186 = vmatmul.mubr.msk.bf16.gmra.mrb[4].mxu1 %vm1262_vm1, %v2778_v32  ;;  %v8558_v32 = vrot.slane %v18453_v38, 2  ;;  %v8571_v38 = vsel %vm6928_vm3, %v8568_v53, %v8570_v30 }
 0x248   : > { %16189 = vmatprep.mubr.msk.bf16.mxu1 %vm1262_vm1, %v2780_v51 }
 0x249   : > { %v8559_v51 = vsel %vm6928_vm3, %v8556_v45, %v8558_v32 }
 0x24a   : > { %16806 = vmatmul.mubr.msk.bf16.gmra.mrb[72].mxu0 %vm1262_vm1, %v8547_v39  ;;  %v8561_v39 = vsel %vm6928_vm3, %v8558_v32, %v8560_v31 }
 0x24b   : > { %16809 = vmatprep.mubr.msk.bf16.mxu0 %vm1262_vm1, %v8549_v20  ;;  %v8562_v20 = vrot.slane %v18455_v19, 2  ;;  %v2811_v19 = vrot.slane %v20062_v40, 1  ;;  %v2813_v40 = vrot.slane %v20067_v44, 1  ;;  %v8584_v44 = vrot.slane %v18466_v37, 2 }
 0x24d   : > { %v8565_v13 = vsel %vm6928_vm3, %v8562_v20, %v8564_v43 }
 0x24f   : > { %16190 = vmatmul.mubr.msk.bf16.gmra.mrb[8].mxu1 %vm1262_vm1, %v2782_v55  ;;  %v8563_v55 = vsel %vm6928_vm3, %v8560_v31, %v8562_v20 }
 0x250   : > { %16193 = vmatprep.mubr.msk.bf16.mxu1 %vm1262_vm1, %v2784_v34  ;;  %v2799_v34 = vrot.slane %v20014_v63, 1  ;;  %v2801_v63 = vrot.slane %v20019_v5, 1 }
 0x252   : > { %16810 = vmatmul.mubr.msk.bf16.gmra.mrb[76].mxu0 %vm1262_vm1, %v8551_v16  ;;  %v2798_v16 = vsel %vm2769_vm4, %v2795_v9, %v2797_v52  ;;  %v2800_v22 = vsel %vm2769_vm4, %v2797_v52, %v2799_v34  ;;  %v2802_v45 = vsel %vm2769_vm4, %v2799_v34, %v2801_v63  ;;  %v2815_v52 = vrot.slane %v20078_v56, 1 }
 0x253   : > { %16813 = vmatprep.mubr.msk.bf16.mxu0 %vm1262_vm1, %v8553_v14  ;;  %v8567_v14 = vsel %vm6928_vm3, %v8564_v43, %v8566_v2  ;;  %v18465_v43 = vld [vmem:[%s19405_s27 + $0x1e0] sm:$0xff]   ;;  %v2814_v34 = vsel %vm2769_vm4, %v2811_v19, %v2813_v40  ;;  %v2817_v56 = vrot.slane %v20083_v58, 1  ;;  %v18467_v2 = vld [vmem:[%s19405_s27 + $0x1f0] sm:$0xff]  }
 0x254   : > { %v2816_v23 = vsel %vm2769_vm4, %v2813_v40, %v2815_v52  ;;  %v8586_v4 = vrot.slane %v18467_v2, 2  ;;  %v2835_v40 = vrot.slane %v20166_v35, 1  ;;  %v9547_v35 = vshrl.u32 %v20159_v24, 16  ;;  %v18477_v2 = vld [vmem:[%s19405_s27 + $0x240] ss:$0 sps:$4 sm:$0x33]  }
 0x257   : > { %16194 = vmatmul.mubr.msk.bf16.gmra.mrb[12].mxu1 %vm1262_vm1, %v2786_v60  ;;  %v2803_v60 = vrot.slane %v20030_v17, 1  ;;  %v2805_v17 = vrot.slane %v20035_v18, 1 }
 0x258   : > { %16197 = vmatprep.mubr.msk.bf16.mxu1 %vm1262_vm1, %v2788_v0  ;;  %v18460_v0 = vld [vmem:[%s19405_s27 + $0x1b8] sm:$0xff]  }
 0x259   : > { %v8572_v5 = vrot.slane %v18460_v0, 2  ;;  %v2806_v32 = vsel %vm2769_vm4, %v2803_v60, %v2805_v17  ;;  %v18469_v0 = vld [vmem:[%s19405_s27 + $0x200] sm:$0xff]  }
 0x25a   : > { %16814 = vmatmul.mubr.msk.bf16.gmra.mrb[80].mxu0 %vm1262_vm1, %v8555_v21  ;;  %v2804_v21 = vsel %vm2769_vm4, %v2801_v63, %v2803_v60  ;;  %v18468_v63 = vld [vmem:[%s19405_s27 + $0x1f8] sm:$0xff]  }
 0x25b   : > { %16817 = vmatprep.mubr.msk.bf16.mxu0 %vm1262_vm1, %v8557_v59  ;;  %v2807_v59 = vrot.slane %v20046_v27, 1  ;;  %v8573_v25 = vsel %vm6928_vm3, %v8570_v30, %v8572_v5  ;;  %v2809_v27 = vrot.slane %v20051_v28, 1  ;;  %v8588_v58 = vrot.slane %v18468_v63, 2 }
 0x25d   : > { %v2808_v31 = vsel %vm2769_vm4, %v2805_v17, %v2807_v59  ;;  %v2810_v57 = vsel %vm2769_vm4, %v2807_v59, %v2809_v27  ;;  %v2812_v20 = vsel %vm2769_vm4, %v2809_v27, %v2811_v19  ;;  %v8589_v30 = vsel %vm6928_vm3, %v8586_v4, %v8588_v58  ;;  %v18471_v59 = vld [vmem:[%s19405_s27 + $0x210] sm:$0xff]  }
 0x25e   : > { %v8590_v17 = vrot.slane %v18469_v0, 2  ;;  %v9568_v0 = vshll.u32 %v20181_v54, 16 }
 0x25f   : > { %16198 = vmatmul.mubr.msk.bf16.gmra.mrb[16].mxu1 %vm1262_vm1, %v2790_v41  ;;  %v18462_v41 = vld [vmem:[%s19405_s27 + $0x1c8] sm:$0xff]  }
 0x260   : > { %16201 = vmatprep.mubr.msk.bf16.mxu1 %vm1262_vm1, %v2792_v1  ;;  %v8574_v1 = vrot.slane %v18461_v33, 2  ;;  %v8576_v18 = vrot.slane %v18462_v41, 2  ;;  %v8591_v33 = vsel %vm6928_vm3, %v8588_v58, %v8590_v17  ;;  %v9559_v58 = vshll.u32 %v20177_v50, 16 }
 0x262   : > { %16818 = vmatmul.mubr.msk.bf16.gmra.mrb[84].mxu0 %vm1262_vm1, %v8559_v51  ;;  %v8575_v42 = vsel %vm6928_vm3, %v8572_v5, %v8574_v1  ;;  %v18463_v51 = vld [vmem:[%s19405_s27 + $0x1d0] sm:$0xff]   ;;  %v8577_v9 = vsel %vm6928_vm3, %v8574_v1, %v8576_v18 }
 0x263   : > { %16821 = vmatprep.mubr.msk.bf16.mxu0 %vm1262_vm1, %v8561_v39  ;;  %v18464_v39 = vld [vmem:[%s19405_s27 + $0x1d8] sm:$0xff]  }
 0x264   : > { %v8580_v28 = vrot.slane %v18464_v39, 2 }
 0x267   : > { %16202 = vmatmul.mubr.msk.bf16.gmra.mrb[20].mxu1 %vm1262_vm1, %v2794_v47  ;;  %v8578_v47 = vrot.slane %v18463_v51, 2  ;;  %v2831_v51 = vrot.slane %v20142_v7, 1 }
 0x268   : > { %16205 = vmatprep.mubr.msk.bf16.mxu1 %vm1262_vm1, %v2796_v61 }
 0x269   : > { %v8579_v61 = vsel %vm6928_vm3, %v8576_v18, %v8578_v47 }
 0x26a   : > { %16822 = vmatmul.mubr.msk.bf16.gmra.mrb[88].mxu0 %vm1262_vm1, %v8563_v55  ;;  %v8581_v55 = vsel %vm6928_vm3, %v8578_v47, %v8580_v28 }
 0x26b   : > { %16825 = vmatprep.mubr.msk.bf16.mxu0 %vm1262_vm1, %v8565_v13  ;;  %v8582_v13 = vrot.slane %v18465_v43, 2 }
 0x26d   : > { %v8585_v53 = vsel %vm6928_vm3, %v8582_v13, %v8584_v44 }
 0x26f   : > { %16206 = vmatmul.mubr.msk.bf16.gmra.mrb[24].mxu1 %vm1262_vm1, %v2798_v16  ;;  %v8583_v16 = vsel %vm6928_vm3, %v8580_v28, %v8582_v13  ;;  %v18475_v28 = vld [vmem:[%s19405_s27 + $0x230] sm:$0xff]   ;;  %v9542_v13 = vshll.u32 %v20156_v3, 16 }
 0x270   : > { %16209 = vmatprep.mubr.msk.bf16.mxu1 %vm1262_vm1, %v2800_v22  ;;  %v2819_v22 = vrot.slane %v20094_v10, 1  ;;  %v2821_v10 = vrot.slane %v20099_v11, 1 }
 0x271   : > { %v9544_v63 = vrot.slane %v9542_v13, 3  ;;  %v23080_v13 = vld [vmem:[#allocation13_spill] sm:$0xff] }
 0x272   : > { %16826 = vmatmul.mubr.msk.bf16.gmra.mrb[92].mxu0 %vm1262_vm1, %v8567_v14  ;;  %v2818_v14 = vsel %vm2769_vm4, %v2815_v52, %v2817_v56  ;;  %v2820_v60 = vsel %vm2769_vm4, %v2817_v56, %v2819_v22  ;;  %v2822_v5 = vsel %vm2769_vm4, %v2819_v22, %v2821_v10  ;;  %v2839_v22 = vrot.slane %v20188_v8, 1 }
 0x273   : > { %16829 = vmatprep.mubr.msk.bf16.mxu0 %vm1262_vm1, %v8569_v6  ;;  %v8587_v6 = vsel %vm6928_vm3, %v8584_v44, %v8586_v4  ;;  %v2837_v44 = vrot.slane %v20171_v36, 1  ;;  %v8606_v4 = vrot.slane %v18477_v2, 2  ;;  %v9565_v8 = vshrl.u32 %v20181_v54, 16 }
 0x275   : > { %v2840_v36 = vsel %vm2769_vm4, %v2837_v44, %v2839_v22 }
 0x277   : > { %16210 = vmatmul.mubr.msk.bf16.gmra.mrb[28].mxu1 %vm1262_vm1, %v2802_v45  ;;  %v2823_v45 = vrot.slane %v20110_v26, 1  ;;  %v2825_v26 = vrot.slane %v20115_v29, 1 }
 0x278   : > { %16213 = vmatprep.mubr.msk.bf16.mxu1 %vm1262_vm1, %v2804_v21  ;;  %v18470_v21 = vld [vmem:[%s19405_s27 + $0x208] sm:$0xff]  }
 0x279   : > { %v8592_v11 = vrot.slane %v18470_v21, 2  ;;  %v2826_v1 = vsel %vm2769_vm4, %v2823_v45, %v2825_v26 }
 0x27a   : > { %16830 = vmatmul.mubr.msk.bf16.gmra.mrb[96].mxu0 %vm1262_vm1, %v8571_v38  ;;  %v2824_v38 = vsel %vm2769_vm4, %v2821_v10, %v2823_v45  ;;  %v2841_v45 = vrot.slane %v20193_v62, 1  ;;  %v23073_v62 = vld [vmem:[#allocation4_spill] sm:$0xff] }
 0x27b   : > { %16833 = vmatprep.mubr.msk.bf16.mxu0 %vm1262_vm1, %v8573_v25  ;;  %v2827_v25 = vrot.slane %v20126_v48, 1  ;;  %v8593_v41 = vsel %vm6928_vm3, %v8590_v17, %v8592_v11  ;;  %v2829_v48 = vrot.slane %v20131_v49, 1  ;;  %v2843_v17 = vrot.slane %v20217_v46, 1 }
 0x27c   : > { %v2842_v54 = vsel %vm2769_vm4, %v2839_v22, %v2841_v45 }
 0x27d   : > { %v2828_v18 = vsel %vm2769_vm4, %v2825_v26, %v2827_v25  ;;  %v2830_v39 = vsel %vm2769_vm4, %v2827_v25, %v2829_v48  ;;  %v2832_v47 = vsel %vm2769_vm4, %v2829_v48, %v2831_v51  ;;  %v9577_v25 = vshll.u32 %v23073_v62, 16 }
 0x27f   : > { %16214 = vmatmul.mubr.msk.bf16.gmra.mrb[32].mxu1 %vm1262_vm1, %v2806_v32  ;;  %v18472_v32 = vld [vmem:[%s19405_s27 + $0x218] sm:$0xff]  }
 0x280   : > { %16217 = vmatprep.mubr.msk.bf16.mxu1 %vm1262_vm1, %v2808_v31  ;;  %v8594_v31 = vrot.slane %v18471_v59, 2  ;;  %v8596_v29 = vrot.slane %v18472_v32, 2  ;;  %v9574_v59 = vshrl.u32 %v23073_v62, 16  ;;  %v23074_v32 = vld [vmem:[#allocation5_spill] sm:$0xff]  ;;  %v23086_v62 = vld [vmem:[#allocation16_spill] sm:$0xff] }
 0x281   : > { %v9583_v46 = vshrl.u32 %v23074_v32, 16 }
 0x282   : > { %16834 = vmatmul.mubr.msk.bf16.gmra.mrb[100].mxu0 %vm1262_vm1, %v8575_v42  ;;  %v8595_v27 = vsel %vm6928_vm3, %v8592_v11, %v8594_v31  ;;  %v18473_v42 = vld [vmem:[%s19405_s27 + $0x220] sm:$0xff]   ;;  %v8597_v19 = vsel %vm6928_vm3, %v8594_v31, %v8596_v29  ;;  %v9570_v11 = vrot.slane %v9568_v0, 3  ;;  %v9576_v48 = vrot.slane %v9574_v59, 2  ;;  %v23084_v0 = vld [vmem:[#allocation17_spill] sm:$0xff] }
 0x283   : > { %16837 = vmatprep.mubr.msk.bf16.mxu0 %vm1262_vm1, %v8577_v9  ;;  %v18474_v9 = vld [vmem:[%s19405_s27 + $0x228] sm:$0xff]   ;;  %v23075_v31 = vld [vmem:[#allocation6_spill] sm:$0xff]  ;;  %v9637_v59 = vshrl.u32 %v23086_v62, 16 }
 0x284   : > { %v8600_v49 = vrot.slane %v18474_v9, 2  ;;  %v9585_v9 = vrot.slane %v9583_v46, 2 }
 0x287   : > { %16218 = vmatmul.mubr.msk.bf16.gmra.mrb[36].mxu1 %vm1262_vm1, %v2810_v57  ;;  %v8598_v57 = vrot.slane %v18473_v42, 2  ;;  %v23076_v42 = vld [vmem:[#allocation9_spill] sm:$0xff] }
 0x288   : > { %16221 = vmatprep.mubr.msk.bf16.mxu1 %vm1262_vm1, %v2812_v20  ;;  %v2833_v20 = vrot.slane %v20149_v15, 1  ;;  %v9539_v15 = vshrl.u32 %v20156_v3, 16  ;;  %v9549_v3 = vrot.slane %v9547_v35, 2  ;;  %v2851_v35 = vrot.slane %v23080_v13, 1 }
 0x289   : > { %v8599_v7 = vsel %vm6928_vm3, %v8596_v29, %v8598_v57  ;;  %v8601_v43 = vsel %vm6928_vm3, %v8598_v57, %v8600_v49 }
 0x28a   : > { %16838 = vmatmul.mubr.msk.bf16.gmra.mrb[104].mxu0 %vm1262_vm1, %v8579_v61  ;;  %v18476_v61 = vld [vmem:[%s19405_s27 + $0x238] sm:$0xff]   ;;  %v2834_v52 = vsel %vm2769_vm4, %v2831_v51, %v2833_v20  ;;  %v2836_v37 = vsel %vm2769_vm4, %v2833_v20, %v2835_v40  ;;  %v2847_v51 = vrot.slane %v23076_v42, 1  ;;  %v23077_v20 = vld [vmem:[#allocation7_spill] sm:$0xff] }
 0x28b   : > { %16841 = vmatprep.mubr.msk.bf16.mxu0 %vm1262_vm1, %v8581_v55  ;;  %v8602_v55 = vrot.slane %v18475_v28, 2  ;;  %v9595_v28 = vshll.u32 %v23077_v20, 16 }
 0x28d   : > { %v8603_v56 = vsel %vm6928_vm3, %v8600_v49, %v8602_v55 }
 0x28f   : > { %16222 = vmatmul.mubr.msk.bf16.gmra.mrb[40].mxu1 %vm1262_vm1, %v2814_v34  ;;  %v8604_v34 = vrot.slane %v18476_v61, 2  ;;  %v23078_v61 = vld [vmem:[#allocation8_spill] sm:$0xff] }
 0x290   : > { %16225 = vmatprep.mubr.msk.bf16.mxu1 %vm1262_vm1, %v2816_v23  ;;  %v9550_v23 = vshll.u32 %v20159_v24, 16  ;;  %v2838_v24 = vsel %vm2769_vm4, %v2835_v40, %v2837_v44 }
 0x292   : > { %16842 = vmatmul.mubr.msk.bf16.gmra.mrb[108].mxu0 %vm1262_vm1, %v8583_v16  ;;  %v8605_v16 = vsel %vm6928_vm3, %v8602_v55, %v8604_v34  ;;  %v23079_v55 = vld [vmem:[#allocation10_spill] sm:$0xff] }
 0x293   : > { %16845 = vmatprep.mubr.msk.bf16.mxu0 %vm1262_vm1, %v8585_v53  ;;  %v9541_v53 = vrot.slane %v9539_v15, 2  ;;  %v9597_v15 = vrot.slane %v9595_v28, 3 }
 0x295   : > { %v9545_v10 = vor.u32 %v9544_v63, %v9541_v53  ;;  %v23081_v53 = vld [vmem:[#allocation11_spill] sm:$0xff] }
 0x296   : > { %v9610_v63 = vshrl.u32 %v23081_v53, 16 }
 0x297   : > { %16226 = vmatmul.mubr.msk.bf16.gmra.mrb[44].mxu1 %vm1262_vm1, %v2818_v14  ;;  %v9552_v14 = vrot.slane %v9550_v23, 3 }
 0x298   : > { %16229 = vmatprep.mubr.msk.bf16.mxu1 %vm1262_vm1, %v2820_v60  ;;  %v9556_v60 = vshrl.u32 %v20177_v50, 16 }
 0x29a   : > { %16846 = vmatmul.mubr.msk.bf16.gmra.mrb[112].mxu0 %vm1262_vm1, %v8587_v6  ;;  %v9553_v6 = vor.u32 %v9552_v14, %v9549_v3  ;;  %v9558_v21 = vrot.slane %v9556_v60, 2  ;;  %v9613_v3 = vshll.u32 %v23081_v53, 16  ;;  %v23083_v60 = vld [vmem:[#allocation14_spill] sm:$0xff]  ;;  %v23094_v53 = vld [vmem:[#allocation24_spill] sm:$0xff] }
 0x29b   : > { %16849 = vmatprep.mubr.msk.bf16.mxu0 %vm1262_vm1, %v8589_v30  ;;  %v8607_v30 = vsel %vm6928_vm3, %v8604_v34, %v8606_v4 }
 0x29c   : > { %v9554_v50 = vsel %vm9537_vm5, %v9545_v10, %v9553_v6 }
 0x29f   : > { %16230 = vmatmul.mubr.msk.bf16.gmra.mrb[48].mxu1 %vm1262_vm1, %v2822_v5  ;;  %v9561_v5 = vrot.slane %v9559_v58, 3  ;;  %v2853_v58 = vrot.slane %v23083_v60, 1 }
 0x2a0   : > { %16233 = vmatprep.mubr.msk.bf16.mxu1 %vm1262_vm1, %v2824_v38  ;;  %v9567_v38 = vrot.slane %v9565_v8, 2  ;;  %v9615_v8 = vrot.slane %v9613_v3, 3  ;;  %v9676_v3 = vshll.u32 %v23094_v53, 16 }
 0x2a1   : > { %v9562_v26 = vor.u32 %v9561_v5, %v9558_v21 }
 0x2a2   : > { %16850 = vmatmul.mubr.msk.bf16.gmra.mrb[116].mxu0 %vm1262_vm1, %v8591_v33  ;;  %v2844_v33 = vsel %vm2769_vm4, %v2841_v45, %v2843_v17  ;;  %v2855_v45 = vrot.slane %v23084_v0, 1  ;;  %v9678_v0 = vrot.slane %v9676_v3, 3 }
 0x2a3   : > { %16853 = vmatprep.mubr.msk.bf16.mxu0 %vm1262_vm1, %v8593_v41  ;;  %v9571_v41 = vor.u32 %v9570_v11, %v9567_v38  ;;  %v9563_v29 = vsel %vm9537_vm5, %v9553_v6, %v9562_v26  ;;  %v9612_v6 = vrot.slane %v9610_v63, 2  ;;  %v23085_v11 = vld [vmem:[#allocation15_spill] sm:$0xff]  ;;  %v9673_v63 = vshrl.u32 %v23094_v53, 16 }
 0x2a4   : > { %v2856_v38 = vsel %vm2769_vm4, %v2853_v58, %v2855_v45 }
 0x2a7   : > { %16234 = vmatmul.mubr.msk.bf16.gmra.mrb[52].mxu1 %vm1262_vm1, %v2826_v1  ;;  %v9586_v1 = vshll.u32 %v23074_v32, 16 }
 0x2a8   : > { %16237 = vmatprep.mubr.msk.bf16.mxu1 %vm1262_vm1, %v2828_v18  ;;  %v2845_v18 = vrot.slane %v23075_v31, 1 }
 0x2aa   : > { %16854 = vmatmul.mubr.msk.bf16.gmra.mrb[120].mxu0 %vm1262_vm1, %v8595_v27  ;;  %v9579_v27 = vrot.slane %v9577_v25, 3  ;;  %v2846_v57 = vsel %vm2769_vm4, %v2843_v17, %v2845_v18  ;;  %v2848_v49 = vsel %vm2769_vm4, %v2845_v18, %v2847_v51  ;;  %v2854_v17 = vsel %vm2769_vm4, %v2851_v35, %v2853_v58  ;;  %v23088_v18 = vld [vmem:[#allocation21_spill] sm:$0xff] }
 0x2ab   : > { %16857 = vmatprep.mubr.msk.bf16.mxu0 %vm1262_vm1, %v8597_v19  ;;  %v9572_v19 = vsel %vm9537_vm5, %v9562_v26, %v9571_v41  ;;  %v9631_v26 = vshll.u32 %v23085_v11, 16  ;;  %v9640_v25 = vshll.u32 %v23086_v62, 16  ;;  %v23096_v58 = vld [vmem:[#allocation29_spill] sm:$0xff] }
 0x2ad   : > { %v9633_v31 = vrot.slane %v9631_v26, 3  ;;  %v9642_v42 = vrot.slane %v9640_v25, 3 }
 0x2af   : > { %16238 = vmatmul.mubr.msk.bf16.gmra.mrb[56].mxu1 %vm1262_vm1, %v2830_v39  ;;  %v9588_v39 = vrot.slane %v9586_v1, 3 }
 0x2b0   : > { %16241 = vmatprep.mubr.msk.bf16.mxu1 %vm1262_vm1, %v2832_v47  ;;  %v9580_v47 = vor.u32 %v9579_v27, %v9576_v48  ;;  %v9639_v27 = vrot.slane %v9637_v59, 2 }
 0x2b1   : > { %v9589_v40 = vor.u32 %v9588_v39, %v9585_v9  ;;  %v23089_v39 = vld [vmem:[#allocation19_spill] sm:$0xff] }
 0x2b2   : > { %16858 = vmatmul.mubr.msk.bf16.gmra.mrb[124].mxu0 %vm1262_vm1, %v8599_v7  ;;  %v9592_v7 = vshrl.u32 %v23077_v20, 16  ;;  %v23090_v20 = vld [vmem:[#allocation20_spill] sm:$0xff] }
 0x2b3   : > { %16861 = vmatprep.mubr.msk.bf16.mxu0 %vm1262_vm1, %v8601_v43  ;;  %v9601_v43 = vshrl.u32 %v23078_v61, 16  ;;  %v9590_v23 = vsel %vm9537_vm5, %v9580_v47, %v9589_v40  ;;  %v9658_v28 = vshll.u32 %v23090_v20, 16 }
 0x2b4   : > { %v9594_v34 = vrot.slane %v9592_v7, 2  ;;  %v9655_v7 = vshrl.u32 %v23090_v20, 16 }
 0x2b5   : > { %v9603_v44 = vrot.slane %v9601_v43, 2  ;;  %v9660_v13 = vrot.slane %v9658_v28, 3 }
 0x2b6   : > { %v9598_v2 = vor.u32 %v9597_v15, %v9594_v34  ;;  %v9657_v15 = vrot.slane %v9655_v7, 2 }
 0x2b7   : > { %16242 = vmatmul.mubr.msk.bf16.gmra.mrb[60].mxu1 %vm1262_vm1, %v2834_v52  ;;  %v9604_v52 = vshll.u32 %v23078_v61, 16 }
 0x2b8   : > { %16245 = vmatprep.mubr.msk.bf16.mxu1 %vm1262_vm1, %v2836_v37  ;;  %v9581_v37 = vsel %vm9537_vm5, %v9571_v41, %v9580_v47  ;;  %v9599_v10 = vsel %vm9537_vm5, %v9589_v40, %v9598_v2  ;;  %v23087_v41 = vld [vmem:[#allocation18_spill] sm:$0xff]  ;;  %v9649_v47 = vshll.u32 %v23089_v39, 16 }
 0x2b9   : > { %v2857_v32 = vrot.slane %v23087_v41, 1  ;;  %v23091_v40 = vld [vmem:[#allocation22_spill] sm:$0xff] }
 0x2ba   : > { %16862 = vmatmul.mubr.msk.bf16.gmra.mrb[128].mxu0 %vm1262_vm1, %v8603_v56  ;;  %v9606_v56 = vrot.slane %v9604_v52, 3  ;;  %v2861_v61 = vrot.slane %v23091_v40, 1 }
 0x2bb   : > { %16865 = vmatprep.mubr.msk.bf16.mxu0 %vm1262_vm1, %v8605_v16 }
 0x2bc   : > { %v9607_v14 = vor.u32 %v9606_v56, %v9603_v44  ;;  %v23093_v56 = vld [vmem:[#allocation23_spill] sm:$0xff] }
 0x2bf   : > { %16246 = vmatmul.mubr.msk.bf16.gmra.mrb[64].mxu1 %vm1262_vm1, %v2838_v24  ;;  %v23082_v24 = vld [vmem:[#allocation12_spill] sm:$0xff] }
 0x2c0   : > { %16249 = vmatprep.mubr.msk.bf16.mxu1 %vm1262_vm1, %v2840_v36  ;;  %v9619_v4 = vshrl.u32 %v23082_v24, 16  ;;  %v9622_v36 = vshll.u32 %v23082_v24, 16 }
 0x2c2   : > { %16866 = vmatmul.mubr.msk.bf16.gmra.mrb[132].mxu0 %vm1262_vm1, %v8607_v30  ;;  %v9608_v30 = vsel %vm9537_vm5, %v9598_v2, %v9607_v14  ;;  %v9621_v21 = vrot.slane %v9619_v4, 2  ;;  %v9624_v5 = vrot.slane %v9622_v36, 3  ;;  %v9667_v2 = vshll.u32 %v23093_v56, 16 }
 0x2c3   : > { %16871 = vmatprep.mubr.msk.bf16.mxu0 %vm1262_vm1, %v9554_v50  ;;  %v9616_v50 = vor.u32 %v9615_v8, %v9612_v6  ;;  %v9675_v8 = vrot.slane %v9673_v63, 2 }
 0x2c4   : > { %v9669_v60 = vrot.slane %v9667_v2, 3 }
 0x2c5   : > { %v9617_v46 = vsel %vm9537_vm5, %v9607_v14, %v9616_v50  ;;  %v23095_v14 = vld [vmem:[#allocation26_spill] sm:$0xff] }
 0x2c6   : > { %v2865_v24 = vrot.slane %v23095_v14, 1 }
 0x2c7   : > { %16250 = vmatmul.mubr.msk.bf16.gmra.mrb[68].mxu1 %vm1262_vm1, %v2842_v54  ;;  %v9628_v54 = vshrl.u32 %v23085_v11, 16  ;;  %v23098_v11 = vld [vmem:[#allocation28_spill] sm:$0xff] }
 0x2c8   : > { %16253 = vmatprep.mubr.msk.bf16.mxu1 %vm1262_vm1, %v2844_v33  ;;  %v9625_v33 = vor.u32 %v9624_v5, %v9621_v21  ;;  %v23097_v5 = vld [vmem:[#allocation27_spill] sm:$0xff]  ;;  %v9694_v26 = vshll.u32 %v23098_v11, 16 }
 0x2c9   : > { %v9630_v1 = vrot.slane %v9628_v54, 2  ;;  %v9691_v54 = vshrl.u32 %v23098_v11, 16 }
 0x2ca   : > { %16872 = vmatmul.mubr.msk.bf16.vlgmr.msra.gmra.mrb[0].mxu0 %vm1262_vm1, %v9563_v29  ;;  %v2859_v29 = vrot.slane %v23088_v18, 1  ;;  %v9626_v48 = vsel %vm9537_vm5, %v9616_v50, %v9625_v33  ;;  %v9685_v50 = vshll.u32 %v23097_v5, 16  ;;  %v9696_v18 = vrot.slane %v9694_v26, 3 }
 0x2cb   : > { %17008 = vmatpush3.bf16.msra.mxu0 %v20498_v12  ;;  %16875 = vmatprep.mubr.msk.bf16.mxu0 %vm1262_vm1, %v9572_v19  ;;  %v2849_v12 = vrot.slane %v23079_v55, 1  ;;  %v9634_v19 = vor.u32 %v9633_v31, %v9630_v1  ;;  %v9651_v55 = vrot.slane %v9649_v47, 3  ;;  %v9693_v31 = vrot.slane %v9691_v54, 2 }
 0x2cc   : > { %v2860_v9 = vsel %vm2769_vm4, %v2857_v32, %v2859_v29  ;;  %v9687_v41 = vrot.slane %v9685_v50, 3 }
 0x2cd   : > { %v2850_v16 = vsel %vm2769_vm4, %v2847_v51, %v2849_v12  ;;  %v2852_v22 = vsel %vm2769_vm4, %v2849_v12, %v2851_v35  ;;  %v2858_v51 = vsel %vm2769_vm4, %v2855_v45, %v2857_v32  ;;  %v9635_v43 = vsel %vm9537_vm5, %v9625_v33, %v9634_v19  ;;  %v23092_v12 = vld [vmem:[#allocation25_spill] sm:$0xff]  ;;  %v23099_v33 = vld [vmem:[#allocation30_spill] sm:$0xff] }
 0x2ce   : > { %v2862_v35 = vsel %vm2769_vm4, %v2859_v29, %v2861_v61  ;;  %v2869_v62 = vrot.slane %v23099_v33, 1  ;;  %v23100_v32 = vld [vmem:[#allocation33_spill] sm:$0xff] }
 0x2cf   : > { %16254 = vmatmul.mubr.msk.bf16.gmra.mrb[72].mxu1 %vm1262_vm1, %v2846_v57  ;;  %v9646_v57 = vshrl.u32 %v23089_v39, 16  ;;  %v23102_v39 = vld [vmem:[#allocation32_spill] sm:$0xff] }
 0x2d0   : > { %16257 = vmatprep.mubr.msk.bf16.mxu1 %vm1262_vm1, %v2848_v49  ;;  %v9643_v49 = vor.u32 %v9642_v42, %v9639_v27  ;;  %v23101_v42 = vld [vmem:[#allocation31_spill] sm:$0xff]  ;;  %v9712_v47 = vshll.u32 %v23102_v39, 16 }
 0x2d1   : > { %v9648_v52 = vrot.slane %v9646_v57, 2  ;;  %v9709_v57 = vshrl.u32 %v23102_v39, 16 }
 0x2d2   : > { %16876 = vmatmul.mubr.msk.bf16.gmra.mrb[4].mxu0 %vm1262_vm1, %v9581_v37  ;;  %v2863_v37 = vrot.slane %v23092_v12, 1  ;;  %v9644_v34 = vsel %vm9537_vm5, %v9634_v19, %v9643_v49  ;;  %v9703_v19 = vshll.u32 %v23101_v42, 16  ;;  %v9714_v12 = vrot.slane %v9712_v47, 3 }
 0x2d3   : > { %16879 = vmatprep.mubr.msk.bf16.mxu0 %vm1262_vm1, %v9590_v23  ;;  %v9652_v23 = vor.u32 %v9651_v55, %v9648_v52  ;;  %v9711_v55 = vrot.slane %v9709_v57, 2 }
 0x2d4   : > { %v2864_v44 = vsel %vm2769_vm4, %v2861_v61, %v2863_v37  ;;  %v2866_v45 = vsel %vm2769_vm4, %v2863_v37, %v2865_v24  ;;  %v9705_v40 = vrot.slane %v9703_v19, 3  ;;  %v23104_v61 = vld [vmem:[#allocation35_spill] sm:$0xff] }
 0x2d5   : > { %v9653_v4 = vsel %vm9537_vm5, %v9643_v49, %v9652_v23  ;;  %v23103_v49 = vld [vmem:[#allocation34_spill] sm:$0xff] }
 0x2d6   : > { %v2873_v20 = vrot.slane %v23103_v49, 1 }
 0x2d7   : > { %16258 = vmatmul.mubr.msk.bf16.gmra.mrb[76].mxu1 %vm1262_vm1, %v2850_v16  ;;  %v9664_v16 = vshrl.u32 %v23093_v56, 16  ;;  %v19121_v56 = vld [vmem:[%s19405_s27 + $0xc8] sm:$0xff]  }
 0x2d8   : > { %16261 = vmatprep.mubr.msk.bf16.mxu1 %vm1262_vm1, %v2852_v22  ;;  %v9661_v22 = vor.u32 %v9660_v13, %v9657_v15  ;;  %v19120_v13 = vld [vmem:[%s19405_s27 + $0xc0] sm:$0xff]   ;;  %v9730_v2 = vshll.u32 %v19121_v56, 16 }
 0x2d9   : > { %v9666_v36 = vrot.slane %v9664_v16, 2  ;;  %v9727_v16 = vshrl.u32 %v19121_v56, 16 }
 0x2da   : > { %16880 = vmatmul.mubr.msk.bf16.gmra.mrb[8].mxu0 %vm1262_vm1, %v9599_v10  ;;  %v2867_v10 = vrot.slane %v23096_v58, 1  ;;  %v9662_v6 = vsel %vm9537_vm5, %v9652_v23, %v9661_v22  ;;  %v9721_v23 = vshll.u32 %v19120_v13, 16  ;;  %v9732_v58 = vrot.slane %v9730_v2, 3 }
 0x2db   : > { %16883 = vmatprep.mubr.msk.bf16.mxu0 %vm1262_vm1, %v9608_v30  ;;  %v9670_v30 = vor.u32 %v9669_v60, %v9666_v36  ;;  %v9729_v60 = vrot.slane %v9727_v16, 2 }
 0x2dc   : > { %v2868_v21 = vsel %vm2769_vm4, %v2865_v24, %v2867_v10  ;;  %v2870_v29 = vsel %vm2769_vm4, %v2867_v10, %v2869_v62  ;;  %v9723_v14 = vrot.slane %v9721_v23, 3  ;;  %v23105_v24 = vld [vmem:[#allocation36_spill] sm:$0xff] }
 0x2dd   : > { %v9671_v59 = vsel %vm9537_vm5, %v9661_v22, %v9670_v30  ;;  %v19122_v22 = vld [vmem:[%s19405_s27 + $0x1b0] sm:$0xff]  }
 0x2de   : > { %v2877_v53 = vrot.slane %v19122_v22, 1 }
 0x2df   : > { %16262 = vmatmul.mubr.msk.bf16.gmra.mrb[80].mxu1 %vm1262_vm1, %v2854_v17  ;;  %v9682_v17 = vshrl.u32 %v23097_v5, 16  ;;  %v19124_v5 = vld [vmem:[%s19405_s27 + $0xd8] sm:$0xff]  }
 0x2e0   : > { %16265 = vmatprep.mubr.msk.bf16.mxu1 %vm1262_vm1, %v2856_v38  ;;  %v9679_v38 = vor.u32 %v9678_v0, %v9675_v8  ;;  %v19123_v0 = vld [vmem:[%s19405_s27 + $0xd0] sm:$0xff]   ;;  %v9748_v50 = vshll.u32 %v19124_v5, 16 }
 0x2e1   : > { %v9684_v25 = vrot.slane %v9682_v17, 2  ;;  %v9745_v17 = vshrl.u32 %v19124_v5, 16 }
 0x2e2   : > { %16884 = vmatmul.mubr.msk.bf16.gmra.mrb[12].mxu0 %vm1262_vm1, %v9617_v46  ;;  %v2871_v46 = vrot.slane %v23100_v32, 1  ;;  %v9680_v1 = vsel %vm9537_vm5, %v9670_v30, %v9679_v38  ;;  %v9739_v30 = vshll.u32 %v19123_v0, 16  ;;  %v9750_v32 = vrot.slane %v9748_v50, 3 }
 0x2e3   : > { %16887 = vmatprep.mubr.msk.bf16.mxu0 %vm1262_vm1, %v9626_v48  ;;  %v9688_v48 = vor.u32 %v9687_v41, %v9684_v25  ;;  %v9747_v41 = vrot.slane %v9745_v17, 2 }
 0x2e4   : > { %v2872_v27 = vsel %vm2769_vm4, %v2869_v62, %v2871_v46  ;;  %v2874_v37 = vsel %vm2769_vm4, %v2871_v46, %v2873_v20  ;;  %v9741_v33 = vrot.slane %v9739_v30, 3  ;;  %v19126_v62 = vld [vmem:[%s19405_s27 + $0x1c8] sm:$0xff]  }
 0x2e5   : > { %v9689_v7 = vsel %vm9537_vm5, %v9679_v38, %v9688_v48  ;;  %v19125_v38 = vld [vmem:[%s19405_s27 + $0x1c0] sm:$0xff]  }
 0x2e6   : > { %v2881_v11 = vrot.slane %v19125_v38, 1 }
 0x2e7   : > { %16266 = vmatmul.mubr.msk.bf16.gmra.mrb[84].mxu1 %vm1262_vm1, %v2858_v51  ;;  %v9700_v51 = vshrl.u32 %v23101_v42, 16  ;;  %v19128_v42 = vld [vmem:[%s19405_s27 + $0xe8] sm:$0xff]  }
 0x2e8   : > { %16269 = vmatprep.mubr.msk.bf16.mxu1 %vm1262_vm1, %v2860_v9  ;;  %v9697_v9 = vor.u32 %v9696_v18, %v9693_v31  ;;  %v19127_v18 = vld [vmem:[%s19405_s27 + $0xe0] sm:$0xff]   ;;  %v9766_v19 = vshll.u32 %v19128_v42, 16 }
 0x2e9   : > { %v9702_v28 = vrot.slane %v9700_v51, 2  ;;  %v9763_v51 = vshrl.u32 %v19128_v42, 16 }
 0x2ea   : > { %16888 = vmatmul.mubr.msk.bf16.gmra.mrb[16].mxu0 %vm1262_vm1, %v9635_v43  ;;  %v2875_v43 = vrot.slane %v23104_v61, 1  ;;  %v9698_v52 = vsel %vm9537_vm5, %v9688_v48, %v9697_v9  ;;  %v9757_v48 = vshll.u32 %v19127_v18, 16  ;;  %v9768_v61 = vrot.slane %v9766_v19, 3 }
 0x2eb   : > { %16891 = vmatprep.mubr.msk.bf16.mxu0 %vm1262_vm1, %v9644_v34  ;;  %v9706_v34 = vor.u32 %v9705_v40, %v9702_v28  ;;  %v9765_v40 = vrot.slane %v9763_v51, 2 }
 0x2ec   : > { %v2876_v15 = vsel %vm2769_vm4, %v2873_v20, %v2875_v43  ;;  %v2878_v10 = vsel %vm2769_vm4, %v2875_v43, %v2877_v53  ;;  %v9759_v49 = vrot.slane %v9757_v48, 3  ;;  %v19130_v20 = vld [vmem:[%s19405_s27 + $0x1d8] sm:$0xff]  }
 0x2ed   : > { %v9707_v63 = vsel %vm9537_vm5, %v9697_v9, %v9706_v34  ;;  %v19129_v9 = vld [vmem:[%s19405_s27 + $0x1d0] sm:$0xff]  }
 0x2ee   : > { %v2885_v39 = vrot.slane %v19129_v9, 1 }
 0x2ef   : > { %16270 = vmatmul.mubr.msk.bf16.gmra.mrb[88].mxu1 %vm1262_vm1, %v2862_v35  ;;  %v9718_v35 = vshrl.u32 %v19120_v13, 16  ;;  %v19132_v13 = vld [vmem:[%s19405_s27 + $0xf8] sm:$0xff]  }
 0x2f0   : > { %16273 = vmatprep.mubr.msk.bf16.mxu1 %vm1262_vm1, %v2864_v44  ;;  %v9715_v44 = vor.u32 %v9714_v12, %v9711_v55  ;;  %v19131_v12 = vld [vmem:[%s19405_s27 + $0xf0] sm:$0xff]   ;;  %v9784_v23 = vshll.u32 %v19132_v13, 16 }
 0x2f1   : > { %v9720_v3 = vrot.slane %v9718_v35, 2  ;;  %v9781_v35 = vshrl.u32 %v19132_v13, 16 }
 0x2f2   : > { %16892 = vmatmul.mubr.msk.bf16.gmra.mrb[20].mxu0 %vm1262_vm1, %v9653_v4  ;;  %v2879_v4 = vrot.slane %v23105_v24, 1  ;;  %v9716_v36 = vsel %vm9537_vm5, %v9706_v34, %v9715_v44  ;;  %v9775_v34 = vshll.u32 %v19131_v12, 16  ;;  %v9786_v24 = vrot.slane %v9784_v23, 3 }
 0x2f3   : > { %16895 = vmatprep.mubr.msk.bf16.mxu0 %vm1262_vm1, %v9662_v6  ;;  %v9724_v6 = vor.u32 %v9723_v14, %v9720_v3  ;;  %v9783_v14 = vrot.slane %v9781_v35, 2 }
 0x2f4   : > { %v2880_v8 = vsel %vm2769_vm4, %v2877_v53, %v2879_v4  ;;  %v2882_v46 = vsel %vm2769_vm4, %v2879_v4, %v2881_v11  ;;  %v9777_v22 = vrot.slane %v9775_v34, 3  ;;  %v19134_v53 = vld [vmem:[%s19405_s27 + $0x1e8] sm:$0xff]  }
 0x2f5   : > { %v9725_v54 = vsel %vm9537_vm5, %v9715_v44, %v9724_v6  ;;  %v19133_v44 = vld [vmem:[%s19405_s27 + $0x1e0] sm:$0xff]  }
 0x2f6   : > { %v2889_v56 = vrot.slane %v19133_v44, 1 }
 0x2f7   : > { %16274 = vmatmul.mubr.msk.bf16.gmra.mrb[92].mxu1 %vm1262_vm1, %v2866_v45  ;;  %v9736_v45 = vshrl.u32 %v19123_v0, 16  ;;  %v19136_v0 = vld [vmem:[%s19405_s27 + $0x108] sm:$0xff]  }
 0x2f8   : > { %16277 = vmatprep.mubr.msk.bf16.mxu1 %vm1262_vm1, %v2868_v21  ;;  %v9733_v21 = vor.u32 %v9732_v58, %v9729_v60  ;;  %v19135_v58 = vld [vmem:[%s19405_s27 + $0x100] sm:$0xff]   ;;  %v9802_v30 = vshll.u32 %v19136_v0, 16 }
 0x2f9   : > { %v9738_v26 = vrot.slane %v9736_v45, 2  ;;  %v9799_v45 = vshrl.u32 %v19136_v0, 16  ;;  %v19149_v0 = vld [vmem:[%s19405_s27 + $0x220] ss:$0 sps:$4 sm:$0x11]  }
 0x2fa   : > { %16896 = vmatmul.mubr.msk.bf16.gmra.mrb[24].mxu0 %vm1262_vm1, %v9671_v59  ;;  %v2883_v59 = vrot.slane %v19126_v62, 1  ;;  %v9734_v25 = vsel %vm9537_vm5, %v9724_v6, %v9733_v21  ;;  %v9793_v6 = vshll.u32 %v19135_v58, 16  ;;  %v9804_v62 = vrot.slane %v9802_v30, 3 }
 0x2fb   : > { %16899 = vmatprep.mubr.msk.bf16.mxu0 %vm1262_vm1, %v9680_v1  ;;  %v9742_v1 = vor.u32 %v9741_v33, %v9738_v26  ;;  %v9801_v33 = vrot.slane %v9799_v45, 2  ;;  %v2905_v45 = vrot.slane %v19149_v0, 1 }
 0x2fc   : > { %v2884_v31 = vsel %vm2769_vm4, %v2881_v11, %v2883_v59  ;;  %v2886_v43 = vsel %vm2769_vm4, %v2883_v59, %v2885_v39  ;;  %v9795_v38 = vrot.slane %v9793_v6, 3  ;;  %v19138_v11 = vld [vmem:[%s19405_s27 + $0x1f8] sm:$0xff]  }
 0x2fd   : > { %v9743_v57 = vsel %vm9537_vm5, %v9733_v21, %v9742_v1  ;;  %v19137_v21 = vld [vmem:[%s19405_s27 + $0x1f0] sm:$0xff]  }
 0x2fe   : > { %v2893_v5 = vrot.slane %v19137_v21, 1 }
 0x2ff   : > { %16278 = vmatmul.mubr.msk.bf16.gmra.mrb[96].mxu1 %vm1262_vm1, %v2870_v29  ;;  %v9754_v29 = vshrl.u32 %v19127_v18, 16  ;;  %v19140_v18 = vld [vmem:[%s19405_s27 + $0x118] sm:$0xff]  }
 0x300   : > { %16281 = vmatprep.mubr.msk.bf16.mxu1 %vm1262_vm1, %v2872_v27  ;;  %v9751_v27 = vor.u32 %v9750_v32, %v9747_v41  ;;  %v19139_v32 = vld [vmem:[%s19405_s27 + $0x110] sm:$0xff]   ;;  %v9820_v48 = vshll.u32 %v19140_v18, 16 }
 0x301   : > { %v9756_v47 = vrot.slane %v9754_v29, 2  ;;  %v9817_v29 = vshrl.u32 %v19140_v18, 16 }
 0x302   : > { %16900 = vmatmul.mubr.msk.bf16.gmra.mrb[28].mxu0 %vm1262_vm1, %v9689_v7  ;;  %v2887_v7 = vrot.slane %v19130_v20, 1  ;;  %v9752_v28 = vsel %vm9537_vm5, %v9742_v1, %v9751_v27  ;;  %v9811_v1 = vshll.u32 %v19139_v32, 16  ;;  %v9822_v20 = vrot.slane %v9820_v48, 3 }
 0x303   : > { %16903 = vmatprep.mubr.msk.bf16.mxu0 %vm1262_vm1, %v9698_v52  ;;  %v9760_v52 = vor.u32 %v9759_v49, %v9756_v47  ;;  %v9819_v49 = vrot.slane %v9817_v29, 2  ;;  %v19153_v29 = vld [vmem:[%s19405_s27 + $0x20] sm:$0xff]  }
 0x304   : > { %v2888_v55 = vsel %vm2769_vm4, %v2885_v39, %v2887_v7  ;;  %v2890_v4 = vsel %vm2769_vm4, %v2887_v7, %v2889_v56  ;;  %v9813_v9 = vrot.slane %v9811_v1, 3  ;;  %v19142_v39 = vld [vmem:[%s19405_s27 + $0x208] sm:$0xff]   ;;  %v4315_v48 = vrot.slane %v19153_v29, 1 }
 0x305   : > { %v9761_v16 = vsel %vm9537_vm5, %v9751_v27, %v9760_v52  ;;  %v19141_v27 = vld [vmem:[%s19405_s27 + $0x200] sm:$0xff]   ;;  %v19152_v1 = vld [vmem:[%s19405_s27 + $0x148] sm:$0xff]  }
 0x306   : > { %v2897_v42 = vrot.slane %v19141_v27, 1  ;;  %v9874_v18 = vshll.u32 %v19152_v1, 16 }
 0x307   : > { %16282 = vmatmul.mubr.msk.bf16.gmra.mrb[100].mxu1 %vm1262_vm1, %v2874_v37  ;;  %v9772_v37 = vshrl.u32 %v19131_v12, 16  ;;  %v19144_v12 = vld [vmem:[%s19405_s27 + $0x128] sm:$0xff]  }
 0x308   : > { %16285 = vmatprep.mubr.msk.bf16.mxu1 %vm1262_vm1, %v2876_v15  ;;  %v9769_v15 = vor.u32 %v9768_v61, %v9765_v40  ;;  %v9838_v34 = vshll.u32 %v19144_v12, 16 }
 0x309   : > { %v9774_v2 = vrot.slane %v9772_v37, 2  ;;  %v9835_v37 = vshrl.u32 %v19144_v12, 16 }
 0x30a   : > { %16904 = vmatmul.mubr.msk.bf16.gmra.mrb[32].mxu0 %vm1262_vm1, %v9707_v63  ;;  %v2891_v63 = vrot.slane %v19134_v53, 1  ;;  %v9770_v3 = vsel %vm9537_vm5, %v9760_v52, %v9769_v15  ;;  %v9840_v53 = vrot.slane %v9838_v34, 3  ;;  %v19158_v34 = vld [vmem:[%s19405_s27 + $0x30] sm:$0xff]  }
 0x30b   : > { %16907 = vmatprep.mubr.msk.bf16.mxu0 %vm1262_vm1, %v9716_v36  ;;  %v9778_v36 = vor.u32 %v9777_v22, %v9774_v2  ;;  %v9837_v22 = vrot.slane %v9835_v37, 2  ;;  %v19157_v37 = vld [vmem:[%s22984_s1 + $0x20] sm:$0xff]  }
 0x30c   : > { %v2892_v60 = vsel %vm2769_vm4, %v2889_v56, %v2891_v63  ;;  %v2894_v59 = vsel %vm2769_vm4, %v2891_v63, %v2893_v5  ;;  %v19146_v56 = vld [vmem:[%s19405_s27 + $0x218] sm:$0xff]  }
 0x30d   : > { %v9779_v17 = vsel %vm9537_vm5, %v9769_v15, %v9778_v36  ;;  %v19145_v15 = vld [vmem:[%s19405_s27 + $0x210] sm:$0xff]  }
 0x30e   : > { %v2901_v13 = vrot.slane %v19145_v15, 1  ;;  %v4319_v15 = vrot.slane %v19158_v34, 1 }
 0x30f   : > { %16286 = vmatmul.mubr.msk.bf16.gmra.mrb[104].mxu1 %vm1262_vm1, %v2878_v10  ;;  %v9790_v10 = vshrl.u32 %v19135_v58, 16  ;;  %v19148_v58 = vld [vmem:[%s19405_s27 + $0x138] sm:$0xff]  }
 0x310   : > { %16289 = vmatprep.mubr.msk.bf16.mxu1 %vm1262_vm1, %v2880_v8  ;;  %v9787_v8 = vor.u32 %v9786_v24, %v9783_v14  ;;  %v19147_v24 = vld [vmem:[%s19405_s27 + $0x130] sm:$0xff]   ;;  %v9856_v6 = vshll.u32 %v19148_v58, 16 }
 0x311   : > { %v9792_v50 = vrot.slane %v9790_v10, 2  ;;  %v9853_v10 = vshrl.u32 %v19148_v58, 16 }
 0x312   : > { %16908 = vmatmul.mubr.msk.bf16.gmra.mrb[36].mxu0 %vm1262_vm1, %v9725_v54  ;;  %v2895_v54 = vrot.slane %v19138_v11, 1  ;;  %v9788_v26 = vsel %vm9537_vm5, %v9778_v36, %v9787_v8  ;;  %v9847_v36 = vshll.u32 %v19147_v24, 16 }
 0x313   : > { %16911 = vmatprep.mubr.msk.bf16.mxu0 %vm1262_vm1, %v9734_v25  ;;  %v9796_v25 = vor.u32 %v9795_v38, %v9792_v50  ;;  %v19150_v50 = vld [vmem:[%s19405_s27 + $0x18] sm:$0xff]  }
 0x314   : > { %v2896_v41 = vsel %vm2769_vm4, %v2893_v5, %v2895_v54  ;;  %v2898_v7 = vsel %vm2769_vm4, %v2895_v54, %v2897_v42  ;;  %v9849_v21 = vrot.slane %v9847_v36, 3  ;;  %v23106_v5 = vld [vmem:[#allocation2_spill] sm:$0xff]  ;;  %v4313_v38 = vrot.slane %v19150_v50, 1 }
 0x315   : > { %v9797_v51 = vsel %vm9537_vm5, %v9787_v8, %v9796_v25  ;;  %v9855_v54 = vrot.slane %v9853_v10, 2 }
 0x317   : > { %16290 = vmatmul.mubr.msk.bf16.gmra.mrb[108].mxu1 %vm1262_vm1, %v2882_v46  ;;  %v9808_v46 = vshrl.u32 %v19139_v32, 16 }
 0x318   : > { %16293 = vmatprep.mubr.msk.bf16.mxu1 %vm1262_vm1, %v2884_v31  ;;  %v9805_v31 = vor.u32 %v9804_v62, %v9801_v33 }
 0x319   : > { %v9810_v19 = vrot.slane %v9808_v46, 2 }
 0x31a   : > { %16912 = vmatmul.mubr.msk.bf16.gmra.mrb[40].mxu0 %vm1262_vm1, %v9743_v57  ;;  %v2899_v57 = vrot.slane %v19142_v39, 1  ;;  %v9806_v47 = vsel %vm9537_vm5, %v9796_v25, %v9805_v31  ;;  %v19151_v25 = vld [vmem:[%s19405_s27 + $0x140] sm:$0xff]  }
 0x31b   : > { %16915 = vmatprep.mubr.msk.bf16.mxu0 %vm1262_vm1, %v9752_v28  ;;  %v19143_v28 = vld [vmem:[%s19405_s27 + $0x120] sm:$0xff]   ;;  %v9865_v32 = vshll.u32 %v19151_v25, 16 }
 0x31c   : > { %v9826_v40 = vshrl.u32 %v19143_v28, 16  ;;  %v9829_v61 = vshll.u32 %v19143_v28, 16  ;;  %v2900_v52 = vsel %vm2769_vm4, %v2897_v42, %v2899_v57  ;;  %v2902_v63 = vsel %vm2769_vm4, %v2899_v57, %v2901_v13  ;;  %v19155_v28 = vld [vmem:[%s19405_s27 + $0x150] sm:$0xff]  }
 0x31e   : > { %v9828_v35 = vrot.slane %v9826_v40, 2  ;;  %v9831_v23 = vrot.slane %v9829_v61, 3  ;;  %v9880_v40 = vshrl.u32 %v19155_v28, 16  ;;  %v9883_v61 = vshll.u32 %v19155_v28, 16 }
 0x31f   : > { %16294 = vmatmul.mubr.msk.bf16.gmra.mrb[112].mxu1 %vm1262_vm1, %v2886_v43  ;;  %v9814_v43 = vor.u32 %v9813_v9, %v9810_v19  ;;  %v19154_v19 = vld [vmem:[%s19405_s27 + $0x28] sm:$0xff]  }
 0x320   : > { %16297 = vmatprep.mubr.msk.bf16.mxu1 %vm1262_vm1, %v2888_v55  ;;  %v9823_v55 = vor.u32 %v9822_v20, %v9819_v49  ;;  %v4317_v9 = vrot.slane %v19154_v19, 1  ;;  %v4316_v49 = vsel %vm2769_vm4, %v4313_v38, %v4315_v48 }
 0x321   : > { %v9815_v44 = vsel %vm9537_vm5, %v9805_v31, %v9814_v43  ;;  %v9871_v31 = vshrl.u32 %v19152_v1, 16  ;;  %v19166_v1 = vld [vmem:[%s19405_s27 + $0x50] sm:$0xff]  }
 0x322   : > { %16916 = vmatmul.mubr.msk.bf16.gmra.mrb[44].mxu0 %vm1262_vm1, %v9761_v16  ;;  %v2903_v16 = vrot.slane %v19146_v56, 1  ;;  %v9824_v2 = vsel %vm9537_vm5, %v9814_v43, %v9823_v55 }
 0x323   : > { %16919 = vmatprep.mubr.msk.bf16.mxu0 %vm1262_vm1, %v9770_v3  ;;  %v9832_v3 = vor.u32 %v9831_v23, %v9828_v35  ;;  %v9873_v57 = vrot.slane %v9871_v31, 2  ;;  %v9882_v35 = vrot.slane %v9880_v40, 2  ;;  %v9885_v23 = vrot.slane %v9883_v61, 3  ;;  %v19169_v40 = vld [vmem:[%s19405_s27 + $0x188] sm:$0xff]  }
 0x324   : > { %v2904_v14 = vsel %vm2769_vm4, %v2901_v13, %v2903_v16  ;;  %v2906_v33 = vsel %vm2769_vm4, %v2903_v16, %v2905_v45  ;;  %v4327_v31 = vrot.slane %v19166_v1, 1  ;;  %v9943_v61 = vshrl.u32 %v19169_v40, 16 }
 0x325   : > { %v9833_v8 = vsel %vm9537_vm5, %v9823_v55, %v9832_v3 }
 0x327   : > { %16298 = vmatmul.mubr.msk.bf16.gmra.mrb[116].mxu1 %vm1262_vm1, %v2890_v4  ;;  %v9844_v4 = vshrl.u32 %v19147_v24, 16 }
 0x328   : > { %16301 = vmatprep.mubr.msk.bf16.mxu1 %vm1262_vm1, %v2892_v60  ;;  %v9841_v60 = vor.u32 %v9840_v53, %v9837_v22  ;;  %v4320_v53 = vsel %vm2769_vm4, %v4317_v9, %v4319_v15 }
 0x329   : > { %v9846_v30 = vrot.slane %v9844_v4, 2 }
 0x32a   : > { %16920 = vmatmul.mubr.msk.bf16.gmra.mrb[48].mxu0 %vm1262_vm1, %v9779_v17  ;;  %v4312_v17 = vrot.slane %v23106_v5, 1  ;;  %v9842_v11 = vsel %vm9537_vm5, %v9832_v3, %v9841_v60 }
 0x32b   : > { %16923 = vmatprep.mubr.msk.bf16.mxu0 %vm1262_vm1, %v9788_v26  ;;  %v9858_v26 = vrot.slane %v9856_v6, 3  ;;  %v9850_v62 = vor.u32 %v9849_v21, %v9846_v30  ;;  %v19162_v6 = vld [vmem:[%s19405_s27 + $0x40] sm:$0xff]   ;;  %v19163_v21 = vld [vmem:[%s19405_s27 + $0x48] sm:$0xff]  }
 0x32c   : > { %v4325_v5 = vrot.slane %v19163_v21, 1 }
 0x32d   : > { %v9859_v46 = vor.u32 %v9858_v26, %v9855_v54  ;;  %v9851_v27 = vsel %vm9537_vm5, %v9841_v60, %v9850_v62  ;;  %v19161_v60 = vld [vmem:[%s19405_s27 + $0x168] sm:$0xff]  }
 0x32e   : > { %v9907_v58 = vshrl.u32 %v19161_v60, 16  ;;  %v9910_v10 = vshll.u32 %v19161_v60, 16 }
 0x32f   : > { %16302 = vmatmul.mubr.msk.bf16.gmra.mrb[120].mxu1 %vm1262_vm1, %v2894_v59  ;;  %v4314_v59 = vsel %vm2769_vm4, %v4312_v17, %v4313_v38  ;;  %v9860_v39 = vsel %vm9537_vm5, %v9850_v62, %v9859_v46 }
 0x330   : > { %16305 = vmatprep.mubr.msk.bf16.mxu1 %vm1262_vm1, %v2896_v41  ;;  %v9862_v41 = vshrl.u32 %v19151_v25, 16  ;;  %v9909_v50 = vrot.slane %v9907_v58, 2  ;;  %v9912_v38 = vrot.slane %v9910_v10, 3 }
 0x332   : > { %16924 = vmatmul.mubr.msk.bf16.gmra.mrb[52].mxu0 %vm1262_vm1, %v9797_v51  ;;  %v9864_v42 = vrot.slane %v9862_v41, 2  ;;  %v9867_v51 = vrot.slane %v9865_v32, 3  ;;  %v9913_v25 = vor.u32 %v9912_v38, %v9909_v50  ;;  %v19165_v41 = vld [vmem:[%s19405_s27 + $0x178] sm:$0xff]   ;;  %v19176_v38 = vld [vmem:[%s19405_s27 + $0x1a0] sm:$0xff]  }
 0x333   : > { %16927 = vmatprep.mubr.msk.bf16.mxu0 %vm1262_vm1, %v9806_v47  ;;  %v9876_v47 = vrot.slane %v9874_v18, 3  ;;  %v9925_v32 = vshrl.u32 %v19165_v41, 16 }
 0x334   : > { %v9868_v20 = vor.u32 %v9867_v51, %v9864_v42 }
 0x335   : > { %v9877_v43 = vor.u32 %v9876_v47, %v9873_v57  ;;  %v9927_v19 = vrot.slane %v9925_v32, 2 }
 0x336   : > { %v9869_v13 = vsel %vm9537_vm5, %v9859_v46, %v9868_v20  ;;  %v9928_v46 = vshll.u32 %v19165_v41, 16 }
 0x337   : > { %16306 = vmatmul.mubr.msk.bf16.gmra.mrb[124].mxu1 %vm1262_vm1, %v2898_v7  ;;  %v4318_v7 = vsel %vm2769_vm4, %v4315_v48, %v4317_v9  ;;  %v9878_v16 = vsel %vm9537_vm5, %v9868_v20, %v9877_v43 }
 0x338   : > { %16309 = vmatprep.mubr.msk.bf16.mxu1 %vm1262_vm1, %v2900_v52  ;;  %v19156_v52 = vld [vmem:[%s19405_s27 + $0x158] sm:$0xff]   ;;  %v9930_v9 = vrot.slane %v9928_v46, 3 }
 0x339   : > { %v9889_v55 = vshrl.u32 %v19156_v52, 16  ;;  %v9892_v12 = vshll.u32 %v19156_v52, 16  ;;  %v19170_v52 = vld [vmem:[%s19405_s27 + $0x60] sm:$0xff]  }
 0x33a   : > { %16928 = vmatmul.mubr.msk.bf16.gmra.mrb[56].mxu0 %vm1262_vm1, %v9815_v44  ;;  %v19159_v44 = vld [vmem:[%s19405_s27 + $0x38] sm:$0xff]   ;;  %v9931_v28 = vor.u32 %v9930_v9, %v9927_v19  ;;  %v19180_v9 = vld [vmem:[%s19405_s27 + $0x1b0] sm:$0xff]  }
 0x33b   : > { %16931 = vmatprep.mubr.msk.bf16.mxu0 %vm1262_vm1, %v9824_v2  ;;  %v4321_v56 = vrot.slane %v19159_v44, 1  ;;  %v9891_v2 = vrot.slane %v9889_v55, 2  ;;  %v9894_v22 = vrot.slane %v9892_v12, 3  ;;  %v4331_v55 = vrot.slane %v19170_v52, 1 }
 0x33d   : > { %v4322_v3 = vsel %vm2769_vm4, %v4319_v15, %v4321_v56  ;;  %v9895_v36 = vor.u32 %v9894_v22, %v9891_v2  ;;  %v19171_v15 = vld [vmem:[%s19405_s27 + $0x68] sm:$0xff]   ;;  %v19172_v22 = vld [vmem:[%s19405_s27 + $0x190] sm:$0xff]  }
 0x33f   : > { %16310 = vmatmul.mubr.msk.bf16.gmra.mrb[128].mxu1 %vm1262_vm1, %v2902_v63  ;;  %v9886_v63 = vor.u32 %v9885_v23, %v9882_v35  ;;  %v9945_v23 = vrot.slane %v9943_v61, 2 }
 0x340   : > { %16313 = vmatprep.mubr.msk.bf16.mxu1 %vm1262_vm1, %v2904_v14  ;;  %v19160_v14 = vld [vmem:[%s19405_s27 + $0x160] sm:$0xff]  }
 0x341   : > { %v9898_v24 = vshrl.u32 %v19160_v14, 16  ;;  %v9901_v4 = vshll.u32 %v19160_v14, 16  ;;  %v9887_v0 = vsel %vm9537_vm5, %v9877_v43, %v9886_v63  ;;  %v9896_v17 = vsel %vm9537_vm5, %v9886_v63, %v9895_v36  ;;  %v19173_v14 = vld [vmem:[%s19405_s27 + $0x198] sm:$0xff]  }
 0x342   : > { %16932 = vmatmul.mubr.msk.bf16.gmra.mrb[60].mxu0 %vm1262_vm1, %v9833_v8  ;;  %v4323_v8 = vrot.slane %v19162_v6, 1  ;;  %v9946_v43 = vshll.u32 %v19169_v40, 16  ;;  %v9955_v63 = vshll.u32 %v19172_v22, 16 }
 0x343   : > { %16935 = vmatprep.mubr.msk.bf16.mxu0 %vm1262_vm1, %v9842_v11  ;;  %v9900_v45 = vrot.slane %v9898_v24, 2  ;;  %v9903_v30 = vrot.slane %v9901_v4, 3  ;;  %v9961_v24 = vshrl.u32 %v19173_v14, 16  ;;  %v9964_v4 = vshll.u32 %v19173_v14, 16 }
 0x344   : > { %v4324_v11 = vsel %vm2769_vm4, %v4321_v56, %v4323_v8  ;;  %v4326_v26 = vsel %vm2769_vm4, %v4323_v8, %v4325_v5  ;;  %v9948_v44 = vrot.slane %v9946_v43, 3  ;;  %v9957_v6 = vrot.slane %v9955_v63, 3  ;;  %v19175_v8 = vld [vmem:[%s19405_s27 + $0x78] sm:$0xff]  }
 0x345   : > { %v9904_v54 = vor.u32 %v9903_v30, %v9900_v45  ;;  %v9963_v30 = vrot.slane %v9961_v24, 2  ;;  %v9966_v21 = vrot.slane %v9964_v4, 3 }
 0x347   : > { %16314 = vmatmul.mubr.msk.bf16.gmra.mrb[132].mxu1 %vm1262_vm1, %v2906_v33  ;;  %v19164_v33 = vld [vmem:[%s19405_s27 + $0x170] sm:$0xff]   ;;  %v9905_v18 = vsel %vm9537_vm5, %v9895_v36, %v9904_v54  ;;  %v9914_v51 = vsel %vm9537_vm5, %v9904_v54, %v9913_v25  ;;  %v9973_v54 = vshll.u32 %v19176_v38, 16 }
 0x348   : > { %16319 = vmatprep.mubr.msk.bf16.mxu1 %vm1262_vm1, %v4314_v59  ;;  %v9916_v62 = vshrl.u32 %v19164_v33, 16  ;;  %v9919_v59 = vshll.u32 %v19164_v33, 16  ;;  %v19174_v36 = vld [vmem:[%s19405_s27 + $0x70] sm:$0xff]   ;;  %v19177_v33 = vld [vmem:[%s19405_s27 + $0x1a8] sm:$0xff]  }
 0x349   : > { %v4335_v60 = vrot.slane %v19174_v36, 1  ;;  %v9975_v1 = vrot.slane %v9973_v54, 3 }
 0x34a   : > { %16936 = vmatmul.mubr.msk.bf16.gmra.mrb[64].mxu0 %vm1262_vm1, %v9851_v27  ;;  %v9918_v29 = vrot.slane %v9916_v62, 2  ;;  %v9921_v48 = vrot.slane %v9919_v59, 3  ;;  %v19167_v27 = vld [vmem:[%s19405_s27 + $0x58] sm:$0xff]   ;;  %v9979_v62 = vshrl.u32 %v19177_v33, 16  ;;  %v9982_v59 = vshll.u32 %v19177_v33, 16 }
 0x34b   : > { %16939 = vmatprep.mubr.msk.bf16.mxu0 %vm1262_vm1, %v9860_v39  ;;  %v4329_v42 = vrot.slane %v19167_v27, 1  ;;  %v4328_v39 = vsel %vm2769_vm4, %v4325_v5, %v4327_v31 }
 0x34c   : > { %v9922_v57 = vor.u32 %v9921_v48, %v9918_v29  ;;  %v9981_v48 = vrot.slane %v9979_v62, 2  ;;  %v9984_v27 = vrot.slane %v9982_v59, 3 }
 0x34d   : > { %v4330_v47 = vsel %vm2769_vm4, %v4327_v31, %v4329_v42  ;;  %v4332_v56 = vsel %vm2769_vm4, %v4329_v42, %v4331_v55  ;;  %v19179_v31 = vld [vmem:[%s19405_s27 + $0x88] sm:$0xff]  }
 0x34e   : > { %v9923_v12 = vsel %vm9537_vm5, %v9913_v25, %v9922_v57  ;;  %v9932_v35 = vsel %vm9537_vm5, %v9922_v57, %v9931_v28  ;;  %v19178_v25 = vld [vmem:[%s19405_s27 + $0x80] sm:$0xff]   ;;  %v9991_v57 = vshll.u32 %v19180_v9, 16 }
 0x34f   : > { %16320 = vmatmul.mubr.msk.bf16.vlgmr.msra.gmra.mrb[0].mxu1 %vm1262_vm1, %v4316_v49  ;;  %v19168_v49 = vld [vmem:[%s19405_s27 + $0x180] sm:$0xff]   ;;  %v4339_v41 = vrot.slane %v19178_v25, 1 }
 0x350   : > { %17146 = vmatpush3.bf16.msra.mxu1 %v19157_v37  ;;  %16323 = vmatprep.mubr.msk.bf16.mxu1 %vm1262_vm1, %v4318_v7  ;;  %v9934_v20 = vshrl.u32 %v19168_v49, 16  ;;  %v9937_v7 = vshll.u32 %v19168_v49, 16  ;;  %v19181_v49 = vld [vmem:[%s19405_s27 + $0x1b8] sm:$0xff]   ;;  %v9993_v52 = vrot.slane %v9991_v57, 3 }
 0x352   : > { %16940 = vmatmul.mubr.msk.bf16.gmra.mrb[68].mxu0 %vm1262_vm1, %v9869_v13  ;;  %v9936_v37 = vrot.slane %v9934_v20, 2  ;;  %v9939_v34 = vrot.slane %v9937_v7, 3  ;;  %v4333_v13 = vrot.slane %v19171_v15, 1  ;;  %v9997_v20 = vshrl.u32 %v19181_v49, 16 }
 0x353   : > { %16943 = vmatprep.mubr.msk.bf16.mxu0 %vm1262_vm1, %v9878_v16  ;;  %v10000_v7 = vshll.u32 %v19181_v49, 16 }
 0x354   : > { %v9940_v16 = vor.u32 %v9939_v34, %v9936_v37  ;;  %v4334_v2 = vsel %vm2769_vm4, %v4331_v55, %v4333_v13  ;;  %v4336_v5 = vsel %vm2769_vm4, %v4333_v13, %v4335_v60  ;;  %v19183_v55 = vld [vmem:[%s19405_s27 + $0x98] sm:$0xff]   ;;  %v9999_v34 = vrot.slane %v9997_v20, 2 }
 0x355   : > { %v10002_v15 = vrot.slane %v10000_v7, 3 }
 0x356   : > { %v9941_v58 = vsel %vm9537_vm5, %v9931_v28, %v9940_v16  ;;  %v19182_v28 = vld [vmem:[%s19405_s27 + $0x90] sm:$0xff]  }
 0x357   : > { %16324 = vmatmul.mubr.msk.bf16.gmra.mrb[4].mxu1 %vm1262_vm1, %v4320_v53  ;;  %v9952_v53 = vshrl.u32 %v19172_v22, 16  ;;  %v4343_v40 = vrot.slane %v19182_v28, 1  ;;  %v19185_v22 = vld [vmem:[%s19405_s27 + $0x1c8] sm:$0xff]  }
 0x358   : > { %16327 = vmatprep.mubr.msk.bf16.mxu1 %vm1262_vm1, %v4322_v3  ;;  %v9949_v3 = vor.u32 %v9948_v44, %v9945_v23  ;;  %v19184_v44 = vld [vmem:[%s19405_s27 + $0x1c0] sm:$0xff]   ;;  %v10018_v63 = vshll.u32 %v19185_v22, 16 }
 0x359   : > { %v9954_v10 = vrot.slane %v9952_v53, 2  ;;  %v10015_v53 = vshrl.u32 %v19185_v22, 16 }
 0x35a   : > { %16944 = vmatmul.mubr.msk.bf16.gmra.mrb[72].mxu0 %vm1262_vm1, %v9887_v0  ;;  %v4337_v0 = vrot.slane %v19175_v8, 1  ;;  %v9950_v45 = vsel %vm9537_vm5, %v9940_v16, %v9949_v3  ;;  %v10009_v16 = vshll.u32 %v19184_v44, 16  ;;  %v10020_v8 = vrot.slane %v10018_v63, 3 }
 0x35b   : > { %16947 = vmatprep.mubr.msk.bf16.mxu0 %vm1262_vm1, %v9896_v17  ;;  %v9958_v17 = vor.u32 %v9957_v6, %v9954_v10  ;;  %v10017_v6 = vrot.slane %v10015_v53, 2 }
 0x35c   : > { %v4338_v50 = vsel %vm2769_vm4, %v4335_v60, %v4337_v0  ;;  %v4340_v42 = vsel %vm2769_vm4, %v4337_v0, %v4339_v41  ;;  %v10011_v36 = vrot.slane %v10009_v16, 3  ;;  %v19187_v60 = vld [vmem:[%s19405_s27 + $0xa8] sm:$0xff]  }
 0x35d   : > { %v9959_v32 = vsel %vm9537_vm5, %v9949_v3, %v9958_v17  ;;  %v19186_v3 = vld [vmem:[%s19405_s27 + $0xa0] sm:$0xff]  }
 0x35e   : > { %v4347_v14 = vrot.slane %v19186_v3, 1 }
 0x35f   : > { %16328 = vmatmul.mubr.msk.bf16.gmra.mrb[8].mxu1 %vm1262_vm1, %v4324_v11  ;;  %v9970_v11 = vshrl.u32 %v19176_v38, 16  ;;  %v19189_v38 = vld [vmem:[%s19405_s27 + $0x1d8] sm:$0xff]  }
 0x360   : > { %16331 = vmatprep.mubr.msk.bf16.mxu1 %vm1262_vm1, %v4326_v26  ;;  %v9967_v26 = vor.u32 %v9966_v21, %v9963_v30  ;;  %v19188_v21 = vld [vmem:[%s19405_s27 + $0x1d0] sm:$0xff]   ;;  %v10036_v54 = vshll.u32 %v19189_v38, 16 }
 0x361   : > { %v9972_v46 = vrot.slane %v9970_v11, 2  ;;  %v10033_v11 = vshrl.u32 %v19189_v38, 16 }
 0x362   : > { %16948 = vmatmul.mubr.msk.bf16.gmra.mrb[76].mxu0 %vm1262_vm1, %v9905_v18  ;;  %v4341_v18 = vrot.slane %v19179_v31, 1  ;;  %v9968_v29 = vsel %vm9537_vm5, %v9958_v17, %v9967_v26  ;;  %v10027_v17 = vshll.u32 %v19188_v21, 16  ;;  %v10038_v31 = vrot.slane %v10036_v54, 3 }
 0x363   : > { %16951 = vmatprep.mubr.msk.bf16.mxu0 %vm1262_vm1, %v9914_v51  ;;  %v9976_v51 = vor.u32 %v9975_v1, %v9972_v46  ;;  %v10035_v1 = vrot.slane %v10033_v11, 2 }
 0x364   : > { %v4342_v19 = vsel %vm2769_vm4, %v4339_v41, %v4341_v18  ;;  %v4344_v13 = vsel %vm2769_vm4, %v4341_v18, %v4343_v40  ;;  %v10029_v25 = vrot.slane %v10027_v17, 3  ;;  %v19191_v41 = vld [vmem:[%s19405_s27 + $0xb8] sm:$0xff]  }
 0x365   : > { %v9977_v61 = vsel %vm9537_vm5, %v9967_v26, %v9976_v51  ;;  %v19190_v26 = vld [vmem:[%s19405_s27 + $0xb0] sm:$0xff]  }
 0x366   : > { %v4351_v33 = vrot.slane %v19190_v26, 1 }
 0x367   : > { %16332 = vmatmul.mubr.msk.bf16.gmra.mrb[12].mxu1 %vm1262_vm1, %v4328_v39  ;;  %v9988_v39 = vshrl.u32 %v19180_v9, 16  ;;  %v19193_v9 = vld [vmem:[%s19405_s27 + $0x1e8] sm:$0xff]  }
 0x368   : > { %16335 = vmatprep.mubr.msk.bf16.mxu1 %vm1262_vm1, %v4330_v47  ;;  %v9985_v47 = vor.u32 %v9984_v27, %v9981_v48  ;;  %v19192_v27 = vld [vmem:[%s19405_s27 + $0x1e0] sm:$0xff]   ;;  %v10054_v57 = vshll.u32 %v19193_v9, 16 }
 0x369   : > { %v9990_v43 = vrot.slane %v9988_v39, 2  ;;  %v10051_v39 = vshrl.u32 %v19193_v9, 16 }
 0x36a   : > { %16952 = vmatmul.mubr.msk.bf16.gmra.mrb[80].mxu0 %vm1262_vm1, %v9923_v12  ;;  %v4345_v12 = vrot.slane %v19183_v55, 1  ;;  %v9986_v37 = vsel %vm9537_vm5, %v9976_v51, %v9985_v47  ;;  %v10045_v51 = vshll.u32 %v19192_v27, 16  ;;  %v10056_v55 = vrot.slane %v10054_v57, 3 }
 0x36b   : > { %16955 = vmatprep.mubr.msk.bf16.mxu0 %vm1262_vm1, %v9932_v35  ;;  %v9994_v35 = vor.u32 %v9993_v52, %v9990_v43  ;;  %v10053_v52 = vrot.slane %v10051_v39, 2 }
 0x36c   : > { %v4346_v23 = vsel %vm2769_vm4, %v4343_v40, %v4345_v12  ;;  %v4348_v0 = vsel %vm2769_vm4, %v4345_v12, %v4347_v14  ;;  %v10047_v28 = vrot.slane %v10045_v51, 3  ;;  %v19195_v40 = vld [vmem:[%s19405_s27 + $0xc8] sm:$0xff]  }
 0x36d   : > { %v9995_v24 = vsel %vm9537_vm5, %v9985_v47, %v9994_v35  ;;  %v19194_v47 = vld [vmem:[%s19405_s27 + $0xc0] sm:$0xff]  }
 0x36e   : > { %v4355_v49 = vrot.slane %v19194_v47, 1 }
 0x36f   : > { %16336 = vmatmul.mubr.msk.bf16.gmra.mrb[16].mxu1 %vm1262_vm1, %v4332_v56  ;;  %v10006_v56 = vshrl.u32 %v19184_v44, 16  ;;  %v19197_v44 = vld [vmem:[%s19405_s27 + $0x1f8] sm:$0xff]  }
 0x370   : > { %16339 = vmatprep.mubr.msk.bf16.mxu1 %vm1262_vm1, %v4334_v2  ;;  %v10003_v2 = vor.u32 %v10002_v15, %v9999_v34  ;;  %v19196_v15 = vld [vmem:[%s19405_s27 + $0x1f0] sm:$0xff]   ;;  %v10072_v16 = vshll.u32 %v19197_v44, 16 }
 0x371   : > { %v10008_v4 = vrot.slane %v10006_v56, 2  ;;  %v10069_v56 = vshrl.u32 %v19197_v44, 16 }
 0x372   : > { %16956 = vmatmul.mubr.msk.bf16.gmra.mrb[84].mxu0 %vm1262_vm1, %v9941_v58  ;;  %v4349_v58 = vrot.slane %v19187_v60, 1  ;;  %v10004_v10 = vsel %vm9537_vm5, %v9994_v35, %v10003_v2  ;;  %v10063_v35 = vshll.u32 %v19196_v15, 16  ;;  %v10074_v60 = vrot.slane %v10072_v16, 3 }
 0x373   : > { %16959 = vmatprep.mubr.msk.bf16.mxu0 %vm1262_vm1, %v9950_v45  ;;  %v10012_v45 = vor.u32 %v10011_v36, %v10008_v4  ;;  %v10071_v36 = vrot.slane %v10069_v56, 2 }
 0x374   : > { %v4350_v30 = vsel %vm2769_vm4, %v4347_v14, %v4349_v58  ;;  %v4352_v18 = vsel %vm2769_vm4, %v4349_v58, %v4351_v33  ;;  %v10065_v3 = vrot.slane %v10063_v35, 3  ;;  %v19199_v14 = vld [vmem:[%s19405_s27 + $0xd8] sm:$0xff]  }
 0x375   : > { %v10013_v62 = vsel %vm9537_vm5, %v10003_v2, %v10012_v45  ;;  %v19198_v2 = vld [vmem:[%s19405_s27 + $0xd0] sm:$0xff]  }
 0x376   : > { %v4359_v22 = vrot.slane %v19198_v2, 1 }
 0x377   : > { %16340 = vmatmul.mubr.msk.bf16.gmra.mrb[20].mxu1 %vm1262_vm1, %v4336_v5  ;;  %v10024_v5 = vshrl.u32 %v19188_v21, 16  ;;  %v19201_v21 = vld [vmem:[%s19405_s27 + $0x208] sm:$0xff]  }
 0x378   : > { %16343 = vmatprep.mubr.msk.bf16.mxu1 %vm1262_vm1, %v4338_v50  ;;  %v10021_v50 = vor.u32 %v10020_v8, %v10017_v6  ;;  %v19200_v8 = vld [vmem:[%s19405_s27 + $0x200] sm:$0xff]   ;;  %v10090_v17 = vshll.u32 %v19201_v21, 16 }
 0x379   : > { %v10026_v59 = vrot.slane %v10024_v5, 2  ;;  %v10087_v5 = vshrl.u32 %v19201_v21, 16 }
 0x37a   : > { %16960 = vmatmul.mubr.msk.bf16.gmra.mrb[88].mxu0 %vm1262_vm1, %v9959_v32  ;;  %v4353_v32 = vrot.slane %v19191_v41, 1  ;;  %v10022_v46 = vsel %vm9537_vm5, %v10012_v45, %v10021_v50  ;;  %v10081_v45 = vshll.u32 %v19200_v8, 16  ;;  %v10092_v41 = vrot.slane %v10090_v17, 3 }
 0x37b   : > { %16963 = vmatprep.mubr.msk.bf16.mxu0 %vm1262_vm1, %v9968_v29  ;;  %v10030_v29 = vor.u32 %v10029_v25, %v10026_v59  ;;  %v10089_v25 = vrot.slane %v10087_v5, 2 }
 0x37c   : > { %v4354_v48 = vsel %vm2769_vm4, %v4351_v33, %v4353_v32  ;;  %v4356_v12 = vsel %vm2769_vm4, %v4353_v32, %v4355_v49  ;;  %v10083_v26 = vrot.slane %v10081_v45, 3  ;;  %v19203_v33 = vld [vmem:[%s19405_s27 + $0xe8] sm:$0xff]  }
 0x37d   : > { %v10031_v20 = vsel %vm9537_vm5, %v10021_v50, %v10030_v29  ;;  %v19202_v50 = vld [vmem:[%s19405_s27 + $0xe0] sm:$0xff]  }
 0x37e   : > { %v4363_v38 = vrot.slane %v19202_v50, 1 }
 0x37f   : > { %16344 = vmatmul.mubr.msk.bf16.gmra.mrb[24].mxu1 %vm1262_vm1, %v4340_v42  ;;  %v10042_v42 = vshrl.u32 %v19192_v27, 16  ;;  %v19205_v27 = vld [vmem:[%s19405_s27 + $0x218] sm:$0xff]  }
 0x380   : > { %16347 = vmatprep.mubr.msk.bf16.mxu1 %vm1262_vm1, %v4342_v19  ;;  %v10039_v19 = vor.u32 %v10038_v31, %v10035_v1  ;;  %v19204_v31 = vld [vmem:[%s19405_s27 + $0x210] sm:$0xff]   ;;  %v10108_v51 = vshll.u32 %v19205_v27, 16 }
 0x381   : > { %v10044_v7 = vrot.slane %v10042_v42, 2  ;;  %v10105_v42 = vshrl.u32 %v19205_v27, 16 }
 0x382   : > { %16964 = vmatmul.mubr.msk.bf16.gmra.mrb[92].mxu0 %vm1262_vm1, %v9977_v61  ;;  %v4357_v61 = vrot.slane %v19195_v40, 1  ;;  %v10040_v43 = vsel %vm9537_vm5, %v10030_v29, %v10039_v19  ;;  %v10099_v29 = vshll.u32 %v19204_v31, 16  ;;  %v10110_v40 = vrot.slane %v10108_v51, 3  ;;  %v21110_v51 = vld [vmem:[%s19405_s27 + $0x128] sm:$0xff]  }
 0x383   : > { %16967 = vmatprep.mubr.msk.bf16.mxu0 %vm1262_vm1, %v9986_v37  ;;  %v10048_v37 = vor.u32 %v10047_v28, %v10044_v7  ;;  %v10107_v28 = vrot.slane %v10105_v42, 2 }
 0x384   : > { %v4358_v34 = vsel %vm2769_vm4, %v4355_v49, %v4357_v61  ;;  %v4360_v58 = vsel %vm2769_vm4, %v4357_v61, %v4359_v22  ;;  %v10101_v47 = vrot.slane %v10099_v29, 3  ;;  %v19207_v49 = vld [vmem:[%s19405_s27 + $0xf8] sm:$0xff]  }
 0x385   : > { %v10049_v53 = vsel %vm9537_vm5, %v10039_v19, %v10048_v37  ;;  %v19206_v19 = vld [vmem:[%s19405_s27 + $0xf0] sm:$0xff]  }
 0x386   : > { %v4367_v9 = vrot.slane %v19206_v19, 1  ;;  %v4381_v19 = vrot.slane %v21110_v51, 1 }
 0x387   : > { %16348 = vmatmul.mubr.msk.bf16.gmra.mrb[28].mxu1 %vm1262_vm1, %v4344_v13  ;;  %v10060_v13 = vshrl.u32 %v19196_v15, 16  ;;  %v19209_v15 = vld [vmem:[%s19405_s27 + $0x228] sm:$0xff]  }
 0x388   : > { %16351 = vmatprep.mubr.msk.bf16.mxu1 %vm1262_vm1, %v4346_v23  ;;  %v10057_v23 = vor.u32 %v10056_v55, %v10053_v52  ;;  %v19208_v55 = vld [vmem:[%s19405_s27 + $0x220] sm:$0xff]   ;;  %v10126_v35 = vshll.u32 %v19209_v15, 16 }
 0x389   : > { %v10062_v63 = vrot.slane %v10060_v13, 2  ;;  %v10123_v13 = vshrl.u32 %v19209_v15, 16  ;;  %v19222_v15 = vld [vmem:[%s19405_s27 + $0x30] sm:$0xff]  }
 0x38a   : > { %16968 = vmatmul.mubr.msk.bf16.gmra.mrb[96].mxu0 %vm1262_vm1, %v9995_v24  ;;  %v4361_v24 = vrot.slane %v19199_v14, 1  ;;  %v10058_v4 = vsel %vm9537_vm5, %v10048_v37, %v10057_v23  ;;  %v10117_v37 = vshll.u32 %v19208_v55, 16  ;;  %v10128_v14 = vrot.slane %v10126_v35, 3 }
 0x38b   : > { %16971 = vmatprep.mubr.msk.bf16.mxu0 %vm1262_vm1, %v10004_v10  ;;  %v10066_v10 = vor.u32 %v10065_v3, %v10062_v63  ;;  %v10125_v3 = vrot.slane %v10123_v13, 2  ;;  %v11091_v13 = vrot.slane %v19222_v15, 3 }
 0x38c   : > { %v4362_v6 = vsel %vm2769_vm4, %v4359_v22, %v4361_v24  ;;  %v4364_v32 = vsel %vm2769_vm4, %v4361_v24, %v4363_v38  ;;  %v10119_v2 = vrot.slane %v10117_v37, 3  ;;  %v19211_v22 = vld [vmem:[%s19405_s27 + $0x108] sm:$0xff]  }
 0x38d   : > { %v10067_v11 = vsel %vm9537_vm5, %v10057_v23, %v10066_v10  ;;  %v19210_v23 = vld [vmem:[%s19405_s27 + $0x100] sm:$0xff]  }
 0x38e   : > { %v4371_v44 = vrot.slane %v19210_v23, 1  ;;  %v19223_v23 = vld [vmem:[%s19405_s27 + $0x38] sm:$0xff]  }
 0x38f   : > { %16352 = vmatmul.mubr.msk.bf16.gmra.mrb[32].mxu1 %vm1262_vm1, %v4348_v0  ;;  %v10078_v0 = vshrl.u32 %v19200_v8, 16  ;;  %v19213_v8 = vld [vmem:[%s19405_s27 + $0x238] sm:$0xff]  }
 0x390   : > { %16355 = vmatprep.mubr.msk.bf16.mxu1 %vm1262_vm1, %v4350_v30  ;;  %v10075_v30 = vor.u32 %v10074_v60, %v10071_v36  ;;  %v19212_v60 = vld [vmem:[%s19405_s27 + $0x230] sm:$0xff]   ;;  %v10144_v45 = vshll.u32 %v19213_v8, 16 }
 0x391   : > { %v10080_v54 = vrot.slane %v10078_v0, 2  ;;  %v10141_v0 = vshrl.u32 %v19213_v8, 16  ;;  %v21164_v8 = vld [vmem:[%s19405_s27 + $0x158] sm:$0xff]  }
 0x392   : > { %16972 = vmatmul.mubr.msk.bf16.gmra.mrb[100].mxu0 %vm1262_vm1, %v10013_v62  ;;  %v4365_v62 = vrot.slane %v19203_v33, 1  ;;  %v10076_v59 = vsel %vm9537_vm5, %v10066_v10, %v10075_v30  ;;  %v10135_v10 = vshll.u32 %v19212_v60, 16 }
 0x393   : > { %16975 = vmatprep.mubr.msk.bf16.mxu0 %vm1262_vm1, %v10022_v46  ;;  %v10084_v46 = vor.u32 %v10083_v26, %v10080_v54  ;;  %v18479_v54 = vld [vmem:[%s19405_s27 + $0x240] ss:$0 sps:$4 sm:$0x77]   ;;  %v10143_v33 = vrot.slane %v10141_v0, 2  ;;  %v4393_v0 = vrot.slane %v21164_v8, 1 }
 0x394   : > { %v4366_v1 = vsel %vm2769_vm4, %v4363_v38, %v4365_v62  ;;  %v4368_v61 = vsel %vm2769_vm4, %v4365_v62, %v4367_v9  ;;  %v10137_v50 = vrot.slane %v10135_v10, 3  ;;  %v19215_v38 = vld [vmem:[%s19405_s27 + $0x118] sm:$0xff]   ;;  %v10146_v62 = vrot.slane %v10144_v45, 3 }
 0x395   : > { %v10085_v39 = vsel %vm9537_vm5, %v10075_v30, %v10084_v46  ;;  %v19214_v30 = vld [vmem:[%s19405_s27 + $0x110] sm:$0xff]  }
 0x396   : > { %v4375_v21 = vrot.slane %v19214_v30, 1 }
 0x397   : > { %16356 = vmatmul.mubr.msk.bf16.gmra.mrb[36].mxu1 %vm1262_vm1, %v4352_v18  ;;  %v10096_v18 = vshrl.u32 %v19204_v31, 16  ;;  %v11081_v31 = vld [vmem:[%s19405_s27 + $0x20] sm:$0x8] }
 0x398   : > { %16359 = vmatprep.mubr.msk.bf16.mxu1 %vm1262_vm1, %v4354_v48  ;;  %v10093_v48 = vor.u32 %v10092_v41, %v10089_v25 }
 0x399   : > { %v10098_v57 = vrot.slane %v10096_v18, 2  ;;  %v19216_v18 = vld [vmem:[%s19405_s27 + $0x120] sm:$0xff]  }
 0x39a   : > { %16976 = vmatmul.mubr.msk.bf16.gmra.mrb[104].mxu0 %vm1262_vm1, %v10031_v20  ;;  %v4369_v20 = vrot.slane %v19207_v49, 1  ;;  %v10094_v7 = vsel %vm9537_vm5, %v10084_v46, %v10093_v48  ;;  %v10153_v46 = vshll.u32 %v18479_v54, 16  ;;  %v4379_v29 = vrot.slane %v19216_v18, 1  ;;  %v21195_v18 = vld [vmem:[%s19405_s27 + $0x170] sm:$0xff]  }
 0x39b   : > { %16979 = vmatprep.mubr.msk.bf16.mxu0 %vm1262_vm1, %v10040_v43  ;;  %v10102_v43 = vor.u32 %v10101_v47, %v10098_v57 }
 0x39c   : > { %v4370_v52 = vsel %vm2769_vm4, %v4367_v9, %v4369_v20  ;;  %v4372_v24 = vsel %vm2769_vm4, %v4369_v20, %v4371_v44  ;;  %v10155_v42 = vrot.slane %v10153_v46, 3  ;;  %v4382_v20 = vsel %vm2769_vm4, %v4379_v29, %v4381_v19 }
 0x39d   : > { %v10103_v56 = vsel %vm9537_vm5, %v10093_v48, %v10102_v43 }
 0x39f   : > { %16360 = vmatmul.mubr.msk.bf16.gmra.mrb[40].mxu1 %vm1262_vm1, %v4356_v12  ;;  %v10114_v12 = vshrl.u32 %v19208_v55, 16  ;;  %v21128_v55 = vld [vmem:[%s19405_s27 + $0x138] sm:$0xff]  }
 0x3a0   : > { %16363 = vmatprep.mubr.msk.bf16.mxu1 %vm1262_vm1, %v4358_v34  ;;  %v10111_v34 = vor.u32 %v10110_v40, %v10107_v28  ;;  %v19219_v28 = vld [vmem:[%s19405_s27 + $0x28] sm:$0xff]  }
 0x3a1   : > { %v10116_v16 = vrot.slane %v10114_v12, 2  ;;  %v11089_v40 = vrot.slane %v19219_v28, 3  ;;  %v4385_v12 = vrot.slane %v21128_v55, 1 }
 0x3a2   : > { %16980 = vmatmul.mubr.msk.bf16.gmra.mrb[108].mxu0 %vm1262_vm1, %v10049_v53  ;;  %v4373_v53 = vrot.slane %v19211_v22, 1  ;;  %v10112_v63 = vsel %vm9537_vm5, %v10102_v43, %v10111_v34  ;;  %v21146_v22 = vld [vmem:[%s19405_s27 + $0x148] sm:$0xff]  }
 0x3a3   : > { %16983 = vmatprep.mubr.msk.bf16.mxu0 %vm1262_vm1, %v10058_v4  ;;  %v10120_v4 = vor.u32 %v10119_v2, %v10116_v16  ;;  %v11092_v2 = vsel %vm11087_vm6, %v11089_v40, %v11091_v13 }
 0x3a4   : > { %v4374_v36 = vsel %vm2769_vm4, %v4371_v44, %v4373_v53  ;;  %v11093_v44 = vrot.slane %v19223_v23, 3 }
 0x3a5   : > { %v10121_v5 = vsel %vm9537_vm5, %v10111_v34, %v10120_v4 }
 0x3a7   : > { %16364 = vmatmul.mubr.msk.bf16.gmra.mrb[44].mxu1 %vm1262_vm1, %v4360_v58  ;;  %v10132_v58 = vshrl.u32 %v19212_v60, 16 }
 0x3a8   : > { %16367 = vmatprep.mubr.msk.bf16.mxu1 %vm1262_vm1, %v4362_v6  ;;  %v10129_v6 = vor.u32 %v10128_v14, %v10125_v3  ;;  %v19226_v14 = vld [vmem:[%s19405_s27 + $0x40] sm:$0xff]  }
 0x3a9   : > { %v10134_v17 = vrot.slane %v10132_v58, 2  ;;  %v21159_v58 = vld [vmem:[%s19405_s27 + $0x150] sm:$0xff]  }
 0x3aa   : > { %16984 = vmatmul.mubr.msk.bf16.gmra.mrb[112].mxu0 %vm1262_vm1, %v10067_v11  ;;  %v4377_v11 = vrot.slane %v19215_v38, 1  ;;  %v10130_v26 = vsel %vm9537_vm5, %v10120_v4, %v10129_v6  ;;  %v4391_v10 = vrot.slane %v21159_v58, 1 }
 0x3ab   : > { %16987 = vmatprep.mubr.msk.bf16.mxu0 %vm1262_vm1, %v10076_v59  ;;  %v4376_v59 = vsel %vm2769_vm4, %v4373_v53, %v4375_v21  ;;  %v10138_v25 = vor.u32 %v10137_v50, %v10134_v17  ;;  %v4389_v53 = vrot.slane %v21146_v22, 1  ;;  %v19231_v50 = vld [vmem:[%s19405_s27 + $0x58] sm:$0xff]  }
 0x3ac   : > { %v4378_v41 = vsel %vm2769_vm4, %v4375_v21, %v4377_v11  ;;  %v4380_v47 = vsel %vm2769_vm4, %v4377_v11, %v4379_v29  ;;  %v19230_v21 = vld [vmem:[%s19405_s27 + $0x50] sm:$0xff]   ;;  %v4394_v17 = vsel %vm2769_vm4, %v4391_v10, %v4393_v0  ;;  %v11101_v38 = vrot.slane %v19231_v50, 3  ;;  %v21177_v11 = vld [vmem:[%s19405_s27 + $0x160] sm:$0xff]  }
 0x3ad   : > { %v10139_v48 = vsel %vm9537_vm5, %v10129_v6, %v10138_v25  ;;  %v4392_v30 = vsel %vm2769_vm4, %v4389_v53, %v4391_v10  ;;  %v4399_v29 = vrot.slane %v21195_v18, 1  ;;  %v19250_v50 = vld [vmem:[%s19405_s27 + $0xa0] sm:$0xff]  }
 0x3af   : > { %16368 = vmatmul.mubr.msk.bf16.gmra.mrb[48].mxu1 %vm1262_vm1, %v4364_v32  ;;  %v10150_v32 = vshrl.u32 %v18479_v54, 16  ;;  %v4395_v54 = vrot.slane %v21177_v11, 1 }
 0x3b0   : > { %16371 = vmatprep.mubr.msk.bf16.mxu1 %vm1262_vm1, %v4366_v1  ;;  %v10147_v1 = vor.u32 %v10146_v62, %v10143_v33  ;;  %v21182_v33 = vld [vmem:[%s19405_s27 + $0x168] sm:$0xff]  }
 0x3b1   : > { %v10152_v27 = vrot.slane %v10150_v32, 2  ;;  %v4397_v62 = vrot.slane %v21182_v33, 1 }
 0x3b2   : > { %16988 = vmatmul.mubr.msk.bf16.gmra.mrb[116].mxu0 %vm1262_vm1, %v10085_v39  ;;  %v10148_v9 = vsel %vm9537_vm5, %v10138_v25, %v10147_v1  ;;  %v19218_v39 = vld [vmem:[%s19405_s27 + $0x24] sm:$0xf]  ;;  %v4396_v25 = vsel %vm2769_vm4, %v4393_v0, %v4395_v54 }
 0x3b3   : > { %16991 = vmatprep.mubr.msk.bf16.mxu0 %vm1262_vm1, %v10094_v7  ;;  %v14801_v57 = vcombine.low %v11081_v31, %v19218_v39  ;;  %v10156_v49 = vor.u32 %v10155_v42, %v10152_v27  ;;  %v4398_v46 = vsel %vm2769_vm4, %v4395_v54, %v4397_v62  ;;  %v21200_v27 = vld [vmem:[%s19405_s27 + $0x178] sm:$0xff]   ;;  %v19238_v39 = vld [vmem:[%s19405_s27 + $0x70] sm:$0xff]  }
 0x3b4   : > { %v4401_v42 = vrot.slane %v21200_v27, 1 }
 0x3b5   : > { %v11088_v7 = vrot.slane %v14801_v57, 3  ;;  %v11107_v57 = vrot.slane %v19238_v39, 3  ;;  %v21285_v39 = vld [vmem:[%s19405_s27 + $0x1c0] sm:$0xff]  }
 0x3b7   : > { %16372 = vmatmul.mubr.msk.bf16.gmra.mrb[52].mxu1 %vm1262_vm1, %v4368_v61  ;;  %v21123_v61 = vld [vmem:[%s19405_s27 + $0x130] sm:$0xff]   ;;  %v11090_v37 = vsel %vm11087_vm6, %v11088_v7, %v11089_v40  ;;  %v21213_v7 = vld [vmem:[%s19405_s27 + $0x180] sm:$0xff]  }
 0x3b8   : > { %16375 = vmatprep.mubr.msk.bf16.mxu1 %vm1262_vm1, %v4370_v52  ;;  %v4383_v43 = vrot.slane %v21123_v61, 1  ;;  %v10157_v52 = vsel %vm9537_vm5, %v10147_v1, %v10156_v49  ;;  %v19235_v1 = vld [vmem:[%s19405_s27 + $0x68] sm:$0xff]   ;;  %v19239_v49 = vld [vmem:[%s19405_s27 + $0x78] sm:$0xff]   ;;  %v4403_v28 = vrot.slane %v21213_v7, 1 }
 0x3b9   : > { %v11105_v31 = vrot.slane %v19235_v1, 3 }
 0x3ba   : > { %16992 = vmatmul.mubr.msk.bf16.gmra.mrb[120].mxu0 %vm1262_vm1, %v10103_v56  ;;  %v4384_v34 = vsel %vm2769_vm4, %v4381_v19, %v4383_v43  ;;  %v4386_v35 = vsel %vm2769_vm4, %v4383_v43, %v4385_v12  ;;  %v21141_v56 = vld [vmem:[%s19405_s27 + $0x140] sm:$0xff]   ;;  %v21218_v43 = vld [vmem:[%s19405_s27 + $0x188] sm:$0xff]  }
 0x3bb   : > { %16995 = vmatprep.mubr.msk.bf16.mxu0 %vm1262_vm1, %v10112_v63  ;;  %v4387_v16 = vrot.slane %v21141_v56, 1  ;;  %v11094_v63 = vsel %vm11087_vm6, %v11091_v13, %v11093_v44  ;;  %v11108_v40 = vsel %vm11087_vm6, %v11105_v31, %v11107_v57 }
 0x3bd   : > { %v4388_v3 = vsel %vm2769_vm4, %v4385_v12, %v4387_v16  ;;  %v4390_v4 = vsel %vm2769_vm4, %v4387_v16, %v4389_v53  ;;  %v21236_v53 = vld [vmem:[%s19405_s27 + $0x198] sm:$0xff]  }
 0x3bf   : > { %16376 = vmatmul.mubr.msk.bf16.gmra.mrb[56].mxu1 %vm1262_vm1, %v4372_v24  ;;  %v11095_v24 = vrot.slane %v19226_v14, 3 }
 0x3c0   : > { %16379 = vmatprep.mubr.msk.bf16.mxu1 %vm1262_vm1, %v4374_v36  ;;  %v19227_v36 = vld [vmem:[%s19405_s27 + $0x48] sm:$0xff]  }
 0x3c1   : > { %v11097_v60 = vrot.slane %v19227_v36, 3  ;;  %v11096_v6 = vsel %vm11087_vm6, %v11093_v44, %v11095_v24  ;;  %v21231_v44 = vld [vmem:[%s19405_s27 + $0x190] sm:$0xff]  }
 0x3c2   : > { %16996 = vmatmul.mubr.msk.bf16.gmra.mrb[124].mxu0 %vm1262_vm1, %v10121_v5  ;;  %v11099_v5 = vrot.slane %v19230_v21, 3  ;;  %v4407_v16 = vrot.slane %v21231_v44, 1 }
 0x3c3   : > { %16999 = vmatprep.mubr.msk.bf16.mxu0 %vm1262_vm1, %v10130_v26  ;;  %v11098_v45 = vsel %vm11087_vm6, %v11095_v24, %v11097_v60  ;;  %v19246_v24 = vld [vmem:[%s19405_s27 + $0x90] sm:$0xff]  }
 0x3c4   : > { %v11100_v26 = vsel %vm11087_vm6, %v11097_v60, %v11099_v5  ;;  %v19247_v60 = vld [vmem:[%s19405_s27 + $0x98] sm:$0xff]  }
 0x3c5   : > { %v11117_v10 = vrot.slane %v19247_v60, 3  ;;  %v19262_v60 = vld [vmem:[%s19405_s27 + $0xd0] sm:$0xff]  }
 0x3c7   : > { %16380 = vmatmul.mubr.msk.bf16.gmra.mrb[60].mxu1 %vm1262_vm1, %v4376_v59  ;;  %v11102_v59 = vsel %vm11087_vm6, %v11099_v5, %v11101_v38 }
 0x3c8   : > { %16383 = vmatprep.mubr.msk.bf16.mxu1 %vm1262_vm1, %v4378_v41  ;;  %v19234_v41 = vld [vmem:[%s19405_s27 + $0x60] sm:$0xff]  }
 0x3c9   : > { %v11103_v32 = vrot.slane %v19234_v41, 3 }
 0x3ca   : > { %17000 = vmatmul.mubr.msk.bf16.gmra.mrb[128].mxu0 %vm1262_vm1, %v10139_v48 }
 0x3cb   : > { %17003 = vmatprep.mubr.msk.bf16.mxu0 %vm1262_vm1, %v10148_v9  ;;  %v11104_v48 = vsel %vm11087_vm6, %v11101_v38, %v11103_v32  ;;  %v11106_v19 = vsel %vm11087_vm6, %v11103_v32, %v11105_v31  ;;  %v4400_v9 = vsel %vm2769_vm4, %v4397_v62, %v4399_v29  ;;  %v11119_v38 = vrot.slane %v19250_v50, 3  ;;  %v21272_v32 = vld [vmem:[%s19405_s27 + $0x1b8] sm:$0xff]  }
 0x3cd   : > { %v11120_v41 = vsel %vm11087_vm6, %v11117_v10, %v11119_v38 }
 0x3cf   : > { %16384 = vmatmul.mubr.msk.bf16.gmra.mrb[64].mxu1 %vm1262_vm1, %v4380_v47  ;;  %v4402_v47 = vsel %vm2769_vm4, %v4399_v29, %v4401_v42  ;;  %v19254_v29 = vld [vmem:[%s19405_s27 + $0xb0] sm:$0xff]  }
 0x3d0   : > { %16387 = vmatprep.mubr.msk.bf16.mxu1 %vm1262_vm1, %v4382_v20  ;;  %v11109_v20 = vrot.slane %v19239_v49, 3  ;;  %v21290_v49 = vld [vmem:[%s19405_s27 + $0x1c8] sm:$0xff]  }
 0x3d2   : > { %17004 = vmatmul.mubr.msk.bf16.gmra.mrb[132].mxu0 %vm1262_vm1, %v10157_v52  ;;  %v4405_v52 = vrot.slane %v21218_v43, 1  ;;  %v11110_v12 = vsel %vm11087_vm6, %v11107_v57, %v11109_v20  ;;  %v4419_v57 = vrot.slane %v21285_v39, 1 }
 0x3d3   : > { %17009 = vmatprep.mubr.msk.bf16.mxu0 %vm1262_vm1, %v11090_v37  ;;  %v4404_v37 = vsel %vm2769_vm4, %v4401_v42, %v4403_v28 }
 0x3d4   : > { %v4406_v13 = vsel %vm2769_vm4, %v4403_v28, %v4405_v52  ;;  %v4408_v14 = vsel %vm2769_vm4, %v4405_v52, %v4407_v16  ;;  %v19258_v52 = vld [vmem:[%s19405_s27 + $0xc0] sm:$0xff]  }
 0x3d7   : > { %16388 = vmatmul.mubr.msk.bf16.gmra.mrb[68].mxu1 %vm1262_vm1, %v4384_v34  ;;  %v19242_v34 = vld [vmem:[%s19405_s27 + $0x80] sm:$0xff]  }
 0x3d8   : > { %16391 = vmatprep.mubr.msk.bf16.mxu1 %vm1262_vm1, %v4386_v35  ;;  %v11111_v15 = vrot.slane %v19242_v34, 3  ;;  %v19243_v35 = vld [vmem:[%s19405_s27 + $0x88] sm:$0xff]  }
 0x3d9   : > { %v11113_v23 = vrot.slane %v19243_v35, 3  ;;  %v19259_v34 = vld [vmem:[%s19405_s27 + $0xc8] sm:$0xff]  }
 0x3da   : > { %17010 = vmatmul.mubr.msk.bf16.vlgmr.msra.gmra.mrb[0].mxu0 %vm1262_vm1, %v11092_v2  ;;  %v11112_v2 = vsel %vm11087_vm6, %v11109_v20, %v11111_v15  ;;  %v4421_v20 = vrot.slane %v21290_v49, 1 }
 0x3db   : > { %17013 = vmatprep.mubr.msk.bf16.mxu0 %vm1262_vm1, %v11094_v63  ;;  %v4409_v63 = vrot.slane %v21236_v53, 1 }
 0x3dd   : > { %v4410_v36 = vsel %vm2769_vm4, %v4407_v16, %v4409_v63  ;;  %v21308_v16 = vld [vmem:[%s19405_s27 + $0x1d8] sm:$0xff]  }
 0x3df   : > { %16392 = vmatmul.mubr.msk.bf16.gmra.mrb[72].mxu1 %vm1262_vm1, %v4388_v3  ;;  %v11114_v3 = vsel %vm11087_vm6, %v11111_v15, %v11113_v23  ;;  %v11129_v15 = vrot.slane %v19259_v34, 3 }
 0x3e0   : > { %16395 = vmatprep.mubr.msk.bf16.mxu1 %vm1262_vm1, %v4390_v4  ;;  %v11115_v4 = vrot.slane %v19246_v24, 3 }
 0x3e2   : > { %17014 = vmatmul.mubr.msk.bf16.gmra.mrb[4].mxu0 %vm1262_vm1, %v11096_v6  ;;  %v21249_v6 = vld [vmem:[%s19405_s27 + $0x1a0] sm:$0xff]   ;;  %v11118_v5 = vsel %vm11087_vm6, %v11115_v4, %v11117_v10  ;;  %v11131_v10 = vrot.slane %v19262_v60, 3 }
 0x3e3   : > { %17017 = vmatprep.mubr.msk.bf16.mxu0 %vm1262_vm1, %v11098_v45  ;;  %v4411_v0 = vrot.slane %v21249_v6, 1  ;;  %v11116_v45 = vsel %vm11087_vm6, %v11113_v23, %v11115_v4  ;;  %v21381_v60 = vld [vmem:[%s19405_s27 + $0x200] sm:$0xff]  }
 0x3e4   : > { %v11132_v50 = vsel %vm11087_vm6, %v11129_v15, %v11131_v10 }
 0x3e7   : > { %16396 = vmatmul.mubr.msk.bf16.gmra.mrb[76].mxu1 %vm1262_vm1, %v4392_v30  ;;  %v21254_v30 = vld [vmem:[%s19405_s27 + $0x1a8] sm:$0xff]  }
 0x3e8   : > { %16399 = vmatprep.mubr.msk.bf16.mxu1 %vm1262_vm1, %v4394_v17  ;;  %v4413_v21 = vrot.slane %v21254_v30, 1  ;;  %v4412_v17 = vsel %vm2769_vm4, %v4409_v63, %v4411_v0 }
 0x3ea   : > { %17018 = vmatmul.mubr.msk.bf16.gmra.mrb[8].mxu0 %vm1262_vm1, %v11100_v26  ;;  %v4414_v54 = vsel %vm2769_vm4, %v4411_v0, %v4413_v21  ;;  %v19251_v26 = vld [vmem:[%s19405_s27 + $0xa8] sm:$0xff]  }
 0x3eb   : > { %17021 = vmatprep.mubr.msk.bf16.mxu0 %vm1262_vm1, %v11102_v59  ;;  %v11121_v62 = vrot.slane %v19251_v26, 3  ;;  %v21267_v59 = vld [vmem:[%s19405_s27 + $0x1b0] sm:$0xff]  }
 0x3ed   : > { %v11122_v1 = vsel %vm11087_vm6, %v11119_v38, %v11121_v62  ;;  %v21334_v38 = vld [vmem:[%s19405_s27 + $0x1e8] sm:$0xff]  }
 0x3ef   : > { %16400 = vmatmul.mubr.msk.bf16.gmra.mrb[80].mxu1 %vm1262_vm1, %v4396_v25  ;;  %v4415_v25 = vrot.slane %v21267_v59, 1 }
 0x3f0   : > { %16403 = vmatprep.mubr.msk.bf16.mxu1 %vm1262_vm1, %v4398_v46  ;;  %v4417_v46 = vrot.slane %v21272_v32, 1 }
 0x3f1   : > { %v4416_v31 = vsel %vm2769_vm4, %v4413_v21, %v4415_v25 }
 0x3f2   : > { %17022 = vmatmul.mubr.msk.bf16.gmra.mrb[12].mxu0 %vm1262_vm1, %v11104_v48  ;;  %v11123_v48 = vrot.slane %v19254_v29, 3  ;;  %v4418_v42 = vsel %vm2769_vm4, %v4415_v25, %v4417_v46 }
 0x3f3   : > { %17025 = vmatprep.mubr.msk.bf16.mxu0 %vm1262_vm1, %v11106_v19  ;;  %v19255_v19 = vld [vmem:[%s19405_s27 + $0xb8] sm:$0xff]  }
 0x3f7   : > { %16404 = vmatmul.mubr.msk.bf16.gmra.mrb[84].mxu1 %vm1262_vm1, %v4400_v9  ;;  %v11125_v9 = vrot.slane %v19255_v19, 3 }
 0x3f8   : > { %16407 = vmatprep.mubr.msk.bf16.mxu1 %vm1262_vm1, %v4402_v47  ;;  %v11124_v47 = vsel %vm11087_vm6, %v11121_v62, %v11123_v48 }
 0x3f9   : > { %v11126_v28 = vsel %vm11087_vm6, %v11123_v48, %v11125_v9 }
 0x3fa   : > { %17026 = vmatmul.mubr.msk.bf16.gmra.mrb[16].mxu0 %vm1262_vm1, %v11108_v40  ;;  %v4420_v40 = vsel %vm2769_vm4, %v4417_v46, %v4419_v57 }
 0x3fb   : > { %17029 = vmatprep.mubr.msk.bf16.mxu0 %vm1262_vm1, %v11110_v12  ;;  %v11127_v12 = vrot.slane %v19258_v52, 3 }
 0x3fd   : > { %v11128_v23 = vsel %vm11087_vm6, %v11125_v9, %v11127_v12  ;;  %v21355_v9 = vld [vmem:[%s19405_s27 + $0x1f0] sm:$0xff]  }
 0x3ff   : > { %16408 = vmatmul.mubr.msk.bf16.gmra.mrb[88].mxu1 %vm1262_vm1, %v4404_v37  ;;  %v4422_v37 = vsel %vm2769_vm4, %v4419_v57, %v4421_v20  ;;  %v4431_v57 = vrot.slane %v21355_v9, 1 }
 0x400   : > { %16411 = vmatprep.mubr.msk.bf16.mxu1 %vm1262_vm1, %v4406_v13  ;;  %v21303_v13 = vld [vmem:[%s19405_s27 + $0x1d0] sm:$0xff]  }
 0x401   : > { %v4423_v35 = vrot.slane %v21303_v13, 1 }
 0x402   : > { %17030 = vmatmul.mubr.msk.bf16.gmra.mrb[20].mxu0 %vm1262_vm1, %v11112_v2  ;;  %v4425_v2 = vrot.slane %v21308_v16, 1 }
 0x403   : > { %17033 = vmatprep.mubr.msk.bf16.mxu0 %vm1262_vm1, %v11114_v3  ;;  %v11130_v3 = vsel %vm11087_vm6, %v11127_v12, %v11129_v15  ;;  %v4424_v4 = vsel %vm2769_vm4, %v4421_v20, %v4423_v35  ;;  %v21360_v20 = vld [vmem:[%s19405_s27 + $0x1f8] sm:$0xff]  }
 0x404   : > { %v4426_v0 = vsel %vm2769_vm4, %v4423_v35, %v4425_v2  ;;  %v19270_v35 = vld [vmem:[%s19405_s27 + $0xf0] sm:$0xff]  }
 0x407   : > { %16412 = vmatmul.mubr.msk.bf16.gmra.mrb[92].mxu1 %vm1262_vm1, %v4408_v14 }
 0x408   : > { %16415 = vmatprep.mubr.msk.bf16.mxu1 %vm1262_vm1, %v4410_v36 }
 0x40a   : > { %17034 = vmatmul.mubr.msk.bf16.gmra.mrb[24].mxu0 %vm1262_vm1, %v11116_v45  ;;  %v19263_v45 = vld [vmem:[%s19405_s27 + $0xd8] sm:$0xff]  }
 0x40b   : > { %17037 = vmatprep.mubr.msk.bf16.mxu0 %vm1262_vm1, %v11118_v5  ;;  %v11133_v21 = vrot.slane %v19263_v45, 3  ;;  %v21329_v5 = vld [vmem:[%s19405_s27 + $0x1e0] sm:$0xff]   ;;  %v21386_v45 = vld [vmem:[%s19405_s27 + $0x208] sm:$0xff]  }
 0x40d   : > { %v11134_v62 = vsel %vm11087_vm6, %v11131_v10, %v11133_v21  ;;  %v4435_v10 = vrot.slane %v21381_v60, 1 }
 0x40f   : > { %16416 = vmatmul.mubr.msk.bf16.gmra.mrb[96].mxu1 %vm1262_vm1, %v4412_v17  ;;  %v4427_v17 = vrot.slane %v21329_v5, 1 }
 0x410   : > { %16419 = vmatprep.mubr.msk.bf16.mxu1 %vm1262_vm1, %v4414_v54  ;;  %v4429_v54 = vrot.slane %v21334_v38, 1 }
 0x411   : > { %v4428_v46 = vsel %vm2769_vm4, %v4425_v2, %v4427_v17 }
 0x412   : > { %17038 = vmatmul.mubr.msk.bf16.gmra.mrb[28].mxu0 %vm1262_vm1, %v11120_v41  ;;  %v4430_v48 = vsel %vm2769_vm4, %v4427_v17, %v4429_v54  ;;  %v4432_v34 = vsel %vm2769_vm4, %v4429_v54, %v4431_v57 }
 0x413   : > { %17041 = vmatprep.mubr.msk.bf16.mxu0 %vm1262_vm1, %v11122_v1 }
 0x417   : > { %16420 = vmatmul.mubr.msk.bf16.gmra.mrb[100].mxu1 %vm1262_vm1, %v4416_v31  ;;  %v19266_v31 = vld [vmem:[%s19405_s27 + $0xe0] sm:$0xff]  }
 0x418   : > { %16423 = vmatprep.mubr.msk.bf16.mxu1 %vm1262_vm1, %v4418_v42  ;;  %v11135_v29 = vrot.slane %v19266_v31, 3  ;;  %v19267_v42 = vld [vmem:[%s19405_s27 + $0xe8] sm:$0xff]  }
 0x419   : > { %v11137_v19 = vrot.slane %v19267_v42, 3 }
 0x41a   : > { %17042 = vmatmul.mubr.msk.bf16.gmra.mrb[32].mxu0 %vm1262_vm1, %v11124_v47  ;;  %v11136_v47 = vsel %vm11087_vm6, %v11133_v21, %v11135_v29  ;;  %v4437_v21 = vrot.slane %v21386_v45, 1 }
 0x41b   : > { %17045 = vmatprep.mubr.msk.bf16.mxu0 %vm1262_vm1, %v11126_v28  ;;  %v4433_v28 = vrot.slane %v21360_v20, 1  ;;  %v11138_v52 = vsel %vm11087_vm6, %v11135_v29, %v11137_v19  ;;  %v19274_v29 = vld [vmem:[%s19405_s27 + $0x100] sm:$0xff]  }
 0x41c   : > { %v4438_v42 = vsel %vm2769_vm4, %v4435_v10, %v4437_v21 }
 0x41d   : > { %v4434_v2 = vsel %vm2769_vm4, %v4431_v57, %v4433_v28 }
 0x41f   : > { %16424 = vmatmul.mubr.msk.bf16.gmra.mrb[104].mxu1 %vm1262_vm1, %v4420_v40 }
 0x420   : > { %16427 = vmatprep.mubr.msk.bf16.mxu1 %vm1262_vm1, %v4422_v37 }
 0x422   : > { %v21311_v63 = vpop.f32.mrb[0].mxu1  ;;  %17046 = vmatmul.mubr.msk.bf16.gmra.mrb[36].mxu0 %vm1262_vm1, %v11128_v23  ;;  %v11139_v23 = vrot.slane %v19270_v35, 3 }
 0x423   : > { %v21314_v14 = vpop.f32.mrb[1].mxu1  ;;  %17049 = vmatprep.mubr.msk.bf16.mxu0 %vm1262_vm1, %v11130_v3  ;;  %v19271_v3 = vld [vmem:[%s19405_s27 + $0xf8] sm:$0xff]  }
 0x424   : > { %v21317_v24 = vpop.f32.mrb[2].mxu1 }
 0x425   : > { %v21320_v36 = vpop.f32.mrb[3].mxu1 }
 0x427   : > { %16428 = vmatmul.mubr.msk.bf16.gmra.mrb[108].mxu1 %vm1262_vm1, %v4424_v4  ;;  %v11141_v4 = vrot.slane %v19271_v3, 3 }
 0x428   : > { %16431 = vmatprep.mubr.msk.bf16.mxu1 %vm1262_vm1, %v4426_v0  ;;  %v11140_v0 = vsel %vm11087_vm6, %v11137_v19, %v11139_v23  ;;  %v19275_v19 = vld [vmem:[%s19405_s27 + $0x108] sm:$0xff]  }
 0x429   : > { %v11145_v57 = vrot.slane %v19275_v19, 3 }
 0x42a   : > { %v21337_v26 = vpop.f32.mrb[4].mxu1  ;;  %17050 = vmatmul.mubr.msk.bf16.gmra.mrb[40].mxu0 %vm1262_vm1, %v11132_v50  ;;  %v11142_v50 = vsel %vm11087_vm6, %v11139_v23, %v11141_v4 }
 0x42b   : > { %v21340_v25 = vpop.f32.mrb[5].mxu1  ;;  %17053 = vmatprep.mubr.msk.bf16.mxu0 %vm1262_vm1, %v11134_v62 }
 0x42c   : > { %v21343_v41 = vpop.f32.mrb[6].mxu1 }
 0x42d   : > { %v21346_v1 = vpop.f32.mrb[7].mxu1 }
 0x42f   : > { %16432 = vmatmul.mubr.msk.bf16.gmra.mrb[112].mxu1 %vm1262_vm1, %v4428_v46  ;;  %v4436_v46 = vsel %vm2769_vm4, %v4433_v28, %v4435_v10 }
 0x430   : > { %16435 = vmatprep.mubr.msk.bf16.mxu1 %vm1262_vm1, %v4430_v48  ;;  %v11143_v48 = vrot.slane %v19274_v29, 3 }
 0x432   : > { %v21363_v40 = vpop.f32.mrb[8].mxu1  ;;  %17054 = vmatmul.mubr.msk.bf16.gmra.mrb[44].mxu0 %vm1262_vm1, %v11136_v47  ;;  %v21407_v47 = vld [vmem:[%s19405_s27 + $0x210] sm:$0xff]  }
 0x433   : > { %v21366_v12 = vpop.f32.mrb[9].mxu1  ;;  %17057 = vmatprep.mubr.msk.bf16.mxu0 %vm1262_vm1, %v11138_v52  ;;  %v4439_v28 = vrot.slane %v21407_v47, 1  ;;  %v11144_v52 = vsel %vm11087_vm6, %v11141_v4, %v11143_v48  ;;  %v19278_v4 = vld [vmem:[%s19405_s27 + $0x110] sm:$0xff]  }
 0x434   : > { %v21369_v37 = vpop.f32.mrb[10].mxu1 }
 0x435   : > { %v21372_v15 = vpop.f32.mrb[11].mxu1 }
 0x436   : > { %23107 = vst [vmem:[#allocation4_spill] sm:$0xff] %v21372_v15 }
 0x437   : > { %16436 = vmatmul.mubr.msk.bf16.gmra.mrb[116].mxu1 %vm1262_vm1, %v4432_v34  ;;  %v21412_v34 = vld [vmem:[%s19405_s27 + $0x218] sm:$0xff]  }
 0x438   : > { %16439 = vmatprep.mubr.msk.bf16.mxu1 %vm1262_vm1, %v4434_v2  ;;  %v4441_v35 = vrot.slane %v21412_v34, 1  ;;  %v11146_v2 = vsel %vm11087_vm6, %v11143_v48, %v11145_v57  ;;  %v21433_v48 = vld [vmem:[%s19405_s27 + $0x220] sm:$0xff]  }
 0x43a   : > { %v21389_v17 = vpop.f32.mrb[12].mxu1  ;;  %17058 = vmatmul.mubr.msk.bf16.gmra.mrb[48].mxu0 %vm1262_vm1, %v11140_v0  ;;  %v4440_v0 = vsel %vm2769_vm4, %v4437_v21, %v4439_v28  ;;  %v4442_v29 = vsel %vm2769_vm4, %v4439_v28, %v4441_v35  ;;  %v4443_v21 = vrot.slane %v21433_v48, 1  ;;  %v5694_v28 = vshrl.u32 %v21110_v51, 16 }
 0x43b   : > { %23108 = vst [vmem:[#allocation5_spill] sm:$0xff] %v21389_v17  ;;  %v21392_v54 = vpop.f32.mrb[13].mxu1  ;;  %17061 = vmatprep.mubr.msk.bf16.mxu0 %vm1262_vm1, %v11142_v50 }
 0x43c   : > { %23109 = vst [vmem:[#allocation6_spill] sm:$0xff] %v21392_v54  ;;  %v21395_v62 = vpop.f32.mrb[14].mxu1 }
 0x43d   : > { %23110 = vst [vmem:[#allocation9_spill] sm:$0xff] %v21395_v62  ;;  %v21398_v31 = vpop.f32.mrb[15].mxu1 }
 0x43e   : > { %23111 = vst [vmem:[#allocation7_spill] sm:$0xff] %v21398_v31  ;;  %v19282_v31 = vld [vmem:[%s19405_s27 + $0x120] sm:$0xff]  }
 0x43f   : > { %16440 = vmatmul.mubr.msk.bf16.gmra.mrb[120].mxu1 %vm1262_vm1, %v4436_v46  ;;  %v11147_v46 = vrot.slane %v19278_v4, 3  ;;  %v5697_v4 = vshll.u32 %v21110_v51, 16  ;;  %v11151_v62 = vrot.slane %v19282_v31, 3  ;;  %v5712_v31 = vshrl.u32 %v21128_v55, 16 }
 0x440   : > { %16443 = vmatprep.mubr.msk.bf16.mxu1 %vm1262_vm1, %v4438_v42  ;;  %v19279_v42 = vld [vmem:[%s19405_s27 + $0x118] sm:$0xff]  }
 0x441   : > { %v11149_v19 = vrot.slane %v19279_v42, 3  ;;  %v5699_v54 = vrot.slane %v5697_v4, 2 }
 0x442   : > { %v21415_v23 = vpop.f32.mrb[16].mxu1  ;;  %17062 = vmatmul.mubr.msk.bf16.gmra.mrb[52].mxu0 %vm1262_vm1, %v11144_v52  ;;  %v11148_v52 = vsel %vm11087_vm6, %v11145_v57, %v11147_v46  ;;  %v4444_v57 = vsel %vm2769_vm4, %v4441_v35, %v4443_v21  ;;  %v5703_v35 = vshrl.u32 %v21123_v61, 16 }
 0x443   : > { %23112 = vst [vmem:[#allocation8_spill] sm:$0xff] %v21415_v23  ;;  %v21418_v3 = vpop.f32.mrb[17].mxu1  ;;  %17065 = vmatprep.mubr.msk.bf16.mxu0 %vm1262_vm1, %v11146_v2 }
 0x444   : > { %23113 = vst [vmem:[#allocation10_spill] sm:$0xff] %v21418_v3  ;;  %v21421_v10 = vpop.f32.mrb[18].mxu1  ;;  %v18481_v3 = vld [vmem:[%s19405_s27 + $0x230] ss:$0 sps:$4 sm:$0x11]  }
 0x445   : > { %23114 = vst [vmem:[#allocation13_spill] sm:$0xff] %v21421_v10  ;;  %v21424_v50 = vpop.f32.mrb[19].mxu1 }
 0x446   : > { %23115 = vst [vmem:[#allocation11_spill] sm:$0xff] %v21424_v50  ;;  %v21438_v50 = vld [vmem:[%s19405_s27 + $0x228] sm:$0xff]  }
 0x447   : > { %16444 = vmatmul.mubr.msk.bf16.gmra.mrb[124].mxu1 %vm1262_vm1, %v4440_v0  ;;  %v4445_v2 = vrot.slane %v21438_v50, 1  ;;  %v11150_v0 = vsel %vm11087_vm6, %v11147_v46, %v11149_v19  ;;  %v19283_v46 = vld [vmem:[%s19405_s27 + $0x128] sm:$0xff]  }
 0x448   : > { %16447 = vmatprep.mubr.msk.bf16.mxu1 %vm1262_vm1, %v4442_v29  ;;  %v11153_v17 = vrot.slane %v19283_v46, 3  ;;  %v23122_v46 = vld [vmem:[#allocation3_spill] sm:$0xff] }
 0x449   : > { %v4446_v51 = vsel %vm2769_vm4, %v4443_v21, %v4445_v2  ;;  %v5715_v21 = vshll.u32 %v21128_v55, 16  ;;  %v19284_v55 = vld [vmem:[%s19405_s27 + $0x130] sm:$0xff]  }
 0x44a   : > { %v21443_v42 = vpop.f32.mrb[20].mxu1  ;;  %17066 = vmatmul.mubr.msk.bf16.gmra.mrb[56].mxu0 %vm1262_vm1, %v11148_v52  ;;  %v4447_v52 = vrot.slane %v18481_v3, 1  ;;  %v11154_v4 = vsel %vm11087_vm6, %v11151_v62, %v11153_v17 }
 0x44b   : > { %23116 = vst [vmem:[#allocation12_spill] sm:$0xff] %v21443_v42  ;;  %v21446_v29 = vpop.f32.mrb[21].mxu1  ;;  %17069 = vmatprep.mubr.msk.bf16.mxu0 %vm1262_vm1, %v11150_v0  ;;  %v5696_v42 = vrot.slane %v5694_v28, 1  ;;  %v11152_v0 = vsel %vm11087_vm6, %v11149_v19, %v11151_v62  ;;  %v5714_v62 = vrot.slane %v5712_v31, 1  ;;  %v5733_v31 = vshll.u32 %v21146_v22, 16 }
 0x44c   : > { %23117 = vst [vmem:[#allocation14_spill] sm:$0xff] %v21446_v29  ;;  %v21449_v10 = vpop.f32.mrb[22].mxu1  ;;  %v5717_v29 = vrot.slane %v5715_v21, 2 }
 0x44d   : > { %23118 = vst [vmem:[#allocation17_spill] sm:$0xff] %v21449_v10  ;;  %v21453_v23 = vpop.f32.mrb[23].mxu1  ;;  %v5700_v10 = vor.u32 %v5699_v54, %v5696_v42  ;;  %v11155_v42 = vrot.slane %v19284_v55, 3 }
 0x44e   : > { %23119 = vst [vmem:[#allocation15_spill] sm:$0xff] %v21453_v23  ;;  %v5706_v23 = vshll.u32 %v21123_v61, 16  ;;  %v4448_v61 = vsel %vm2769_vm4, %v4445_v2, %v4447_v52  ;;  %v5724_v52 = vshll.u32 %v21141_v56, 16 }
 0x44f   : > { %16448 = vmatmul.mubr.msk.bf16.gmra.mrb[128].mxu1 %vm1262_vm1, %v4444_v57 }
 0x450   : > { %16451 = vmatprep.mubr.msk.bf16.mxu1 %vm1262_vm1, %v4446_v51  ;;  %v5705_v51 = vrot.slane %v5703_v35, 1  ;;  %v5708_v19 = vrot.slane %v5706_v23, 2  ;;  %v5721_v23 = vshrl.u32 %v21141_v56, 16  ;;  %v11156_v35 = vsel %vm11087_vm6, %v11153_v17, %v11155_v42 }
 0x451   : > { %v5726_v17 = vrot.slane %v5724_v52, 2 }
 0x452   : > { %v21466_v28 = vpop.f32.mrb[24].mxu1  ;;  %17070 = vmatmul.mubr.msk.bf16.gmra.mrb[60].mxu0 %vm1262_vm1, %v11152_v0  ;;  %v5709_v2 = vor.u32 %v5708_v19, %v5705_v51  ;;  %v5718_v0 = vor.u32 %v5717_v29, %v5714_v62  ;;  %v5723_v51 = vrot.slane %v5721_v23, 1  ;;  %v19287_v62 = vld [vmem:[%s19405_s27 + $0x148] sm:$0xff]   ;;  %v5742_v23 = vshll.u32 %v21159_v58, 16 }
 0x453   : > { %23120 = vst [vmem:[#allocation16_spill] sm:$0xff] %v21466_v28  ;;  %v21469_v57 = vpop.f32.mrb[25].mxu1  ;;  %17073 = vmatprep.mubr.msk.bf16.mxu0 %vm1262_vm1, %v11154_v4  ;;  %v5701_v28 = vsel %vm5378_vm2, %v23122_v46, %v5700_v10  ;;  %v5730_v4 = vshrl.u32 %v21146_v22, 16  ;;  %v19286_v22 = vld [vmem:[%s19405_s27 + $0x140] sm:$0xff]  }
 0x454   : > { %23121 = vst [vmem:[#allocation18_spill] sm:$0xff] %v21469_v57  ;;  %v21472_v3 = vpop.f32.mrb[26].mxu1  ;;  %v19285_v57 = vld [vmem:[%s19405_s27 + $0x138] sm:$0xff]   ;;  %v5710_v56 = vsel %vm5378_vm2, %v5700_v10, %v5709_v2  ;;  %v11159_v19 = vrot.slane %v19286_v22, 3  ;;  %v5719_v55 = vsel %vm5378_vm2, %v5709_v2, %v5718_v0  ;;  %v5739_v10 = vshrl.u32 %v21159_v58, 16 }
 0x455   : > { %v21475_v54 = vpop.f32.mrb[27].mxu1  ;;  %v11157_v15 = vrot.slane %v19285_v57, 3  ;;  %v5732_v46 = vrot.slane %v5730_v4, 1  ;;  %v5748_v22 = vshrl.u32 %v21164_v8, 16  ;;  %v5751_v2 = vshll.u32 %v21164_v8, 16  ;;  %v19288_v8 = vld [vmem:[%s19405_s27 + $0x150] sm:$0xff]  }
 0x457   : > { %16452 = vmatmul.mubr.msk.bf16.gmra.mrb[132].mxu1 %vm1262_vm1, %v4448_v61  ;;  %v11158_v57 = vsel %vm11087_vm6, %v11155_v42, %v11157_v15  ;;  %v5735_v42 = vrot.slane %v5733_v31, 2  ;;  %v11160_v52 = vsel %vm11087_vm6, %v11157_v15, %v11159_v19  ;;  %v5744_v15 = vrot.slane %v5742_v23, 2 }
 0x458   : > { %16525 = vmatprep.mubr.msk.bf16.mxu1 %vm1262_vm1, %v5701_v28 }
 0x45a   : > { %v21489_v21 = vpop.f32.mrb[28].mxu1  ;;  %17074 = vmatmul.mubr.msk.bf16.gmra.mrb[64].mxu0 %vm1262_vm1, %v11156_v35  ;;  %v5727_v35 = vor.u32 %v5726_v17, %v5723_v51  ;;  %v5741_v17 = vrot.slane %v5739_v10, 1  ;;  %v5760_v10 = vshll.u32 %v21177_v11, 16 }
 0x45b   : > { %v21492_v61 = vpop.f32.mrb[29].mxu1  ;;  %17077 = vmatprep.mubr.msk.bf16.mxu0 %vm1262_vm1, %v11158_v57  ;;  %v5736_v57 = vor.u32 %v5735_v42, %v5732_v46  ;;  %v11163_v46 = vrot.slane %v19288_v8, 3  ;;  %v5766_v8 = vshrl.u32 %v21182_v33, 16 }
 0x45c   : > { %23123 = vst [vmem:[#allocation21_spill] sm:$0xff] %v21492_v61  ;;  %v21495_v28 = vpop.f32.mrb[30].mxu1  ;;  %v11161_v61 = vrot.slane %v19287_v62, 3  ;;  %v5728_v58 = vsel %vm5378_vm2, %v5718_v0, %v5727_v35  ;;  %v5750_v62 = vrot.slane %v5748_v22, 1  ;;  %v5757_v0 = vshrl.u32 %v21177_v11, 16 }
 0x45d   : > { %v21498_v29 = vpop.f32.mrb[31].mxu1  ;;  %v5737_v42 = vsel %vm5378_vm2, %v5727_v35, %v5736_v57  ;;  %v5769_v35 = vshll.u32 %v21182_v33, 16  ;;  %v19290_v33 = vld [vmem:[%s19405_s27 + $0x160] sm:$0xff]  }
 0x45e   : > { %v11162_v31 = vsel %vm11087_vm6, %v11159_v19, %v11161_v61  ;;  %v5753_v19 = vrot.slane %v5751_v2, 2  ;;  %v11164_v23 = vsel %vm11087_vm6, %v11161_v61, %v11163_v46  ;;  %v5762_v61 = vrot.slane %v5760_v10, 2 }
 0x45f   : > { %16526 = vmatmul.mubr.msk.bf16.vlgmr.msra.gmra.mrb[68].mxu1 %vm1262_vm1, %v5710_v56 }
 0x460   : > { %16529 = vmatprep.mubr.msk.bf16.mxu1 %vm1262_vm1, %v5719_v55 }
 0x462   : > { %v21511_v4 = vpop.f32.mrb[32].mxu1  ;;  %17078 = vmatmul.mubr.msk.bf16.gmra.mrb[68].mxu0 %vm1262_vm1, %v11160_v52  ;;  %v5745_v52 = vor.u32 %v5744_v15, %v5741_v17  ;;  %v5759_v17 = vrot.slane %v5757_v0, 1  ;;  %v5778_v0 = vshll.u32 %v21195_v18, 16 }
 0x463   : > { %23124 = vst [vmem:[#allocation19_spill] sm:$0xff] %v21511_v4  ;;  %v21514_v56 = vpop.f32.mrb[33].mxu1  ;;  %17081 = vmatprep.mubr.msk.bf16.mxu0 %vm1262_vm1, %v11162_v31  ;;  %v19289_v4 = vld [vmem:[%s19405_s27 + $0x158] sm:$0xff]   ;;  %v5754_v31 = vor.u32 %v5753_v19, %v5750_v62  ;;  %v5768_v19 = vrot.slane %v5766_v8, 1 }
 0x464   : > { %23125 = vst [vmem:[#allocation20_spill] sm:$0xff] %v21514_v56  ;;  %v21517_v51 = vpop.f32.mrb[34].mxu1  ;;  %v11165_v56 = vrot.slane %v19289_v4, 3  ;;  %v5746_v11 = vsel %vm5378_vm2, %v5736_v57, %v5745_v52  ;;  %v5775_v57 = vshrl.u32 %v21195_v18, 16 }
 0x465   : > { %v21520_v55 = vpop.f32.mrb[35].mxu1  ;;  %v5755_v62 = vsel %vm5378_vm2, %v5745_v52, %v5754_v31  ;;  %v5787_v52 = vshll.u32 %v21200_v27, 16 }
 0x466   : > { %v11166_v2 = vsel %vm11087_vm6, %v11163_v46, %v11165_v56  ;;  %v5771_v46 = vrot.slane %v5769_v35, 2 }
 0x467   : > { %16530 = vmatmul.mubr.msk.bf16.gmra.mrb[72].mxu1 %vm1262_vm1, %v5728_v58 }
 0x468   : > { %16533 = vmatprep.mubr.msk.bf16.mxu1 %vm1262_vm1, %v5737_v42  ;;  %v11167_v42 = vrot.slane %v19290_v33, 3  ;;  %v5784_v33 = vshrl.u32 %v21200_v27, 16  ;;  %v19292_v27 = vld [vmem:[%s19405_s27 + $0x170] sm:$0xff]  }
 0x46a   : > { %v21533_v22 = vpop.f32.mrb[36].mxu1  ;;  %17082 = vmatmul.mubr.msk.bf16.gmra.mrb[72].mxu0 %vm1262_vm1, %v11164_v23  ;;  %v5763_v23 = vor.u32 %v5762_v61, %v5759_v17  ;;  %v11168_v10 = vsel %vm11087_vm6, %v11165_v56, %v11167_v42  ;;  %v5777_v17 = vrot.slane %v5775_v57, 1  ;;  %v5780_v56 = vrot.slane %v5778_v0, 2 }
 0x46b   : > { %23126 = vst [vmem:[#allocation22_spill] sm:$0xff] %v21533_v22  ;;  %v21536_v4 = vpop.f32.mrb[37].mxu1  ;;  %17085 = vmatprep.mubr.msk.bf16.mxu0 %vm1262_vm1, %v11166_v2  ;;  %v19291_v22 = vld [vmem:[%s19405_s27 + $0x168] sm:$0xff]   ;;  %v5772_v2 = vor.u32 %v5771_v46, %v5768_v19  ;;  %v5786_v46 = vrot.slane %v5784_v33, 1  ;;  %v5796_v57 = vshll.u32 %v21213_v7, 16 }
 0x46c   : > { %23127 = vst [vmem:[#allocation25_spill] sm:$0xff] %v21536_v4  ;;  %v21539_v58 = vpop.f32.mrb[38].mxu1  ;;  %v11169_v4 = vrot.slane %v19291_v22, 3  ;;  %v5764_v18 = vsel %vm5378_vm2, %v5754_v31, %v5763_v23  ;;  %v5793_v31 = vshrl.u32 %v21213_v7, 16 }
 0x46d   : > { %v21542_v15 = vpop.f32.mrb[39].mxu1  ;;  %v5773_v19 = vsel %vm5378_vm2, %v5763_v23, %v5772_v2  ;;  %v5805_v23 = vshll.u32 %v21218_v43, 16 }
 0x46e   : > { %v11170_v35 = vsel %vm11087_vm6, %v11167_v42, %v11169_v4  ;;  %v5789_v42 = vrot.slane %v5787_v52, 2 }
 0x46f   : > { %16534 = vmatmul.mubr.msk.bf16.gmra.mrb[76].mxu1 %vm1262_vm1, %v5746_v11 }
 0x470   : > { %16537 = vmatprep.mubr.msk.bf16.mxu1 %vm1262_vm1, %v5755_v62  ;;  %v11171_v62 = vrot.slane %v19292_v27, 3  ;;  %v5802_v27 = vshrl.u32 %v21218_v43, 16  ;;  %v19294_v43 = vld [vmem:[%s19405_s27 + $0x180] sm:$0xff]  }
 0x472   : > { %v21555_v8 = vpop.f32.mrb[40].mxu1  ;;  %17086 = vmatmul.mubr.msk.bf16.gmra.mrb[76].mxu0 %vm1262_vm1, %v11168_v10  ;;  %v5781_v10 = vor.u32 %v5780_v56, %v5777_v17  ;;  %v11172_v0 = vsel %vm11087_vm6, %v11169_v4, %v11171_v62  ;;  %v5795_v17 = vrot.slane %v5793_v31, 1  ;;  %v5798_v4 = vrot.slane %v5796_v57, 2 }
 0x473   : > { %23128 = vst [vmem:[#allocation23_spill] sm:$0xff] %v21555_v8  ;;  %v21558_v22 = vpop.f32.mrb[41].mxu1  ;;  %17089 = vmatprep.mubr.msk.bf16.mxu0 %vm1262_vm1, %v11170_v35  ;;  %v19293_v8 = vld [vmem:[%s19405_s27 + $0x178] sm:$0xff]   ;;  %v5790_v35 = vor.u32 %v5789_v42, %v5786_v46  ;;  %v5804_v42 = vrot.slane %v5802_v27, 1  ;;  %v5814_v31 = vshll.u32 %v21231_v44, 16 }
 0x474   : > { %23129 = vst [vmem:[#allocation24_spill] sm:$0xff] %v21558_v22  ;;  %v21561_v11 = vpop.f32.mrb[42].mxu1  ;;  %v11173_v22 = vrot.slane %v19293_v8, 3  ;;  %v5782_v7 = vsel %vm5378_vm2, %v5772_v2, %v5781_v10  ;;  %v5811_v2 = vshrl.u32 %v21231_v44, 16 }
 0x475   : > { %v21564_v61 = vpop.f32.mrb[43].mxu1  ;;  %v5791_v46 = vsel %vm5378_vm2, %v5781_v10, %v5790_v35  ;;  %v5823_v10 = vshll.u32 %v21236_v53, 16 }
 0x476   : > { %v11174_v52 = vsel %vm11087_vm6, %v11171_v62, %v11173_v22  ;;  %v5807_v62 = vrot.slane %v5805_v23, 2 }
 0x477   : > { %16538 = vmatmul.mubr.msk.bf16.gmra.mrb[80].mxu1 %vm1262_vm1, %v5764_v18 }
 0x478   : > { %16541 = vmatprep.mubr.msk.bf16.mxu1 %vm1262_vm1, %v5773_v19  ;;  %v11175_v19 = vrot.slane %v19294_v43, 3  ;;  %v5820_v43 = vshrl.u32 %v21236_v53, 16  ;;  %v19296_v53 = vld [vmem:[%s19405_s27 + $0x190] sm:$0xff]  }
 0x47a   : > { %v21577_v33 = vpop.f32.mrb[44].mxu1  ;;  %17090 = vmatmul.mubr.msk.bf16.gmra.mrb[80].mxu0 %vm1262_vm1, %v11172_v0  ;;  %v5799_v0 = vor.u32 %v5798_v4, %v5795_v17  ;;  %v11176_v57 = vsel %vm11087_vm6, %v11173_v22, %v11175_v19  ;;  %v5813_v17 = vrot.slane %v5811_v2, 1  ;;  %v5816_v22 = vrot.slane %v5814_v31, 2 }
 0x47b   : > { %23130 = vst [vmem:[#allocation26_spill] sm:$0xff] %v21577_v33  ;;  %v21580_v8 = vpop.f32.mrb[45].mxu1  ;;  %17093 = vmatprep.mubr.msk.bf16.mxu0 %vm1262_vm1, %v11174_v52  ;;  %v19295_v33 = vld [vmem:[%s19405_s27 + $0x188] sm:$0xff]   ;;  %v5808_v52 = vor.u32 %v5807_v62, %v5804_v42  ;;  %v5822_v62 = vrot.slane %v5820_v43, 1  ;;  %v5832_v2 = vshll.u32 %v21249_v6, 16 }
 0x47c   : > { %23131 = vst [vmem:[#allocation29_spill] sm:$0xff] %v21580_v8  ;;  %v21583_v18 = vpop.f32.mrb[46].mxu1  ;;  %v11177_v8 = vrot.slane %v19295_v33, 3  ;;  %v5800_v44 = vsel %vm5378_vm2, %v5790_v35, %v5799_v0  ;;  %v5829_v35 = vshrl.u32 %v21249_v6, 16 }
 0x47d   : > { %v21586_v56 = vpop.f32.mrb[47].mxu1  ;;  %v5809_v42 = vsel %vm5378_vm2, %v5799_v0, %v5808_v52  ;;  %v5841_v0 = vshll.u32 %v21254_v30, 16 }
 0x47e   : > { %v11178_v23 = vsel %vm11087_vm6, %v11175_v19, %v11177_v8  ;;  %v5825_v19 = vrot.slane %v5823_v10, 2 }
 0x47f   : > { %16542 = vmatmul.mubr.msk.bf16.gmra.mrb[84].mxu1 %vm1262_vm1, %v5782_v7 }
 0x480   : > { %16545 = vmatprep.mubr.msk.bf16.mxu1 %vm1262_vm1, %v5791_v46  ;;  %v11179_v46 = vrot.slane %v19296_v53, 3  ;;  %v5838_v53 = vshrl.u32 %v21254_v30, 16  ;;  %v19298_v30 = vld [vmem:[%s19405_s27 + $0x1a0] sm:$0xff]  }
 0x482   : > { %v21599_v27 = vpop.f32.mrb[48].mxu1  ;;  %17094 = vmatmul.mubr.msk.bf16.gmra.mrb[84].mxu0 %vm1262_vm1, %v11176_v57  ;;  %v5817_v57 = vor.u32 %v5816_v22, %v5813_v17  ;;  %v11180_v31 = vsel %vm11087_vm6, %v11177_v8, %v11179_v46  ;;  %v5831_v17 = vrot.slane %v5829_v35, 1  ;;  %v5834_v8 = vrot.slane %v5832_v2, 2 }
 0x483   : > { %23132 = vst [vmem:[#allocation27_spill] sm:$0xff] %v21599_v27  ;;  %v21602_v33 = vpop.f32.mrb[49].mxu1  ;;  %17097 = vmatprep.mubr.msk.bf16.mxu0 %vm1262_vm1, %v11178_v23  ;;  %v19297_v27 = vld [vmem:[%s19405_s27 + $0x198] sm:$0xff]   ;;  %v5826_v23 = vor.u32 %v5825_v19, %v5822_v62  ;;  %v5840_v19 = vrot.slane %v5838_v53, 1  ;;  %v5850_v35 = vshll.u32 %v21267_v59, 16 }
 0x484   : > { %23133 = vst [vmem:[#allocation28_spill] sm:$0xff] %v21602_v33  ;;  %v21605_v7 = vpop.f32.mrb[50].mxu1  ;;  %v11181_v33 = vrot.slane %v19297_v27, 3  ;;  %v5818_v6 = vsel %vm5378_vm2, %v5808_v52, %v5817_v57  ;;  %v5847_v52 = vshrl.u32 %v21267_v59, 16 }
 0x485   : > { %v21608_v4 = vpop.f32.mrb[51].mxu1  ;;  %v5827_v62 = vsel %vm5378_vm2, %v5817_v57, %v5826_v23  ;;  %v5859_v57 = vshll.u32 %v21272_v32, 16 }
 0x486   : > { %23134 = vst [vmem:[#allocation30_spill] sm:$0xff] %v21608_v4  ;;  %v11182_v10 = vsel %vm11087_vm6, %v11179_v46, %v11181_v33  ;;  %v5843_v46 = vrot.slane %v5841_v0, 2 }
 0x487   : > { %16546 = vmatmul.mubr.msk.bf16.gmra.mrb[88].mxu1 %vm1262_vm1, %v5800_v44 }
 0x488   : > { %16549 = vmatprep.mubr.msk.bf16.mxu1 %vm1262_vm1, %v5809_v42  ;;  %v11183_v42 = vrot.slane %v19298_v30, 3  ;;  %v5856_v30 = vshrl.u32 %v21272_v32, 16  ;;  %v19300_v32 = vld [vmem:[%s19405_s27 + $0x1b0] sm:$0xff]  }
 0x48a   : > { %v21621_v43 = vpop.f32.mrb[52].mxu1  ;;  %17098 = vmatmul.mubr.msk.bf16.gmra.mrb[88].mxu0 %vm1262_vm1, %v11180_v31  ;;  %v5835_v31 = vor.u32 %v5834_v8, %v5831_v17  ;;  %v11184_v2 = vsel %vm11087_vm6, %v11181_v33, %v11183_v42  ;;  %v5849_v17 = vrot.slane %v5847_v52, 1  ;;  %v5852_v33 = vrot.slane %v5850_v35, 2 }
 0x48b   : > { %23135 = vst [vmem:[#allocation33_spill] sm:$0xff] %v21621_v43  ;;  %v21624_v27 = vpop.f32.mrb[53].mxu1  ;;  %17101 = vmatprep.mubr.msk.bf16.mxu0 %vm1262_vm1, %v11182_v10  ;;  %v19299_v43 = vld [vmem:[%s19405_s27 + $0x1a8] sm:$0xff]   ;;  %v5844_v10 = vor.u32 %v5843_v46, %v5840_v19  ;;  %v5858_v46 = vrot.slane %v5856_v30, 1  ;;  %v5877_v30 = vshll.u32 %v21290_v49, 16 }
 0x48c   : > { %23136 = vst [vmem:[#allocation31_spill] sm:$0xff] %v21624_v27  ;;  %v21627_v44 = vpop.f32.mrb[54].mxu1  ;;  %v11185_v27 = vrot.slane %v19299_v43, 3  ;;  %v5836_v59 = vsel %vm5378_vm2, %v5826_v23, %v5835_v31  ;;  %v5868_v23 = vshll.u32 %v21285_v39, 16  ;;  %v5853_v52 = vor.u32 %v5852_v33, %v5849_v17  ;;  %v19302_v17 = vld [vmem:[%s19405_s27 + $0x1c0] sm:$0xff]  }
 0x48d   : > { %23137 = vst [vmem:[#allocation32_spill] sm:$0xff] %v21627_v44  ;;  %v21630_v22 = vpop.f32.mrb[55].mxu1  ;;  %v5845_v19 = vsel %vm5378_vm2, %v5835_v31, %v5844_v10  ;;  %v5874_v31 = vshrl.u32 %v21290_v49, 16  ;;  %v11191_v33 = vrot.slane %v19302_v17, 3  ;;  %v5895_v17 = vshll.u32 %v21308_v16, 16  ;;  %v19309_v44 = vld [vmem:[%s19405_s27 + $0x1f8] sm:$0xff]  }
 0x48e   : > { %23138 = vst [vmem:[#allocation34_spill] sm:$0xff] %v21630_v22  ;;  %v11186_v0 = vsel %vm11087_vm6, %v11183_v42, %v11185_v27  ;;  %v5861_v42 = vrot.slane %v5859_v57, 2  ;;  %v19308_v22 = vld [vmem:[%s19405_s27 + $0x1f0] sm:$0xff]   ;;  %v11205_v4 = vrot.slane %v19309_v44, 3  ;;  %v19311_v44 = vld [vmem:[%s19405_s27 + $0x208] sm:$0xff]  }
 0x48f   : > { %16550 = vmatmul.mubr.msk.bf16.gmra.mrb[92].mxu1 %vm1262_vm1, %v5818_v6 }
 0x490   : > { %16553 = vmatprep.mubr.msk.bf16.mxu1 %vm1262_vm1, %v5827_v62  ;;  %v11187_v62 = vrot.slane %v19300_v32, 3 }
 0x492   : > { %v21643_v53 = vpop.f32.mrb[56].mxu1  ;;  %17102 = vmatmul.mubr.msk.bf16.gmra.mrb[92].mxu0 %vm1262_vm1, %v11184_v2  ;;  %v5865_v2 = vshrl.u32 %v21285_v39, 16  ;;  %v11188_v35 = vsel %vm11087_vm6, %v11185_v27, %v11187_v62  ;;  %v5854_v27 = vsel %vm5378_vm2, %v5844_v10, %v5853_v52  ;;  %v5892_v10 = vshrl.u32 %v21308_v16, 16 }
 0x493   : > { %23139 = vst [vmem:[#allocation35_spill] sm:$0xff] %v21643_v53  ;;  %v21646_v43 = vpop.f32.mrb[57].mxu1  ;;  %17105 = vmatprep.mubr.msk.bf16.mxu0 %vm1262_vm1, %v11186_v0  ;;  %v19301_v53 = vld [vmem:[%s19405_s27 + $0x1b8] sm:$0xff]   ;;  %v5862_v0 = vor.u32 %v5861_v42, %v5858_v46  ;;  %v19303_v46 = vld [vmem:[%s19405_s27 + $0x1c8] sm:$0xff]   ;;  %v5876_v42 = vrot.slane %v5874_v31, 1  ;;  %v5910_v16 = vshrl.u32 %v21334_v38, 16 }
 0x494   : > { %23140 = vst [vmem:[#allocation36_spill] sm:$0xff] %v21646_v43  ;;  %v21649_v6 = vpop.f32.mrb[58].mxu1  ;;  %v11189_v43 = vrot.slane %v19301_v53, 3  ;;  %v5867_v32 = vrot.slane %v5865_v2, 1  ;;  %v5883_v2 = vshrl.u32 %v21303_v13, 16 }
 0x495   : > { %23141 = vst [vmem:[#allocation2_spill] sm:$0xff] %v21649_v6  ;;  %v21652_v8 = vpop.f32.mrb[59].mxu1  ;;  %v5863_v49 = vsel %vm5378_vm2, %v5853_v52, %v5862_v0 }
 0x496   : > { %23142 = vst [vmem:[#allocation3_spill] sm:$0xff] %v21652_v8  ;;  %v11190_v53 = vsel %vm11087_vm6, %v11187_v62, %v11189_v43  ;;  %v5870_v8 = vrot.slane %v5868_v23, 2  ;;  %v11193_v62 = vrot.slane %v19303_v46, 3  ;;  %v5886_v23 = vshll.u32 %v21303_v13, 16 }
 0x497   : > { %16554 = vmatmul.mubr.msk.bf16.gmra.mrb[96].mxu1 %vm1262_vm1, %v5836_v59  ;;  %v5901_v13 = vshrl.u32 %v21329_v5, 16 }
 0x498   : > { %16557 = vmatprep.mubr.msk.bf16.mxu1 %vm1262_vm1, %v5845_v19  ;;  %v11194_v52 = vsel %vm11087_vm6, %v11191_v33, %v11193_v62 }
 0x49a   : > { %v21665_v57 = vpop.f32.mrb[60].mxu1  ;;  %17106 = vmatmul.mubr.msk.bf16.gmra.mrb[96].mxu0 %vm1262_vm1, %v11188_v35  ;;  %v5871_v35 = vor.u32 %v5870_v8, %v5867_v32  ;;  %v5904_v8 = vshll.u32 %v21329_v5, 16 }
 0x49b   : > { %23143 = vst [vmem:[#allocation37_spill] sm:$0xff] %v21665_v57  ;;  %v21668_v59 = vpop.f32.mrb[61].mxu1  ;;  %17109 = vmatprep.mubr.msk.bf16.mxu0 %vm1262_vm1, %v11190_v53  ;;  %v11192_v53 = vsel %vm11087_vm6, %v11189_v43, %v11191_v33  ;;  %v5913_v43 = vshll.u32 %v21334_v38, 16  ;;  %v5894_v33 = vrot.slane %v5892_v10, 1  ;;  %v5928_v38 = vshrl.u32 %v21360_v20, 16 }
 0x49c   : > { %23144 = vst [vmem:[#allocation38_spill] sm:$0xff] %v21668_v59  ;;  %v21671_v39 = vpop.f32.mrb[62].mxu1  ;;  %v5879_v59 = vrot.slane %v5877_v30, 2  ;;  %v5885_v30 = vrot.slane %v5883_v2, 1  ;;  %v5922_v2 = vshll.u32 %v21355_v9, 16 }
 0x49d   : > { %23145 = vst [vmem:[#allocation39_spill] sm:$0xff] %v21671_v39  ;;  %v21675_v19 = vpop.f32.mrb[63].mxu1  ;;  %v5906_v39 = vrot.slane %v5904_v8, 2  ;;  %v5930_v8 = vrot.slane %v5928_v38, 1 }
 0x49e   : > { %23146 = vst [vmem:[#allocation40_spill] sm:$0xff] %v21675_v19  ;;  %v5880_v46 = vor.u32 %v5879_v59, %v5876_v42  ;;  %v5888_v19 = vrot.slane %v5886_v23, 2  ;;  %v5919_v42 = vshrl.u32 %v21355_v9, 16  ;;  %v5912_v9 = vrot.slane %v5910_v16, 1 }
 0x49f   : > { %16558 = vmatmul.mubr.msk.bf16.gmra.mrb[100].mxu1 %vm1262_vm1, %v5854_v27  ;;  %v5872_v27 = vsel %vm5378_vm2, %v5862_v0, %v5871_v35  ;;  %v19304_v0 = vld [vmem:[%s19405_s27 + $0x1d0] sm:$0xff]   ;;  %v5924_v6 = vrot.slane %v5922_v2, 2 }
 0x4a0   : > { %16561 = vmatprep.mubr.msk.bf16.mxu1 %vm1262_vm1, %v5863_v49  ;;  %v5897_v49 = vrot.slane %v5895_v17, 2  ;;  %v11195_v23 = vrot.slane %v19304_v0, 3  ;;  %v5889_v17 = vor.u32 %v5888_v19, %v5885_v30  ;;  %v5940_v0 = vshll.u32 %v21381_v60, 16  ;;  %v19307_v30 = vld [vmem:[%s19405_s27 + $0x1e8] sm:$0xff]  }
 0x4a2   : > { %v21688_v31 = vpop.f32.mrb[64].mxu1  ;;  %17110 = vmatmul.mubr.msk.bf16.gmra.mrb[100].mxu0 %vm1262_vm1, %v11192_v53  ;;  %v5931_v53 = vshll.u32 %v21360_v20, 16  ;;  %v5898_v57 = vor.u32 %v5897_v49, %v5894_v33  ;;  %v11196_v19 = vsel %vm11087_vm6, %v11193_v62, %v11195_v23  ;;  %v5942_v33 = vrot.slane %v5940_v0, 2  ;;  %v19312_v0 = vld [vmem:[%s19405_s27 + $0x210] sm:$0xff]  }
 0x4a3   : > { %23147 = vst [vmem:[#allocation41_spill] sm:$0xff] %v21688_v31  ;;  %v21692_v32 = vpop.f32.mrb[65].mxu1  ;;  %17113 = vmatprep.mubr.msk.bf16.mxu0 %vm1262_vm1, %v11194_v52  ;;  %v5903_v31 = vrot.slane %v5901_v13, 1  ;;  %v5937_v52 = vshrl.u32 %v21381_v60, 16  ;;  %v11201_v13 = vrot.slane %v19307_v30, 3  ;;  %v11203_v60 = vrot.slane %v19308_v22, 3 }
 0x4a4   : > { %23148 = vst [vmem:[#allocation42_spill] sm:$0xff] %v21692_v32  ;;  %v21698_v59 = vpop.f32.mrb[66].mxu1  ;;  %v5881_v32 = vsel %vm5378_vm2, %v5871_v35, %v5880_v46  ;;  %v19306_v35 = vld [vmem:[%s19405_s27 + $0x1e0] sm:$0xff]   ;;  %v5890_v62 = vsel %vm5378_vm2, %v5880_v46, %v5889_v17  ;;  %v5946_v46 = vshrl.u32 %v21386_v45, 16  ;;  %v5955_v30 = vshrl.u32 %v21407_v47, 16 }
 0x4a5   : > { %23149 = vst [vmem:[#allocation43_spill] sm:$0xff] %v21698_v59  ;;  %v21702_v5 = vpop.f32.mrb[67].mxu1  ;;  %v19305_v59 = vld [vmem:[%s19405_s27 + $0x1d8] sm:$0xff]   ;;  %v11199_v20 = vrot.slane %v19306_v35, 3  ;;  %v5939_v35 = vrot.slane %v5937_v52, 1  ;;  %v19310_v22 = vld [vmem:[%s19405_s27 + $0x200] sm:$0xff]   ;;  %v21742_v52 = vsel %vm11087_vm6, %v11203_v60, %v11205_v4 }
 0x4a6   : > { %23150 = vst [vmem:[#allocation44_spill] sm:$0xff] %v21702_v5  ;;  %v11197_v10 = vrot.slane %v19305_v59, 3  ;;  %v5915_v5 = vrot.slane %v5913_v43, 2  ;;  %v5921_v59 = vrot.slane %v5919_v42, 1  ;;  %v5907_v43 = vor.u32 %v5906_v39, %v5903_v31 }
 0x4a7   : > { %16562 = vmatmul.mubr.msk.bf16.gmra.mrb[104].mxu1 %vm1262_vm1, %v5872_v27  ;;  %v5933_v27 = vrot.slane %v5931_v53, 2  ;;  %v5899_v42 = vsel %vm5378_vm2, %v5889_v17, %v5898_v57  ;;  %v11202_v39 = vsel %vm11087_vm6, %v11199_v20, %v11201_v13  ;;  %v11207_v31 = vrot.slane %v19310_v22, 3  ;;  %v21737_v17 = vld [vmem:[%s22985_s2] ss:$0 sm:$0xff] }
 0x4a8   : > { %16565 = vmatprep.mubr.msk.bf16.mxu1 %vm1262_vm1, %v5881_v32  ;;  %v11198_v16 = vsel %vm11087_vm6, %v11195_v23, %v11197_v10  ;;  %v5916_v32 = vor.u32 %v5915_v5, %v5912_v9  ;;  %v11200_v49 = vsel %vm11087_vm6, %v11197_v10, %v11199_v20  ;;  %v5925_v2 = vor.u32 %v5924_v6, %v5921_v59 }
 0x4a9   : > { %v5934_v5 = vor.u32 %v5933_v27, %v5930_v8  ;;  %v11209_v23 = vrot.slane %v19311_v44, 3  ;;  %v5908_v38 = vsel %vm5378_vm2, %v5898_v57, %v5907_v43  ;;  %v21730_v53 = vsel %vm11087_vm6, %v11201_v13, %v11203_v60 }
 0x4aa   : > { %17114 = vmatmul.mubr.msk.bf16.gmra.mrb[104].mxu0 %vm1262_vm1, %v11196_v19  ;;  %v5949_v10 = vshll.u32 %v21386_v45, 16  ;;  %v5917_v9 = vsel %vm5378_vm2, %v5907_v43, %v5916_v32  ;;  %v5943_v57 = vor.u32 %v5942_v33, %v5939_v35  ;;  %v11211_v20 = vrot.slane %v19312_v0, 3 }
 0x4ab   : > { %17117 = vmatprep.mubr.msk.bf16.mxu0 %vm1262_vm1, %v11198_v16  ;;  %v21748_v45 = vsel %vm5378_vm2, %v5916_v32, %v5925_v2  ;;  %v5958_v13 = vshll.u32 %v21407_v47, 16  ;;  %v21754_v16 = vsel %vm11087_vm6, %v11205_v4, %v11207_v31  ;;  %v21757_v43 = vsel %vm5378_vm2, %v5925_v2, %v5934_v5 }
 0x4ac   : > { %v5948_v33 = vrot.slane %v5946_v46, 1  ;;  %v5951_v47 = vrot.slane %v5949_v10, 2 }
 0x4ad   : > { %v17011_v6 = vpop.f32.mrb[0].mxu0 }
 0x4ae   : > { %v17147_v59 = vadd.f32 %v17011_v6, %v21311_v63  ;;  %v11469_v19 = vpop.f32.mrb[1].mxu0  ;;  %v21760_v63 = vsel %vm11087_vm6, %v11207_v31, %v11209_v23  ;;  %v5960_v31 = vrot.slane %v5958_v13, 2  ;;  %v5952_v10 = vor.u32 %v5951_v47, %v5948_v33  ;;  %v19313_v6 = vld [vmem:[%s19405_s27 + $0x218] sm:$0xff]  }
 0x4af   : > { %16566 = vmatmul.mubr.msk.bf16.gmra.mrb[108].mxu1 %vm1262_vm1, %v5890_v62  ;;  %v17148_v8 = vadd.f32 %v11469_v19, %v21314_v14  ;;  %v17012_v27 = vpop.f32.mrb[2].mxu0  ;;  %v21771_v62 = vsel %vm5378_vm2, %v5934_v5, %v5943_v57  ;;  %v5964_v5 = vshrl.u32 %v21412_v34, 16  ;;  %v5973_v19 = vshrl.u32 %v21433_v48, 16 }
 0x4b0   : > { %16569 = vmatprep.mubr.msk.bf16.mxu1 %vm1262_vm1, %v5899_v42  ;;  %v21763_v60 = vadd.f32 %v17147_v59, %v21737_v17  ;;  %v17149_v32 = vadd.f32 %v17012_v27, %v21317_v24  ;;  %v11472_v35 = vpop.f32.mrb[3].mxu0  ;;  %v21774_v42 = vsel %vm11087_vm6, %v11209_v23, %v11211_v20  ;;  %v5957_v24 = vrot.slane %v5955_v30, 1 }
 0x4b1   : > { %v21767_v14 = vadd.f32 %v17148_v8, %v21737_v17  ;;  %v17150_v4 = vadd.f32 %v11472_v35, %v21320_v36  ;;  %v5967_v23 = vshll.u32 %v21412_v34, 16  ;;  %v21799_v8 = vld [vmem:[%s19405_s27 + $0x220] sm:$0xff]   ;;  %v5966_v35 = vrot.slane %v5964_v5, 1 }
 0x4b2   : > { %v14874_v2 = vmul.f32 -1.442695, %v21763_v60  ;;  %v21778_v22 = vadd.f32 %v17149_v32, %v21737_v17  ;;  %17118 = vmatmul.mubr.msk.bf16.gmra.mrb[108].mxu0 %vm1262_vm1, %v11200_v49  ;;  %v11213_v49 = vrot.slane %v19313_v6, 3  ;;  %v21796_v13 = vor.u32 %v5960_v31, %v5957_v24 }
 0x4b3   : > { %v14872_v44 = vmul.f32 -1.442695, %v21767_v14  ;;  %v21783_v36 = vadd.f32 %v17150_v4, %v21737_v17  ;;  %17121 = vmatprep.mubr.msk.bf16.mxu0 %vm1262_vm1, %v11202_v39  ;;  %v5976_v39 = vshll.u32 %v21433_v48, 16  ;;  %v11215_v27 = vrot.slane %v21799_v8, 3 }
 0x4b4   : > { %18482 = vpow2.f32 %v14874_v2  ;;  %v14875_v46 = vmul.f32 -1.442695, %v21778_v22  ;;  %v5969_v33 = vrot.slane %v5967_v23, 2  ;;  %v21811_v4 = vsel %vm11087_vm6, %v11211_v20, %v11213_v49 }
 0x4b5   : > { %18484 = vpow2.f32 %v14872_v44  ;;  %v14873_v0 = vmul.f32 -1.442695, %v21783_v36  ;;  %v17015_v59 = vpop.f32.mrb[4].mxu0  ;;  %v5975_v24 = vrot.slane %v5973_v19, 1  ;;  %v5978_v31 = vrot.slane %v5976_v39, 2 }
 0x4b6   : > { %18486 = vpow2.f32 %v14875_v46  ;;  %v17151_v34 = vadd.f32 %v17015_v59, %v21337_v26  ;;  %v11485_v30 = vpop.f32.mrb[5].mxu0  ;;  %v5970_v23 = vor.u32 %v5969_v33, %v5966_v35 }
 0x4b7   : > { %16570 = vmatmul.mubr.msk.bf16.gmra.mrb[112].mxu1 %vm1262_vm1, %v5908_v38  ;;  %18488 = vpow2.f32 %v14873_v0  ;;  %v17152_v32 = vadd.f32 %v11485_v30, %v21340_v25  ;;  %v17016_v38 = vpop.f32.mrb[6].mxu0  ;;  %v21845_v19 = vor.u32 %v5978_v31, %v5975_v24 }
 0x4b8   : > { %16573 = vmatprep.mubr.msk.bf16.mxu1 %vm1262_vm1, %v5917_v9  ;;  %v21804_v48 = vadd.f32 %v17151_v34, %v21737_v17  ;;  %v17153_v26 = vadd.f32 %v17016_v38, %v21343_v41  ;;  %v11488_v47 = vpop.f32.mrb[7].mxu0  ;;  %v21808_v9 = vsel %vm5378_vm2, %v5943_v57, %v5952_v10  ;;  %v21825_v41 = vsel %vm5378_vm2, %v5952_v10, %v21796_v13  ;;  %v19315_v10 = vld [vmem:[%s19405_s27 + $0x228] sm:$0xff]  }
 0x4b9   : > { %v21814_v2 = vadd.f32 %v17152_v32, %v21737_v17  ;;  %v17154_v25 = vadd.f32 %v11488_v47, %v21346_v1  ;;  %v21830_v57 = vsel %vm11087_vm6, %v11213_v49, %v11215_v27  ;;  %v11217_v6 = vrot.slane %v19315_v10, 3 }
 0x4ba   : > { %v14878_v44 = vmul.f32 -1.442695, %v21804_v48  ;;  %v21819_v5 = vadd.f32 %v17153_v26, %v21737_v17  ;;  %17122 = vmatmul.mubr.msk.bf16.gmra.mrb[112].mxu0 %vm1262_vm1, %v21730_v53  ;;  %v5982_v53 = vshrl.u32 %v21438_v50, 16  ;;  %v5985_v49 = vshll.u32 %v21438_v50, 16 }
 0x4bb   : > { %v14876_v1 = vmul.f32 -1.442695, %v21814_v2  ;;  %v21834_v20 = vadd.f32 %v17154_v25, %v21737_v17  ;;  %17125 = vmatprep.mubr.msk.bf16.mxu0 %vm1262_vm1, %v21742_v52  ;;  %v21848_v52 = vld [vmem:[%s19405_s27 + $0x230] sm:$0xff]  }
 0x4bc   : > { %18490 = vpow2.f32 %v14878_v44  ;;  %v14879_v46 = vmul.f32 -1.442695, %v21819_v5  ;;  %v11219_v39 = vrot.slane %v21848_v52, 3  ;;  %v19317_v50 = vld [vmem:[%s19405_s27 + $0x230] ss:$0 sps:$4 sm:$0x33]  }
 0x4bd   : > { %18492 = vpow2.f32 %v14876_v1  ;;  %v14877_v0 = vmul.f32 -1.442695, %v21834_v20  ;;  %v17019_v59 = vpop.f32.mrb[8].mxu0  ;;  %v5991_v38 = vshrl.u32 %v19317_v50, 16  ;;  %v5994_v35 = vshll.u32 %v19317_v50, 16 }
 0x4be   : > { %v18483_v34 = vpop.eup %18482  ;;  %18494 = vpow2.f32 %v14879_v46  ;;  %v17155_v30 = vadd.f32 %v17019_v59, %v21363_v40  ;;  %v11501_v32 = vpop.f32.mrb[9].mxu0  ;;  %v5984_v25 = vrot.slane %v5982_v53, 1  ;;  %v5987_v46 = vrot.slane %v5985_v49, 2 }
 0x4bf   : > { %16574 = vmatmul.mubr.msk.bf16.gmra.mrb[116].mxu1 %vm1262_vm1, %v21748_v45  ;;  %v18485_v33 = vpop.eup %18484  ;;  %v12701_v26 = vadd.f32 1.0, %v18483_v34  ;;  %18496 = vpow2.f32 %v14877_v0  ;;  %v17156_v45 = vadd.f32 %v11501_v32, %v21366_v12  ;;  %v17020_v47 = vpop.f32.mrb[10].mxu0  ;;  %v23151_v0 = vld [vmem:[#allocation4_spill] sm:$0xff]  ;;  %v21898_v8 = vrot.slane %v5991_v38, 1 }
 0x4c0   : > { %16577 = vmatprep.mubr.msk.bf16.mxu1 %vm1262_vm1, %v21757_v43  ;;  %v18487_v24 = vpop.eup %18486  ;;  %v12699_v31 = vadd.f32 1.0, %v18485_v33  ;;  %v21857_v44 = vadd.f32 %v17155_v30, %v21737_v17  ;;  %v17157_v40 = vadd.f32 %v17020_v47, %v21369_v37  ;;  %v11504_v1 = vpop.f32.mrb[11].mxu0  ;;  %v21878_v30 = vsel %vm5378_vm2, %v21796_v13, %v5970_v23 }
 0x4c1   : > { %v18489_v43 = vpop.eup %18488  ;;  %18498 = vrcp.f32 %v12701_v26  ;;  %v12702_v10 = vadd.f32 1.0, %v18487_v24  ;;  %v21861_v59 = vadd.f32 %v17156_v45, %v21737_v17  ;;  %v17158_v34 = vadd.f32 %v11504_v1, %v23151_v0 }
 0x4c2   : > { %18500 = vrcp.f32 %v12699_v31  ;;  %v12700_v12 = vadd.f32 1.0, %v18489_v43  ;;  %v14882_v53 = vmul.f32 -1.442695, %v21857_v44  ;;  %v21866_v32 = vadd.f32 %v17157_v40, %v21737_v17  ;;  %17126 = vmatmul.mubr.msk.bf16.gmra.mrb[116].mxu0 %vm1262_vm1, %v21754_v16  ;;  %v21909_v43 = vld [vmem:[%s19405_s27 + $0x238] sm:$0xff]  }
 0x4c3   : > { %18502 = vrcp.f32 %v12702_v10  ;;  %v14880_v37 = vmul.f32 -1.442695, %v21861_v59  ;;  %v21872_v49 = vadd.f32 %v17158_v34, %v21737_v17  ;;  %17129 = vmatprep.mubr.msk.bf16.mxu0 %vm1262_vm1, %v21760_v63  ;;  %v21884_v16 = vsel %vm11087_vm6, %v11215_v27, %v11217_v6 }
 0x4c4   : > { %18504 = vrcp.f32 %v12700_v12  ;;  %v14883_v50 = vmul.f32 -1.442695, %v21866_v32  ;;  %v21888_v33 = vsel %vm5378_vm2, %v5970_v23, %v21845_v19  ;;  %v21896_v13 = vsel %vm11087_vm6, %v11217_v6, %v11219_v39  ;;  %v23152_v23 = vld [vmem:[#allocation5_spill] sm:$0xff]  ;;  %v23153_v6 = vld [vmem:[#allocation6_spill] sm:$0xff] }
 0x4c5   : > { %18506 = vpow2.f32 %v14882_v53  ;;  %v14881_v63 = vmul.f32 -1.442695, %v21872_v49  ;;  %v17023_v26 = vpop.f32.mrb[12].mxu0  ;;  %v21903_v24 = vor.u32 %v5987_v46, %v5984_v25  ;;  %v21905_v31 = vrot.slane %v5994_v35, 2  ;;  %v23154_v25 = vld [vmem:[#allocation9_spill] sm:$0xff] }
 0x4c6   : > { %v18491_v27 = vpop.eup %18490  ;;  %18508 = vpow2.f32 %v14880_v37  ;;  %v17159_v45 = vadd.f32 %v17023_v26, %v23152_v23  ;;  %v11517_v47 = vpop.f32.mrb[13].mxu0  ;;  %v11221_v10 = vrot.slane %v21909_v43, 3 }
 0x4c7   : > { %16578 = vmatmul.mubr.msk.bf16.gmra.mrb[120].mxu1 %vm1262_vm1, %v21771_v62  ;;  %v18493_v62 = vpop.eup %18492  ;;  %v12705_v40 = vadd.f32 1.0, %v18491_v27  ;;  %18510 = vpow2.f32 %v14883_v50  ;;  %v17160_v1 = vadd.f32 %v11517_v47, %v23153_v6  ;;  %v17024_v38 = vpop.f32.mrb[14].mxu0  ;;  %v23155_v50 = vld [vmem:[#allocation7_spill] sm:$0xff] }
 0x4c8   : > { %16581 = vmatprep.mubr.msk.bf16.mxu1 %vm1262_vm1, %v21808_v9  ;;  %v18495_v0 = vpop.eup %18494  ;;  %v12703_v34 = vadd.f32 1.0, %v18493_v62  ;;  %18512 = vpow2.f32 %v14881_v63  ;;  %v21913_v9 = vadd.f32 %v17159_v45, %v21737_v17  ;;  %v17161_v46 = vadd.f32 %v17024_v38, %v23154_v25  ;;  %v11520_v35 = vpop.f32.mrb[15].mxu0 }
 0x4c9   : > { %v18497_v12 = vpop.eup %18496  ;;  %18514 = vrcp.f32 %v12705_v40  ;;  %v12706_v53 = vadd.f32 1.0, %v18495_v0  ;;  %v21918_v37 = vadd.f32 %v17160_v1, %v21737_v17  ;;  %v17162_v26 = vadd.f32 %v11520_v35, %v23155_v50  ;;  %v23156_v50 = vld [vmem:[#allocation8_spill] sm:$0xff] }
 0x4ca   : > { %18516 = vrcp.f32 %v12703_v34  ;;  %v12704_v27 = vadd.f32 1.0, %v18497_v12  ;;  %v14886_v63 = vmul.f32 -1.442695, %v21913_v9  ;;  %v21923_v23 = vadd.f32 %v17161_v46, %v21737_v17  ;;  %17130 = vmatmul.mubr.msk.bf16.gmra.mrb[120].mxu0 %vm1262_vm1, %v21774_v42  ;;  %v21938_v42 = vld [vmem:[%s19405_s27 + $0x240] ss:$0 sps:$4 sm:$0x77]  }
 0x4cb   : > { %v18499_v45 = vpop.eup %18498  ;;  %18518 = vrcp.f32 %v12706_v53  ;;  %v14884_v47 = vmul.f32 -1.442695, %v21918_v37  ;;  %v21929_v62 = vadd.f32 %v17162_v26, %v21737_v17  ;;  %17133 = vmatprep.mubr.msk.bf16.mxu0 %vm1262_vm1, %v21811_v4  ;;  %v5997_v40 = vor.u32 %v21905_v31, %v21898_v8  ;;  %v23160_v8 = vld [vmem:[#allocation12_spill] sm:$0xff] }
 0x4cc   : > { %v18501_v6 = vpop.eup %18500  ;;  %v13109_v1 = vmul.f32 %v18499_v45, %v21763_v60  ;;  %18520 = vrcp.f32 %v12704_v27  ;;  %v14887_v38 = vmul.f32 -1.442695, %v21923_v23  ;;  %v11223_v0 = vrot.slane %v21938_v42, 3  ;;  %v23157_v45 = vld [vmem:[#allocation10_spill] sm:$0xff] }
 0x4cd   : > { %v18503_v34 = vpop.eup %18502  ;;  %v13107_v4 = vmul.f32 %v18501_v6, %v21767_v14  ;;  %18522 = vpow2.f32 %v14886_v63  ;;  %v14885_v25 = vmul.f32 -1.442695, %v21929_v62  ;;  %v17027_v46 = vpop.f32.mrb[16].mxu0  ;;  %v5989_v60 = vsel %vm5378_vm2, %v21845_v19, %v21903_v24 }
 0x4ce   : > { %v18505_v35 = vpop.eup %18504  ;;  %v15148_v12 = vpack.c.bf16 %v13109_v1, %v13109_v1  ;;  %v13110_v53 = vmul.f32 %v18503_v34, %v21778_v22  ;;  %18524 = vpow2.f32 %v14884_v47  ;;  %v17163_v26 = vadd.f32 %v17027_v46, %v23156_v50  ;;  %v11533_v14 = vpop.f32.mrb[17].mxu0 }
 0x4cf   : > { %16582 = vmatmul.mubr.msk.bf16.gmra.mrb[124].mxu1 %vm1262_vm1, %v21825_v41  ;;  %v18507_v27 = vpop.eup %18506  ;;  %v15146_v63 = vpack.c.bf16 %v13107_v4, %v13107_v4  ;;  %v13108_v41 = vmul.f32 %v18505_v35, %v21783_v36  ;;  %18526 = vpow2.f32 %v14887_v38  ;;  %v17164_v6 = vadd.f32 %v11533_v14, %v23157_v45  ;;  %v17028_v19 = vpop.f32.mrb[18].mxu0  ;;  %v23158_v35 = vld [vmem:[#allocation13_spill] sm:$0xff] }
 0x4d0   : > { %16585 = vmatprep.mubr.msk.bf16.mxu1 %vm1262_vm1, %v21878_v30  ;;  %v18509_v1 = vpop.eup %18508  ;;  %13790 = vst.msk [vmem:[%s21944_s23 + $0x8] sm:$0xf] %vm13787_vm7, %v15148_v12  ;;  %v15149_v22 = vpack.c.bf16 %v13110_v53, %v13110_v53  ;;  %v12709_v47 = vadd.f32 1.0, %v18507_v27  ;;  %18528 = vpow2.f32 %v14885_v25  ;;  %v21962_v34 = vadd.f32 %v17163_v26, %v21737_v17  ;;  %v11536_v30 = vpop.f32.mrb[19].mxu0  ;;  %v23159_v53 = vld [vmem:[#allocation11_spill] sm:$0xff] }
 0x4d1   : > { %v18511_v46 = vpop.eup %18510  ;;  %13788 = vst.msk [vmem:[%s21944_s23] sm:$0xf] %vm13787_vm7, %v15146_v63  ;;  %v15147_v36 = vpack.c.bf16 %v13108_v41, %v13108_v41  ;;  %v12707_v38 = vadd.f32 1.0, %v18509_v1  ;;  %v21967_v4 = vadd.f32 %v17164_v6, %v21737_v17  ;;  %v17165_v50 = vadd.f32 %v17028_v19, %v23158_v35 }
 0x4d2   : > { %v18513_v14 = vpop.eup %18512  ;;  %13791 = vst.msk [vmem:[%s21944_s23 + $0xc] sm:$0xf] %vm13787_vm7, %v15149_v22  ;;  %18530 = vrcp.f32 %v12709_v47  ;;  %v12710_v25 = vadd.f32 1.0, %v18511_v46  ;;  %v14890_v12 = vmul.f32 -1.442695, %v21962_v34  ;;  %v17166_v26 = vadd.f32 %v11536_v30, %v23159_v53  ;;  %17134 = vmatmul.mubr.msk.bf16.gmra.mrb[124].mxu0 %vm1262_vm1, %v21830_v57 }
 0x4d3   : > { %v18515_v27 = vpop.eup %18514  ;;  %13789 = vst.msk [vmem:[%s21944_s23 + $0x4] sm:$0xf] %vm13787_vm7, %v15147_v36  ;;  %18532 = vrcp.f32 %v12707_v38  ;;  %v12708_v63 = vadd.f32 1.0, %v18513_v14  ;;  %v14888_v41 = vmul.f32 -1.442695, %v21967_v4  ;;  %v21980_v45 = vadd.f32 %v17165_v50, %v21737_v17  ;;  %17137 = vmatprep.mubr.msk.bf16.mxu0 %vm1262_vm1, %v21884_v16  ;;  %v23161_v14 = vld [vmem:[#allocation14_spill] sm:$0xff] }
 0x4d4   : > { %v18517_v6 = vpop.eup %18516  ;;  %v13113_v19 = vmul.f32 %v18515_v27, %v21804_v48  ;;  %18534 = vrcp.f32 %v12710_v25  ;;  %v21986_v1 = vadd.f32 %v17166_v26, %v21737_v17  ;;  %v11222_v57 = vsel %vm11087_vm6, %v11219_v39, %v11221_v10 }
 0x4d5   : > { %v18519_v22 = vpop.eup %18518  ;;  %v13111_v47 = vmul.f32 %v18517_v6, %v21814_v2  ;;  %18536 = vrcp.f32 %v12708_v63  ;;  %v14891_v30 = vmul.f32 -1.442695, %v21980_v45  ;;  %v17031_v16 = vpop.f32.mrb[20].mxu0  ;;  %v5998_v48 = vsel %vm5378_vm2, %v21903_v24, %v5997_v40  ;;  %v23162_v6 = vld [vmem:[#allocation17_spill] sm:$0xff] }
 0x4d6   : > { %v18521_v52 = vpop.eup %18520  ;;  %v15152_v46 = vpack.c.bf16 %v13113_v19, %v13113_v19  ;;  %v13114_v39 = vmul.f32 %v18519_v22, %v21819_v5  ;;  %18538 = vpow2.f32 %v14890_v12  ;;  %v14889_v2 = vmul.f32 -1.442695, %v21986_v1  ;;  %v11549_v36 = vpop.f32.mrb[21].mxu0 }
 0x4d7   : > { %16586 = vmatmul.mubr.msk.bf16.gmra.mrb[128].mxu1 %vm1262_vm1, %v21888_v33  ;;  %v18523_v38 = vpop.eup %18522  ;;  %v15150_v33 = vpack.c.bf16 %v13111_v47, %v13111_v47  ;;  %v13112_v35 = vmul.f32 %v18521_v52, %v21834_v20  ;;  %18540 = vpow2.f32 %v14888_v41  ;;  %v17167_v31 = vadd.f32 %v17031_v16, %v23160_v8  ;;  %v17032_v24 = vpop.f32.mrb[22].mxu0 }
 0x4d8   : > { %16589 = vmatprep.mubr.msk.bf16.mxu1 %vm1262_vm1, %v5989_v60  ;;  %v18525_v40 = vpop.eup %18524  ;;  %13794 = vst.msk [vmem:[%s21944_s23 + $0x18] sm:$0xf] %vm13787_vm7, %v15152_v46  ;;  %v15153_v5 = vpack.c.bf16 %v13114_v39, %v13114_v39  ;;  %v12713_v50 = vadd.f32 1.0, %v18523_v38  ;;  %18542 = vpow2.f32 %v14891_v30  ;;  %v17168_v25 = vadd.f32 %v11549_v36, %v23161_v14  ;;  %v11552_v12 = vpop.f32.mrb[23].mxu0  ;;  %v23163_v30 = vld [vmem:[#allocation15_spill] sm:$0xff] }
 0x4d9   : > { %v18527_v60 = vpop.eup %18526  ;;  %13792 = vst.msk [vmem:[%s21944_s23 + $0x10] sm:$0xf] %vm13787_vm7, %v15150_v33  ;;  %v15151_v53 = vpack.c.bf16 %v13112_v35, %v13112_v35  ;;  %v12711_v20 = vadd.f32 1.0, %v18525_v40  ;;  %18544 = vpow2.f32 %v14889_v2  ;;  %v22013_v26 = vadd.f32 %v17167_v31, %v21737_v17 }
 0x4da   : > { %v18529_v27 = vpop.eup %18528  ;;  %13795 = vst.msk [vmem:[%s21944_s23 + $0x1c] sm:$0xf] %vm13787_vm7, %v15153_v5  ;;  %18546 = vrcp.f32 %v12713_v50  ;;  %v12714_v63 = vadd.f32 1.0, %v18527_v60  ;;  %v22018_v41 = vadd.f32 %v17168_v25, %v21737_v17  ;;  %v17169_v19 = vadd.f32 %v17032_v24, %v23162_v6  ;;  %17138 = vmatmul.mubr.msk.bf16.gmra.mrb[128].mxu0 %vm1262_vm1, %v21896_v13  ;;  %v23165_v60 = vld [vmem:[#allocation18_spill] sm:$0xff] }
 0x4db   : > { %13793 = vst.msk [vmem:[%s21944_s23 + $0x14] sm:$0xf] %vm13787_vm7, %v15151_v53  ;;  %18548 = vrcp.f32 %v12711_v20  ;;  %v12712_v22 = vadd.f32 1.0, %v18529_v27  ;;  %v14894_v47 = vmul.f32 -1.442695, %v22013_v26  ;;  %v17170_v16 = vadd.f32 %v11552_v12, %v23163_v30  ;;  %17141 = vmatprep.mubr.msk.bf16.mxu0 %vm1262_vm1, %v11222_v57 }
 0x4dc   : > { %v18531_v52 = vpop.eup %18530  ;;  %18550 = vrcp.f32 %v12714_v63  ;;  %v14892_v46 = vmul.f32 -1.442695, %v22018_v41  ;;  %v22030_v39 = vadd.f32 %v17169_v19, %v21737_v17  ;;  %v11224_v57 = vsel %vm11087_vm6, %v11221_v10, %v11223_v0 }
 0x4dd   : > { %v18533_v2 = vpop.eup %18532  ;;  %v13117_v13 = vmul.f32 %v18531_v52, %v21857_v44  ;;  %18552 = vrcp.f32 %v12712_v22  ;;  %v22034_v36 = vadd.f32 %v17170_v16, %v21737_v17  ;;  %v17035_v38 = vpop.f32.mrb[24].mxu0  ;;  %v23164_v44 = vld [vmem:[#allocation16_spill] sm:$0xff] }
 0x4de   : > { %v18535_v33 = vpop.eup %18534  ;;  %v13115_v35 = vmul.f32 %v18533_v2, %v21861_v59  ;;  %18554 = vpow2.f32 %v14894_v47  ;;  %v14895_v8 = vmul.f32 -1.442695, %v22030_v39  ;;  %v17171_v31 = vadd.f32 %v17035_v38, %v23164_v44  ;;  %v11565_v24 = vpop.f32.mrb[25].mxu0 }
 0x4df   : > { %16590 = vmatmul.mubr.msk.bf16.gmra.mrb[132].mxu1 %vm1262_vm1, %v5998_v48  ;;  %v18537_v40 = vpop.eup %18536  ;;  %v15156_v5 = vpack.c.bf16 %v13117_v13, %v13117_v13  ;;  %v13118_v48 = vmul.f32 %v18535_v33, %v21866_v32  ;;  %18556 = vpow2.f32 %v14892_v46  ;;  %v14893_v43 = vmul.f32 -1.442695, %v22034_v36  ;;  %v17036_v42 = vpop.f32.mrb[26].mxu0 }
 0x4e0   : > { %v18539_v10 = vpop.eup %18538  ;;  %v15154_v0 = vpack.c.bf16 %v13115_v35, %v13115_v35  ;;  %v13116_v59 = vmul.f32 %v18537_v40, %v21872_v49  ;;  %18558 = vpow2.f32 %v14895_v8  ;;  %v22049_v50 = vadd.f32 %v17171_v31, %v21737_v17  ;;  %v11568_v14 = vpop.f32.mrb[27].mxu0 }
 0x4e1   : > { %v18541_v25 = vpop.eup %18540  ;;  %13798 = vst.msk [vmem:[%s21944_s23 + $0x28] sm:$0xf] %vm13787_vm7, %v15156_v5  ;;  %v15157_v12 = vpack.c.bf16 %v13118_v48, %v13118_v48  ;;  %v12717_v32 = vadd.f32 1.0, %v18539_v10  ;;  %18560 = vpow2.f32 %v14893_v43  ;;  %v17172_v53 = vadd.f32 %v11565_v24, %v23165_v60 }
 0x4e2   : > { %v18543_v20 = vpop.eup %18542  ;;  %13796 = vst.msk [vmem:[%s21944_s23 + $0x20] sm:$0xf] %vm13787_vm7, %v15154_v0  ;;  %v15155_v27 = vpack.c.bf16 %v13116_v59, %v13116_v59  ;;  %v12715_v49 = vadd.f32 1.0, %v18541_v25  ;;  %v14898_v63 = vmul.f32 -1.442695, %v22049_v50  ;;  %v17173_v6 = vadd.f32 %v17036_v42, %v21472_v3  ;;  %17142 = vmatmul.mubr.msk.bf16.gmra.mrb[132].mxu0 %vm1262_vm1, %v11224_v57  ;;  %v23166_v59 = vld [vmem:[#allocation21_spill] sm:$0xff] }
 0x4e3   : > { %v18545_v19 = vpop.eup %18544  ;;  %13799 = vst.msk [vmem:[%s21944_s23 + $0x2c] sm:$0xf] %vm13787_vm7, %v15157_v12  ;;  %18562 = vrcp.f32 %v12717_v32  ;;  %v12718_v22 = vadd.f32 1.0, %v18543_v20  ;;  %v22062_v47 = vadd.f32 %v17172_v53, %v21737_v17  ;;  %v17174_v30 = vadd.f32 %v11568_v14, %v21475_v54 }
 0x4e4   : > { %v18547_v16 = vpop.eup %18546  ;;  %13797 = vst.msk [vmem:[%s21944_s23 + $0x24] sm:$0xf] %vm13787_vm7, %v15155_v27  ;;  %18564 = vrcp.f32 %v12715_v49  ;;  %v12716_v52 = vadd.f32 1.0, %v18545_v19  ;;  %v22068_v46 = vadd.f32 %v17173_v6, %v21737_v17 }
 0x4e5   : > { %v18549_v3 = vpop.eup %18548  ;;  %v13121_v2 = vmul.f32 %v18547_v16, %v21913_v9  ;;  %18566 = vrcp.f32 %v12718_v22  ;;  %v14896_v13 = vmul.f32 -1.442695, %v22062_v47  ;;  %v22073_v38 = vadd.f32 %v17174_v30, %v21737_v17  ;;  %v17039_v57 = vpop.f32.mrb[28].mxu0 }
 0x4e6   : > { %v18551_v33 = vpop.eup %18550  ;;  %v13119_v54 = vmul.f32 %v18549_v3, %v21918_v37  ;;  %18568 = vrcp.f32 %v12716_v52  ;;  %v14899_v35 = vmul.f32 -1.442695, %v22068_v46  ;;  %v17175_v8 = vadd.f32 %v17039_v57, %v21489_v21  ;;  %v11581_v44 = vpop.f32.mrb[29].mxu0  ;;  %v23167_v3 = vld [vmem:[#allocation19_spill] sm:$0xff] }
 0x4e7   : > { %v18553_v31 = vpop.eup %18552  ;;  %v15160_v24 = vpack.c.bf16 %v13121_v2, %v13121_v2  ;;  %v13122_v9 = vmul.f32 %v18551_v33, %v21923_v23  ;;  %18570 = vpow2.f32 %v14898_v63  ;;  %v14897_v40 = vmul.f32 -1.442695, %v22073_v38  ;;  %v17040_v5 = vpop.f32.mrb[30].mxu0 }
 0x4e8   : > { %v18555_v48 = vpop.eup %18554  ;;  %v15158_v43 = vpack.c.bf16 %v13119_v54, %v13119_v54  ;;  %v13120_v37 = vmul.f32 %v18553_v31, %v21929_v62  ;;  %18572 = vpow2.f32 %v14896_v13  ;;  %v22082_v42 = vadd.f32 %v17175_v8, %v21737_v17  ;;  %v11584_v21 = vpop.f32.mrb[31].mxu0  ;;  %v23168_v54 = vld [vmem:[#allocation20_spill] sm:$0xff] }
 0x4e9   : > { %v18557_v10 = vpop.eup %18556  ;;  %13802 = vst.msk [vmem:[%s21944_s23 + $0x38] sm:$0xf] %vm13787_vm7, %v15160_v24  ;;  %v15161_v0 = vpack.c.bf16 %v13122_v9, %v13122_v9  ;;  %v12721_v23 = vadd.f32 1.0, %v18555_v48  ;;  %18574 = vpow2.f32 %v14899_v35  ;;  %v17176_v14 = vadd.f32 %v11581_v44, %v23166_v59 }
 0x4ea   : > { %v18559_v25 = vpop.eup %18558  ;;  %13800 = vst.msk [vmem:[%s21944_s23 + $0x30] sm:$0xf] %vm13787_vm7, %v15158_v43  ;;  %v15159_v12 = vpack.c.bf16 %v13120_v37, %v13120_v37  ;;  %v12719_v62 = vadd.f32 1.0, %v18557_v10  ;;  %18576 = vpow2.f32 %v14897_v40  ;;  %v14902_v32 = vmul.f32 -1.442695, %v22082_v42 }
 0x4eb   : > { %v18561_v60 = vpop.eup %18560  ;;  %13803 = vst.msk [vmem:[%s21944_s23 + $0x3c] sm:$0xf] %vm13787_vm7, %v15161_v0  ;;  %18578 = vrcp.f32 %v12721_v23  ;;  %v12722_v53 = vadd.f32 1.0, %v18559_v25  ;;  %v22093_v20 = vadd.f32 %v17176_v14, %v21737_v17  ;;  %v17177_v27 = vadd.f32 %v17040_v5, %v21495_v28 }
 0x4ec   : > { %13801 = vst.msk [vmem:[%s21944_s23 + $0x34] sm:$0xf] %vm13787_vm7, %v15159_v12  ;;  %18580 = vrcp.f32 %v12719_v62  ;;  %v12720_v49 = vadd.f32 1.0, %v18561_v60  ;;  %v17178_v63 = vadd.f32 %v11584_v21, %v21498_v29 }
 0x4ed   : > { %v18563_v6 = vpop.eup %18562  ;;  %18582 = vrcp.f32 %v12722_v53  ;;  %v14900_v19 = vmul.f32 -1.442695, %v22093_v20  ;;  %v22101_v22 = vadd.f32 %v17177_v27, %v21737_v17  ;;  %v17043_v30 = vpop.f32.mrb[32].mxu0 }
 0x4ee   : > { %v18565_v16 = vpop.eup %18564  ;;  %v13125_v52 = vmul.f32 %v18563_v6, %v21962_v34  ;;  %18584 = vrcp.f32 %v12720_v49  ;;  %v22105_v28 = vadd.f32 %v17178_v63, %v21737_v17  ;;  %v17179_v2 = vadd.f32 %v17043_v30, %v23167_v3  ;;  %v11597_v13 = vpop.f32.mrb[33].mxu0  ;;  %v23169_v6 = vld [vmem:[#allocation22_spill] sm:$0xff]  ;;  %v23170_v3 = vld [vmem:[#allocation25_spill] sm:$0xff] }
 0x4ef   : > { %v18567_v57 = vpop.eup %18566  ;;  %v13123_v29 = vmul.f32 %v18565_v16, %v21967_v4  ;;  %18586 = vpow2.f32 %v14902_v32  ;;  %v14903_v33 = vmul.f32 -1.442695, %v22101_v22  ;;  %v17180_v35 = vadd.f32 %v11597_v13, %v23168_v54  ;;  %v17044_v8 = vpop.f32.mrb[34].mxu0 }
 0x4f0   : > { %v18569_v44 = vpop.eup %18568  ;;  %v15164_v31 = vpack.c.bf16 %v13125_v52, %v13125_v52  ;;  %v13126_v34 = vmul.f32 %v18567_v57, %v21980_v45  ;;  %18588 = vpow2.f32 %v14900_v19  ;;  %v14901_v24 = vmul.f32 -1.442695, %v22105_v28  ;;  %v11600_v9 = vpop.f32.mrb[35].mxu0 }
 0x4f1   : > { %v18571_v40 = vpop.eup %18570  ;;  %v15162_v5 = vpack.c.bf16 %v13123_v29, %v13123_v29  ;;  %v13124_v4 = vmul.f32 %v18569_v44, %v21986_v1  ;;  %18590 = vpow2.f32 %v14903_v33  ;;  %v22115_v48 = vadd.f32 %v17179_v2, %v21737_v17 }
 0x4f2   : > { %v18573_v43 = vpop.eup %18572  ;;  %13806 = vst.msk [vmem:[%s21944_s23 + $0x48] sm:$0xf] %vm13787_vm7, %v15164_v31  ;;  %v15165_v37 = vpack.c.bf16 %v13126_v34, %v13126_v34  ;;  %v12725_v45 = vadd.f32 1.0, %v18571_v40  ;;  %18592 = vpow2.f32 %v14901_v24  ;;  %v22120_v21 = vadd.f32 %v17180_v35, %v21737_v17 }
 0x4f3   : > { %v18575_v10 = vpop.eup %18574  ;;  %13804 = vst.msk [vmem:[%s21944_s23 + $0x40] sm:$0xf] %vm13787_vm7, %v15162_v5  ;;  %v15163_v0 = vpack.c.bf16 %v13124_v4, %v13124_v4  ;;  %v12723_v23 = vadd.f32 1.0, %v18573_v43  ;;  %v17181_v1 = vadd.f32 %v17044_v8, %v21517_v51  ;;  %v14906_v25 = vmul.f32 -1.442695, %v22115_v48 }
 0x4f4   : > { %v18577_v59 = vpop.eup %18576  ;;  %13807 = vst.msk [vmem:[%s21944_s23 + $0x4c] sm:$0xf] %vm13787_vm7, %v15165_v37  ;;  %18594 = vrcp.f32 %v12725_v45  ;;  %v12726_v14 = vadd.f32 1.0, %v18575_v10  ;;  %v17182_v12 = vadd.f32 %v11600_v9, %v21520_v55  ;;  %v14904_v60 = vmul.f32 -1.442695, %v22120_v21 }
 0x4f5   : > { %v18579_v62 = vpop.eup %18578  ;;  %13805 = vst.msk [vmem:[%s21944_s23 + $0x44] sm:$0xf] %vm13787_vm7, %v15163_v0  ;;  %18596 = vrcp.f32 %v12723_v23  ;;  %v12724_v32 = vadd.f32 1.0, %v18577_v59  ;;  %v22133_v53 = vadd.f32 %v17181_v1, %v21737_v17  ;;  %v17047_v51 = vpop.f32.mrb[36].mxu0 }
 0x4f6   : > { %v18581_v27 = vpop.eup %18580  ;;  %v13129_v49 = vmul.f32 %v18579_v62, %v22013_v26  ;;  %18598 = vrcp.f32 %v12726_v14  ;;  %v22137_v63 = vadd.f32 %v17182_v12, %v21737_v17  ;;  %v17183_v55 = vadd.f32 %v17047_v51, %v23169_v6  ;;  %v11613_v19 = vpop.f32.mrb[37].mxu0  ;;  %v23171_v14 = vld [vmem:[#allocation23_spill] sm:$0xff] }
 0x4f7   : > { %v18583_v30 = vpop.eup %18582  ;;  %v13127_v16 = vmul.f32 %v18581_v27, %v22018_v41  ;;  %18600 = vrcp.f32 %v12724_v32  ;;  %v14907_v52 = vmul.f32 -1.442695, %v22133_v53  ;;  %v17184_v2 = vadd.f32 %v11613_v19, %v23170_v3  ;;  %v17048_v13 = vpop.f32.mrb[38].mxu0 }
 0x4f8   : > { %v18585_v57 = vpop.eup %18584  ;;  %v15168_v29 = vpack.c.bf16 %v13129_v49, %v13129_v49  ;;  %v13130_v26 = vmul.f32 %v18583_v30, %v22030_v39  ;;  %18602 = vpow2.f32 %v14906_v25  ;;  %v14905_v33 = vmul.f32 -1.442695, %v22137_v63  ;;  %v11616_v54 = vpop.f32.mrb[39].mxu0 }
 0x4f9   : > { %v18587_v35 = vpop.eup %18586  ;;  %v15166_v8 = vpack.c.bf16 %v13127_v16, %v13127_v16  ;;  %v13128_v41 = vmul.f32 %v18585_v57, %v22034_v36  ;;  %18604 = vpow2.f32 %v14904_v60  ;;  %v22147_v44 = vadd.f32 %v17183_v55, %v21737_v17  ;;  %v23172_v60 = vld [vmem:[#allocation24_spill] sm:$0xff] }
 0x4fa   : > { %v18589_v31 = vpop.eup %18588  ;;  %13810 = vst.msk [vmem:[%s21944_s23 + $0x58] sm:$0xf] %vm13787_vm7, %v15168_v29  ;;  %v15169_v34 = vpack.c.bf16 %v13130_v26, %v13130_v26  ;;  %v12729_v39 = vadd.f32 1.0, %v18587_v35  ;;  %18606 = vpow2.f32 %v14907_v52  ;;  %v22152_v24 = vadd.f32 %v17184_v2, %v21737_v17 }
 0x4fb   : > { %v18591_v9 = vpop.eup %18590  ;;  %13808 = vst.msk [vmem:[%s21944_s23 + $0x50] sm:$0xf] %vm13787_vm7, %v15166_v8  ;;  %v15167_v40 = vpack.c.bf16 %v13128_v41, %v13128_v41  ;;  %v12727_v5 = vadd.f32 1.0, %v18589_v31  ;;  %18608 = vpow2.f32 %v14905_v33  ;;  %v14910_v43 = vmul.f32 -1.442695, %v22147_v44 }
 0x4fc   : > { %v18593_v36 = vpop.eup %18592  ;;  %13811 = vst.msk [vmem:[%s21944_s23 + $0x5c] sm:$0xf] %vm13787_vm7, %v15169_v34  ;;  %18610 = vrcp.f32 %v12729_v39  ;;  %v12730_v4 = vadd.f32 1.0, %v18591_v9  ;;  %v17185_v37 = vadd.f32 %v17048_v13, %v21539_v58  ;;  %v14908_v10 = vmul.f32 -1.442695, %v22152_v24 }
 0x4fd   : > { %13809 = vst.msk [vmem:[%s21944_s23 + $0x54] sm:$0xf] %vm13787_vm7, %v15167_v40  ;;  %18612 = vrcp.f32 %v12727_v5  ;;  %v12728_v45 = vadd.f32 1.0, %v18593_v36  ;;  %v17186_v0 = vadd.f32 %v11616_v54, %v21542_v15  ;;  %v17051_v23 = vpop.f32.mrb[40].mxu0  ;;  %v22199_v40 = vld [vmem:[%s22985_s2] ss:$0 sm:$0xff] }
 0x4fe   : > { %v18595_v1 = vpop.eup %18594  ;;  %18614 = vrcp.f32 %v12730_v4  ;;  %v22165_v59 = vadd.f32 %v17185_v37, %v21737_v17  ;;  %v17187_v25 = vadd.f32 %v17051_v23, %v23171_v14  ;;  %v11629_v12 = vpop.f32.mrb[41].mxu0  ;;  %v23173_v5 = vld [vmem:[#allocation26_spill] sm:$0xff] }
 0x4ff   : > { %v18597_v62 = vpop.eup %18596  ;;  %v13133_v58 = vmul.f32 %v18595_v1, %v22049_v50  ;;  %18616 = vrcp.f32 %v12728_v45  ;;  %v22170_v32 = vadd.f32 %v17186_v0, %v21737_v17  ;;  %v17188_v51 = vadd.f32 %v11629_v12, %v23172_v60  ;;  %v17052_v27 = vpop.f32.mrb[42].mxu0  ;;  %v23174_v45 = vld [vmem:[#allocation29_spill] sm:$0xff] }
 0x500   : > { %v18599_v15 = vpop.eup %18598  ;;  %v13131_v49 = vmul.f32 %v18597_v62, %v22062_v47  ;;  %18618 = vpow2.f32 %v14910_v43  ;;  %v14911_v6 = vmul.f32 -1.442695, %v22165_v59  ;;  %v22176_v55 = vadd.f32 %v17187_v25, %v21737_v17  ;;  %v11632_v19 = vpop.f32.mrb[43].mxu0 }
 0x501   : > { %v18601_v30 = vpop.eup %18600  ;;  %v15172_v50 = vpack.c.bf16 %v13133_v58, %v13133_v58  ;;  %v13134_v16 = vmul.f32 %v18599_v15, %v22068_v46  ;;  %18620 = vpow2.f32 %v14908_v10  ;;  %v14909_v52 = vmul.f32 -1.442695, %v22170_v32 }
 0x502   : > { %v18603_v3 = vpop.eup %18602  ;;  %v15170_v2 = vpack.c.bf16 %v13131_v49, %v13131_v49  ;;  %v13132_v47 = vmul.f32 %v18601_v30, %v22073_v38  ;;  %18622 = vpow2.f32 %v14911_v6  ;;  %v14914_v13 = vmul.f32 -1.442695, %v22176_v55 }
 0x503   : > { %v18605_v57 = vpop.eup %18604  ;;  %13814 = vst.msk [vmem:[%s21944_s23 + $0x68] sm:$0xf] %vm13787_vm7, %v15172_v50  ;;  %v15173_v29 = vpack.c.bf16 %v13134_v16, %v13134_v16  ;;  %v12733_v26 = vadd.f32 1.0, %v18603_v3  ;;  %18624 = vpow2.f32 %v14909_v52  ;;  %v22185_v46 = vadd.f32 %v17188_v51, %v21737_v17 }
 0x504   : > { %v18607_v33 = vpop.eup %18606  ;;  %13812 = vst.msk [vmem:[%s21944_s23 + $0x60] sm:$0xf] %vm13787_vm7, %v15170_v2  ;;  %v15171_v54 = vpack.c.bf16 %v13132_v47, %v13132_v47  ;;  %v12731_v35 = vadd.f32 1.0, %v18605_v57  ;;  %18626 = vpow2.f32 %v14914_v13  ;;  %v17189_v38 = vadd.f32 %v17052_v27, %v21561_v11 }
 0x505   : > { %v18609_v8 = vpop.eup %18608  ;;  %13815 = vst.msk [vmem:[%s21944_s23 + $0x6c] sm:$0xf] %vm13787_vm7, %v15173_v29  ;;  %18628 = vrcp.f32 %v12733_v26  ;;  %v12734_v41 = vadd.f32 1.0, %v18607_v33  ;;  %v14912_v31 = vmul.f32 -1.442695, %v22185_v46  ;;  %v17190_v34 = vadd.f32 %v11632_v19, %v21564_v61  ;;  %v17055_v39 = vpop.f32.mrb[44].mxu0 }
 0x506   : > { %v18611_v17 = vpop.eup %18610  ;;  %13813 = vst.msk [vmem:[%s21944_s23 + $0x64] sm:$0xf] %vm13787_vm7, %v15171_v54  ;;  %18630 = vrcp.f32 %v12731_v35  ;;  %v12732_v9 = vadd.f32 1.0, %v18609_v8  ;;  %v22202_v11 = vadd.f32 %v22199_v40, %v17189_v38  ;;  %v17191_v36 = vadd.f32 %v17055_v39, %v23173_v5  ;;  %v11645_v4 = vpop.f32.mrb[45].mxu0  ;;  %v23175_v33 = vld [vmem:[#allocation27_spill] sm:$0xff] }
 0x507   : > { %v18613_v43 = vpop.eup %18612  ;;  %v13137_v61 = vmul.f32 %v18611_v17, %v22082_v42  ;;  %18632 = vrcp.f32 %v12734_v41  ;;  %v22207_v37 = vadd.f32 %v22199_v40, %v17190_v34  ;;  %v17192_v10 = vadd.f32 %v11645_v4, %v23174_v45  ;;  %v17056_v0 = vpop.f32.mrb[46].mxu0  ;;  %v23176_v41 = vld [vmem:[#allocation28_spill] sm:$0xff] }
 0x508   : > { %v18615_v23 = vpop.eup %18614  ;;  %v13135_v1 = vmul.f32 %v18613_v43, %v22093_v20  ;;  %18634 = vrcp.f32 %v12732_v9  ;;  %v14915_v14 = vmul.f32 -1.442695, %v22202_v11  ;;  %v22213_v25 = vadd.f32 %v22199_v40, %v17191_v36  ;;  %v11648_v12 = vpop.f32.mrb[47].mxu0 }
 0x509   : > { %v18617_v62 = vpop.eup %18616  ;;  %v15176_v42 = vpack.c.bf16 %v13137_v61, %v13137_v61  ;;  %v13138_v58 = vmul.f32 %v18615_v23, %v22101_v22  ;;  %18636 = vpow2.f32 %v14912_v31  ;;  %v14913_v60 = vmul.f32 -1.442695, %v22207_v37 }
 0x50a   : > { %v18619_v51 = vpop.eup %18618  ;;  %v15174_v27 = vpack.c.bf16 %v13135_v1, %v13135_v1  ;;  %v13136_v20 = vmul.f32 %v18617_v62, %v22105_v28  ;;  %18638 = vpow2.f32 %v14915_v14  ;;  %v14918_v15 = vmul.f32 -1.442695, %v22213_v25 }
 0x50b   : > { %v18621_v49 = vpop.eup %18620  ;;  %13818 = vst.msk [vmem:[%s21944_s23 + $0x78] sm:$0xf] %vm13787_vm7, %v15176_v42  ;;  %v15177_v6 = vpack.c.bf16 %v13138_v58, %v13138_v58  ;;  %v12737_v19 = vadd.f32 1.0, %v18619_v51  ;;  %18640 = vpow2.f32 %v14913_v60  ;;  %v22222_v22 = vadd.f32 %v22199_v40, %v17192_v10 }
 0x50c   : > { %v18623_v30 = vpop.eup %18622  ;;  %13816 = vst.msk [vmem:[%s21944_s23 + $0x70] sm:$0xf] %vm13787_vm7, %v15174_v27  ;;  %v15175_v50 = vpack.c.bf16 %v13136_v20, %v13136_v20  ;;  %v12735_v16 = vadd.f32 1.0, %v18621_v49  ;;  %18642 = vpow2.f32 %v14918_v15  ;;  %v17193_v28 = vadd.f32 %v17056_v0, %v21583_v18 }
 0x50d   : > { %v18625_v52 = vpop.eup %18624  ;;  %13819 = vst.msk [vmem:[%s21944_s23 + $0x7c] sm:$0xf] %vm13787_vm7, %v15177_v6  ;;  %18644 = vrcp.f32 %v12737_v19  ;;  %v12738_v3 = vadd.f32 1.0, %v18623_v30  ;;  %v14916_v2 = vmul.f32 -1.442695, %v22222_v22  ;;  %v17194_v47 = vadd.f32 %v11648_v12, %v21586_v56  ;;  %v17059_v13 = vpop.f32.mrb[48].mxu0 }
 0x50e   : > { %v18627_v57 = vpop.eup %18626  ;;  %13817 = vst.msk [vmem:[%s21944_s23 + $0x74] sm:$0xf] %vm13787_vm7, %v15175_v50  ;;  %18646 = vrcp.f32 %v12735_v16  ;;  %v12736_v29 = vadd.f32 1.0, %v18625_v52  ;;  %v22234_v26 = vadd.f32 %v22199_v40, %v17193_v28  ;;  %v17195_v18 = vadd.f32 %v17059_v13, %v23175_v33  ;;  %v11661_v54 = vpop.f32.mrb[49].mxu0  ;;  %v23178_v19 = vld [vmem:[#allocation33_spill] sm:$0xff]  ;;  %v23179_v52 = vld [vmem:[#allocation31_spill] sm:$0xff] }
 0x50f   : > { %v18629_v35 = vpop.eup %18628  ;;  %18648 = vrcp.f32 %v12738_v3  ;;  %v12741_v38 = vadd.f32 1.0, %v18627_v57  ;;  %v22238_v8 = vadd.f32 %v22199_v40, %v17194_v47  ;;  %v17196_v56 = vadd.f32 %v11661_v54, %v23176_v41  ;;  %v17060_v31 = vpop.f32.mrb[50].mxu0 }
 0x510   : > { %v18631_v34 = vpop.eup %18630  ;;  %v13141_v39 = vmul.f32 %v18629_v35, %v22115_v48  ;;  %18650 = vrcp.f32 %v12736_v29  ;;  %v14919_v17 = vmul.f32 -1.442695, %v22234_v26  ;;  %v22244_v9 = vadd.f32 %v22199_v40, %v17195_v18  ;;  %v11664_v5 = vpop.f32.mrb[51].mxu0 }
 0x511   : > { %v18633_v36 = vpop.eup %18632  ;;  %v13139_v4 = vmul.f32 %v18631_v34, %v22120_v21  ;;  %18652 = vrcp.f32 %v12741_v38  ;;  %v14917_v43 = vmul.f32 -1.442695, %v22238_v8  ;;  %v22249_v61 = vadd.f32 %v22199_v40, %v17196_v56 }
 0x512   : > { %v18635_v45 = vpop.eup %18634  ;;  %v15180_v10 = vpack.c.bf16 %v13141_v39, %v13141_v39  ;;  %v13142_v48 = vmul.f32 %v18633_v36, %v22133_v53  ;;  %18654 = vpow2.f32 %v14916_v2  ;;  %v14922_v0 = vmul.f32 -1.442695, %v22244_v9 }
 0x513   : > { %v18637_v23 = vpop.eup %18636  ;;  %v15178_v1 = vpack.c.bf16 %v13139_v4, %v13139_v4  ;;  %v13140_v14 = vmul.f32 %v18635_v45, %v22137_v63  ;;  %18656 = vpow2.f32 %v14919_v17  ;;  %v14920_v21 = vmul.f32 -1.442695, %v22249_v61  ;;  %v23177_v63 = vld [vmem:[#allocation30_spill] sm:$0xff] }
 0x514   : > { %v18639_v12 = vpop.eup %18638  ;;  %13822 = vst.msk [vmem:[%s21944_s23 + $0x88] sm:$0xf] %vm13787_vm7, %v15180_v10  ;;  %v15181_v62 = vpack.c.bf16 %v13142_v48, %v13142_v48  ;;  %v12739_v42 = vadd.f32 1.0, %v18637_v23  ;;  %18658 = vpow2.f32 %v14917_v43  ;;  %v17197_v58 = vadd.f32 %v17060_v31, %v21605_v7  ;;  %v23180_v43 = vld [vmem:[#allocation32_spill] sm:$0xff] }
 0x515   : > { %v18641_v53 = vpop.eup %18640  ;;  %13820 = vst.msk [vmem:[%s21944_s23 + $0x80] sm:$0xf] %vm13787_vm7, %v15178_v1  ;;  %v15179_v60 = vpack.c.bf16 %v13140_v14, %v13140_v14  ;;  %v12742_v51 = vadd.f32 1.0, %v18639_v12  ;;  %18660 = vpow2.f32 %v14922_v0  ;;  %v17198_v27 = vadd.f32 %v11664_v5, %v23177_v63  ;;  %v17063_v20 = vpop.f32.mrb[52].mxu0 }
 0x516   : > { %v18643_v15 = vpop.eup %18642  ;;  %13823 = vst.msk [vmem:[%s21944_s23 + $0x8c] sm:$0xf] %vm13787_vm7, %v15181_v62  ;;  %18662 = vrcp.f32 %v12739_v42  ;;  %v12740_v49 = vadd.f32 1.0, %v18641_v53  ;;  %v22264_v6 = vadd.f32 %v22199_v40, %v17197_v58  ;;  %v17199_v7 = vadd.f32 %v17063_v20, %v23178_v19  ;;  %v11677_v30 = vpop.f32.mrb[53].mxu0  ;;  %v23182_v53 = vld [vmem:[#allocation35_spill] sm:$0xff] }
 0x517   : > { %v18645_v50 = vpop.eup %18644  ;;  %13821 = vst.msk [vmem:[%s21944_s23 + $0x84] sm:$0xf] %vm13787_vm7, %v15179_v60  ;;  %18664 = vrcp.f32 %v12742_v51  ;;  %v12745_v16 = vadd.f32 1.0, %v18643_v15  ;;  %v22270_v28 = vadd.f32 %v22199_v40, %v17198_v27  ;;  %v17200_v3 = vadd.f32 %v11677_v30, %v23179_v52  ;;  %v17064_v2 = vpop.f32.mrb[54].mxu0  ;;  %v23183_v15 = vld [vmem:[#allocation36_spill] sm:$0xff] }
 0x518   : > { %v18647_v47 = vpop.eup %18646  ;;  %v13145_v13 = vmul.f32 %v18645_v50, %v22147_v44  ;;  %18666 = vrcp.f32 %v12740_v49  ;;  %v14923_v57 = vmul.f32 -1.442695, %v22264_v6  ;;  %v22276_v29 = vadd.f32 %v22199_v40, %v17199_v7  ;;  %v11680_v33 = vpop.f32.mrb[55].mxu0 }
 0x519   : > { %v18649_v18 = vpop.eup %18648  ;;  %v13143_v54 = vmul.f32 %v18647_v47, %v22152_v24  ;;  %18668 = vrcp.f32 %v12745_v16  ;;  %v14921_v35 = vmul.f32 -1.442695, %v22270_v28  ;;  %v22281_v38 = vadd.f32 %v22199_v40, %v17200_v3  ;;  %v23184_v47 = vld [vmem:[#allocation2_spill] sm:$0xff] }
 0x51a   : > { %v18651_v41 = vpop.eup %18650  ;;  %v15184_v56 = vpack.c.bf16 %v13145_v13, %v13145_v13  ;;  %v13146_v44 = vmul.f32 %v18649_v18, %v22165_v59  ;;  %18670 = vpow2.f32 %v14920_v21  ;;  %v14926_v31 = vmul.f32 -1.442695, %v22276_v29 }
 0x51b   : > { %v18653_v34 = vpop.eup %18652  ;;  %v15182_v39 = vpack.c.bf16 %v13143_v54, %v13143_v54  ;;  %v13144_v17 = vmul.f32 %v18651_v41, %v22170_v32  ;;  %18672 = vpow2.f32 %v14923_v57  ;;  %v14924_v24 = vmul.f32 -1.442695, %v22281_v38  ;;  %v23181_v32 = vld [vmem:[#allocation34_spill] sm:$0xff] }
 0x51c   : > { %v18655_v5 = vpop.eup %18654  ;;  %13826 = vst.msk [vmem:[%s21944_s23 + $0x98] sm:$0xf] %vm13787_vm7, %v15184_v56  ;;  %v15185_v36 = vpack.c.bf16 %v13146_v44, %v13146_v44  ;;  %v13149_v4 = vmul.f32 %v18653_v34, %v22176_v55  ;;  %18674 = vpow2.f32 %v14921_v35  ;;  %v17201_v59 = vadd.f32 %v17064_v2, %v23180_v43 }
 0x51d   : > { %v18657_v45 = vpop.eup %18656  ;;  %13824 = vst.msk [vmem:[%s21944_s23 + $0x90] sm:$0xf] %vm13787_vm7, %v15182_v39  ;;  %v15183_v10 = vpack.c.bf16 %v13144_v17, %v13144_v17  ;;  %v12743_v48 = vadd.f32 1.0, %v18655_v5  ;;  %18676 = vpow2.f32 %v14926_v31  ;;  %v17202_v0 = vadd.f32 %v11680_v33, %v23181_v32  ;;  %v17067_v23 = vpop.f32.mrb[56].mxu0 }
 0x51e   : > { %v18659_v1 = vpop.eup %18658  ;;  %13827 = vst.msk [vmem:[%s21944_s23 + $0x9c] sm:$0xf] %vm13787_vm7, %v15185_v36  ;;  %v15188_v14 = vpack.c.bf16 %v13149_v4, %v13149_v4  ;;  %v12746_v21 = vadd.f32 1.0, %v18657_v45  ;;  %18678 = vpow2.f32 %v14924_v24  ;;  %v22297_v55 = vadd.f32 %v22199_v40, %v17201_v59  ;;  %v11693_v12 = vpop.f32.mrb[57].mxu0  ;;  %v23185_v24 = vld [vmem:[#allocation3_spill] sm:$0xff]  ;;  %v23186_v45 = vld [vmem:[#allocation37_spill] sm:$0xff] }
 0x51f   : > { %v18661_v62 = vpop.eup %18660  ;;  %13825 = vst.msk [vmem:[%s21944_s23 + $0x94] sm:$0xf] %vm13787_vm7, %v15183_v10  ;;  %18680 = vrcp.f32 %v12743_v48  ;;  %v12744_v42 = vadd.f32 1.0, %v18659_v1  ;;  %v22302_v58 = vadd.f32 %v22199_v40, %v17202_v0  ;;  %v17203_v60 = vadd.f32 %v17067_v23, %v23182_v53  ;;  %v17068_v51 = vpop.f32.mrb[58].mxu0  ;;  %v23187_v1 = vld [vmem:[#allocation38_spill] sm:$0xff]  ;;  %v23188_v53 = vld [vmem:[#allocation39_spill] sm:$0xff] }
 0x520   : > { %v18663_v63 = vpop.eup %18662  ;;  %13830 = vst.msk [vmem:[%s21944_s23 + $0xa8] sm:$0xf] %vm13787_vm7, %v15188_v14  ;;  %18682 = vrcp.f32 %v12746_v21  ;;  %v12749_v27 = vadd.f32 1.0, %v18661_v62  ;;  %v14927_v20 = vmul.f32 -1.442695, %v22297_v55  ;;  %v17204_v49 = vadd.f32 %v11693_v12, %v23183_v15  ;;  %v11696_v19 = vpop.f32.mrb[59].mxu0 }
 0x521   : > { %v18665_v7 = vpop.eup %18664  ;;  %v13147_v30 = vmul.f32 %v18663_v63, %v22185_v46  ;;  %18684 = vrcp.f32 %v12744_v42  ;;  %v14925_v50 = vmul.f32 -1.442695, %v22302_v58  ;;  %v22312_v16 = vadd.f32 %v22199_v40, %v17203_v60 }
 0x522   : > { %v18667_v52 = vpop.eup %18666  ;;  %v13150_v3 = vmul.f32 %v18665_v7, %v22202_v11  ;;  %18686 = vrcp.f32 %v12749_v27  ;;  %v22316_v2 = vadd.f32 %v22199_v40, %v17204_v49  ;;  %v17205_v13 = vadd.f32 %v17068_v51, %v23184_v47 }
 0x523   : > { %v18669_v57 = vpop.eup %18668  ;;  %v15186_v33 = vpack.c.bf16 %v13147_v30, %v13147_v30  ;;  %v13148_v46 = vmul.f32 %v18667_v52, %v22207_v37  ;;  %18688 = vpow2.f32 %v14927_v20  ;;  %v14930_v18 = vmul.f32 -1.442695, %v22312_v16 }
 0x524   : > { %v18671_v54 = vpop.eup %18670  ;;  %v15189_v35 = vpack.c.bf16 %v13150_v3, %v13150_v3  ;;  %v13153_v41 = vmul.f32 %v18669_v57, %v22213_v25  ;;  %18690 = vpow2.f32 %v14925_v50  ;;  %v14928_v11 = vmul.f32 -1.442695, %v22316_v2 }
 0x525   : > { %v18673_v56 = vpop.eup %18672  ;;  %13828 = vst.msk [vmem:[%s21944_s23 + $0xa0] sm:$0xf] %vm13787_vm7, %v15186_v33  ;;  %v15187_v44 = vpack.c.bf16 %v13148_v46, %v13148_v46  ;;  %v12747_v31 = vadd.f32 1.0, %v18671_v54  ;;  %18692 = vpow2.f32 %v14930_v18  ;;  %v22326_v37 = vadd.f32 %v22199_v40, %v17205_v13  ;;  %v17071_v34 = vpop.f32.mrb[60].mxu0 }
 0x526   : > { %v18675_v39 = vpop.eup %18674  ;;  %13831 = vst.msk [vmem:[%s21944_s23 + $0xac] sm:$0xf] %vm13787_vm7, %v15189_v35  ;;  %v15192_v17 = vpack.c.bf16 %v13153_v41, %v13153_v41  ;;  %v12750_v25 = vadd.f32 1.0, %v18673_v56  ;;  %18694 = vpow2.f32 %v14928_v11  ;;  %v17206_v5 = vadd.f32 %v11696_v19, %v23185_v24  ;;  %v11709_v36 = vpop.f32.mrb[61].mxu0  ;;  %v23190_v56 = vld [vmem:[#allocation41_spill] sm:$0xff] }
 0x527   : > { %v18677_v4 = vpop.eup %18676  ;;  %13829 = vst.msk [vmem:[%s21944_s23 + $0xa4] sm:$0xf] %vm13787_vm7, %v15187_v44  ;;  %18696 = vrcp.f32 %v12747_v31  ;;  %v12748_v43 = vadd.f32 1.0, %v18675_v39  ;;  %v14931_v59 = vmul.f32 -1.442695, %v22326_v37  ;;  %v17207_v10 = vadd.f32 %v17071_v34, %v23186_v45  ;;  %v17072_v48 = vpop.f32.mrb[62].mxu0 }
 0x528   : > { %v18679_v32 = vpop.eup %18678  ;;  %13834 = vst.msk [vmem:[%s21944_s23 + $0xb8] sm:$0xf] %vm13787_vm7, %v15192_v17  ;;  %18698 = vrcp.f32 %v12750_v25  ;;  %v12753_v0 = vadd.f32 1.0, %v18677_v4  ;;  %v22338_v23 = vadd.f32 %v22199_v40, %v17206_v5  ;;  %v17208_v14 = vadd.f32 %v11709_v36, %v23187_v1  ;;  %v11712_v21 = vpop.f32.mrb[63].mxu0  ;;  %v23191_v25 = vld [vmem:[#allocation42_spill] sm:$0xff]  ;;  %v23192_v45 = vld [vmem:[#allocation43_spill] sm:$0xff] }
 0x529   : > { %v18681_v12 = vpop.eup %18680  ;;  %18700 = vrcp.f32 %v12748_v43  ;;  %v12751_v62 = vadd.f32 1.0, %v18679_v32  ;;  %v22342_v42 = vadd.f32 %v22199_v40, %v17207_v10  ;;  %v17209_v60 = vadd.f32 %v17072_v48, %v23188_v53 }
 0x52a   : > { %v18683_v51 = vpop.eup %18682  ;;  %v13151_v63 = vmul.f32 %v18681_v12, %v22222_v22  ;;  %18702 = vrcp.f32 %v12753_v0  ;;  %v14929_v27 = vmul.f32 -1.442695, %v22338_v23  ;;  %v22348_v20 = vadd.f32 %v22199_v40, %v17208_v14 }
 0x52b   : > { %v18685_v15 = vpop.eup %18684  ;;  %v13154_v49 = vmul.f32 %v18683_v51, %v22234_v26  ;;  %18704 = vrcp.f32 %v12751_v62  ;;  %v14934_v19 = vmul.f32 -1.442695, %v22342_v42  ;;  %v22353_v7 = vadd.f32 %v22199_v40, %v17209_v60 }
 0x52c   : > { %v18687_v30 = vpop.eup %18686  ;;  %v15190_v50 = vpack.c.bf16 %v13151_v63, %v13151_v63  ;;  %v13152_v22 = vmul.f32 %v18685_v15, %v22238_v8  ;;  %18706 = vpow2.f32 %v14931_v59  ;;  %v14932_v52 = vmul.f32 -1.442695, %v22348_v20  ;;  %v23189_v8 = vld [vmem:[#allocation40_spill] sm:$0xff] }
 0x52d   : > { %v18689_v3 = vpop.eup %18688  ;;  %v15193_v47 = vpack.c.bf16 %v13154_v49, %v13154_v49  ;;  %v13157_v13 = vmul.f32 %v18687_v30, %v22244_v9  ;;  %18708 = vpow2.f32 %v14929_v27  ;;  %v14935_v26 = vmul.f32 -1.442695, %v22353_v7  ;;  %v17075_v57 = vpop.f32.mrb[64].mxu0 }
 0x52e   : > { %v18691_v33 = vpop.eup %18690  ;;  %13832 = vst.msk [vmem:[%s21944_s23 + $0xb0] sm:$0xf] %vm13787_vm7, %v15190_v50  ;;  %v15191_v46 = vpack.c.bf16 %v13152_v22, %v13152_v22  ;;  %v12754_v18 = vadd.f32 1.0, %v18689_v3  ;;  %18710 = vpow2.f32 %v14934_v19  ;;  %v17210_v54 = vadd.f32 %v11712_v21, %v23189_v8  ;;  %v11725_v35 = vpop.f32.mrb[65].mxu0 }
 0x52f   : > { %v18693_v41 = vpop.eup %18692  ;;  %13835 = vst.msk [vmem:[%s21944_s23 + $0xbc] sm:$0xf] %vm13787_vm7, %v15193_v47  ;;  %v15196_v11 = vpack.c.bf16 %v13157_v13, %v13157_v13  ;;  %v12752_v9 = vadd.f32 1.0, %v18691_v33  ;;  %18712 = vpow2.f32 %v14932_v52  ;;  %v17211_v44 = vadd.f32 %v17075_v57, %v23190_v56  ;;  %v17076_v31 = vpop.f32.mrb[66].mxu0 }
 0x530   : > { %v18695_v34 = vpop.eup %18694  ;;  %13833 = vst.msk [vmem:[%s21944_s23 + $0xb4] sm:$0xf] %vm13787_vm7, %v15191_v46  ;;  %18714 = vrcp.f32 %v12754_v18  ;;  %v12757_v39 = vadd.f32 1.0, %v18693_v41  ;;  %v22368_v17 = vadd.f32 %v22199_v40, %v17210_v54  ;;  %v17212_v24 = vadd.f32 %v11725_v35, %v23191_v25  ;;  %v11728_v5 = vpop.f32.mrb[67].mxu0 }
 0x531   : > { %v18697_v4 = vpop.eup %18696  ;;  %13838 = vst.msk [vmem:[%s21944_s23 + $0xc8] sm:$0xf] %vm13787_vm7, %v15196_v11  ;;  %18716 = vrcp.f32 %v12752_v9  ;;  %v12755_v43 = vadd.f32 1.0, %v18695_v34  ;;  %v22374_v59 = vadd.f32 %v22199_v40, %v17211_v44  ;;  %v17213_v10 = vadd.f32 %v17076_v31, %v23192_v45 }
 0x532   : > { %v16527_v36 = vpop.f32.mrb[68].mxu1  ;;  %v18699_v32 = vpop.eup %18698  ;;  %v13155_v0 = vmul.f32 %v18697_v4, %v22249_v61  ;;  %18718 = vrcp.f32 %v12757_v39  ;;  %v14933_v1 = vmul.f32 -1.442695, %v22368_v17  ;;  %v22380_v14 = vadd.f32 %v22199_v40, %v17212_v24 }
 0x533   : > { %v6515_v48 = vpop.f32.mrb[69].mxu1  ;;  %v18701_v12 = vpop.eup %18700  ;;  %v13158_v62 = vmul.f32 %v18699_v32, %v22264_v6  ;;  %18720 = vrcp.f32 %v12755_v43  ;;  %v14938_v53 = vmul.f32 -1.442695, %v22374_v59  ;;  %v22385_v60 = vadd.f32 %v22199_v40, %v17213_v10 }
 0x534   : > { %v16528_v21 = vpop.f32.mrb[70].mxu1  ;;  %v18703_v63 = vpop.eup %18702  ;;  %v15194_v61 = vpack.c.bf16 %v13155_v0, %v13155_v0  ;;  %v13156_v27 = vmul.f32 %v18701_v12, %v22270_v28  ;;  %18722 = vpow2.f32 %v14935_v26  ;;  %v14936_v15 = vmul.f32 -1.442695, %v22380_v14  ;;  %v23193_v28 = vld [vmem:[#allocation44_spill] sm:$0xff] }
 0x535   : > { %v6518_v51 = vpop.f32.mrb[71].mxu1  ;;  %v18705_v49 = vpop.eup %18704  ;;  %v15197_v19 = vpack.c.bf16 %v13158_v62, %v13158_v62  ;;  %v13161_v6 = vmul.f32 %v18703_v63, %v22276_v29  ;;  %18724 = vpow2.f32 %v14933_v1  ;;  %v14939_v30 = vmul.f32 -1.442695, %v22385_v60 }
 0x536   : > { %v17079_v50 = vpop.f32.mrb[68].mxu0  ;;  %v18707_v22 = vpop.eup %18706  ;;  %13836 = vst.msk [vmem:[%s21944_s23 + $0xc0] sm:$0xf] %vm13787_vm7, %v15194_v61  ;;  %v15195_v52 = vpack.c.bf16 %v13156_v27, %v13156_v27  ;;  %v13159_v3 = vmul.f32 %v18705_v49, %v22281_v38  ;;  %18726 = vpow2.f32 %v14938_v53  ;;  %v17214_v47 = vadd.f32 %v11728_v5, %v23193_v28 }
 0x537   : > { %v11741_v13 = vpop.f32.mrb[69].mxu0  ;;  %v18709_v26 = vpop.eup %18708  ;;  %13839 = vst.msk [vmem:[%s21944_s23 + $0xcc] sm:$0xf] %vm13787_vm7, %v15197_v19  ;;  %v15200_v29 = vpack.c.bf16 %v13161_v6, %v13161_v6  ;;  %v12758_v57 = vadd.f32 1.0, %v18707_v22  ;;  %18728 = vpow2.f32 %v14936_v15  ;;  %v17215_v33 = vadd.f32 %v17079_v50, %v16527_v36 }
 0x538   : > { %v17080_v46 = vpop.f32.mrb[70].mxu0  ;;  %v18711_v18 = vpop.eup %18710  ;;  %13837 = vst.msk [vmem:[%s21944_s23 + $0xc4] sm:$0xf] %vm13787_vm7, %v15195_v52  ;;  %v15198_v8 = vpack.c.bf16 %v13159_v3, %v13159_v3  ;;  %v12756_v54 = vadd.f32 1.0, %v18709_v26  ;;  %18730 = vpow2.f32 %v14939_v30  ;;  %v22400_v38 = vadd.f32 %v22199_v40, %v17214_v47 }
 0x539   : > { %v11744_v35 = vpop.f32.mrb[71].mxu0  ;;  %v18713_v11 = vpop.eup %18712  ;;  %13842 = vst.msk [vmem:[%s21944_s23 + $0xd8] sm:$0xf] %vm13787_vm7, %v15200_v29  ;;  %18732 = vrcp.f32 %v12758_v57  ;;  %v12761_v9 = vadd.f32 1.0, %v18711_v18  ;;  %v22405_v56 = vadd.f32 %v22199_v40, %v17215_v33  ;;  %v17216_v44 = vadd.f32 %v11741_v13, %v6515_v48 }
 0x53a   : > { %v16531_v41 = vpop.f32.mrb[72].mxu1  ;;  %v18715_v34 = vpop.eup %18714  ;;  %13840 = vst.msk [vmem:[%s21944_s23 + $0xd0] sm:$0xf] %vm13787_vm7, %v15198_v8  ;;  %18734 = vrcp.f32 %v12756_v54  ;;  %v12759_v39 = vadd.f32 1.0, %v18713_v11  ;;  %v14937_v25 = vmul.f32 -1.442695, %v22400_v38  ;;  %v17217_v24 = vadd.f32 %v17080_v46, %v16528_v21 }
 0x53b   : > { %v6531_v31 = vpop.f32.mrb[73].mxu1  ;;  %v18717_v36 = vpop.eup %18716  ;;  %v13162_v4 = vmul.f32 %v18715_v34, %v22297_v55  ;;  %18736 = vrcp.f32 %v12761_v9  ;;  %v14942_v43 = vmul.f32 -1.442695, %v22405_v56  ;;  %v22413_v45 = vadd.f32 %v22199_v40, %v17216_v44 }
 0x53c   : > { %v16532_v5 = vpop.f32.mrb[74].mxu1  ;;  %v18719_v48 = vpop.eup %18718  ;;  %v13160_v32 = vmul.f32 %v18717_v36, %v22302_v58  ;;  %18738 = vrcp.f32 %v12759_v39  ;;  %v22417_v0 = vadd.f32 %v22199_v40, %v17217_v24  ;;  %v17218_v1 = vadd.f32 %v11744_v35, %v6518_v51 }
 0x53d   : > { %v6534_v10 = vpop.f32.mrb[75].mxu1  ;;  %v18721_v21 = vpop.eup %18720  ;;  %v15201_v12 = vpack.c.bf16 %v13162_v4, %v13162_v4  ;;  %v13165_v55 = vmul.f32 %v18719_v48, %v22312_v16  ;;  %18740 = vpow2.f32 %v14937_v25  ;;  %v14940_v62 = vmul.f32 -1.442695, %v22413_v45 }
 0x53e   : > { %v17083_v53 = vpop.f32.mrb[72].mxu0  ;;  %v18723_v63 = vpop.eup %18722  ;;  %v15199_v61 = vpack.c.bf16 %v13160_v32, %v13160_v32  ;;  %v13163_v27 = vmul.f32 %v18721_v21, %v22316_v2  ;;  %18742 = vpow2.f32 %v14942_v43  ;;  %v14943_v58 = vmul.f32 -1.442695, %v22417_v0 }
 0x53f   : > { %v11757_v15 = vpop.f32.mrb[73].mxu0  ;;  %v18725_v49 = vpop.eup %18724  ;;  %13843 = vst.msk [vmem:[%s21944_s23 + $0xdc] sm:$0xf] %vm13787_vm7, %v15201_v12  ;;  %v15204_v51 = vpack.c.bf16 %v13165_v55, %v13165_v55  ;;  %v12762_v19 = vadd.f32 1.0, %v18723_v63  ;;  %18744 = vpow2.f32 %v14940_v62  ;;  %v22426_v16 = vadd.f32 %v22199_v40, %v17218_v1 }
 0x540   : > { %v17084_v6 = vpop.f32.mrb[74].mxu0  ;;  %v18727_v30 = vpop.eup %18726  ;;  %13841 = vst.msk [vmem:[%s21944_s23 + $0xd4] sm:$0xf] %vm13787_vm7, %v15199_v61  ;;  %v15202_v2 = vpack.c.bf16 %v13163_v27, %v13163_v27  ;;  %v12760_v50 = vadd.f32 1.0, %v18725_v49  ;;  %18746 = vpow2.f32 %v14943_v58  ;;  %v17219_v22 = vadd.f32 %v17083_v53, %v16531_v41 }
 0x541   : > { %v11760_v52 = vpop.f32.mrb[75].mxu0  ;;  %v18729_v28 = vpop.eup %18728  ;;  %13846 = vst.msk [vmem:[%s21944_s23 + $0xe8] sm:$0xf] %vm13787_vm7, %v15204_v51  ;;  %18748 = vrcp.f32 %v12762_v19  ;;  %v12765_v47 = vadd.f32 1.0, %v18727_v30  ;;  %v14941_v13 = vmul.f32 -1.442695, %v22426_v16  ;;  %v17220_v26 = vadd.f32 %v11757_v15, %v6531_v31 }
 0x542   : > { %v16535_v3 = vpop.f32.mrb[76].mxu1  ;;  %v18731_v57 = vpop.eup %18730  ;;  %13844 = vst.msk [vmem:[%s21944_s23 + $0xe0] sm:$0xf] %vm13787_vm7, %v15202_v2  ;;  %18750 = vrcp.f32 %v12760_v50  ;;  %v12763_v33 = vadd.f32 1.0, %v18729_v28  ;;  %v22436_v46 = vadd.f32 %v22199_v40, %v17219_v22  ;;  %v17221_v18 = vadd.f32 %v17084_v6, %v16532_v5 }
 0x543   : > { %v6547_v29 = vpop.f32.mrb[77].mxu1  ;;  %v18733_v54 = vpop.eup %18732  ;;  %18752 = vrcp.f32 %v12765_v47  ;;  %v12766_v35 = vadd.f32 1.0, %v18731_v57  ;;  %v22439_v41 = vadd.f32 %v22199_v40, %v17220_v26  ;;  %v17222_v11 = vadd.f32 %v11760_v52, %v6534_v10 }
 0x544   : > { %v16536_v8 = vpop.f32.mrb[78].mxu1  ;;  %v18735_v44 = vpop.eup %18734  ;;  %v13166_v31 = vmul.f32 %v18733_v54, %v22326_v37  ;;  %18754 = vrcp.f32 %v12763_v33  ;;  %v14946_v34 = vmul.f32 -1.442695, %v22436_v46  ;;  %v22444_v39 = vadd.f32 %v22199_v40, %v17221_v18 }
 0x545   : > { %v6550_v9 = vpop.f32.mrb[79].mxu1  ;;  %v18737_v25 = vpop.eup %18736  ;;  %v13164_v24 = vmul.f32 %v18735_v44, %v22338_v23  ;;  %18756 = vrcp.f32 %v12766_v35  ;;  %v14944_v5 = vmul.f32 -1.442695, %v22439_v41  ;;  %v22449_v36 = vadd.f32 %v22199_v40, %v17222_v11 }
 0x546   : > { %v17087_v4 = vpop.f32.mrb[76].mxu0  ;;  %v18739_v43 = vpop.eup %18738  ;;  %v15205_v10 = vpack.c.bf16 %v13166_v31, %v13166_v31  ;;  %v13169_v37 = vmul.f32 %v18737_v25, %v22342_v42  ;;  %18758 = vpow2.f32 %v14941_v13  ;;  %v14947_v48 = vmul.f32 -1.442695, %v22444_v39 }
 0x547   : > { %v11773_v32 = vpop.f32.mrb[77].mxu0  ;;  %v18741_v1 = vpop.eup %18740  ;;  %v15203_v21 = vpack.c.bf16 %v13164_v24, %v13164_v24  ;;  %v13167_v23 = vmul.f32 %v18739_v43, %v22348_v20  ;;  %18760 = vpow2.f32 %v14946_v34  ;;  %v14945_v12 = vmul.f32 -1.442695, %v22449_v36 }
 0x548   : > { %v17088_v55 = vpop.f32.mrb[78].mxu0  ;;  %v18743_v62 = vpop.eup %18742  ;;  %13847 = vst.msk [vmem:[%s21944_s23 + $0xec] sm:$0xf] %vm13787_vm7, %v15205_v10  ;;  %v15208_v53 = vpack.c.bf16 %v13169_v37, %v13169_v37  ;;  %v12764_v63 = vadd.f32 1.0, %v18741_v1  ;;  %18762 = vpow2.f32 %v14944_v5  ;;  %v17223_v42 = vadd.f32 %v17087_v4, %v16535_v3 }
 0x549   : > { %v11776_v61 = vpop.f32.mrb[79].mxu0  ;;  %v18745_v58 = vpop.eup %18744  ;;  %13845 = vst.msk [vmem:[%s21944_s23 + $0xe4] sm:$0xf] %vm13787_vm7, %v15203_v21  ;;  %v15206_v15 = vpack.c.bf16 %v13167_v23, %v13167_v23  ;;  %v12769_v20 = vadd.f32 1.0, %v18743_v62  ;;  %18764 = vpow2.f32 %v14947_v48  ;;  %v17224_v49 = vadd.f32 %v11773_v32, %v6547_v29 }
 0x54a   : > { %v16539_v27 = vpop.f32.mrb[80].mxu1  ;;  %v18747_v19 = vpop.eup %18746  ;;  %13850 = vst.msk [vmem:[%s21944_s23 + $0xf8] sm:$0xf] %vm13787_vm7, %v15208_v53  ;;  %18766 = vrcp.f32 %v12764_v63  ;;  %v12767_v6 = vadd.f32 1.0, %v18745_v58  ;;  %v22462_v30 = vadd.f32 %v22199_v40, %v17223_v42  ;;  %v17225_v2 = vadd.f32 %v17088_v55, %v16536_v8 }
 0x54b   : > { %v6563_v51 = vpop.f32.mrb[81].mxu1  ;;  %v18749_v22 = vpop.eup %18748  ;;  %13848 = vst.msk [vmem:[%s21944_s23 + $0xf0] sm:$0xf] %vm13787_vm7, %v15206_v15  ;;  %18768 = vrcp.f32 %v12769_v20  ;;  %v12770_v52 = vadd.f32 1.0, %v18747_v19  ;;  %v22467_v3 = vadd.f32 %v22199_v40, %v17224_v49  ;;  %v17226_v28 = vadd.f32 %v11776_v61, %v6550_v9 }
 0x54c   : > { %v16540_v50 = vpop.f32.mrb[82].mxu1  ;;  %v18751_v13 = vpop.eup %18750  ;;  %v13170_v26 = vmul.f32 %v18749_v22, %v22353_v7  ;;  %18770 = vrcp.f32 %v12767_v6  ;;  %v14950_v29 = vmul.f32 -1.442695, %v22462_v30  ;;  %v22472_v57 = vadd.f32 %v22199_v40, %v17225_v2 }
 0x54d   : > { %v6566_v47 = vpop.f32.mrb[83].mxu1  ;;  %v18753_v33 = vpop.eup %18752  ;;  %v13168_v18 = vmul.f32 %v18751_v13, %v22368_v17  ;;  %18772 = vrcp.f32 %v12770_v52  ;;  %v14948_v8 = vmul.f32 -1.442695, %v22467_v3  ;;  %v22477_v54 = vadd.f32 %v22199_v40, %v17226_v28 }
 0x54e   : > { %v17091_v35 = vpop.f32.mrb[80].mxu0  ;;  %v18755_v11 = vpop.eup %18754  ;;  %v15209_v9 = vpack.c.bf16 %v13170_v26, %v13170_v26  ;;  %v13173_v7 = vmul.f32 %v18753_v33, %v22374_v59  ;;  %18774 = vpow2.f32 %v14945_v12  ;;  %v14951_v44 = vmul.f32 -1.442695, %v22472_v57 }
 0x54f   : > { %v11789_v31 = vpop.f32.mrb[81].mxu0  ;;  %v18757_v34 = vpop.eup %18756  ;;  %v15207_v25 = vpack.c.bf16 %v13168_v18, %v13168_v18  ;;  %v13171_v17 = vmul.f32 %v18755_v11, %v22380_v14  ;;  %18776 = vpow2.f32 %v14950_v29  ;;  %v14949_v24 = vmul.f32 -1.442695, %v22477_v54 }
 0x550   : > { %v17092_v5 = vpop.f32.mrb[82].mxu0  ;;  %v18759_v4 = vpop.eup %18758  ;;  %13851 = vst.msk [vmem:[%s21944_s23 + $0xfc] sm:$0xf] %vm13787_vm7, %v15209_v9  ;;  %v15212_v43 = vpack.c.bf16 %v13173_v7, %v13173_v7  ;;  %v13174_v59 = vmul.f32 %v18757_v34, %v22385_v60  ;;  %18778 = vpow2.f32 %v14948_v8  ;;  %v17227_v10 = vadd.f32 %v17091_v35, %v16539_v27  ;;  %v22519_v34 = vld [vmem:[%s22985_s2] ss:$0 sm:$0xff] }
 0x551   : > { %v11792_v37 = vpop.f32.mrb[83].mxu0  ;;  %v18761_v32 = vpop.eup %18760  ;;  %13849 = vst.msk [vmem:[%s21944_s23 + $0xf4] sm:$0xf] %vm13787_vm7, %v15207_v25  ;;  %v15210_v14 = vpack.c.bf16 %v13171_v17, %v13171_v17  ;;  %v12768_v1 = vadd.f32 1.0, %v18759_v4  ;;  %18780 = vpow2.f32 %v14951_v44  ;;  %v17228_v21 = vadd.f32 %v11789_v31, %v6563_v51 }
 0x552   : > { %v16543_v48 = vpop.f32.mrb[84].mxu1  ;;  %v18763_v12 = vpop.eup %18762  ;;  %13854 = vst.msk [vmem:[%s21944_s23 + $0x108] sm:$0xf] %vm13787_vm7, %v15212_v43  ;;  %v15213_v55 = vpack.c.bf16 %v13174_v59, %v13174_v59  ;;  %v12773_v62 = vadd.f32 1.0, %v18761_v32  ;;  %18782 = vpow2.f32 %v14949_v24  ;;  %v22491_v60 = vadd.f32 %v22199_v40, %v17227_v10 }
 0x553   : > { %v6579_v23 = vpop.f32.mrb[85].mxu1  ;;  %v18765_v63 = vpop.eup %18764  ;;  %13852 = vst.msk [vmem:[%s21944_s23 + $0x100] sm:$0xf] %vm13787_vm7, %v15210_v14  ;;  %18784 = vrcp.f32 %v12768_v1  ;;  %v12771_v42 = vadd.f32 1.0, %v18763_v12  ;;  %v22496_v61 = vadd.f32 %v22199_v40, %v17228_v21  ;;  %v17229_v27 = vadd.f32 %v17092_v5, %v16540_v50 }
 0x554   : > { %v16544_v53 = vpop.f32.mrb[86].mxu1  ;;  %v18767_v15 = vpop.eup %18766  ;;  %13855 = vst.msk [vmem:[%s21944_s23 + $0x10c] sm:$0xf] %vm13787_vm7, %v15213_v55  ;;  %18786 = vrcp.f32 %v12773_v62  ;;  %v12774_v20 = vadd.f32 1.0, %v18765_v63  ;;  %v14954_v49 = vmul.f32 -1.442695, %v22491_v60  ;;  %v17230_v51 = vadd.f32 %v11792_v37, %v6566_v47 }
 0x555   : > { %v6582_v58 = vpop.f32.mrb[87].mxu1  ;;  %v18769_v19 = vpop.eup %18768  ;;  %v13172_v6 = vmul.f32 %v18767_v15, %v22400_v38  ;;  %18788 = vrcp.f32 %v12771_v42  ;;  %v14952_v2 = vmul.f32 -1.442695, %v22496_v61  ;;  %v22504_v22 = vadd.f32 %v22199_v40, %v17229_v27 }
 0x556   : > { %v17095_v52 = vpop.f32.mrb[84].mxu0  ;;  %v18771_v50 = vpop.eup %18770  ;;  %v13177_v28 = vmul.f32 %v18769_v19, %v22405_v56  ;;  %18790 = vrcp.f32 %v12774_v20  ;;  %v22508_v13 = vadd.f32 %v22199_v40, %v17230_v51 }
 0x557   : > { %v17231_v26 = vadd.f32 %v17095_v52, %v16543_v48  ;;  %v11805_v47 = vpop.f32.mrb[85].mxu0  ;;  %v18773_v29 = vpop.eup %18772  ;;  %v15211_v33 = vpack.c.bf16 %v13172_v6, %v13172_v6  ;;  %v13175_v38 = vmul.f32 %v18771_v50, %v22413_v45  ;;  %18792 = vpow2.f32 %v14954_v49 }
 0x558   : > { %v14955_v18 = vmul.f32 -1.442695, %v22504_v22  ;;  %v17096_v8 = vpop.f32.mrb[86].mxu0  ;;  %v18775_v35 = vpop.eup %18774  ;;  %v15216_v11 = vpack.c.bf16 %v13177_v28, %v13177_v28  ;;  %v13178_v56 = vmul.f32 %v18773_v29, %v22417_v0  ;;  %18794 = vpow2.f32 %v14952_v2 }
 0x559   : > { %v14953_v40 = vmul.f32 -1.442695, %v22508_v13  ;;  %v11808_v9 = vpop.f32.mrb[87].mxu0  ;;  %v18777_v44 = vpop.eup %18776  ;;  %13853 = vst.msk [vmem:[%s21944_s23 + $0x104] sm:$0xf] %vm13787_vm7, %v15211_v33  ;;  %v15214_v31 = vpack.c.bf16 %v13175_v38, %v13175_v38  ;;  %v12772_v45 = vadd.f32 1.0, %v18775_v35  ;;  %v22522_v25 = vadd.f32 %v22519_v34, %v17231_v26 }
 0x55a   : > { %v16547_v7 = vpop.f32.mrb[88].mxu1  ;;  %18796 = vpow2.f32 %v14955_v18  ;;  %v18779_v17 = vpop.eup %18778  ;;  %13858 = vst.msk [vmem:[%s21944_s23 + $0x118] sm:$0xf] %vm13787_vm7, %v15216_v11  ;;  %v15217_v24 = vpack.c.bf16 %v13178_v56, %v13178_v56  ;;  %v12777_v5 = vadd.f32 1.0, %v18777_v44  ;;  %v17232_v4 = vadd.f32 %v11805_v47, %v6579_v23 }
 0x55b   : > { %v6595_v0 = vpop.f32.mrb[89].mxu1  ;;  %18798 = vpow2.f32 %v14953_v40  ;;  %v18781_v59 = vpop.eup %18780  ;;  %13856 = vst.msk [vmem:[%s21944_s23 + $0x110] sm:$0xf] %vm13787_vm7, %v15214_v31  ;;  %v12775_v10 = vadd.f32 1.0, %v18779_v17  ;;  %v14958_v37 = vmul.f32 -1.442695, %v22522_v25  ;;  %v17233_v48 = vadd.f32 %v17096_v8, %v16544_v53 }
 0x55c   : > { %v22526_v43 = vpop.f32.mrb[90].mxu1  ;;  %18800 = vrcp.f32 %v12772_v45  ;;  %v18783_v14 = vpop.eup %18782  ;;  %13859 = vst.msk [vmem:[%s21944_s23 + $0x11c] sm:$0xf] %vm13787_vm7, %v15217_v24  ;;  %v12778_v1 = vadd.f32 1.0, %v18781_v59  ;;  %v22534_v21 = vadd.f32 %v22519_v34, %v17232_v4  ;;  %v17234_v23 = vadd.f32 %v11808_v9, %v6582_v58 }
 0x55d   : > { %v6598_v32 = vpop.f32.mrb[91].mxu1  ;;  %18802 = vrcp.f32 %v12777_v5  ;;  %v18785_v12 = vpop.eup %18784  ;;  %v12776_v55 = vadd.f32 1.0, %v18783_v14  ;;  %v22537_v62 = vadd.f32 %v22519_v34, %v17233_v48 }
 0x55e   : > { %18804 = vrcp.f32 %v12775_v10  ;;  %v17099_v63 = vpop.f32.mrb[88].mxu0  ;;  %v18787_v42 = vpop.eup %18786  ;;  %v13176_v53 = vmul.f32 %v18785_v12, %v22426_v16  ;;  %v14956_v27 = vmul.f32 -1.442695, %v22534_v21  ;;  %v22542_v15 = vadd.f32 %v22519_v34, %v17234_v23 }
 0x55f   : > { %18806 = vrcp.f32 %v12778_v1  ;;  %v11821_v20 = vpop.f32.mrb[89].mxu0  ;;  %v18789_v49 = vpop.eup %18788  ;;  %v13181_v58 = vmul.f32 %v18787_v42, %v22436_v46  ;;  %v14959_v51 = vmul.f32 -1.442695, %v22537_v62  ;;  %v17235_v19 = vadd.f32 %v17099_v63, %v16547_v7 }
 0x560   : > { %18808 = vrcp.f32 %v12776_v55  ;;  %v17100_v6 = vpop.f32.mrb[90].mxu0  ;;  %v18791_v2 = vpop.eup %18790  ;;  %v15215_v52 = vpack.c.bf16 %v13176_v53, %v13176_v53  ;;  %v13179_v16 = vmul.f32 %v18789_v49, %v22439_v41  ;;  %v14957_v50 = vmul.f32 -1.442695, %v22542_v15 }
 0x561   : > { %18810 = vpow2.f32 %v14958_v37  ;;  %v11824_v28 = vpop.f32.mrb[91].mxu0  ;;  %v18793_v47 = vpop.eup %18792  ;;  %v15220_v29 = vpack.c.bf16 %v13181_v58, %v13181_v58  ;;  %v13182_v46 = vmul.f32 %v18791_v2, %v22444_v39  ;;  %v22550_v33 = vadd.f32 %v22519_v34, %v17235_v19 }
 0x562   : > { %v16551_v26 = vpop.f32.mrb[92].mxu1  ;;  %18812 = vpow2.f32 %v14956_v27  ;;  %v18795_v18 = vpop.eup %18794  ;;  %13857 = vst.msk [vmem:[%s21944_s23 + $0x114] sm:$0xf] %vm13787_vm7, %v15215_v52  ;;  %v15218_v41 = vpack.c.bf16 %v13179_v16, %v13179_v16  ;;  %v12781_v8 = vadd.f32 1.0, %v18793_v47  ;;  %v17236_v35 = vadd.f32 %v11821_v20, %v6595_v0 }
 0x563   : > { %v22552_v38 = vpop.f32.mrb[93].mxu1  ;;  %18814 = vpow2.f32 %v14959_v51  ;;  %13862 = vst.msk [vmem:[%s21944_s23 + $0x128] sm:$0xf] %vm13787_vm7, %v15220_v29  ;;  %v15221_v39 = vpack.c.bf16 %v13182_v46, %v13182_v46  ;;  %v12779_v40 = vadd.f32 1.0, %v18795_v18  ;;  %v14962_v9 = vmul.f32 -1.442695, %v22550_v33 }
 0x564   : > { %v22556_v11 = vpop.f32.mrb[94].mxu1  ;;  %v18797_v56 = vpop.eup %18796  ;;  %18816 = vpow2.f32 %v14957_v50  ;;  %13860 = vst.msk [vmem:[%s21944_s23 + $0x120] sm:$0xf] %vm13787_vm7, %v15218_v41  ;;  %v22566_v45 = vadd.f32 %v22519_v34, %v17236_v35  ;;  %v17237_v0 = vadd.f32 %v17100_v6, %v22526_v43  ;;  %v17238_v5 = vadd.f32 %v11824_v28, %v6598_v32 }
 0x565   : > { %v22561_v7 = vpop.f32.mrb[95].mxu1  ;;  %v18799_v44 = vpop.eup %18798  ;;  %18818 = vrcp.f32 %v12781_v8  ;;  %v12782_v31 = vadd.f32 1.0, %v18797_v56  ;;  %13863 = vst.msk [vmem:[%s21944_s23 + $0x12c] sm:$0xf] %vm13787_vm7, %v15221_v39 }
 0x566   : > { %v18801_v17 = vpop.eup %18800  ;;  %18820 = vrcp.f32 %v12779_v40  ;;  %v12780_v24 = vadd.f32 1.0, %v18799_v44  ;;  %v17103_v4 = vpop.f32.mrb[92].mxu0  ;;  %v14960_v37 = vmul.f32 -1.442695, %v22566_v45  ;;  %v22574_v48 = vadd.f32 %v22519_v34, %v17237_v0 }
 0x567   : > { %v18803_v59 = vpop.eup %18802  ;;  %v13180_v10 = vmul.f32 %v18801_v17, %v22449_v36  ;;  %18822 = vrcp.f32 %v12782_v31  ;;  %v11837_v14 = vpop.f32.mrb[93].mxu0  ;;  %v22578_v23 = vadd.f32 %v22519_v34, %v17238_v5  ;;  %v17239_v12 = vadd.f32 %v17103_v4, %v16551_v26 }
 0x568   : > { %v18805_v1 = vpop.eup %18804  ;;  %v13185_v43 = vmul.f32 %v18803_v59, %v22462_v30  ;;  %18824 = vrcp.f32 %v12780_v24  ;;  %v17104_v32 = vpop.f32.mrb[94].mxu0  ;;  %v14963_v42 = vmul.f32 -1.442695, %v22574_v48  ;;  %v17240_v28 = vadd.f32 %v11837_v14, %v22552_v38 }
 0x569   : > { %v18807_v55 = vpop.eup %18806  ;;  %v15219_v63 = vpack.c.bf16 %v13180_v10, %v13180_v10  ;;  %v13183_v36 = vmul.f32 %v18805_v1, %v22467_v3  ;;  %18826 = vpow2.f32 %v14962_v9  ;;  %v11840_v53 = vpop.f32.mrb[95].mxu0  ;;  %v14961_v58 = vmul.f32 -1.442695, %v22578_v23 }
 0x56a   : > { %v16555_v27 = vpop.f32.mrb[96].mxu1  ;;  %v18809_v20 = vpop.eup %18808  ;;  %v15224_v49 = vpack.c.bf16 %v13185_v43, %v13185_v43  ;;  %v13186_v30 = vmul.f32 %v18807_v55, %v22472_v57  ;;  %18828 = vpow2.f32 %v14960_v37  ;;  %v22590_v2 = vadd.f32 %v22519_v34, %v17239_v12 }
 0x56b   : > { %v22584_v51 = vpop.f32.mrb[97].mxu1  ;;  %v18811_v19 = vpop.eup %18810  ;;  %13861 = vst.msk [vmem:[%s21944_s23 + $0x124] sm:$0xf] %vm13787_vm7, %v15219_v63  ;;  %v15222_v3 = vpack.c.bf16 %v13183_v36, %v13183_v36  ;;  %v13184_v6 = vmul.f32 %v18809_v20, %v22477_v54  ;;  %18830 = vpow2.f32 %v14963_v42  ;;  %v17241_v18 = vadd.f32 %v17104_v32, %v22556_v11 }
 0x56c   : > { %v22592_v52 = vpop.f32.mrb[98].mxu1  ;;  %v18813_v57 = vpop.eup %18812  ;;  %13866 = vst.msk [vmem:[%s21944_s23 + $0x138] sm:$0xf] %vm13787_vm7, %v15224_v49  ;;  %v15225_v16 = vpack.c.bf16 %v13186_v30, %v13186_v30  ;;  %v12785_v50 = vadd.f32 1.0, %v18811_v19  ;;  %18832 = vpow2.f32 %v14961_v58  ;;  %v14966_v46 = vmul.f32 -1.442695, %v22590_v2 }
 0x56d   : > { %v22597_v26 = vpop.f32.mrb[99].mxu1  ;;  %v18815_v47 = vpop.eup %18814  ;;  %13864 = vst.msk [vmem:[%s21944_s23 + $0x130] sm:$0xf] %vm13787_vm7, %v15222_v3  ;;  %v15223_v54 = vpack.c.bf16 %v13184_v6, %v13184_v6  ;;  %v12783_v29 = vadd.f32 1.0, %v18813_v57  ;;  %v22606_v35 = vadd.f32 %v22519_v34, %v17240_v28  ;;  %v17242_v38 = vadd.f32 %v11840_v53, %v22561_v7 }
 0x56e   : > { %v18817_v41 = vpop.eup %18816  ;;  %13867 = vst.msk [vmem:[%s21944_s23 + $0x13c] sm:$0xf] %vm13787_vm7, %v15225_v16  ;;  %18834 = vrcp.f32 %v12785_v50  ;;  %v12786_v8 = vadd.f32 1.0, %v18815_v47  ;;  %v17107_v56 = vpop.f32.mrb[96].mxu0  ;;  %v22612_v9 = vadd.f32 %v22519_v34, %v17241_v18 }
 0x56f   : > { %v18819_v39 = vpop.eup %18818  ;;  %13865 = vst.msk [vmem:[%s21944_s23 + $0x134] sm:$0xf] %vm13787_vm7, %v15223_v54  ;;  %18836 = vrcp.f32 %v12783_v29  ;;  %v12784_v40 = vadd.f32 1.0, %v18817_v41  ;;  %v17243_v11 = vadd.f32 %v17107_v56, %v16555_v27  ;;  %v11853_v44 = vpop.f32.mrb[97].mxu0  ;;  %v14964_v17 = vmul.f32 -1.442695, %v22606_v35 }
 0x570   : > { %v18821_v31 = vpop.eup %18820  ;;  %v13189_v0 = vmul.f32 %v18819_v39, %v22491_v60  ;;  %18838 = vrcp.f32 %v12786_v8  ;;  %v22617_v24 = vadd.f32 %v22519_v34, %v17242_v38  ;;  %v17108_v7 = vpop.f32.mrb[98].mxu0  ;;  %v14967_v59 = vmul.f32 -1.442695, %v22612_v9 }
 0x571   : > { %v18823_v5 = vpop.eup %18822  ;;  %v13187_v4 = vmul.f32 %v18821_v31, %v22496_v61  ;;  %18840 = vrcp.f32 %v12784_v40  ;;  %v22622_v10 = vadd.f32 %v22519_v34, %v17243_v11  ;;  %v11856_v37 = vpop.f32.mrb[99].mxu0  ;;  %v17244_v20 = vadd.f32 %v11853_v44, %v22584_v51 }
 0x572   : > { %v16559_v14 = vpop.f32.mrb[100].mxu1  ;;  %v18825_v60 = vpop.eup %18824  ;;  %v15228_v1 = vpack.c.bf16 %v13189_v0, %v13189_v0  ;;  %v13190_v43 = vmul.f32 %v18823_v5, %v22504_v22  ;;  %18842 = vpow2.f32 %v14966_v46  ;;  %v14965_v12 = vmul.f32 -1.442695, %v22617_v24 }
 0x573   : > { %v6643_v32 = vpop.f32.mrb[101].mxu1  ;;  %v18827_v55 = vpop.eup %18826  ;;  %v15226_v61 = vpack.c.bf16 %v13187_v4, %v13187_v4  ;;  %v13188_v63 = vmul.f32 %v18825_v60, %v22508_v13  ;;  %18844 = vpow2.f32 %v14964_v17  ;;  %v14970_v36 = vmul.f32 -1.442695, %v22622_v10 }
 0x574   : > { %v22628_v42 = vpop.f32.mrb[102].mxu1  ;;  %v18829_v53 = vpop.eup %18828  ;;  %13870 = vst.msk [vmem:[%s21944_s23 + $0x148] sm:$0xf] %vm13787_vm7, %v15228_v1  ;;  %v15229_v27 = vpack.c.bf16 %v13190_v43, %v13190_v43  ;;  %v12789_v22 = vadd.f32 1.0, %v18827_v55  ;;  %18846 = vpow2.f32 %v14967_v59  ;;  %v17245_v19 = vadd.f32 %v17108_v7, %v22592_v52 }
 0x575   : > { %v6646_v49 = vpop.f32.mrb[103].mxu1  ;;  %v18831_v30 = vpop.eup %18830  ;;  %13868 = vst.msk [vmem:[%s21944_s23 + $0x140] sm:$0xf] %vm13787_vm7, %v15226_v61  ;;  %v15227_v13 = vpack.c.bf16 %v13188_v63, %v13188_v63  ;;  %v12787_v58 = vadd.f32 1.0, %v18829_v53  ;;  %18848 = vpow2.f32 %v14965_v12  ;;  %v22639_v57 = vadd.f32 %v22519_v34, %v17244_v20 }
 0x576   : > { %v18833_v3 = vpop.eup %18832  ;;  %13871 = vst.msk [vmem:[%s21944_s23 + $0x14c] sm:$0xf] %vm13787_vm7, %v15229_v27  ;;  %18850 = vrcp.f32 %v12789_v22  ;;  %v12790_v6 = vadd.f32 1.0, %v18831_v30  ;;  %v17246_v16 = vadd.f32 %v11856_v37, %v22597_v26  ;;  %v17111_v51 = vpop.f32.mrb[100].mxu0  ;;  %v22645_v28 = vadd.f32 %v22519_v34, %v17245_v19 }
 0x577   : > { %13869 = vst.msk [vmem:[%s21944_s23 + $0x144] sm:$0xf] %vm13787_vm7, %v15227_v13  ;;  %18852 = vrcp.f32 %v12787_v58  ;;  %v12788_v50 = vadd.f32 1.0, %v18833_v3  ;;  %v17247_v47 = vadd.f32 %v17111_v51, %v16559_v14  ;;  %v11869_v52 = vpop.f32.mrb[101].mxu0  ;;  %v14968_v29 = vmul.f32 -1.442695, %v22639_v57 }
 0x578   : > { %v18835_v54 = vpop.eup %18834  ;;  %18854 = vrcp.f32 %v12790_v6  ;;  %v22649_v46 = vadd.f32 %v22519_v34, %v17246_v16  ;;  %v17248_v18 = vadd.f32 %v11869_v52, %v6643_v32  ;;  %v17112_v41 = vpop.f32.mrb[102].mxu0  ;;  %v14971_v38 = vmul.f32 -1.442695, %v22645_v28 }
 0x579   : > { %v18837_v26 = vpop.eup %18836  ;;  %v13193_v8 = vmul.f32 %v18835_v54, %v22522_v25  ;;  %18856 = vrcp.f32 %v12788_v50  ;;  %v22654_v56 = vadd.f32 %v22519_v34, %v17247_v47  ;;  %v11872_v39 = vpop.f32.mrb[103].mxu0  ;;  %v17249_v32 = vadd.f32 %v17112_v41, %v22628_v42 }
 0x57a   : > { %v16563_v40 = vpop.f32.mrb[104].mxu1  ;;  %v18839_v11 = vpop.eup %18838  ;;  %v13191_v44 = vmul.f32 %v18837_v26, %v22534_v21  ;;  %18858 = vpow2.f32 %v14970_v36  ;;  %v14969_v31 = vmul.f32 -1.442695, %v22649_v46  ;;  %v22659_v0 = vadd.f32 %v22519_v34, %v17248_v18 }
 0x57b   : > { %v6659_v17 = vpop.f32.mrb[105].mxu1  ;;  %v18841_v25 = vpop.eup %18840  ;;  %v15232_v7 = vpack.c.bf16 %v13193_v8, %v13193_v8  ;;  %v13194_v5 = vmul.f32 %v18839_v11, %v22537_v62  ;;  %18860 = vpow2.f32 %v14968_v29  ;;  %v14974_v4 = vmul.f32 -1.442695, %v22654_v56 }
 0x57c   : > { %v22663_v59 = vpop.f32.mrb[106].mxu1  ;;  %v18843_v37 = vpop.eup %18842  ;;  %v15230_v21 = vpack.c.bf16 %v13191_v44, %v13191_v44  ;;  %v13192_v14 = vmul.f32 %v18841_v25, %v22542_v15  ;;  %18862 = vpow2.f32 %v14971_v38  ;;  %v14972_v60 = vmul.f32 -1.442695, %v22659_v0 }
 0x57d   : > { %v22667_v1 = vpop.f32.mrb[107].mxu1  ;;  %v18845_v43 = vpop.eup %18844  ;;  %13874 = vst.msk [vmem:[%s21944_s23 + $0x158] sm:$0xf] %vm13787_vm7, %v15232_v7  ;;  %v15233_v62 = vpack.c.bf16 %v13194_v5, %v13194_v5  ;;  %v12793_v12 = vadd.f32 1.0, %v18843_v37  ;;  %18864 = vpow2.f32 %v14969_v31  ;;  %v17250_v63 = vadd.f32 %v11872_v39, %v6646_v49 }
 0x57e   : > { %v18847_v55 = vpop.eup %18846  ;;  %13872 = vst.msk [vmem:[%s21944_s23 + $0x150] sm:$0xf] %vm13787_vm7, %v15230_v21  ;;  %v15231_v61 = vpack.c.bf16 %v13192_v14, %v13192_v14  ;;  %v12791_v15 = vadd.f32 1.0, %v18845_v43  ;;  %18866 = vpow2.f32 %v14974_v4  ;;  %v17115_v36 = vpop.f32.mrb[104].mxu0  ;;  %v22677_v22 = vadd.f32 %v22519_v34, %v17249_v32 }
 0x57f   : > { %v18849_v53 = vpop.eup %18848  ;;  %13875 = vst.msk [vmem:[%s21944_s23 + $0x15c] sm:$0xf] %vm13787_vm7, %v15233_v62  ;;  %18868 = vrcp.f32 %v12793_v12  ;;  %v12794_v27 = vadd.f32 1.0, %v18847_v55  ;;  %v17251_v20 = vadd.f32 %v17115_v36, %v16563_v40  ;;  %v11885_v30 = vpop.f32.mrb[105].mxu0  ;;  %v22682_v58 = vadd.f32 %v22519_v34, %v17250_v63 }
 0x580   : > { %v18851_v42 = vpop.eup %18850  ;;  %13873 = vst.msk [vmem:[%s21944_s23 + $0x154] sm:$0xf] %vm13787_vm7, %v15231_v61  ;;  %18870 = vrcp.f32 %v12791_v15  ;;  %v12792_v13 = vadd.f32 1.0, %v18849_v53  ;;  %v17252_v49 = vadd.f32 %v11885_v30, %v6659_v17  ;;  %v17116_v19 = vpop.f32.mrb[106].mxu0  ;;  %v14975_v16 = vmul.f32 -1.442695, %v22677_v22 }
 0x581   : > { %v18853_v3 = vpop.eup %18852  ;;  %v13197_v6 = vmul.f32 %v18851_v42, %v22550_v33  ;;  %18872 = vrcp.f32 %v12794_v27  ;;  %v22687_v51 = vadd.f32 %v22519_v34, %v17251_v20  ;;  %v11888_v50 = vpop.f32.mrb[107].mxu0  ;;  %v14973_v29 = vmul.f32 -1.442695, %v22682_v58 }
 0x582   : > { %v16567_v47 = vpop.f32.mrb[108].mxu1  ;;  %v18855_v52 = vpop.eup %18854  ;;  %v13195_v54 = vmul.f32 %v18853_v3, %v22566_v45  ;;  %18874 = vrcp.f32 %v12792_v13  ;;  %v22692_v18 = vadd.f32 %v22519_v34, %v17252_v49  ;;  %v17253_v7 = vadd.f32 %v17116_v19, %v22663_v59 }
 0x583   : > { %v6675_v41 = vpop.f32.mrb[109].mxu1  ;;  %v18857_v33 = vpop.eup %18856  ;;  %v15236_v26 = vpack.c.bf16 %v13197_v6, %v13197_v6  ;;  %v13198_v8 = vmul.f32 %v18855_v52, %v22574_v48  ;;  %18876 = vpow2.f32 %v14972_v60  ;;  %v14978_v38 = vmul.f32 -1.442695, %v22687_v51 }
 0x584   : > { %v16568_v39 = vpop.f32.mrb[110].mxu1  ;;  %v18859_v40 = vpop.eup %18858  ;;  %v15234_v11 = vpack.c.bf16 %v13195_v54, %v13195_v54  ;;  %v13196_v45 = vmul.f32 %v18857_v33, %v22578_v23  ;;  %18878 = vpow2.f32 %v14975_v16  ;;  %v14976_v44 = vmul.f32 -1.442695, %v22692_v18 }
 0x585   : > { %v22698_v31 = vpop.f32.mrb[111].mxu1  ;;  %v18861_v17 = vpop.eup %18860  ;;  %13878 = vst.msk [vmem:[%s21944_s23 + $0x168] sm:$0xf] %vm13787_vm7, %v15236_v26  ;;  %v15237_v25 = vpack.c.bf16 %v13198_v8, %v13198_v8  ;;  %v12797_v48 = vadd.f32 1.0, %v18859_v40  ;;  %18880 = vpow2.f32 %v14973_v29  ;;  %v17254_v37 = vadd.f32 %v11888_v50, %v22667_v1 }
 0x586   : > { %v18863_v5 = vpop.eup %18862  ;;  %13876 = vst.msk [vmem:[%s21944_s23 + $0x160] sm:$0xf] %vm13787_vm7, %v15234_v11  ;;  %v15235_v4 = vpack.c.bf16 %v13196_v45, %v13196_v45  ;;  %v12795_v23 = vadd.f32 1.0, %v18861_v17  ;;  %18882 = vpow2.f32 %v14978_v38  ;;  %v17119_v21 = vpop.f32.mrb[108].mxu0  ;;  %v22709_v43 = vadd.f32 %v22519_v34, %v17253_v7 }
 0x587   : > { %v18865_v14 = vpop.eup %18864  ;;  %13879 = vst.msk [vmem:[%s21944_s23 + $0x16c] sm:$0xf] %vm13787_vm7, %v15237_v25  ;;  %18884 = vrcp.f32 %v12797_v48  ;;  %v12798_v60 = vadd.f32 1.0, %v18863_v5  ;;  %v17255_v62 = vadd.f32 %v17119_v21, %v16567_v47  ;;  %v11901_v59 = vpop.f32.mrb[109].mxu0  ;;  %v22714_v55 = vadd.f32 %v22519_v34, %v17254_v37 }
 0x588   : > { %v18867_v12 = vpop.eup %18866  ;;  %13877 = vst.msk [vmem:[%s21944_s23 + $0x164] sm:$0xf] %vm13787_vm7, %v15235_v4  ;;  %18886 = vrcp.f32 %v12795_v23  ;;  %v12796_v32 = vadd.f32 1.0, %v18865_v14  ;;  %v17256_v1 = vadd.f32 %v11901_v59, %v6675_v41  ;;  %v17120_v61 = vpop.f32.mrb[110].mxu0  ;;  %v14979_v36 = vmul.f32 -1.442695, %v22709_v43 }
 0x589   : > { %v18869_v15 = vpop.eup %18868  ;;  %18888 = vrcp.f32 %v12798_v60  ;;  %v12801_v63 = vadd.f32 1.0, %v18867_v12  ;;  %v22718_v53 = vadd.f32 %v22519_v34, %v17255_v62  ;;  %v11904_v27 = vpop.f32.mrb[111].mxu0  ;;  %v14977_v13 = vmul.f32 -1.442695, %v22714_v55 }
 0x58a   : > { %v16571_v20 = vpop.f32.mrb[112].mxu1  ;;  %v18871_v30 = vpop.eup %18870  ;;  %v13201_v42 = vmul.f32 %v18869_v15, %v22590_v2  ;;  %18890 = vrcp.f32 %v12796_v32  ;;  %v22723_v49 = vadd.f32 %v22519_v34, %v17256_v1  ;;  %v17257_v50 = vadd.f32 %v17120_v61, %v16568_v39 }
 0x58b   : > { %v6691_v19 = vpop.f32.mrb[113].mxu1  ;;  %v18873_v3 = vpop.eup %18872  ;;  %v13199_v6 = vmul.f32 %v18871_v30, %v22606_v35  ;;  %18892 = vrcp.f32 %v12801_v63  ;;  %v14982_v16 = vmul.f32 -1.442695, %v22718_v53  ;;  %v17258_v40 = vadd.f32 %v11904_v27, %v22698_v31 }
 0x58c   : > { %v16572_v47 = vpop.f32.mrb[114].mxu1  ;;  %v18875_v52 = vpop.eup %18874  ;;  %v15240_v54 = vpack.c.bf16 %v13201_v42, %v13201_v42  ;;  %v13202_v2 = vmul.f32 %v18873_v3, %v22612_v9  ;;  %18894 = vpow2.f32 %v14976_v44  ;;  %v14980_v29 = vmul.f32 -1.442695, %v22723_v49 }
 0x58d   : > { %v22729_v41 = vpop.f32.mrb[115].mxu1  ;;  %v18877_v33 = vpop.eup %18876  ;;  %v15238_v26 = vpack.c.bf16 %v13199_v6, %v13199_v6  ;;  %v13200_v35 = vmul.f32 %v18875_v52, %v22617_v24  ;;  %18896 = vpow2.f32 %v14979_v36  ;;  %v22733_v8 = vadd.f32 %v22519_v34, %v17257_v50 }
 0x58e   : > { %v18879_v38 = vpop.eup %18878  ;;  %13882 = vst.msk [vmem:[%s21944_s23 + $0x178] sm:$0xf] %vm13787_vm7, %v15240_v54  ;;  %v15241_v39 = vpack.c.bf16 %v13202_v2, %v13202_v2  ;;  %v12799_v9 = vadd.f32 1.0, %v18877_v33  ;;  %18898 = vpow2.f32 %v14977_v13  ;;  %v17123_v11 = vpop.f32.mrb[112].mxu0  ;;  %v22744_v5 = vadd.f32 %v22519_v34, %v17258_v40 }
 0x58f   : > { %v18881_v45 = vpop.eup %18880  ;;  %13880 = vst.msk [vmem:[%s21944_s23 + $0x170] sm:$0xf] %vm13787_vm7, %v15238_v26  ;;  %v15239_v44 = vpack.c.bf16 %v13200_v35, %v13200_v35  ;;  %v12802_v24 = vadd.f32 1.0, %v18879_v38  ;;  %18900 = vpow2.f32 %v14982_v16  ;;  %v14983_v17 = vmul.f32 -1.442695, %v22733_v8  ;;  %v11917_v25 = vpop.f32.mrb[113].mxu0 }
 0x590   : > { %v18883_v48 = vpop.eup %18882  ;;  %13883 = vst.msk [vmem:[%s21944_s23 + $0x17c] sm:$0xf] %vm13787_vm7, %v15241_v39  ;;  %18902 = vrcp.f32 %v12799_v9  ;;  %v12800_v7 = vadd.f32 1.0, %v18881_v45  ;;  %v17259_v31 = vadd.f32 %v17123_v11, %v16571_v20  ;;  %v17124_v4 = vpop.f32.mrb[114].mxu0  ;;  %v17260_v21 = vadd.f32 %v11917_v25, %v6691_v19 }
 0x591   : > { %v18885_v23 = vpop.eup %18884  ;;  %13881 = vst.msk [vmem:[%s21944_s23 + $0x174] sm:$0xf] %vm13787_vm7, %v15239_v44  ;;  %18904 = vrcp.f32 %v12802_v24  ;;  %v12805_v37 = vadd.f32 1.0, %v18883_v48  ;;  %v17261_v14 = vadd.f32 %v17124_v4, %v16572_v47  ;;  %v11920_v60 = vpop.f32.mrb[115].mxu0  ;;  %v14981_v32 = vmul.f32 -1.442695, %v22744_v5 }
 0x592   : > { %v16575_v62 = vpop.f32.mrb[116].mxu1  ;;  %v18887_v59 = vpop.eup %18886  ;;  %v13205_v12 = vmul.f32 %v18885_v23, %v22622_v10  ;;  %18906 = vrcp.f32 %v12800_v7  ;;  %v22751_v1 = vadd.f32 %v22519_v34, %v17259_v31  ;;  %v22755_v36 = vadd.f32 %v22519_v34, %v17260_v21 }
 0x593   : > { %v6707_v61 = vpop.f32.mrb[117].mxu1  ;;  %v18889_v15 = vpop.eup %18888  ;;  %v13203_v63 = vmul.f32 %v18887_v59, %v22639_v57  ;;  %18908 = vrcp.f32 %v12805_v37  ;;  %v22758_v27 = vadd.f32 %v22519_v34, %v17261_v14  ;;  %v17262_v33 = vadd.f32 %v11920_v60, %v22729_v41 }
 0x594   : > { %v16576_v20 = vpop.f32.mrb[118].mxu1  ;;  %v18891_v10 = vpop.eup %18890  ;;  %v15244_v30 = vpack.c.bf16 %v13205_v12, %v13205_v12  ;;  %v13206_v42 = vmul.f32 %v18889_v15, %v22645_v28  ;;  %18910 = vpow2.f32 %v14980_v29  ;;  %v14986_v13 = vmul.f32 -1.442695, %v22751_v1 }
 0x595   : > { %v22762_v19 = vpop.f32.mrb[119].mxu1  ;;  %v18893_v57 = vpop.eup %18892  ;;  %v15242_v3 = vpack.c.bf16 %v13203_v63, %v13203_v63  ;;  %v13204_v6 = vmul.f32 %v18891_v10, %v22649_v46  ;;  %18912 = vpow2.f32 %v14983_v17  ;;  %v14984_v16 = vmul.f32 -1.442695, %v22755_v36 }
 0x596   : > { %v18895_v50 = vpop.eup %18894  ;;  %13886 = vst.msk [vmem:[%s21944_s23 + $0x188] sm:$0xf] %vm13787_vm7, %v15244_v30  ;;  %v15245_v47 = vpack.c.bf16 %v13206_v42, %v13206_v42  ;;  %v13209_v28 = vmul.f32 %v18893_v57, %v22654_v56  ;;  %18914 = vpow2.f32 %v14981_v32  ;;  %v14987_v52 = vmul.f32 -1.442695, %v22758_v27  ;;  %v17127_v54 = vpop.f32.mrb[116].mxu0 }
 0x597   : > { %v18897_v2 = vpop.eup %18896  ;;  %13884 = vst.msk [vmem:[%s21944_s23 + $0x180] sm:$0xf] %vm13787_vm7, %v15242_v3  ;;  %v15243_v29 = vpack.c.bf16 %v13204_v6, %v13204_v6  ;;  %v12803_v46 = vadd.f32 1.0, %v18895_v50  ;;  %18916 = vpow2.f32 %v14986_v13  ;;  %v11933_v26 = vpop.f32.mrb[117].mxu0  ;;  %v17263_v39 = vadd.f32 %v17127_v54, %v16575_v62 }
 0x598   : > { %v18899_v35 = vpop.eup %18898  ;;  %13887 = vst.msk [vmem:[%s21944_s23 + $0x18c] sm:$0xf] %vm13787_vm7, %v15245_v47  ;;  %v15248_v38 = vpack.c.bf16 %v13209_v28, %v13209_v28  ;;  %v12806_v56 = vadd.f32 1.0, %v18897_v2  ;;  %18918 = vpow2.f32 %v14984_v16  ;;  %v17128_v9 = vpop.f32.mrb[118].mxu0  ;;  %v22778_v45 = vadd.f32 %v22519_v34, %v17262_v33 }
 0x599   : > { %v18901_v40 = vpop.eup %18900  ;;  %13885 = vst.msk [vmem:[%s21944_s23 + $0x184] sm:$0xf] %vm13787_vm7, %v15243_v29  ;;  %18920 = vrcp.f32 %v12803_v46  ;;  %v12804_v11 = vadd.f32 1.0, %v18899_v35  ;;  %v17264_v44 = vadd.f32 %v11933_v26, %v6707_v61  ;;  %v11936_v41 = vpop.f32.mrb[119].mxu0  ;;  %v22783_v48 = vadd.f32 %v22519_v34, %v17263_v39 }
 0x59a   : > { %v16579_v24 = vpop.f32.mrb[120].mxu1  ;;  %v18903_v17 = vpop.eup %18902  ;;  %13890 = vst.msk [vmem:[%s21944_s23 + $0x198] sm:$0xf] %vm13787_vm7, %v15248_v38  ;;  %18922 = vrcp.f32 %v12806_v56  ;;  %v12809_v25 = vadd.f32 1.0, %v18901_v40  ;;  %v17265_v7 = vadd.f32 %v17128_v9, %v16576_v20  ;;  %v14985_v37 = vmul.f32 -1.442695, %v22778_v45 }
 0x59b   : > { %v6723_v31 = vpop.f32.mrb[121].mxu1  ;;  %v18905_v4 = vpop.eup %18904  ;;  %v13207_v23 = vmul.f32 %v18903_v17, %v22659_v0  ;;  %18924 = vrcp.f32 %v12804_v11  ;;  %v22788_v21 = vadd.f32 %v22519_v34, %v17264_v44  ;;  %v14990_v59 = vmul.f32 -1.442695, %v22783_v48 }
 0x59c   : > { %v16580_v14 = vpop.f32.mrb[122].mxu1  ;;  %v18907_v60 = vpop.eup %18906  ;;  %v13210_v62 = vmul.f32 %v18905_v4, %v22677_v22  ;;  %18926 = vrcp.f32 %v12809_v25  ;;  %v22793_v12 = vadd.f32 %v22519_v34, %v17265_v7 }
 0x59d   : > { %v6726_v32 = vpop.f32.mrb[123].mxu1  ;;  %v18909_v61 = vpop.eup %18908  ;;  %v15246_v0 = vpack.c.bf16 %v13207_v23, %v13207_v23  ;;  %v13208_v15 = vmul.f32 %v18907_v60, %v22682_v58  ;;  %18928 = vpow2.f32 %v14987_v52  ;;  %v14988_v63 = vmul.f32 -1.442695, %v22788_v21 }
 0x59e   : > { %v18911_v20 = vpop.eup %18910  ;;  %v15249_v10 = vpack.c.bf16 %v13210_v62, %v13210_v62  ;;  %v13213_v22 = vmul.f32 %v18909_v61, %v22687_v51  ;;  %18930 = vpow2.f32 %v14985_v37  ;;  %v14991_v30 = vmul.f32 -1.442695, %v22793_v12  ;;  %v17131_v42 = vpop.f32.mrb[120].mxu0 }
 0x59f   : > { %v18913_v13 = vpop.eup %18912  ;;  %13888 = vst.msk [vmem:[%s21944_s23 + $0x190] sm:$0xf] %vm13787_vm7, %v15246_v0  ;;  %v15247_v57 = vpack.c.bf16 %v13208_v15, %v13208_v15  ;;  %v12807_v3 = vadd.f32 1.0, %v18911_v20  ;;  %18932 = vpow2.f32 %v14990_v59  ;;  %v17266_v58 = vadd.f32 %v11936_v41, %v22762_v19  ;;  %v11949_v6 = vpop.f32.mrb[121].mxu0 }
 0x5a0   : > { %v18915_v16 = vpop.eup %18914  ;;  %13891 = vst.msk [vmem:[%s21944_s23 + $0x19c] sm:$0xf] %vm13787_vm7, %v15249_v10  ;;  %v15252_v50 = vpack.c.bf16 %v13213_v22, %v13213_v22  ;;  %v12810_v51 = vadd.f32 1.0, %v18913_v13  ;;  %18934 = vpow2.f32 %v14988_v63  ;;  %v17267_v47 = vadd.f32 %v17131_v42, %v16579_v24  ;;  %v17132_v28 = vpop.f32.mrb[122].mxu0 }
 0x5a1   : > { %v18917_v52 = vpop.eup %18916  ;;  %13889 = vst.msk [vmem:[%s21944_s23 + $0x194] sm:$0xf] %vm13787_vm7, %v15247_v57  ;;  %18936 = vrcp.f32 %v12807_v3  ;;  %v12808_v54 = vadd.f32 1.0, %v18915_v16  ;;  %v22807_v2 = vadd.f32 %v22519_v34, %v17266_v58  ;;  %v17268_v29 = vadd.f32 %v11949_v6, %v6723_v31  ;;  %v11952_v19 = vpop.f32.mrb[123].mxu0  ;;  %v22841_v6 = vld [vmem:[%s22985_s2] ss:$0 sm:$0xff] }
 0x5a2   : > { %v16583_v46 = vpop.f32.mrb[124].mxu1  ;;  %v18919_v33 = vpop.eup %18918  ;;  %13894 = vst.msk [vmem:[%s21944_s23 + $0x1a8] sm:$0xf] %vm13787_vm7, %v15252_v50  ;;  %18938 = vrcp.f32 %v12810_v51  ;;  %v12813_v26 = vadd.f32 1.0, %v18917_v52  ;;  %v22812_v35 = vadd.f32 %v22519_v34, %v17267_v47  ;;  %v17269_v38 = vadd.f32 %v17132_v28, %v16580_v14 }
 0x5a3   : > { %v6739_v56 = vpop.f32.mrb[125].mxu1  ;;  %v18921_v39 = vpop.eup %18920  ;;  %18940 = vrcp.f32 %v12808_v54  ;;  %v12811_v9 = vadd.f32 1.0, %v18919_v33  ;;  %v14989_v40 = vmul.f32 -1.442695, %v22807_v2  ;;  %v22816_v11 = vadd.f32 %v22519_v34, %v17268_v29 }
 0x5a4   : > { %v16584_v44 = vpop.f32.mrb[126].mxu1  ;;  %v18923_v41 = vpop.eup %18922  ;;  %v13211_v24 = vmul.f32 %v18921_v39, %v22692_v18  ;;  %18942 = vrcp.f32 %v12813_v26  ;;  %v14994_v17 = vmul.f32 -1.442695, %v22812_v35  ;;  %v22821_v25 = vadd.f32 %v22519_v34, %v17269_v38 }
 0x5a5   : > { %v6742_v7 = vpop.f32.mrb[127].mxu1  ;;  %v18925_v31 = vpop.eup %18924  ;;  %v13214_v4 = vmul.f32 %v18923_v41, %v22709_v43  ;;  %18944 = vrcp.f32 %v12811_v9  ;;  %v14992_v23 = vmul.f32 -1.442695, %v22816_v11  ;;  %v17270_v37 = vadd.f32 %v11952_v19, %v6726_v32 }
 0x5a6   : > { %v18927_v14 = vpop.eup %18926  ;;  %v15250_v60 = vpack.c.bf16 %v13211_v24, %v13211_v24  ;;  %v13212_v62 = vmul.f32 %v18925_v31, %v22714_v55  ;;  %18946 = vpow2.f32 %v14991_v30  ;;  %v14995_v18 = vmul.f32 -1.442695, %v22821_v25  ;;  %v17135_v59 = vpop.f32.mrb[124].mxu0 }
 0x5a7   : > { %v18929_v61 = vpop.eup %18928  ;;  %v15253_v0 = vpack.c.bf16 %v13214_v4, %v13214_v4  ;;  %v13217_v15 = vmul.f32 %v18927_v14, %v22718_v53  ;;  %18948 = vpow2.f32 %v14989_v40  ;;  %v22829_v43 = vadd.f32 %v22519_v34, %v17270_v37  ;;  %v11965_v63 = vpop.f32.mrb[125].mxu0 }
 0x5a8   : > { %v18931_v20 = vpop.eup %18930  ;;  %13892 = vst.msk [vmem:[%s21944_s23 + $0x1a0] sm:$0xf] %vm13787_vm7, %v15250_v60  ;;  %v15251_v32 = vpack.c.bf16 %v13212_v62, %v13212_v62  ;;  %v12814_v55 = vadd.f32 1.0, %v18929_v61  ;;  %18950 = vpow2.f32 %v14994_v17  ;;  %v17271_v10 = vadd.f32 %v17135_v59, %v16583_v46  ;;  %v17136_v22 = vpop.f32.mrb[126].mxu0 }
 0x5a9   : > { %v18933_v30 = vpop.eup %18932  ;;  %13895 = vst.msk [vmem:[%s21944_s23 + $0x1ac] sm:$0xf] %vm13787_vm7, %v15253_v0  ;;  %v15256_v42 = vpack.c.bf16 %v13217_v15, %v13217_v15  ;;  %v12812_v53 = vadd.f32 1.0, %v18931_v20  ;;  %18952 = vpow2.f32 %v14992_v23  ;;  %v14993_v34 = vmul.f32 -1.442695, %v22829_v43  ;;  %v11968_v13 = vpop.f32.mrb[127].mxu0 }
 0x5aa   : > { %v16587_v57 = vpop.f32.mrb[128].mxu1  ;;  %v18935_v3 = vpop.eup %18934  ;;  %13893 = vst.msk [vmem:[%s21944_s23 + $0x1a4] sm:$0xf] %vm13787_vm7, %v15251_v32  ;;  %18954 = vrcp.f32 %v12814_v55  ;;  %v12817_v58 = vadd.f32 1.0, %v18933_v30  ;;  %v22844_v16 = vadd.f32 %v22841_v6, %v17271_v10  ;;  %v17272_v50 = vadd.f32 %v11965_v63, %v6739_v56 }
 0x5ab   : > { %v6755_v51 = vpop.f32.mrb[129].mxu1  ;;  %v18937_v47 = vpop.eup %18936  ;;  %13898 = vst.msk [vmem:[%s21944_s23 + $0x1b8] sm:$0xf] %vm13787_vm7, %v15256_v42  ;;  %18956 = vrcp.f32 %v12812_v53  ;;  %v12815_v28 = vadd.f32 1.0, %v18935_v3  ;;  %v17273_v52 = vadd.f32 %v17136_v22, %v16584_v44  ;;  %v17274_v54 = vadd.f32 %v11968_v13, %v6742_v7 }
 0x5ac   : > { %v16588_v29 = vpop.f32.mrb[130].mxu1  ;;  %v18939_v19 = vpop.eup %18938  ;;  %v13215_v46 = vmul.f32 %v18937_v47, %v22723_v49  ;;  %18958 = vrcp.f32 %v12817_v58  ;;  %v14998_v33 = vmul.f32 -1.442695, %v22844_v16  ;;  %v22851_v26 = vadd.f32 %v22841_v6, %v17272_v50 }
 0x5ad   : > { %v6758_v38 = vpop.f32.mrb[131].mxu1  ;;  %v18941_v56 = vpop.eup %18940  ;;  %v13218_v39 = vmul.f32 %v18939_v19, %v22733_v8  ;;  %18960 = vrcp.f32 %v12815_v28  ;;  %v22855_v9 = vadd.f32 %v22841_v6, %v17273_v52  ;;  %v22858_v40 = vadd.f32 %v22841_v6, %v17274_v54 }
 0x5ae   : > { %v18943_v44 = vpop.eup %18942  ;;  %v15254_v49 = vpack.c.bf16 %v13215_v46, %v13215_v46  ;;  %v13216_v41 = vmul.f32 %v18941_v56, %v22744_v5  ;;  %18962 = vpow2.f32 %v14995_v18  ;;  %v14996_v24 = vmul.f32 -1.442695, %v22851_v26  ;;  %v17139_v17 = vpop.f32.mrb[128].mxu0 }
 0x5af   : > { %v18945_v7 = vpop.eup %18944  ;;  %v15257_v31 = vpack.c.bf16 %v13218_v39, %v13218_v39  ;;  %v13221_v8 = vmul.f32 %v18943_v44, %v22751_v1  ;;  %18964 = vpow2.f32 %v14993_v34  ;;  %v14999_v4 = vmul.f32 -1.442695, %v22855_v9  ;;  %v11981_v23 = vpop.f32.mrb[129].mxu0 }
 0x5b0   : > { %v18947_v37 = vpop.eup %18946  ;;  %13896 = vst.msk [vmem:[%s21944_s23 + $0x1b0] sm:$0xf] %vm13787_vm7, %v15254_v49  ;;  %v15255_v14 = vpack.c.bf16 %v13216_v41, %v13216_v41  ;;  %v13219_v5 = vmul.f32 %v18945_v7, %v22755_v36  ;;  %18966 = vpow2.f32 %v14998_v33  ;;  %v14997_v60 = vmul.f32 -1.442695, %v22858_v40  ;;  %v17140_v62 = vpop.f32.mrb[130].mxu0 }
 0x5b1   : > { %v18949_v18 = vpop.eup %18948  ;;  %13899 = vst.msk [vmem:[%s21944_s23 + $0x1bc] sm:$0xf] %vm13787_vm7, %v15257_v31  ;;  %v15260_v1 = vpack.c.bf16 %v13221_v8, %v13221_v8  ;;  %v12818_v59 = vadd.f32 1.0, %v18947_v37  ;;  %18968 = vpow2.f32 %v14996_v24  ;;  %v17275_v61 = vadd.f32 %v17139_v17, %v16587_v57  ;;  %v11984_v0 = vpop.f32.mrb[131].mxu0 }
 0x5b2   : > { %v16591_v15 = vpop.f32.mrb[132].mxu1  ;;  %v18951_v63 = vpop.eup %18950  ;;  %13897 = vst.msk [vmem:[%s21944_s23 + $0x1b4] sm:$0xf] %vm13787_vm7, %v15255_v14  ;;  %v15258_v20 = vpack.c.bf16 %v13219_v5, %v13219_v5  ;;  %v12816_v36 = vadd.f32 1.0, %v18949_v18  ;;  %18970 = vpow2.f32 %v14999_v4  ;;  %v17276_v32 = vadd.f32 %v11981_v23, %v6755_v51 }
 0x5b3   : > { %v6771_v55 = vpop.f32.mrb[133].mxu1  ;;  %v18953_v10 = vpop.eup %18952  ;;  %13902 = vst.msk [vmem:[%s21944_s23 + $0x1c8] sm:$0xf] %vm13787_vm7, %v15260_v1  ;;  %18972 = vrcp.f32 %v12818_v59  ;;  %v12821_v22 = vadd.f32 1.0, %v18951_v63  ;;  %v22875_v30 = vadd.f32 %v22841_v6, %v17275_v61  ;;  %v17277_v42 = vadd.f32 %v17140_v62, %v16588_v29 }
 0x5b4   : > { %v16592_v53 = vpop.f32.mrb[134].mxu1  ;;  %v18955_v34 = vpop.eup %18954  ;;  %13900 = vst.msk [vmem:[%s21944_s23 + $0x1c0] sm:$0xf] %vm13787_vm7, %v15258_v20  ;;  %18974 = vrcp.f32 %v12816_v36  ;;  %v12819_v13 = vadd.f32 1.0, %v18953_v10  ;;  %v22880_v57 = vadd.f32 %v22841_v6, %v17276_v32  ;;  %v17278_v3 = vadd.f32 %v11984_v0, %v6758_v38 }
 0x5b5   : > { %v6774_v58 = vpop.f32.mrb[135].mxu1  ;;  %v18957_v50 = vpop.eup %18956  ;;  %v13222_v51 = vmul.f32 %v18955_v34, %v22758_v27  ;;  %18976 = vrcp.f32 %v12821_v22  ;;  %v15002_v47 = vmul.f32 -1.442695, %v22875_v30  ;;  %v22885_v28 = vadd.f32 %v22841_v6, %v17277_v42 }
 0x5b6   : > { %v18959_v52 = vpop.eup %18958  ;;  %v13220_v54 = vmul.f32 %v18957_v50, %v22778_v45  ;;  %18978 = vrcp.f32 %v12819_v13  ;;  %v15000_v29 = vmul.f32 -1.442695, %v22880_v57  ;;  %v22890_v19 = vadd.f32 %v22841_v6, %v17278_v3  ;;  %v17143_v46 = vpop.f32.mrb[132].mxu0 }
 0x5b7   : > { %v18961_v33 = vpop.eup %18960  ;;  %v15261_v38 = vpack.c.bf16 %v13222_v51, %v13222_v51  ;;  %v13225_v27 = vmul.f32 %v18959_v52, %v22783_v48  ;;  %18980 = vpow2.f32 %v14997_v60  ;;  %v15003_v56 = vmul.f32 -1.442695, %v22885_v28  ;;  %v11997_v39 = vpop.f32.mrb[133].mxu0 }
 0x5b8   : > { %v18963_v44 = vpop.eup %18962  ;;  %v15259_v49 = vpack.c.bf16 %v13220_v54, %v13220_v54  ;;  %v13223_v45 = vmul.f32 %v18961_v33, %v22788_v21  ;;  %18982 = vpow2.f32 %v15002_v47  ;;  %v15001_v41 = vmul.f32 -1.442695, %v22890_v19  ;;  %v17144_v24 = vpop.f32.mrb[134].mxu0 }
 0x5b9   : > { %v18965_v17 = vpop.eup %18964  ;;  %13903 = vst.msk [vmem:[%s21944_s23 + $0x1cc] sm:$0xf] %vm13787_vm7, %v15261_v38  ;;  %v15264_v7 = vpack.c.bf16 %v13225_v27, %v13225_v27  ;;  %v12822_v31 = vadd.f32 1.0, %v18963_v44  ;;  %18984 = vpow2.f32 %v15000_v29  ;;  %v17279_v48 = vadd.f32 %v17143_v46, %v16591_v15  ;;  %v12000_v8 = vpop.f32.mrb[135].mxu0 }
 0x5ba   : > { %v18967_v4 = vpop.eup %18966  ;;  %13901 = vst.msk [vmem:[%s21944_s23 + $0x1c4] sm:$0xf] %vm13787_vm7, %v15259_v49  ;;  %v15262_v23 = vpack.c.bf16 %v13223_v45, %v13223_v45  ;;  %v12820_v37 = vadd.f32 1.0, %v18965_v17  ;;  %18986 = vpow2.f32 %v15003_v56  ;;  %v17280_v21 = vadd.f32 %v11997_v39, %v6771_v55 }
 0x5bb   : > { %v18969_v14 = vpop.eup %18968  ;;  %13906 = vst.msk [vmem:[%s21944_s23 + $0x1d8] sm:$0xf] %vm13787_vm7, %v15264_v7  ;;  %18988 = vrcp.f32 %v12822_v31  ;;  %v12825_v5 = vadd.f32 1.0, %v18967_v4  ;;  %v22903_v60 = vadd.f32 %v22841_v6, %v17279_v48  ;;  %v17281_v62 = vadd.f32 %v17144_v24, %v16592_v53 }
 0x5bc   : > { %v18971_v18 = vpop.eup %18970  ;;  %13904 = vst.msk [vmem:[%s21944_s23 + $0x1d0] sm:$0xf] %vm13787_vm7, %v15262_v23  ;;  %18990 = vrcp.f32 %v12820_v37  ;;  %v12823_v1 = vadd.f32 1.0, %v18969_v14  ;;  %v22908_v59 = vadd.f32 %v22841_v6, %v17280_v21  ;;  %v17282_v61 = vadd.f32 %v12000_v8, %v6774_v58 }
 0x5bd   : > { %v18973_v0 = vpop.eup %18972  ;;  %18992 = vrcp.f32 %v12825_v5  ;;  %v12826_v15 = vadd.f32 1.0, %v18971_v18  ;;  %v15006_v63 = vmul.f32 -1.442695, %v22903_v60  ;;  %v22912_v20 = vadd.f32 %v22841_v6, %v17281_v62 }
 0x5be   : > { %v18975_v36 = vpop.eup %18974  ;;  %v13226_v32 = vmul.f32 %v18973_v0, %v22793_v12  ;;  %18994 = vrcp.f32 %v12823_v1  ;;  %v15004_v55 = vmul.f32 -1.442695, %v22908_v59  ;;  %v22920_v3 = vadd.f32 %v22841_v6, %v17282_v61 }
 0x5bf   : > { %v18977_v10 = vpop.eup %18976  ;;  %v13224_v22 = vmul.f32 %v18975_v36, %v22807_v2  ;;  %18996 = vrcp.f32 %v12826_v15  ;;  %v15007_v42 = vmul.f32 -1.442695, %v22912_v20 }
 0x5c0   : > { %v18979_v53 = vpop.eup %18978  ;;  %v15265_v34 = vpack.c.bf16 %v13226_v32, %v13226_v32  ;;  %v13229_v13 = vmul.f32 %v18977_v10, %v22812_v35  ;;  %18998 = vpow2.f32 %v15001_v41 }
 0x5c1   : > { %v18981_v12 = vpop.eup %18980  ;;  %v15263_v58 = vpack.c.bf16 %v13224_v22, %v13224_v22  ;;  %v13227_v50 = vmul.f32 %v18979_v53, %v22816_v11  ;;  %19000 = vpow2.f32 %v15006_v63  ;;  %v15005_v11 = vmul.f32 -1.442695, %v22920_v3 }
 0x5c2   : > { %v18983_v51 = vpop.eup %18982  ;;  %13907 = vst.msk [vmem:[%s21944_s23 + $0x1dc] sm:$0xf] %vm13787_vm7, %v15265_v34  ;;  %v15268_v2 = vpack.c.bf16 %v13229_v13, %v13229_v13  ;;  %v12824_v47 = vadd.f32 1.0, %v18981_v12  ;;  %19002 = vpow2.f32 %v15004_v55 }
 0x5c3   : > { %v18985_v52 = vpop.eup %18984  ;;  %13905 = vst.msk [vmem:[%s21944_s23 + $0x1d4] sm:$0xf] %vm13787_vm7, %v15263_v58  ;;  %v15266_v35 = vpack.c.bf16 %v13227_v50, %v13227_v50  ;;  %v12829_v54 = vadd.f32 1.0, %v18983_v51  ;;  %19004 = vpow2.f32 %v15007_v42 }
 0x5c4   : > { %v18987_v6 = vpop.eup %18986  ;;  %13910 = vst.msk [vmem:[%s21944_s23 + $0x1e8] sm:$0xf] %vm13787_vm7, %v15268_v2  ;;  %19006 = vrcp.f32 %v12824_v47  ;;  %v12827_v29 = vadd.f32 1.0, %v18985_v52 }
 0x5c5   : > { %v18989_v46 = vpop.eup %18988  ;;  %13908 = vst.msk [vmem:[%s21944_s23 + $0x1e0] sm:$0xf] %vm13787_vm7, %v15266_v35  ;;  %19008 = vrcp.f32 %v12829_v54  ;;  %v12830_v33 = vadd.f32 1.0, %v18987_v6 }
 0x5c6   : > { %v18991_v38 = vpop.eup %18990  ;;  %v13230_v27 = vmul.f32 %v18989_v46, %v22821_v25  ;;  %19010 = vrcp.f32 %v12827_v29 }
 0x5c7   : > { %v18993_v56 = vpop.eup %18992  ;;  %v13228_v39 = vmul.f32 %v18991_v38, %v22829_v43  ;;  %19012 = vrcp.f32 %v12830_v33 }
 0x5c8   : > { %v18995_v44 = vpop.eup %18994  ;;  %v15269_v49 = vpack.c.bf16 %v13230_v27, %v13230_v27  ;;  %v13233_v45 = vmul.f32 %v18993_v56, %v22844_v16  ;;  %19014 = vpow2.f32 %v15005_v11 }
 0x5c9   : > { %v18997_v41 = vpop.eup %18996  ;;  %v15267_v24 = vpack.c.bf16 %v13228_v39, %v13228_v39  ;;  %v13231_v17 = vmul.f32 %v18995_v44, %v22851_v26 }
 0x5ca   : > { %v18999_v7 = vpop.eup %18998  ;;  %13911 = vst.msk [vmem:[%s21944_s23 + $0x1ec] sm:$0xf] %vm13787_vm7, %v15269_v49  ;;  %v15272_v25 = vpack.c.bf16 %v13233_v45, %v13233_v45  ;;  %v13234_v31 = vmul.f32 %v18997_v41, %v22855_v9 }
 0x5cb   : > { %v19001_v43 = vpop.eup %19000  ;;  %13909 = vst.msk [vmem:[%s21944_s23 + $0x1e4] sm:$0xf] %vm13787_vm7, %v15267_v24  ;;  %v15270_v48 = vpack.c.bf16 %v13231_v17, %v13231_v17  ;;  %v12828_v8 = vadd.f32 1.0, %v18999_v7 }
 0x5cc   : > { %v19003_v4 = vpop.eup %19002  ;;  %13914 = vst.msk [vmem:[%s21944_s23 + $0x1f8] sm:$0xf] %vm13787_vm7, %v15272_v25  ;;  %v15273_v16 = vpack.c.bf16 %v13234_v31, %v13234_v31  ;;  %v12833_v23 = vadd.f32 1.0, %v19001_v43 }
 0x5cd   : > { %v19005_v37 = vpop.eup %19004  ;;  %13912 = vst.msk [vmem:[%s21944_s23 + $0x1f0] sm:$0xf] %vm13787_vm7, %v15270_v48  ;;  %19016 = vrcp.f32 %v12828_v8  ;;  %v12831_v26 = vadd.f32 1.0, %v19003_v4 }
 0x5ce   : > { %v19007_v21 = vpop.eup %19006  ;;  %13915 = vst.msk [vmem:[%s21944_s23 + $0x1fc] sm:$0xf] %vm13787_vm7, %v15273_v16  ;;  %19018 = vrcp.f32 %v12833_v23  ;;  %v12834_v9 = vadd.f32 1.0, %v19005_v37 }
 0x5cf   : > { %v19009_v14 = vpop.eup %19008  ;;  %v13232_v5 = vmul.f32 %v19007_v21, %v22858_v40  ;;  %19020 = vrcp.f32 %v12831_v26 }
 0x5d0   : > { %v19011_v62 = vpop.eup %19010  ;;  %v13237_v18 = vmul.f32 %v19009_v14, %v22875_v30  ;;  %19022 = vrcp.f32 %v12834_v9 }
 0x5d1   : > { %v19013_v1 = vpop.eup %19012  ;;  %v15271_v61 = vpack.c.bf16 %v13232_v5, %v13232_v5  ;;  %v13235_v0 = vmul.f32 %v19011_v62, %v22880_v57 }
 0x5d2   : > { %v19015_v15 = vpop.eup %19014  ;;  %v15276_v63 = vpack.c.bf16 %v13237_v18, %v13237_v18  ;;  %v13238_v36 = vmul.f32 %v19013_v1, %v22885_v28 }
 0x5d3   : > { %13913 = vst.msk [vmem:[%s21944_s23 + $0x1f4] sm:$0xf] %vm13787_vm7, %v15271_v61  ;;  %v15274_v32 = vpack.c.bf16 %v13235_v0, %v13235_v0  ;;  %v12832_v55 = vadd.f32 1.0, %v19015_v15 }
 0x5d4   : > { %13918 = vst.msk [vmem:[%s21944_s23 + $0x208] sm:$0xf] %vm13787_vm7, %v15276_v63  ;;  %v15277_v40 = vpack.c.bf16 %v13238_v36, %v13238_v36 }
 0x5d5   : > { %13916 = vst.msk [vmem:[%s21944_s23 + $0x200] sm:$0xf] %vm13787_vm7, %v15274_v32  ;;  %19024 = vrcp.f32 %v12832_v55 }
 0x5d6   : > { %13919 = vst.msk [vmem:[%s21944_s23 + $0x20c] sm:$0xf] %vm13787_vm7, %v15277_v40 }
 0x5d7   : > { %v19017_v30 = vpop.eup %19016 }
 0x5d8   : > { %v19019_v57 = vpop.eup %19018  ;;  %v13236_v28 = vmul.f32 %v19017_v30, %v22890_v19 }
 0x5d9   : > { %v19021_v10 = vpop.eup %19020  ;;  %v13241_v22 = vmul.f32 %v19019_v57, %v22903_v60 }
 0x5da   : > { %v19023_v42 = vpop.eup %19022  ;;  %v15275_v53 = vpack.c.bf16 %v13236_v28, %v13236_v28  ;;  %v13239_v34 = vmul.f32 %v19021_v10, %v22908_v59 }
 0x5db   : > { %v15280_v13 = vpack.c.bf16 %v13241_v22, %v13241_v22  ;;  %v13242_v12 = vmul.f32 %v19023_v42, %v22912_v20 }
 0x5dc   : > { %13917 = vst.msk [vmem:[%s21944_s23 + $0x204] sm:$0xf] %vm13787_vm7, %v15275_v53  ;;  %v15278_v58 = vpack.c.bf16 %v13239_v34, %v13239_v34 }
 0x5dd   : > { %13922 = vst.msk [vmem:[%s21944_s23 + $0x218] sm:$0xf] %vm13787_vm7, %v15280_v13  ;;  %v15281_v50 = vpack.c.bf16 %v13242_v12, %v13242_v12 }
 0x5de   : > { %13920 = vst.msk [vmem:[%s21944_s23 + $0x210] sm:$0xf] %vm13787_vm7, %v15278_v58 }
 0x5df   : > { %v19025_v19 = vpop.eup %19024  ;;  %13923 = vst.msk [vmem:[%s21944_s23 + $0x21c] sm:$0xf] %vm13787_vm7, %v15281_v50 }
 0x5e0   : > { %v13240_v60 = vmul.f32 %v19025_v19, %v22920_v3 }
 0x5e2   : > { %v15279_v51 = vpack.c.bf16 %v13240_v60, %v13240_v60 }
 0x5e4   : > { %13921 = vst.msk [vmem:[%s21944_s23 + $0x214] sm:$0xf] %vm13787_vm7, %v15279_v51 }
 0x5e5 PF: > { %s13_s14 = sadd.s32 1, %s19345_s14   ;;  %s23194_s12 = smov %s19341_s13 }
 0x5e6   : > { %p10_p5 = scmp.ge.s32.totalorder %s13_s14, 4   ;;  %s23195_s13 = smov %s23197_s15 }
 0x5e8   :  { %12 = sbr.rel (!%p10_p5) target bundleno = 2 (0x2), region = 68 }

</bundles_post_ra>
